<compile_context>
chip_gen: v7x
topology: tpu7x:2x2x1
jax: 0.10.0
libtpu: 0.0.40
codegen_flags: <defaults>
</compile_context>

<pallas_src>
import functools

import jax
import jax.numpy as jnp
from jax.experimental import pallas as pl
from jax.experimental.pallas import tpu as pltpu


def _fused_kernel(x_ref, w1_ref, b1_ref, w2_ref, b2_ref, w3_ref, b3_ref,
                  w4_ref, b4_ref, o_ref, h1_ref, z_ref, h2_ref,
                  *, n1, n2, n3, tn_big, tn_small):
    """One weight-streaming phase of the fused 4-layer MLP.

    Phases:
      [0,        n1)          : h1_raw[j] = x @ W1[:, j-th tile]
      [n1,       n1+n2)       : z_raw[j]  = relu(h1_raw + b1) @ W2[:, j]
      [n1+n2,    n1+n2+n3)    : h2_raw[j] = (z_raw + b2) @ W3[:, j]
      [n1+n2+n3, end)         : out[j]    = relu(h2_raw + b3) @ W4[:, j] + b4[j]
    """
    p = pl.program_id(0)
    m = x_ref.shape[0]
    p1 = n1
    p2 = n1 + n2
    p3 = n1 + n2 + n3

    # ---- layer 1 (encoder Linear 2048->2048): raw tile; bias/ReLU deferred.
    @pl.when(p < p1)
    def _():
        h1_ref[p] = jnp.dot(x_ref[...], w1_ref[...],
                            preferred_element_type=jnp.float32)

    # ---- layer 2 (encoder Linear 2048->512): z tile = relu(h1 + b1) @ W2.
    @pl.when(jnp.logical_and(p >= p1, p < p2))
    def _():
        acc = jnp.zeros((m, tn_small), jnp.float32)
        for k in range(n1):  # static unroll over K chunks (all slices static)
            a = jnp.maximum(
                h1_ref[k] + b1_ref[:, k * tn_big:(k + 1) * tn_big], 0.0)
            acc += jnp.dot(a, w2_ref[k * tn_big:(k + 1) * tn_big, :],
                           preferred_element_type=jnp.float32)
        z_ref[p - p1] = acc

    # ---- layer 3 (decoder Linear 512->2048): raw tile; bias/ReLU deferred.
    @pl.when(jnp.logical_and(p >= p2, p < p3))
    def _():
        acc = jnp.zeros((m, tn_big), jnp.float32)
        for k in range(n2):
            a = z_ref[k] + b2_ref[:, k * tn_small:(k + 1) * tn_small]
            acc += jnp.dot(a, w3_ref[k * tn_small:(k + 1) * tn_small, :],
                           preferred_element_type=jnp.float32)
        h2_ref[p - p2] = acc

    # ---- layer 4 (decoder Linear 2048->2048): final output tile.
    @pl.when(p >= p3)
    def _():
        acc = jnp.zeros((m, tn_big), jnp.float32)
        for k in range(n3):
            a = jnp.maximum(
                h2_ref[k] + b3_ref[:, k * tn_big:(k + 1) * tn_big], 0.0)
            acc += jnp.dot(a, w4_ref[k * tn_big:(k + 1) * tn_big, :],
                           preferred_element_type=jnp.float32)
        o_ref[...] = (acc + b4_ref[...]).astype(o_ref.dtype)


def netfc1_fused(x, params, *, tn_big=512, tn_small=256,
                 vmem_limit_bytes=40 * 1024 * 1024):
    """Fused netFC1 forward.  x: (M, 2048) f32 -> (M, 2048) f32."""
    w1, b1 = params["enc1"]
    w2, b2 = params["enc2"]
    w3, b3 = params["dec1"]
    w4, b4 = params["dec2"]

    M, D = x.shape
    R = w2.shape[1]
    assert w1.shape == (D, D) and w2.shape == (D, R)
    assert w3.shape == (R, D) and w4.shape == (D, D)
    assert b1.shape == (D,) and b2.shape == (R,)
    assert b3.shape == (D,) and b4.shape == (D,)
    assert D % tn_big == 0 and R % tn_small == 0

    n1 = D // tn_big      # layer-1 output tiles  (== K chunks of layer 2)
    n2 = R // tn_small    # layer-2 output tiles  (== K chunks of layer 3)
    n3 = D // tn_big      # layer-3 output tiles  (== K chunks of layer 4)
    n4 = D // tn_big      # layer-4 (final) output tiles
    p1, p2, p3 = n1, n1 + n2, n1 + n2 + n3
    grid = (p3 + n4,)

    kernel = functools.partial(_fused_kernel, n1=n1, n2=n2, n3=n3,
                               tn_big=tn_big, tn_small=tn_small)

    def resident(shape):
        # Grid-invariant block: DMA'd exactly once, stays resident in VMEM.
        return pl.BlockSpec(shape, lambda p: (0, 0))

    # Weight tiles advance only during their own layer's phases; clipping the
    # phase index keeps the block index constant outside (=> no redundant DMA).
    w1_spec = pl.BlockSpec((D, tn_big),
                           lambda p: (0, jnp.minimum(p, n1 - 1)))
    w2_spec = pl.BlockSpec((D, tn_small),
                           lambda p: (0, jnp.clip(p - p1, 0, n2 - 1)))
    w3_spec = pl.BlockSpec((R, tn_big),
                           lambda p: (0, jnp.clip(p - p2, 0, n3 - 1)))
    w4_spec = pl.BlockSpec((D, tn_big),
                           lambda p: (0, jnp.clip(p - p3, 0, n4 - 1)))
    b4_spec = pl.BlockSpec((1, tn_big),
                           lambda p: (0, jnp.clip(p - p3, 0, n4 - 1)))
    out_spec = pl.BlockSpec((M, tn_big),
                            lambda p: (0, jnp.clip(p - p3, 0, n4 - 1)))

    return pl.pallas_call(
        kernel,
        out_shape=jax.ShapeDtypeStruct((M, D), x.dtype),
        grid=grid,
        in_specs=[
            resident((M, D)),   # x        (16 KiB, loaded once)
            w1_spec,            # W1       streamed, 4 MiB tiles
            resident((1, D)),   # b1
            w2_spec,            # W2       streamed, 2 MiB tiles
            resident((1, R)),   # b2
            w3_spec,            # W3       streamed, 1 MiB tiles
            resident((1, D)),   # b3
            w4_spec,            # W4       streamed, 4 MiB tiles
            b4_spec,            # b4       tiled with the output
        ],
        out_specs=out_spec,
        scratch_shapes=[
            pltpu.VMEM((n1, M, tn_big), jnp.float32),    # h1 raw tiles
            pltpu.VMEM((n2, M, tn_small), jnp.float32),  # z  raw tiles
            pltpu.VMEM((n3, M, tn_big), jnp.float32),    # h2 raw tiles
        ],
        compiler_params=pltpu.CompilerParams(
            # Sequential inter-layer dependency => single "arbitrary" axis.
            dimension_semantics=("arbitrary",),
            vmem_limit_bytes=vmem_limit_bytes,  # ~22 MiB actually used
        ),
    )(x, w1, b1.reshape(1, D), w2, b2.reshape(1, R),
      w3, b3.reshape(1, D), w4, b4.reshape(1, D))


# ---------------------------------------------------------------------------
# Parameter construction (deterministic, mimicking nn.Linear's uniform init).
# ---------------------------------------------------------------------------
def _init_linear(key, fan_in, fan_out, dtype=jnp.float32):
    kw, kb = jax.random.split(key)
    bound = 1.0 / jnp.sqrt(fan_in)
    # stored already transposed: (fan_in, fan_out) so the kernel does x @ w
    w = jax.random.uniform(kw, (fan_in, fan_out), dtype, -bound, bound)
    b = jax.random.uniform(kb, (fan_out,), dtype, -bound, bound)
    return w, b


def init_netfc1_params(key, dim=2048, reduction=4):
    k1, k2, k3, k4 = jax.random.split(key, 4)
    return {
        "enc1": _init_linear(k1, dim, dim),
        "enc2": _init_linear(k2, dim, dim // reduction),
        "dec1": _init_linear(k3, dim // reduction, dim),
        "dec2": _init_linear(k4, dim, dim),
    }


def netfc1_forward(params, data):
    """data: (n, c, h, w) with c*h*w == 2048.  Returns (n, c, h, w)."""
    n, c, h, w = data.shape
    x = data.reshape(n, -1)           # row-major flatten, like torch .view
    out = netfc1_fused(x, params)
    return out.reshape(n, c, h, w)


if __name__ == "__main__":
    key = jax.random.PRNGKey(0)
    pkey, dkey = jax.random.split(key)

    # small batch; spatial dims chosen so c*h*w == 2048 as the module requires
    n, c, h, w = 2, 8, 16, 16
    data = jax.random.normal(dkey, (n, c, h, w), jnp.float32)
    params = init_netfc1_params(pkey)

    out = jax.jit(netfc1_forward)(params, data)
    out = jax.block_until_ready(out)

    assert out.shape == (n, c, h, w), out.shape
    assert out.dtype == jnp.float32

    # quick sanity check against a pure-JAX reference of the same math
    xf = data.reshape(n, -1)
    r = jnp.maximum(xf @ params["enc1"][0] + params["enc1"][1], 0.0)
    r = r @ params["enc2"][0] + params["enc2"][1]
    r = jnp.maximum(r @ params["dec1"][0] + params["dec1"][1], 0.0)
    r = (r @ params["dec2"][0] + params["dec2"][1]).reshape(n, c, h, w)
    assert jnp.allclose(out, r, atol=2e-3, rtol=2e-3), \
        float(jnp.max(jnp.abs(out - r)))

    print("KERNEL_OK")
</pallas_src>

<mosaic_0001>
module attributes {stable_mosaic.version = 11 : i64} {
  func.func @_fused_kernel(%arg0: i32, %arg1: memref<2x2048xf32, #tpu.memory_space<vmem>>, %arg2: memref<2048x512xf32, #tpu.memory_space<vmem>>, %arg3: memref<1x2048xf32, #tpu.memory_space<vmem>>, %arg4: memref<2048x256xf32, #tpu.memory_space<vmem>>, %arg5: memref<1x512xf32, #tpu.memory_space<vmem>>, %arg6: memref<512x512xf32, #tpu.memory_space<vmem>>, %arg7: memref<1x2048xf32, #tpu.memory_space<vmem>>, %arg8: memref<2048x512xf32, #tpu.memory_space<vmem>>, %arg9: memref<1x512xf32, #tpu.memory_space<vmem>>, %arg10: memref<2x512xf32, #tpu.memory_space<vmem>>, %arg11: memref<4x2x512xf32, #tpu.memory_space<vmem>>, %arg12: memref<2x2x256xf32, #tpu.memory_space<vmem>>, %arg13: memref<4x2x512xf32, #tpu.memory_space<vmem>>) attributes {dimension_semantics = [#tpu.dimension_semantics<arbitrary>], iteration_bounds = array<i64: 14>, scalar_prefetch = 0 : i64, scratch_operands = 3 : i64, tpu.core_type = #tpu.core_type<tc>, window_params = [{pipeline_mode = #tpu.pipeline_mode<synchronous>, transform_indices = @transform_0, window_bounds = array<i64: 2, 2048>}, {transform_indices = @transform_1, window_bounds = array<i64: 2048, 512>}, {pipeline_mode = #tpu.pipeline_mode<synchronous>, transform_indices = @transform_2, window_bounds = array<i64: 1, 2048>}, {transform_indices = @transform_3, window_bounds = array<i64: 2048, 256>}, {pipeline_mode = #tpu.pipeline_mode<synchronous>, transform_indices = @transform_4, window_bounds = array<i64: 1, 512>}, {transform_indices = @transform_5, window_bounds = array<i64: 512, 512>}, {pipeline_mode = #tpu.pipeline_mode<synchronous>, transform_indices = @transform_6, window_bounds = array<i64: 1, 2048>}, {transform_indices = @transform_7, window_bounds = array<i64: 2048, 512>}, {transform_indices = @transform_8, window_bounds = array<i64: 1, 512>}, {transform_indices = @transform_9, window_bounds = array<i64: 2, 512>}]} {
    %c4_i32 = arith.constant 4 : i32
    %0 = arith.cmpi slt, %arg0, %c4_i32 : i32
    %1 = arith.extui %0 : i1 to i32
    %c0_i32 = arith.constant 0 : i32
    %2 = arith.cmpi ne, %1, %c0_i32 : i32
    scf.if %2 {
      %c0 = arith.constant 0 : index
      %c0_6 = arith.constant 0 : index
      %16 = vector.load %arg1[%c0, %c0_6] : memref<2x2048xf32, #tpu.memory_space<vmem>>, vector<2x2048xf32>
      %c0_7 = arith.constant 0 : index
      %c0_8 = arith.constant 0 : index
      %17 = vector.load %arg2[%c0_7, %c0_8] : memref<2048x512xf32, #tpu.memory_space<vmem>>, vector<2048x512xf32>
      %cst = arith.constant dense<0.000000e+00> : vector<2x512xf32>
      %18 = tpu.matmul %16, %17, %cst {dimension_numbers = #tpu.dot_dimension_numbers<[1], [0], [0], [1], [0, 0, 1, 1], [], []>} : vector<2x2048xf32>, vector<2048x512xf32>, vector<2x512xf32> -> vector<2x512xf32>
      %19 = arith.index_cast %arg0 : i32 to index
      %c0_9 = arith.constant 0 : index
      %c0_10 = arith.constant 0 : index
      %20 = vector.load %arg11[%19, %c0_9, %c0_10] : memref<4x2x512xf32, #tpu.memory_space<vmem>>, vector<1x2x512xf32>
      %21 = vector.shape_cast %20 : vector<1x2x512xf32> to vector<2x512xf32>
      %22 = vector.shape_cast %18 : vector<2x512xf32> to vector<1x2x512xf32>
      tpu.vector_store %arg11[%19, %c0_9, %c0_10], %22 {strides = array<i32>} : memref<4x2x512xf32, #tpu.memory_space<vmem>>, vector<1x2x512xf32>,
    } else {
    }
    %c4_i32_0 = arith.constant 4 : i32
    %3 = arith.cmpi sge, %arg0, %c4_i32_0 : i32
    %c6_i32 = arith.constant 6 : i32
    %4 = arith.cmpi slt, %arg0, %c6_i32 : i32
    %5 = arith.andi %3, %4 : i1
    %6 = arith.extui %5 : i1 to i32
    %c0_i32_1 = arith.constant 0 : i32
    %7 = arith.cmpi ne, %6, %c0_i32_1 : i32
    scf.if %7 {
      %cst = arith.constant 0.000000e+00 : f32
      %16 = vector.broadcast %cst : f32 to vector<2x256xf32>
      %c0 = arith.constant 0 : index
      %c0_6 = arith.constant 0 : index
      %c0_7 = arith.constant 0 : index
      %17 = vector.load %arg11[%c0, %c0_6, %c0_7] : memref<4x2x512xf32, #tpu.memory_space<vmem>>, vector<1x2x512xf32>
      %18 = vector.shape_cast %17 : vector<1x2x512xf32> to vector<2x512xf32>
      %c0_8 = arith.constant 0 : index
      %c0_9 = arith.constant 0 : index
      %19 = vector.load %arg3[%c0_8, %c0_9] : memref<1x2048xf32, #tpu.memory_space<vmem>>, vector<1x512xf32>
      %20 = vector.broadcast %19 : vector<1x512xf32> to vector<2x512xf32>
      %21 = arith.addf %18, %20 : vector<2x512xf32>
      %cst_10 = arith.constant 0.000000e+00 : f32
      %22 = vector.broadcast %cst_10 : f32 to vector<2x512xf32>
      %23 = arith.maximumf %21, %22 : vector<2x512xf32>
      %c0_11 = arith.constant 0 : index
      %c0_12 = arith.constant 0 : index
      %24 = vector.load %arg4[%c0_11, %c0_12] : memref<2048x256xf32, #tpu.memory_space<vmem>>, vector<512x256xf32>
      %cst_13 = arith.constant dense<0.000000e+00> : vector<2x256xf32>
      %25 = tpu.matmul %23, %24, %cst_13 {dimension_numbers = #tpu.dot_dimension_numbers<[1], [0], [0], [1], [0, 0, 1, 1], [], []>} : vector<2x512xf32>, vector<512x256xf32>, vector<2x256xf32> -> vector<2x256xf32>
      %26 = arith.addf %16, %25 : vector<2x256xf32>
      %c1 = arith.constant 1 : index
      %c0_14 = arith.constant 0 : index
      %c0_15 = arith.constant 0 : index
      %27 = vector.load %arg11[%c1, %c0_14, %c0_15] : memref<4x2x512xf32, #tpu.memory_space<vmem>>, vector<1x2x512xf32>
      %28 = vector.shape_cast %27 : vector<1x2x512xf32> to vector<2x512xf32>
      %c0_16 = arith.constant 0 : index
      %c512 = arith.constant 512 : index
      %29 = vector.load %arg3[%c0_16, %c512] : memref<1x2048xf32, #tpu.memory_space<vmem>>, vector<1x512xf32>
      %30 = vector.broadcast %29 : vector<1x512xf32> to vector<2x512xf32>
      %31 = arith.addf %28, %30 : vector<2x512xf32>
      %cst_17 = arith.constant 0.000000e+00 : f32
      %32 = vector.broadcast %cst_17 : f32 to vector<2x512xf32>
      %33 = arith.maximumf %31, %32 : vector<2x512xf32>
      %c512_18 = arith.constant 512 : index
      %c0_19 = arith.constant 0 : index
      %34 = vector.load %arg4[%c512_18, %c0_19] : memref<2048x256xf32, #tpu.memory_space<vmem>>, vector<512x256xf32>
      %cst_20 = arith.constant dense<0.000000e+00> : vector<2x256xf32>
      %35 = tpu.matmul %33, %34, %cst_20 {dimension_numbers = #tpu.dot_dimension_numbers<[1], [0], [0], [1], [0, 0, 1, 1], [], []>} : vector<2x512xf32>, vector<512x256xf32>, vector<2x256xf32> -> vector<2x256xf32>
      %36 = arith.addf %26, %35 : vector<2x256xf32>
      %c2 = arith.constant 2 : index
      %c0_21 = arith.constant 0 : index
      %c0_22 = arith.constant 0 : index
      %37 = vector.load %arg11[%c2, %c0_21, %c0_22] : memref<4x2x512xf32, #tpu.memory_space<vmem>>, vector<1x2x512xf32>
      %38 = vector.shape_cast %37 : vector<1x2x512xf32> to vector<2x512xf32>
      %c0_23 = arith.constant 0 : index
      %c1024 = arith.constant 1024 : index
      %39 = vector.load %arg3[%c0_23, %c1024] : memref<1x2048xf32, #tpu.memory_space<vmem>>, vector<1x512xf32>
      %40 = vector.broadcast %39 : vector<1x512xf32> to vector<2x512xf32>
      %41 = arith.addf %38, %40 : vector<2x512xf32>
      %cst_24 = arith.constant 0.000000e+00 : f32
      %42 = vector.broadcast %cst_24 : f32 to vector<2x512xf32>
      %43 = arith.maximumf %41, %42 : vector<2x512xf32>
      %c1024_25 = arith.constant 1024 : index
      %c0_26 = arith.constant 0 : index
      %44 = vector.load %arg4[%c1024_25, %c0_26] : memref<2048x256xf32, #tpu.memory_space<vmem>>, vector<512x256xf32>
      %cst_27 = arith.constant dense<0.000000e+00> : vector<2x256xf32>
      %45 = tpu.matmul %43, %44, %cst_27 {dimension_numbers = #tpu.dot_dimension_numbers<[1], [0], [0], [1], [0, 0, 1, 1], [], []>} : vector<2x512xf32>, vector<512x256xf32>, vector<2x256xf32> -> vector<2x256xf32>
      %46 = arith.addf %36, %45 : vector<2x256xf32>
      %c3 = arith.constant 3 : index
      %c0_28 = arith.constant 0 : index
      %c0_29 = arith.constant 0 : index
      %47 = vector.load %arg11[%c3, %c0_28, %c0_29] : memref<4x2x512xf32, #tpu.memory_space<vmem>>, vector<1x2x512xf32>
      %48 = vector.shape_cast %47 : vector<1x2x512xf32> to vector<2x512xf32>
      %c0_30 = arith.constant 0 : index
      %c1536 = arith.constant 1536 : index
      %49 = vector.load %arg3[%c0_30, %c1536] : memref<1x2048xf32, #tpu.memory_space<vmem>>, vector<1x512xf32>
      %50 = vector.broadcast %49 : vector<1x512xf32> to vector<2x512xf32>
      %51 = arith.addf %48, %50 : vector<2x512xf32>
      %cst_31 = arith.constant 0.000000e+00 : f32
      %52 = vector.broadcast %cst_31 : f32 to vector<2x512xf32>
      %53 = arith.maximumf %51, %52 : vector<2x512xf32>
      %c1536_32 = arith.constant 1536 : index
      %c0_33 = arith.constant 0 : index
      %54 = vector.load %arg4[%c1536_32, %c0_33] : memref<2048x256xf32, #tpu.memory_space<vmem>>, vector<512x256xf32>
      %cst_34 = arith.constant dense<0.000000e+00> : vector<2x256xf32>
      %55 = tpu.matmul %53, %54, %cst_34 {dimension_numbers = #tpu.dot_dimension_numbers<[1], [0], [0], [1], [0, 0, 1, 1], [], []>} : vector<2x512xf32>, vector<512x256xf32>, vector<2x256xf32> -> vector<2x256xf32>
      %56 = arith.addf %46, %55 : vector<2x256xf32>
      %c4_i32_35 = arith.constant 4 : i32
      %57 = arith.subi %arg0, %c4_i32_35 : i32
      %58 = arith.index_cast %57 : i32 to index
      %c0_36 = arith.constant 0 : index
      %c0_37 = arith.constant 0 : index
      %59 = vector.load %arg12[%58, %c0_36, %c0_37] : memref<2x2x256xf32, #tpu.memory_space<vmem>>, vector<1x2x256xf32>
      %60 = vector.shape_cast %59 : vector<1x2x256xf32> to vector<2x256xf32>
      %61 = vector.shape_cast %56 : vector<2x256xf32> to vector<1x2x256xf32>
      tpu.vector_store %arg12[%58, %c0_36, %c0_37], %61 {strides = array<i32>} : memref<2x2x256xf32, #tpu.memory_space<vmem>>, vector<1x2x256xf32>,
    } else {
    }
    %c6_i32_2 = arith.constant 6 : i32
    %8 = arith.cmpi sge, %arg0, %c6_i32_2 : i32
    %c10_i32 = arith.constant 10 : i32
    %9 = arith.cmpi slt, %arg0, %c10_i32 : i32
    %10 = arith.andi %8, %9 : i1
    %11 = arith.extui %10 : i1 to i32
    %c0_i32_3 = arith.constant 0 : i32
    %12 = arith.cmpi ne, %11, %c0_i32_3 : i32
    scf.if %12 {
      %cst = arith.constant 0.000000e+00 : f32
      %16 = vector.broadcast %cst : f32 to vector<2x512xf32>
      %c0 = arith.constant 0 : index
      %c0_6 = arith.constant 0 : index
      %c0_7 = arith.constant 0 : index
      %17 = vector.load %arg12[%c0, %c0_6, %c0_7] : memref<2x2x256xf32, #tpu.memory_space<vmem>>, vector<1x2x256xf32>
      %18 = vector.shape_cast %17 : vector<1x2x256xf32> to vector<2x256xf32>
      %c0_8 = arith.constant 0 : index
      %c0_9 = arith.constant 0 : index
      %19 = vector.load %arg5[%c0_8, %c0_9] : memref<1x512xf32, #tpu.memory_space<vmem>>, vector<1x256xf32>
      %20 = vector.broadcast %19 : vector<1x256xf32> to vector<2x256xf32>
      %21 = arith.addf %18, %20 : vector<2x256xf32>
      %c0_10 = arith.constant 0 : index
      %c0_11 = arith.constant 0 : index
      %22 = vector.load %arg6[%c0_10, %c0_11] : memref<512x512xf32, #tpu.memory_space<vmem>>, vector<256x512xf32>
      %cst_12 = arith.constant dense<0.000000e+00> : vector<2x512xf32>
      %23 = tpu.matmul %21, %22, %cst_12 {dimension_numbers = #tpu.dot_dimension_numbers<[1], [0], [0], [1], [0, 0, 1, 1], [], []>} : vector<2x256xf32>, vector<256x512xf32>, vector<2x512xf32> -> vector<2x512xf32>
      %24 = arith.addf %16, %23 : vector<2x512xf32>
      %c1 = arith.constant 1 : index
      %c0_13 = arith.constant 0 : index
      %c0_14 = arith.constant 0 : index
      %25 = vector.load %arg12[%c1, %c0_13, %c0_14] : memref<2x2x256xf32, #tpu.memory_space<vmem>>, vector<1x2x256xf32>
      %26 = vector.shape_cast %25 : vector<1x2x256xf32> to vector<2x256xf32>
      %c0_15 = arith.constant 0 : index
      %c256 = arith.constant 256 : index
      %27 = vector.load %arg5[%c0_15, %c256] : memref<1x512xf32, #tpu.memory_space<vmem>>, vector<1x256xf32>
      %28 = vector.broadcast %27 : vector<1x256xf32> to vector<2x256xf32>
      %29 = arith.addf %26, %28 : vector<2x256xf32>
      %c256_16 = arith.constant 256 : index
      %c0_17 = arith.constant 0 : index
      %30 = vector.load %arg6[%c256_16, %c0_17] : memref<512x512xf32, #tpu.memory_space<vmem>>, vector<256x512xf32>
      %cst_18 = arith.constant dense<0.000000e+00> : vector<2x512xf32>
      %31 = tpu.matmul %29, %30, %cst_18 {dimension_numbers = #tpu.dot_dimension_numbers<[1], [0], [0], [1], [0, 0, 1, 1], [], []>} : vector<2x256xf32>, vector<256x512xf32>, vector<2x512xf32> -> vector<2x512xf32>
      %32 = arith.addf %24, %31 : vector<2x512xf32>
      %c6_i32_19 = arith.constant 6 : i32
      %33 = arith.subi %arg0, %c6_i32_19 : i32
      %34 = arith.index_cast %33 : i32 to index
      %c0_20 = arith.constant 0 : index
      %c0_21 = arith.constant 0 : index
      %35 = vector.load %arg13[%34, %c0_20, %c0_21] : memref<4x2x512xf32, #tpu.memory_space<vmem>>, vector<1x2x512xf32>
      %36 = vector.shape_cast %35 : vector<1x2x512xf32> to vector<2x512xf32>
      %37 = vector.shape_cast %32 : vector<2x512xf32> to vector<1x2x512xf32>
      tpu.vector_store %arg13[%34, %c0_20, %c0_21], %37 {strides = array<i32>} : memref<4x2x512xf32, #tpu.memory_space<vmem>>, vector<1x2x512xf32>,
    } else {
    }
    %c10_i32_4 = arith.constant 10 : i32
    %13 = arith.cmpi sge, %arg0, %c10_i32_4 : i32
    %14 = arith.extui %13 : i1 to i32
    %c0_i32_5 = arith.constant 0 : i32
    %15 = arith.cmpi ne, %14, %c0_i32_5 : i32
    scf.if %15 {
      %cst = arith.constant 0.000000e+00 : f32
      %16 = vector.broadcast %cst : f32 to vector<2x512xf32>
      %c0 = arith.constant 0 : index
      %c0_6 = arith.constant 0 : index
      %c0_7 = arith.constant 0 : index
      %17 = vector.load %arg13[%c0, %c0_6, %c0_7] : memref<4x2x512xf32, #tpu.memory_space<vmem>>, vector<1x2x512xf32>
      %18 = vector.shape_cast %17 : vector<1x2x512xf32> to vector<2x512xf32>
      %c0_8 = arith.constant 0 : index
      %c0_9 = arith.constant 0 : index
      %19 = vector.load %arg7[%c0_8, %c0_9] : memref<1x2048xf32, #tpu.memory_space<vmem>>, vector<1x512xf32>
      %20 = vector.broadcast %19 : vector<1x512xf32> to vector<2x512xf32>
      %21 = arith.addf %18, %20 : vector<2x512xf32>
      %cst_10 = arith.constant 0.000000e+00 : f32
      %22 = vector.broadcast %cst_10 : f32 to vector<2x512xf32>
      %23 = arith.maximumf %21, %22 : vector<2x512xf32>
      %c0_11 = arith.constant 0 : index
      %c0_12 = arith.constant 0 : index
      %24 = vector.load %arg8[%c0_11, %c0_12] : memref<2048x512xf32, #tpu.memory_space<vmem>>, vector<512x512xf32>
      %cst_13 = arith.constant dense<0.000000e+00> : vector<2x512xf32>
      %25 = tpu.matmul %23, %24, %cst_13 {dimension_numbers = #tpu.dot_dimension_numbers<[1], [0], [0], [1], [0, 0, 1, 1], [], []>} : vector<2x512xf32>, vector<512x512xf32>, vector<2x512xf32> -> vector<2x512xf32>
      %26 = arith.addf %16, %25 : vector<2x512xf32>
      %c1 = arith.constant 1 : index
      %c0_14 = arith.constant 0 : index
      %c0_15 = arith.constant 0 : index
      %27 = vector.load %arg13[%c1, %c0_14, %c0_15] : memref<4x2x512xf32, #tpu.memory_space<vmem>>, vector<1x2x512xf32>
      %28 = vector.shape_cast %27 : vector<1x2x512xf32> to vector<2x512xf32>
      %c0_16 = arith.constant 0 : index
      %c512 = arith.constant 512 : index
      %29 = vector.load %arg7[%c0_16, %c512] : memref<1x2048xf32, #tpu.memory_space<vmem>>, vector<1x512xf32>
      %30 = vector.broadcast %29 : vector<1x512xf32> to vector<2x512xf32>
      %31 = arith.addf %28, %30 : vector<2x512xf32>
      %cst_17 = arith.constant 0.000000e+00 : f32
      %32 = vector.broadcast %cst_17 : f32 to vector<2x512xf32>
      %33 = arith.maximumf %31, %32 : vector<2x512xf32>
      %c512_18 = arith.constant 512 : index
      %c0_19 = arith.constant 0 : index
      %34 = vector.load %arg8[%c512_18, %c0_19] : memref<2048x512xf32, #tpu.memory_space<vmem>>, vector<512x512xf32>
      %cst_20 = arith.constant dense<0.000000e+00> : vector<2x512xf32>
      %35 = tpu.matmul %33, %34, %cst_20 {dimension_numbers = #tpu.dot_dimension_numbers<[1], [0], [0], [1], [0, 0, 1, 1], [], []>} : vector<2x512xf32>, vector<512x512xf32>, vector<2x512xf32> -> vector<2x512xf32>
      %36 = arith.addf %26, %35 : vector<2x512xf32>
      %c2 = arith.constant 2 : index
      %c0_21 = arith.constant 0 : index
      %c0_22 = arith.constant 0 : index
      %37 = vector.load %arg13[%c2, %c0_21, %c0_22] : memref<4x2x512xf32, #tpu.memory_space<vmem>>, vector<1x2x512xf32>
      %38 = vector.shape_cast %37 : vector<1x2x512xf32> to vector<2x512xf32>
      %c0_23 = arith.constant 0 : index
      %c1024 = arith.constant 1024 : index
      %39 = vector.load %arg7[%c0_23, %c1024] : memref<1x2048xf32, #tpu.memory_space<vmem>>, vector<1x512xf32>
      %40 = vector.broadcast %39 : vector<1x512xf32> to vector<2x512xf32>
      %41 = arith.addf %38, %40 : vector<2x512xf32>
      %cst_24 = arith.constant 0.000000e+00 : f32
      %42 = vector.broadcast %cst_24 : f32 to vector<2x512xf32>
      %43 = arith.maximumf %41, %42 : vector<2x512xf32>
      %c1024_25 = arith.constant 1024 : index
      %c0_26 = arith.constant 0 : index
      %44 = vector.load %arg8[%c1024_25, %c0_26] : memref<2048x512xf32, #tpu.memory_space<vmem>>, vector<512x512xf32>
      %cst_27 = arith.constant dense<0.000000e+00> : vector<2x512xf32>
      %45 = tpu.matmul %43, %44, %cst_27 {dimension_numbers = #tpu.dot_dimension_numbers<[1], [0], [0], [1], [0, 0, 1, 1], [], []>} : vector<2x512xf32>, vector<512x512xf32>, vector<2x512xf32> -> vector<2x512xf32>
      %46 = arith.addf %36, %45 : vector<2x512xf32>
      %c3 = arith.constant 3 : index
      %c0_28 = arith.constant 0 : index
      %c0_29 = arith.constant 0 : index
      %47 = vector.load %arg13[%c3, %c0_28, %c0_29] : memref<4x2x512xf32, #tpu.memory_space<vmem>>, vector<1x2x512xf32>
      %48 = vector.shape_cast %47 : vector<1x2x512xf32> to vector<2x512xf32>
      %c0_30 = arith.constant 0 : index
      %c1536 = arith.constant 1536 : index
      %49 = vector.load %arg7[%c0_30, %c1536] : memref<1x2048xf32, #tpu.memory_space<vmem>>, vector<1x512xf32>
      %50 = vector.broadcast %49 : vector<1x512xf32> to vector<2x512xf32>
      %51 = arith.addf %48, %50 : vector<2x512xf32>
      %cst_31 = arith.constant 0.000000e+00 : f32
      %52 = vector.broadcast %cst_31 : f32 to vector<2x512xf32>
      %53 = arith.maximumf %51, %52 : vector<2x512xf32>
      %c1536_32 = arith.constant 1536 : index
      %c0_33 = arith.constant 0 : index
      %54 = vector.load %arg8[%c1536_32, %c0_33] : memref<2048x512xf32, #tpu.memory_space<vmem>>, vector<512x512xf32>
      %cst_34 = arith.constant dense<0.000000e+00> : vector<2x512xf32>
      %55 = tpu.matmul %53, %54, %cst_34 {dimension_numbers = #tpu.dot_dimension_numbers<[1], [0], [0], [1], [0, 0, 1, 1], [], []>} : vector<2x512xf32>, vector<512x512xf32>, vector<2x512xf32> -> vector<2x512xf32>
      %56 = arith.addf %46, %55 : vector<2x512xf32>
      %c0_35 = arith.constant 0 : index
      %c0_36 = arith.constant 0 : index
      %57 = vector.load %arg9[%c0_35, %c0_36] : memref<1x512xf32, #tpu.memory_space<vmem>>, vector<1x512xf32>
      %58 = vector.broadcast %57 : vector<1x512xf32> to vector<2x512xf32>
      %59 = arith.addf %56, %58 : vector<2x512xf32>
      %c0_37 = arith.constant 0 : index
      %c0_38 = arith.constant 0 : index
      %60 = vector.load %arg10[%c0_37, %c0_38] : memref<2x512xf32, #tpu.memory_space<vmem>>, vector<2x512xf32>
      tpu.vector_store %arg10[%c0_37, %c0_38], %59 {strides = array<i32>} : memref<2x512xf32, #tpu.memory_space<vmem>>, vector<2x512xf32>,
    } else {
    }
    return
  }
  func.func @transform_0(%arg0: i32) -> (i32, i32) {
    %c0_i32 = arith.constant 0 : i32
    %c0_i32_0 = arith.constant 0 : i32
    %c0_i32_1 = arith.constant 0 : i32
    return %c0_i32, %c0_i32_0 : i32, i32
  }
  func.func @transform_1(%arg0: i32) -> (i32, i32) {
    %c3_i32 = arith.constant 3 : i32
    %0 = arith.minsi %arg0, %c3_i32 : i32
    %c0_i32 = arith.constant 0 : i32
    %c0_i32_0 = arith.constant 0 : i32
    return %c0_i32, %0 : i32, i32
  }
  func.func @transform_2(%arg0: i32) -> (i32, i32) {
    %c0_i32 = arith.constant 0 : i32
    %c0_i32_0 = arith.constant 0 : i32
    %c0_i32_1 = arith.constant 0 : i32
    return %c0_i32, %c0_i32_0 : i32, i32
  }
  func.func @transform_3(%arg0: i32) -> (i32, i32) {
    %c4_i32 = arith.constant 4 : i32
    %0 = arith.subi %arg0, %c4_i32 : i32
    %c0_i32 = arith.constant 0 : i32
    %c1_i32 = arith.constant 1 : i32
    %1 = arith.maxsi %c0_i32, %0 : i32
    %2 = arith.minsi %c1_i32, %1 : i32
    %c0_i32_0 = arith.constant 0 : i32
    %c0_i32_1 = arith.constant 0 : i32
    return %c0_i32_0, %2 : i32, i32
  }
  func.func @transform_4(%arg0: i32) -> (i32, i32) {
    %c0_i32 = arith.constant 0 : i32
    %c0_i32_0 = arith.constant 0 : i32
    %c0_i32_1 = arith.constant 0 : i32
    return %c0_i32, %c0_i32_0 : i32, i32
  }
  func.func @transform_5(%arg0: i32) -> (i32, i32) {
    %c6_i32 = arith.constant 6 : i32
    %0 = arith.subi %arg0, %c6_i32 : i32
    %c0_i32 = arith.constant 0 : i32
    %c3_i32 = arith.constant 3 : i32
    %1 = arith.maxsi %c0_i32, %0 : i32
    %2 = arith.minsi %c3_i32, %1 : i32
    %c0_i32_0 = arith.constant 0 : i32
    %c0_i32_1 = arith.constant 0 : i32
    return %c0_i32_0, %2 : i32, i32
  }
  func.func @transform_6(%arg0: i32) -> (i32, i32) {
    %c0_i32 = arith.constant 0 : i32
    %c0_i32_0 = arith.constant 0 : i32
    %c0_i32_1 = arith.constant 0 : i32
    return %c0_i32, %c0_i32_0 : i32, i32
  }
  func.func @transform_7(%arg0: i32) -> (i32, i32) {
    %c10_i32 = arith.constant 10 : i32
    %0 = arith.subi %arg0, %c10_i32 : i32
    %c0_i32 = arith.constant 0 : i32
    %c3_i32 = arith.constant 3 : i32
    %1 = arith.maxsi %c0_i32, %0 : i32
    %2 = arith.minsi %c3_i32, %1 : i32
    %c0_i32_0 = arith.constant 0 : i32
    %c0_i32_1 = arith.constant 0 : i32
    return %c0_i32_0, %2 : i32, i32
  }
  func.func @transform_8(%arg0: i32) -> (i32, i32) {
    %c10_i32 = arith.constant 10 : i32
    %0 = arith.subi %arg0, %c10_i32 : i32
    %c0_i32 = arith.constant 0 : i32
    %c3_i32 = arith.constant 3 : i32
    %1 = arith.maxsi %c0_i32, %0 : i32
    %2 = arith.minsi %c3_i32, %1 : i32
    %c0_i32_0 = arith.constant 0 : i32
    %c0_i32_1 = arith.constant 0 : i32
    return %c0_i32_0, %2 : i32, i32
  }
  func.func @transform_9(%arg0: i32) -> (i32, i32) {
    %c10_i32 = arith.constant 10 : i32
    %0 = arith.subi %arg0, %c10_i32 : i32
    %c0_i32 = arith.constant 0 : i32
    %c3_i32 = arith.constant 3 : i32
    %1 = arith.maxsi %c0_i32, %0 : i32
    %2 = arith.minsi %c3_i32, %1 : i32
    %c0_i32_0 = arith.constant 0 : i32
    %c0_i32_1 = arith.constant 0 : i32
    return %c0_i32_0, %2 : i32, i32
  }
}

</mosaic_0001>

<bundles_post_ra>
// kernel: netfc1_forward.1
= control target key start
LH: loop header
LB: loop body
LE: loop exit
PB: predicated region body
PF: predicated region fallthrough
CT: control target
= control target key end

     0   :  { %s14968_s0 = inlined_call_operand.vmem [shape: f32[2,2048], index: 0, kind: input, shape index: {}]   ;;  %s14969_s1 = inlined_call_operand.hbm [shape: f32[2048,2048], index: 1, kind: input, shape index: {}]   ;;  %s14970_s2 = inlined_call_operand.hbm [shape: f32[1,2048], index: 2, kind: input, shape index: {}]   ;;  %s14971_s3 = inlined_call_operand.hbm [shape: f32[2048,512], index: 3, kind: input, shape index: {}]   ;;  %s14972_s4 = inlined_call_operand.hbm [shape: f32[1,512], index: 4, kind: input, shape index: {}]   ;;  %s14973_s5 = inlined_call_operand.hbm [shape: f32[512,2048], index: 5, kind: input, shape index: {}]   ;;  %s14974_s6 = inlined_call_operand.hbm [shape: f32[1,2048], index: 6, kind: input, shape index: {}]   ;;  %s14975_s7 = inlined_call_operand.hbm [shape: f32[2048,2048], index: 7, kind: input, shape index: {}]   ;;  %s14976_s8 = inlined_call_operand.hbm [shape: f32[1,2048], index: 8, kind: input, shape index: {}]   ;;  %s14977_s9 = inlined_call_operand.vmem [shape: f32[2,2048], index: 9, kind: output, shape index: {}]  }
   0x1   :  { %15007 = sst [smem:[#allocation33_spill]] %s14968_s0 }
   0x2   :  { %15008 = sst [smem:[#allocation34_spill]] %s14969_s1 }
   0x3   :  { %15009 = sst [smem:[#allocation35_spill]] %s14970_s2 }
   0x4   :  { %15010 = sst [smem:[#allocation36_spill]] %s14971_s3 }
   0x5   :  { %15011 = sst [smem:[#allocation37_spill]] %s14972_s4 }
   0x6   :  { %15012 = sst [smem:[#allocation38_spill]] %s14973_s5 }
   0x7   :  { %15013 = sst [smem:[#allocation39_spill]] %s14974_s6 }
   0x8   :  { %15014 = sst [smem:[#allocation40_spill]] %s14975_s7 }
   0x9   :  { %15015 = sst [smem:[#allocation41_spill]] %s14976_s8 }
   0xa   :  { %15016 = sst [smem:[#allocation42_spill]] %s14977_s9 }
   0xb   :  { %14 = vsyncpa [#allocation6], 0 }
   0xc   :  { %16 = vsyncpa [#allocation6 + $0x1], 0 }
   0xd   :  { %17 = vsyncpa [#allocation8], 0 }
   0xe   :  { %18 = vsyncpa [#allocation12], 0 }
   0xf   :  { %20 = vsyncpa [#allocation12 + $0x1], 0 }
  0x10   :  { %21 = vsyncpa [#allocation15], 0 }
  0x11   :  { %23 = vsyncpa [#allocation15 + $0x1], 0  ;;  %s11276_s30 = smov 0   ;;  %s11278_s10 = smov 0  }
  0x12   :  { %s11280_s11 = smov 0   ;;  %s11282_s12 = smov 0  }
  0x13   :  { %s11284_s13 = smov 0   ;;  %s11286_s14 = smov 0  }
  0x14   :  { %s11288_s15 = smov 0   ;;  %s11290_s16 = smov 0  }
  0x15   :  { %s11292_s17 = smov 0   ;;  %s11294_s18 = smov 0  }
  0x16   :  { %s11296_s19 = smov 0   ;;  %s11298_s20 = smov 0  }
  0x17   :  { %s11300_s21 = smov 0  }
  0x18 LB: > { %15017 = sst [smem:[#allocation24_spill]] %s11163_s10  ;;  %s11209_s22 = smov [#allocation7]   ;;  %s11207_s21 = sphi %s11300_s21, %s15102_s21   ;;  %s11203_s20 = sphi %s11298_s20, %s15091_s20   ;;  %s11199_s19 = sphi %s11296_s19, %s15101_s19   ;;  %s11195_s18 = sphi %s11294_s18, %s15100_s18   ;;  %s11191_s17 = sphi %s11292_s17, %s15099_s17   ;;  %s11187_s16 = sphi %s11290_s16, %s15098_s16   ;;  %s11183_s15 = sphi %s11288_s15, %s15097_s15   ;;  %s11179_s14 = sphi %s11286_s14, %s15096_s14   ;;  %s11175_s13 = sphi %s11284_s13, %s15095_s13   ;;  %s11171_s12 = sphi %s11282_s12, %s15094_s12   ;;  %s11167_s11 = sphi %s11280_s11, %s15093_s11   ;;  %s11163_s10 = sphi %s11278_s10, %s15092_s10   ;;  %s11159_s30 = sphi %s11276_s30, %s15086_s30  }
  0x19   : > { %15018 = sst [smem:[#allocation25_spill]] %s11171_s12  ;;  %s344_s23 = sshll.u32 %s11209_s22, 4  ;;  %s345_s23 = int_to_ptr.vmem [resolvable:$true] %s344_s23 }
  0x1a   : > { %15019 = sst [smem:[#allocation26_spill]] %s11175_s13  ;;  %s11342_s24 = sadd.s32 4294967295, %s11207_s21  }
  0x1b   : > { %15020 = sst [smem:[#allocation27_spill]] %s11203_s20  ;;  %p7666_p0 = scmp.ge.s32.totalorder %s11207_s21, 1 }
  0x1c   : > { %p14982_p1 = scmp.eq.s32.totalorder %s11342_s24, 0  ;;  %p328_p2 = scmp.lt.s32.totalorder %s11207_s21, 15 }
  0x1d   : > { %s11210_s26 = smov [#allocation13]   ;;  %s15024_s2 = sld [smem:[#allocation35_spill]] }
  0x1e   : > { %p11347_p3 = pnand %p7666_p0, %p328_p2  ;;  %s366_s27 = sshll.u32 %s11210_s26, 4  ;;  %s11353_s27 = int_to_ptr.vmem [resolvable:$true] %s366_s27 }
  0x20   : > { %s15021_s25 = scalar_select %p11347_p3, 1, 0 }
  0x21   : > { %p10690_p4 = pneg %p11347_p3 }
  0x22   : > { %15022 = sst [smem:[#allocation28_spill]] %s15021_s25 }
  0x23   : > { %p11357_p5 = pnand %p10690_p4, %p14982_p1  ;;  %s10843_s0 = scalar_lea.hbm %s15024_s2, 256 }
  0x24   : > { %p10844_p6 = scmp.ne.s32.totalorder %s15024_s2, %s10843_s0  ;;  %p10850_p10 = scmp.lt.u32.totalorder %s10843_s0, %s15024_s2 }
  0x25   : > { %s15023_s28 = scalar_select %p11357_p5, 1, 0 }
  0x26   : > { %p11369_p7 = pneg %p11357_p5 }
  0x28   : > { %p10846_p8 = pnand %p11369_p7, %p10844_p6 }
  0x2a   : > { %p10847_p9 = pneg %p10846_p8 }
  0x2c   : > { %p10852_p11 = pnand %p10850_p10, %p10847_p9 }
  0x2e   : > { %10855 = shalt.err (!%p10852_p11)
}
  0x2f   : > { %s10856_s29 = scalar_lea.vmem %s345_s23, 256  ;;  %p10864_p2 = scmp.lt.s32.totalorder %s345_s23, %s345_s23 }
  0x30   : > { %p10857_p12 = scmp.ne.s32.totalorder %s345_s23, %s10856_s29  ;;  %p10865_p4 = scmp.lt.s32.totalorder %s10856_s29, %s10856_s29 }
  0x32   : > { %p10859_p13 = pnand %p10857_p12, %p11369_p7  ;;  %p10866_p1 = por %p10865_p4, %p10864_p2 }
  0x34   : > { %p10860_p0 = pneg %p10859_p13 }
  0x36   : > { %p10867_p3 = pnand %p10866_p1, %p10860_p0 }
  0x38   : > { %10870 = shalt.err (!%p10867_p3)
}
  0x39   : > { %10693 = dma.hbm_to_vmem [thread:$0]  (!%p11357_p5), %s15024_s2, 256, %s345_s23, [#allocation8]  }
  0x3a   : > { %s15026_s6 = sld [smem:[#allocation39_spill]] }
  0x40   : > { %s10871_s22 = scalar_lea.hbm %s15026_s6, 256 }
  0x41   : > { %p10872_p6 = scmp.ne.s32.totalorder %s15026_s6, %s10871_s22  ;;  %p10878_p1 = scmp.lt.u32.totalorder %s10871_s22, %s15026_s6 }
  0x43   : > { %p10874_p8 = pnand %p10872_p6, %p11369_p7 }
  0x45   : > { %p10875_p9 = pneg %p10874_p8 }
  0x47   : > { %p10880_p3 = pnand %p10878_p1, %p10875_p9 }
  0x49   : > { %10883 = shalt.err (!%p10880_p3)
}
  0x4a   : > { %s10884_s23 = scalar_lea.vmem %s11353_s27, 256  ;;  %p10892_p13 = scmp.lt.s32.totalorder %s11353_s27, %s11353_s27 }
  0x4b   : > { %p10885_p10 = scmp.ne.s32.totalorder %s11353_s27, %s10884_s23  ;;  %p10893_p0 = scmp.lt.s32.totalorder %s10884_s23, %s10884_s23 }
  0x4d   : > { %p10887_p11 = pnand %p10885_p10, %p11369_p7  ;;  %p10894_p2 = por %p10893_p0, %p10892_p13 }
  0x4f   : > { %p10888_p12 = pneg %p10887_p11 }
  0x51   : > { %p10895_p4 = pnand %p10894_p2, %p10888_p12 }
  0x53   : > { %10898 = shalt.err (!%p10895_p4)
}
  0x54   : > { %10699 = dma.hbm_to_vmem [thread:$0]  (!%p11357_p5), %s15026_s6, 256, %s11353_s27, [#allocation12]  }
  0x55   : > { %s11409_s8 = sadd.s32 1, %s11207_s21   ;;  %p54_p6 = scmp.lt.s32.totalorder %s11207_s21, 3 }
  0x56   : > { %p56_p8 = scmp.lt.s32.totalorder %s11409_s8, 3  ;;  %s61_s9 = sadd.s32 1, %s11203_s20 }
  0x57   : > { %s55_s0 = scalar_select %p54_p6, %s11207_s21, 3 }
  0x58   : > { %s57_s5 = scalar_select %p56_p8, %s11409_s8, 3 }
  0x59   : > { %p68_p9 = scmp.ne.s32.totalorder %s11203_s20, %s11199_s19  ;;  %p14986_p1 = scmp.eq.s32.totalorder %s11207_s21, 0 }
  0x5a   : > { %s58_s22 = ssub.s32 %s55_s0, %s57_s5  ;;  %p74_p3 = scmp.ne.s32.totalorder %s11199_s19, %s11195_s18 }
  0x5b   : > { %p59_p10 = scmp.eq.s32.totalorder %s58_s22, 0  ;;  %p70_p11 = por %p14986_p1, %p68_p9 }
  0x5c   : > { %p15027_p12 = scmp.eq.s32.totalorder %s11342_s24, 0  ;;  %p14985_p0 = scmp.lt.s32.totalorder %s11207_s21, 14 }
  0x5d   : > { %s11431_s26 = scalar_select %p59_p10, %s11203_s20, %s61_s9  }
  0x5e   : > { %p11425_p13 = por %p15027_p12, %p74_p3  ;;  %s11434_s29 = sand.u32 1, %s11207_s21  }
  0x5f   : > { %15030 = sst [smem:[#allocation30_spill]] %s11431_s26  ;;  %s379_s23 = sand.u32 1, %s11203_s20  }
  0x60   : > { %s15028_s27 = scalar_select %p11425_p13, 1, 0 }
  0x61   : > { %s7671_s12 = sshll.u32 %s379_s23, 13  ;;  %s7760_s13 = sshll.u32 %s55_s0, 9 }
  0x62   : > { %15029 = sst [smem:[#allocation29_spill]] %s15028_s27  ;;  %s381_s22 = scalar_lea.vmem [#allocation5], %s7671_s12 }
  0x63   : > { %s15031_s1 = sld [smem:[#allocation34_spill]]  ;;  %s390_s6 = sshll.u32 %s381_s22, 4  ;;  %s11442_s6 = int_to_ptr.vmem [resolvable:$true] %s390_s6 }
  0x64   : > { %p11446_p2 = pnand %p14985_p0, %p70_p11 }
  0x66   : > { %p10901_p6 = pneg %p11446_p2 }
  0x69   : > { %s11440_s18 = scalar_lea.hbm %s15031_s1, %s7760_s13  ;;  %s10904_s13 = scalar_lea.hbm %s15031_s1, 524288 }
  0x6a   : > { %s10899_s23 = scalar_lea.hbm %s11440_s18, 131072  ;;  %p10905_p3 = scmp.lt.u32.totalorder %s11440_s18, %s15031_s1 }
  0x6b   : > { %p10900_p4 = scmp.ne.s32.totalorder %s11440_s18, %s10899_s23  ;;  %p10906_p10 = scmp.lt.u32.totalorder %s10904_s13, %s10899_s23 }
  0x6c   : > { %p10908_p12 = scmp.lt.u32.totalorder %s10899_s23, %s11440_s18 }
  0x6d   : > { %p10902_p8 = pnand %p10901_p6, %p10900_p4  ;;  %p10907_p11 = por %p10906_p10, %p10905_p3 }
  0x6f   : > { %p10903_p9 = pneg %p10902_p8  ;;  %p10909_p0 = por %p10908_p12, %p10907_p11 }
  0x71   : > { %p10910_p1 = pnand %p10909_p0, %p10903_p9 }
  0x73   : > { %10913 = shalt.err (!%p10910_p1)
}
  0x74   : > { %s10914_s0 = scalar_lea.vmem %s11442_s6, 131072  ;;  %s11211_s2 = smov [#allocation5]  }
  0x75   : > { %p10915_p4 = scmp.ne.s32.totalorder %s11442_s6, %s10914_s0  ;;  %s10919_s12 = sshll.u32 %s11211_s2, 4  ;;  %s10920_s12 = int_to_ptr.vmem [resolvable:$false] %s10919_s12 }
  0x76   : > { %s10921_s5 = scalar_lea.vmem %s10920_s12, 262144  ;;  %p10922_p5 = scmp.lt.s32.totalorder %s11442_s6, %s10920_s12 }
  0x77   : > { %p10917_p8 = pnand %p10915_p4, %p10901_p6  ;;  %p10923_p3 = scmp.lt.s32.totalorder %s10921_s5, %s10914_s0 }
  0x79   : > { %p10918_p13 = pneg %p10917_p8  ;;  %p10924_p10 = por %p10923_p3, %p10922_p5 }
  0x7b   : > { %p10925_p11 = pnand %p10924_p10, %p10918_p13 }
  0x7d   : > { %10928 = shalt.err (!%p10925_p11)
}
  0x7e   : > { %s14989_s23 = smov 2048   ;;  %s14991_s13 = smov 512  }
  0x7f   : > { %s14993_s22 = smov 32   ;;  %s15033_s0 = scalar_lea.sflag [#allocation6], %s11434_s29 }
  0x80   : > { %10703 = dma.hbm_to_vmem [thread:$0]  (!%p11446_p2), %s11440_s18, 131072, %s11442_s6, %s15033_s0, %s14989_s23, %s14991_s13, %s14993_s22  }
  0x81   : > { %s7630_s2 = sadd.s32 4294967286, %s11207_s21  ;;  %s7636_s12 = sadd.s32 4294967286, %s11409_s8 }
  0x82   : > { %p220_p5 = scmp.gt.s32.totalorder %s7630_s2, 0  ;;  %p7631_p1 = scmp.lt.s32.totalorder %s7630_s2, 3 }
  0x83   : > { %p225_p13 = scmp.gt.s32.totalorder %s7636_s12, 0  ;;  %p7637_p0 = scmp.lt.s32.totalorder %s7636_s12, 3 }
  0x84   : > { %s15104_s2 = smov (!%p220_p5, %s7630_s2), 0  ;;  %s232_s6 = sadd.s32 1, %s11167_s11 }
  0x85   : > { %s15106_s12 = smov (!%p225_p13, %s7636_s12), 0  ;;  %s15108_s2 = smov (!%p7631_p1, %s15104_s2), 3 }
  0x86   : > { %s15110_s12 = smov (!%p7637_p0, %s15106_s12), 3  ;;  %p239_p2 = scmp.ne.s32.totalorder %s11167_s11, %s11163_s10 }
  0x87   : > { %s229_s18 = ssub.s32 %s15108_s2, %s15110_s12  ;;  %p245_p6 = scmp.ne.s32.totalorder %s11163_s10, %s11159_s30 }
  0x88   : > { %p230_p9 = scmp.eq.s32.totalorder %s229_s18, 0  ;;  %p15034_p12 = scmp.eq.s32.totalorder %s11207_s21, 0 }
  0x89   : > { %p15035_p8 = scmp.eq.s32.totalorder %s11342_s24, 0  ;;  %s14995_s0 = sand.u32 1, %s11167_s11  }
  0x8a   : > { %p241_p4 = por %p239_p2, %p15034_p12  ;;  %s7769_s23 = sshll.u32 %s15108_s2, 9 }
  0x8b   : > { %p11495_p3 = por %p245_p6, %p15035_p8  ;;  %s7692_s13 = sshll.u32 %s14995_s0, 13 }
  0x8c   : > { %s11500_s5 = scalar_select %p230_p9, %s11167_s11, %s232_s6  }
  0x8d   : > { %s15036_s9 = scalar_select %p11495_p3, 1, 0 }
  0x8e   : > { %15038 = sst [smem:[#allocation32_spill]] %s11500_s5  ;;  %s15039_s7 = sld [smem:[#allocation40_spill]] }
  0x8f   : > { %15037 = sst [smem:[#allocation31_spill]] %s15036_s9  ;;  %p15040_p10 = scmp.lt.s32.totalorder %s11207_s21, 14 }
  0x90   : > { %s456_s12 = scalar_lea.vmem [#allocation14], %s7692_s13  ;;  %s15005_s18 = scalar_lea.sflag [#allocation15], %s11434_s29 }
  0x91   : > { %p11513_p11 = pnand %p15040_p10, %p241_p4  ;;  %s468_s6 = sshll.u32 %s456_s12, 4  ;;  %s11517_s6 = int_to_ptr.vmem [resolvable:$true] %s468_s6 }
  0x93   : > { %p15003_p1 = pneg %p11513_p11 }
  0x94   : > { %s11509_s26 = scalar_lea.hbm %s15039_s7, %s7769_s23  ;;  %s10934_s22 = scalar_lea.hbm %s15039_s7, 524288 }
  0x95   : > { %s10929_s0 = scalar_lea.hbm %s11509_s26, 131072  ;;  %p10935_p2 = scmp.lt.u32.totalorder %s11509_s26, %s15039_s7 }
  0x96   : > { %p10930_p5 = scmp.ne.s32.totalorder %s11509_s26, %s10929_s0  ;;  %p10936_p6 = scmp.lt.u32.totalorder %s10934_s22, %s10929_s0 }
  0x97   : > { %p10938_p12 = scmp.lt.u32.totalorder %s10929_s0, %s11509_s26 }
  0x98   : > { %p10932_p13 = pnand %p15003_p1, %p10930_p5  ;;  %p10937_p9 = por %p10936_p6, %p10935_p2 }
  0x9a   : > { %p10933_p0 = pneg %p10932_p13  ;;  %p10939_p4 = por %p10938_p12, %p10937_p9 }
  0x9c   : > { %p10940_p8 = pnand %p10939_p4, %p10933_p0 }
  0x9e   : > { %10943 = shalt.err (!%p10940_p8)
}
  0x9f   : > { %s10944_s13 = scalar_lea.vmem %s11517_s6, 131072  ;;  %s11215_s12 = smov [#allocation14]  }
  0xa0   : > { %p10945_p10 = scmp.ne.s32.totalorder %s11517_s6, %s10944_s13  ;;  %s10949_s1 = sshll.u32 %s11215_s12, 4  ;;  %s10950_s1 = int_to_ptr.vmem [resolvable:$false] %s10949_s1 }
  0xa1   : > { %s10951_s20 = scalar_lea.vmem %s10950_s1, 262144  ;;  %p10952_p3 = scmp.lt.s32.totalorder %s11517_s6, %s10950_s1 }
  0xa2   : > { %p10947_p5 = pnand %p10945_p10, %p15003_p1  ;;  %p10953_p2 = scmp.lt.s32.totalorder %s10951_s20, %s10944_s13 }
  0xa4   : > { %p10948_p13 = pneg %p10947_p5  ;;  %p10954_p6 = por %p10953_p2, %p10952_p3 }
  0xa6   : > { %p10955_p9 = pnand %p10954_p6, %p10948_p13 }
  0xa8   : > { %10958 = shalt.err (!%p10955_p9)
}
  0xa9   : > { %s15042_s5 = smov 32   ;;  %s15043_s0 = smov 512  }
  0xaa   : > { %s15044_s23 = smov 2048   ;;  %s11216_s22 = smov [#allocation10]  }
  0xab   : > { %10712 = dma.hbm_to_vmem [thread:$0]  (!%p11513_p11), %s11509_s26, 131072, %s11517_s6, %s15005_s18, %s15044_s23, %s15043_s0, %s15042_s5  }
  0xac   : > { %s355_s12 = sshll.u32 %s11216_s22, 4  ;;  %s15045_s4 = sld [smem:[#allocation37_spill]]  ;;  %s356_s12 = int_to_ptr.vmem [resolvable:$true] %s355_s12 }
  0xb2   : > { %s10959_s13 = scalar_lea.hbm %s15045_s4, 64 }
  0xb3   : > { %p10960_p3 = scmp.ne.s32.totalorder %s15045_s4, %s10959_s13  ;;  %p10966_p4 = scmp.lt.u32.totalorder %s10959_s13, %s15045_s4 }
  0xb5   : > { %p10962_p0 = pnand %p10960_p3, %p11369_p7 }
  0xb7   : > { %p10963_p12 = pneg %p10962_p0 }
  0xb9   : > { %p10968_p8 = pnand %p10966_p4, %p10963_p12 }
  0xbb   : > { %10971 = shalt.err (!%p10968_p8)
}
  0xbc   : > { %s10972_s26 = scalar_lea.vmem %s356_s12, 64  ;;  %p10980_p2 = scmp.lt.s32.totalorder %s356_s12, %s356_s12 }
  0xbd   : > { %p10973_p10 = scmp.ne.s32.totalorder %s356_s12, %s10972_s26  ;;  %p10981_p6 = scmp.lt.s32.totalorder %s10972_s26, %s10972_s26 }
  0xbf   : > { %p10975_p5 = pnand %p10973_p10, %p11369_p7  ;;  %p10982_p9 = por %p10981_p6, %p10980_p2 }
  0xc1   : > { %p10976_p13 = pneg %p10975_p5 }
  0xc3   : > { %p10983_p1 = pnand %p10982_p9, %p10976_p13 }
  0xc5   : > { %10986 = shalt.err (!%p10983_p1)
}
  0xc6   : > { %p15046_p3 = scmp.ne.s32.totalorder %s15023_s28, 0  ;;  %s7606_s10 = sadd.s32 4294967292, %s11207_s21 }
  0xc7   : > { %s7612_s25 = sadd.s32 4294967292, %s11409_s8  ;;  %p106_p7 = scmp.gt.s32.totalorder %s7606_s10, 0 }
  0xc8   : > { %10696 = dma.hbm_to_vmem [thread:$0]  (!%p15046_p3), %s15045_s4, 64, %s356_s12, [#allocation8]  }
  0xc9   : > { %p7607_p1 = scmp.lt.s32.totalorder %s7606_s10, 1  ;;  %p111_p0 = scmp.gt.s32.totalorder %s7612_s25, 0 }
  0xca   : > { %p7613_p12 = scmp.lt.s32.totalorder %s7612_s25, 1  ;;  %s15112_s10 = smov (!%p106_p7, %s7606_s10), 0 }
  0xcb   : > { %s15114_s25 = smov (!%p111_p0, %s7612_s25), 0  ;;  %s15116_s10 = smov (!%p7607_p1, %s15112_s10), 1 }
  0xcc   : > { %s15118_s25 = smov (!%p7613_p12, %s15114_s25), 1  ;;  %s118_s28 = sadd.s32 1, %s11191_s17 }
  0xcd   : > { %p125_p4 = scmp.ne.s32.totalorder %s11191_s17, %s11187_s16  ;;  %s115_s27 = ssub.s32 %s15116_s10, %s15118_s25 }
  0xce   : > { %p131_p8 = scmp.ne.s32.totalorder %s11187_s16, %s11183_s15  ;;  %p116_p10 = scmp.eq.s32.totalorder %s115_s27, 0 }
  0xcf   : > { %p15047_p5 = scmp.eq.s32.totalorder %s11207_s21, 0  ;;  %p15048_p2 = scmp.eq.s32.totalorder %s11342_s24, 0 }
  0xd0   : > { %s402_s22 = sand.u32 1, %s11191_s17   ;;  %s7763_s13 = sshll.u32 %s15116_s10, 8 }
  0xd1   : > { %p127_p13 = por %p125_p4, %p15047_p5  ;;  %p11579_p6 = por %p131_p8, %p15048_p2 }
  0xd2   : > { %s11585_s12 = scalar_select %p116_p10, %s11191_s17, %s118_s28  }
  0xd3   : > { %s15049_s6 = scalar_select %p11579_p6, 1, 0 }
  0xd4   : > { %s7674_s1 = sshll.u32 %s402_s22, 12  ;;  %s15050_s3 = sld [smem:[#allocation36_spill]] }
  0xd5   : > { %s404_s15 = scalar_lea.vmem [#allocation9], %s7674_s1  ;;  %p15051_p9 = scmp.lt.s32.totalorder %s11207_s21, 14 }
  0xd6   : > { %s416_s9 = sshll.u32 %s404_s15, 4  ;;  %s11598_s9 = int_to_ptr.vmem [resolvable:$true] %s416_s9 }
  0xd7   : > { %p11594_p3 = pnand %p15051_p9, %p127_p13 }
  0xd9   : > { %p10989_p1 = pneg %p11594_p3 }
  0xda   : > { %s11590_s7 = scalar_lea.hbm %s15050_s3, %s7763_s13  ;;  %s10992_s22 = scalar_lea.hbm %s15050_s3, 131072 }
  0xdb   : > { %s10987_s10 = scalar_lea.hbm %s11590_s7, 65536  ;;  %p10993_p4 = scmp.lt.u32.totalorder %s11590_s7, %s15050_s3 }
  0xdc   : > { %p10988_p7 = scmp.ne.s32.totalorder %s11590_s7, %s10987_s10  ;;  %p10994_p8 = scmp.lt.u32.totalorder %s10992_s22, %s10987_s10 }
  0xdd   : > { %p10996_p5 = scmp.lt.u32.totalorder %s10987_s10, %s11590_s7 }
  0xde   : > { %p10990_p0 = pnand %p10989_p1, %p10988_p7  ;;  %p10995_p10 = por %p10994_p8, %p10993_p4 }
  0xe0   : > { %p10991_p12 = pneg %p10990_p0  ;;  %p10997_p13 = por %p10996_p5, %p10995_p10 }
  0xe2   : > { %p10998_p2 = pnand %p10997_p13, %p10991_p12 }
  0xe4   : > { %11001 = shalt.err (!%p10998_p2)
}
  0xe5   : > { %s11002_s20 = scalar_lea.vmem %s11598_s9, 65536  ;;  %s11217_s26 = smov [#allocation9]  }
  0xe6   : > { %p11003_p9 = scmp.ne.s32.totalorder %s11598_s9, %s11002_s20  ;;  %s11007_s15 = sshll.u32 %s11217_s26, 4  ;;  %s11008_s15 = int_to_ptr.vmem [resolvable:$false] %s11007_s15 }
  0xe7   : > { %s11009_s28 = scalar_lea.vmem %s11008_s15, 131072  ;;  %p11010_p6 = scmp.lt.s32.totalorder %s11598_s9, %s11008_s15 }
  0xe8   : > { %p11005_p7 = pnand %p11003_p9, %p10989_p1  ;;  %p11011_p4 = scmp.lt.s32.totalorder %s11009_s28, %s11002_s20 }
  0xea   : > { %p11006_p0 = pneg %p11005_p7  ;;  %p11012_p8 = por %p11011_p4, %p11010_p6 }
  0xec   : > { %p11013_p10 = pnand %p11012_p8, %p11006_p0 }
  0xee   : > { %11016 = shalt.err (!%p11013_p10)
}
  0xef   : > { %s11218_s10 = smov 256   ;;  %s15053_s27 = sld [smem:[#allocation26_spill]] }
  0xf0   : > { %s15054_s22 = sld [smem:[#allocation25_spill]]  ;;  %s11219_s1 = smov 16  }
  0xf1   : > { %s15055_s13 = scalar_lea.sflag [#allocation6], %s11434_s29  ;;  %s7618_s20 = sadd.s32 4294967290, %s11207_s21 }
  0xf2   : > { %10706 = dma.hbm_to_vmem [thread:$0]  (!%p11594_p3), %s11590_s7, 65536, %s11598_s9, %s15055_s13, %s15043_s0, %s11218_s10, %s11219_s1  }
  0xf3   : > { %s7624_s26 = sadd.s32 4294967290, %s11409_s8  ;;  %p163_p6 = scmp.gt.s32.totalorder %s7618_s20, 0 }
  0xf4   : > { %p7619_p1 = scmp.lt.s32.totalorder %s7618_s20, 3  ;;  %p168_p12 = scmp.gt.s32.totalorder %s7624_s26, 0 }
  0xf5   : > { %p7625_p5 = scmp.lt.s32.totalorder %s7624_s26, 3  ;;  %s15120_s20 = smov (!%p163_p6, %s7618_s20), 0 }
  0xf6   : > { %s15122_s26 = smov (!%p168_p12, %s7624_s26), 0  ;;  %s15124_s20 = smov (!%p7619_p1, %s15120_s20), 3 }
  0xf7   : > { %s15126_s26 = smov (!%p7625_p5, %s15122_s26), 3  ;;  %s175_s25 = sadd.s32 1, %s11179_s14 }
  0xf8   : > { %p182_p13 = scmp.ne.s32.totalorder %s11179_s14, %s15053_s27  ;;  %s172_s7 = ssub.s32 %s15124_s20, %s15126_s26 }
  0xf9   : > { %p188_p3 = scmp.ne.s32.totalorder %s15053_s27, %s15054_s22  ;;  %p173_p2 = scmp.eq.s32.totalorder %s172_s7, 0 }
  0xfa   : > { %p15056_p9 = scmp.eq.s32.totalorder %s11207_s21, 0  ;;  %p15057_p0 = scmp.eq.s32.totalorder %s11342_s24, 0 }
  0xfb   : > { %s11644_s15 = scalar_select %p173_p2, %s11179_s14, %s175_s25  }
  0xfc   : > { %p184_p7 = por %p182_p13, %p15056_p9  ;;  %p11639_p4 = por %p188_p3, %p15057_p0 }
  0xfd   : > { %s428_s28 = sand.u32 1, %s11179_s14   ;;  %s7766_s10 = sshll.u32 %s15124_s20, 9 }
  0xfe   : > { %s15058_s9 = scalar_select %p11639_p4, 1, 0 }
  0xff   : > { %s7683_s1 = sshll.u32 %s428_s28, 11  ;;  %s15059_s3 = sld [smem:[#allocation38_spill]] }
 0x100   : > { %p15060_p8 = scmp.lt.s32.totalorder %s11207_s21, 14  ;;  %s430_s22 = scalar_lea.vmem [#allocation11], %s7683_s1 }
 0x101   : > { %s442_s26 = sshll.u32 %s430_s22, 4  ;;  %s15062_s20 = sand.u32 1, %s11167_s11   ;;  %s11662_s26 = int_to_ptr.vmem [resolvable:$true] %s442_s26 }
 0x102   : > { %p11654_p10 = pnand %p15060_p8, %p184_p7  ;;  %s11660_s25 = sshll.u32 %s15062_s20, 2 }
 0x103   : > { %s427_s18 = scalar_lea.sflag [#allocation12], %s11434_s29 }
 0x104   : > { %p11019_p1 = pneg %p11654_p10 }
 0x105   : > { %s11650_s4 = scalar_lea.hbm %s15059_s3, %s7766_s10  ;;  %s11022_s10 = scalar_lea.hbm %s15059_s3, 131072 }
 0x106   : > { %s11017_s7 = scalar_lea.hbm %s11650_s4, 32768  ;;  %p11023_p13 = scmp.lt.u32.totalorder %s11650_s4, %s15059_s3 }
 0x107   : > { %p11018_p6 = scmp.ne.s32.totalorder %s11650_s4, %s11017_s7  ;;  %p11024_p3 = scmp.lt.u32.totalorder %s11022_s10, %s11017_s7 }
 0x108   : > { %p11026_p9 = scmp.lt.u32.totalorder %s11017_s7, %s11650_s4 }
 0x109   : > { %p11020_p12 = pnand %p11019_p1, %p11018_p6  ;;  %p11025_p2 = por %p11024_p3, %p11023_p13 }
 0x10b   : > { %p11021_p5 = pneg %p11020_p12  ;;  %p11027_p7 = por %p11026_p9, %p11025_p2 }
 0x10d   : > { %p11028_p0 = pnand %p11027_p7, %p11021_p5 }
 0x10f   : > { %11031 = shalt.err (!%p11028_p0)
}
 0x110   : > { %s11032_s22 = scalar_lea.vmem %s11662_s26, 32768  ;;  %s11220_s20 = smov [#allocation11]  }
 0x111   : > { %p11033_p8 = scmp.ne.s32.totalorder %s11662_s26, %s11032_s22  ;;  %s11037_s21 = sshll.u32 %s11220_s20, 4  ;;  %s11038_s21 = int_to_ptr.vmem [resolvable:$false] %s11037_s21 }
 0x112   : > { %s11039_s28 = scalar_lea.vmem %s11038_s21, 65536  ;;  %p11040_p4 = scmp.lt.s32.totalorder %s11662_s26, %s11038_s21 }
 0x113   : > { %p11035_p6 = pnand %p11033_p8, %p11019_p1  ;;  %p11041_p13 = scmp.lt.s32.totalorder %s11039_s28, %s11032_s22 }
 0x115   : > { %p11036_p12 = pneg %p11035_p6  ;;  %p11042_p3 = por %p11041_p13, %p11040_p4 }
 0x117   : > { %p11043_p2 = pnand %p11042_p3, %p11036_p12 }
 0x119   : > { %11046 = shalt.err (!%p11043_p2)
}
 0x11a   : > { %10709 = dma.hbm_to_vmem [thread:$0]  (!%p11654_p10), %s11650_s4, 32768, %s11662_s26, %s427_s18, %s15044_s23, %s15043_s0, %s15042_s5  }
 0x11b   : > { %s7772_s7 = sshll.u32 %s15108_s2, 6  ;;  %s15063_s13 = sld [smem:[#allocation41_spill]] }
 0x11c   : > { %s482_s27 = scalar_lea.vmem [#allocation16], %s11660_s25  ;;  %p15065_p1 = pneg %p11513_p11 }
 0x11d   : > { %s495_s21 = sshll.u32 %s482_s27, 4  ;;  %s496_s21 = int_to_ptr.vmem [resolvable:$true] %s495_s21 }
 0x121   : > { %s15064_s22 = smov %s15063_s13  ;;  %s11699_s20 = scalar_lea.hbm %s15063_s13, %s7772_s7 }
 0x122   : > { %s11047_s28 = scalar_lea.hbm %s11699_s20, 64  ;;  %s11052_s5 = scalar_lea.hbm %s15064_s22, 256 }
 0x123   : > { %p11048_p4 = scmp.ne.s32.totalorder %s11699_s20, %s11047_s28  ;;  %p11053_p10 = scmp.lt.u32.totalorder %s11699_s20, %s15064_s22 }
 0x124   : > { %p11054_p7 = scmp.lt.u32.totalorder %s11052_s5, %s11047_s28  ;;  %p11056_p8 = scmp.lt.u32.totalorder %s11047_s28, %s11699_s20 }
 0x125   : > { %p11050_p5 = pnand %p11048_p4, %p15065_p1 }
 0x126   : > { %p11055_p0 = por %p11054_p7, %p11053_p10 }
 0x127   : > { %p11051_p9 = pneg %p11050_p5 }
 0x128   : > { %p11057_p6 = por %p11056_p8, %p11055_p0 }
 0x12a   : > { %p11058_p12 = pnand %p11057_p6, %p11051_p9 }
 0x12c   : > { %11061 = shalt.err (!%p11058_p12)
}
 0x12d   : > { %s11062_s26 = scalar_lea.vmem %s496_s21, 64  ;;  %p15066_p3 = pmov %p15065_p1 }
 0x12e   : > { %p11063_p13 = scmp.ne.s32.totalorder %s496_s21, %s11062_s26  ;;  %s11221_s25 = smov [#allocation16]  }
 0x12f   : > { %s11067_s18 = sshll.u32 %s11221_s25, 4  ;;  %s11068_s18 = int_to_ptr.vmem [resolvable:$false] %s11067_s18 }
 0x130   : > { %p11065_p2 = pnand %p11063_p13, %p15066_p3  ;;  %s11069_s7 = scalar_lea.vmem %s11068_s18, 128 }
 0x131   : > { %p11070_p1 = scmp.lt.s32.totalorder %s496_s21, %s11068_s18  ;;  %p11071_p5 = scmp.lt.s32.totalorder %s11069_s7, %s11062_s26 }
 0x132   : > { %p11066_p4 = pneg %p11065_p2 }
 0x133   : > { %p11072_p7 = por %p11071_p5, %p11070_p1 }
 0x135   : > { %p11073_p10 = pnand %p11072_p7, %p11066_p4 }
 0x137   : > { %11076 = shalt.err (!%p11073_p10)
}
 0x138   : > { %s15067_s10 = scalar_lea.sflag [#allocation15], %s11434_s29  ;;  %s15068_s1 = sld [smem:[#allocation28_spill]] }
 0x139   : > { %10715 = dma.hbm_to_vmem [thread:$0]  (!%p11513_p11), %s11699_s20, 64, %s496_s21, %s15067_s10  }
 0x13e   : > { %p15069_p9 = scmp.ne.s32.totalorder %s15068_s1, 0 }
 0x13f   : > { %s15070_s13 = sld [smem:[#allocation29_spill]] (!%p15069_p9)  ;;  %s11726_s27 = sand.u32 (!%p15069_p9), 1, %s11342_s24  }
 0x140   : > { %504 = sbr.rel (%p15069_p9) target bundleno = 2678 (0xa76), region = 56  ;;  %s508_s28 = sand.u32 (!%p15069_p9), 1, %s11199_s19  }
 0x141   : > { %s7711_s4 = sshll.u32 (!%p15069_p9), %s508_s28, 13  ;;  %s507_s2 = scalar_lea.sflag (!%p15069_p9), [#allocation6], %s11726_s27 }
 0x142   : > { %s11730_s5 = scalar_lea.vmem (!%p15069_p9), [#allocation5], %s7711_s4 }
 0x145   : > { %p15071_p0 = scmp.ne.s32.totalorder (!%p15069_p9), %s15070_s13, 0 }
 0x147   : > { %11130 = dma.done.wait (%p15071_p0), %s507_s2, 131072  }
 0x148   : > { %11132 = vsyncadd (%p15071_p0), %s507_s2, 4294836224  ;;  %p15072_p11 = scmp.eq.s32.totalorder %s11342_s24, 0 }
 0x14a   : > { %11134 = dma.done.wait (%p15072_p11), [#allocation8], 256   ;;  %p15073_p8 = pmov %p15072_p11 }
 0x14b   : > { %s521_s29 = sand.u32 1, %s11187_s16   ;;  %p15074_p6 = scmp.ne.s32.totalorder %s15049_s6, 0 }
 0x14c   : > { %11136 = vsyncadd (%p15073_p8), [#allocation8], 4294967040  ;;  %s7713_s30 = sshll.u32 %s521_s29, 12 }
 0x14d   : > { %s11741_s20 = scalar_lea.vmem [#allocation9], %s7713_s30 }
 0x14e   : > { %11138 = dma.done.wait (%p15074_p6), %s507_s2, 65536  }
 0x14f   : > { %11140 = vsyncadd (%p15074_p6), %s507_s2, 4294901760  ;;  %p15075_p12 = pmov %p15073_p8 }
 0x150   : > { %p15076_p13 = pmov %p15073_p8 }
 0x151   : > { %11142 = dma.done.wait (%p15075_p12), [#allocation8], 64  }
 0x152   : > { %11144 = vsyncadd (%p15076_p13), [#allocation8], 4294967232  ;;  %s15077_s21 = sld [smem:[#allocation26_spill]]  ;;  %s533_s26 = scalar_lea.sflag [#allocation12], %s11726_s27 }
 0x153   : > { %p15078_p3 = scmp.ne.s32.totalorder %s15058_s9, 0 }
 0x158   : > { %s534_s0 = sand.u32 1, %s15077_s21  }
 0x159   : > { %s7715_s23 = sshll.u32 %s534_s0, 11 }
 0x15a   : > { %s11753_s25 = scalar_lea.vmem [#allocation11], %s7715_s23 }
 0x15b   : > { %11146 = dma.done.wait (%p15078_p3), %s533_s26, 32768  }
 0x15c   : > { %11148 = vsyncadd (%p15078_p3), %s533_s26, 4294934528  ;;  %p15079_p2 = pmov %p15073_p8 }
 0x15e   : > { %11150 = dma.done.wait (%p15079_p2), [#allocation12], 256   ;;  %p15080_p4 = pmov %p15079_p2 }
 0x15f   : > { %s15081_s6 = sld [smem:[#allocation24_spill]]  ;;  %s546_s1 = scalar_lea.sflag [#allocation15], %s11726_s27 }
 0x160   : > { %11152 = vsyncadd (%p15080_p4), [#allocation12], 4294967040  ;;  %s15082_s18 = sld [smem:[#allocation31_spill]] }
 0x165   : > { %s547_s7 = sand.u32 1, %s15081_s6  }
 0x166   : > { %s7717_s10 = sshll.u32 %s547_s7, 13  ;;  %p15083_p1 = scmp.ne.s32.totalorder %s15082_s18, 0 }
 0x167   : > { %s11765_s13 = scalar_lea.vmem [#allocation14], %s7717_s10 }
 0x168   : > { %11154 = dma.done.wait (%p15083_p1), %s546_s1, 131136  }
 0x169   : > { %11156 = vsyncadd (%p15083_p1), %s546_s1, 4294836160  ;;  %s11771_s9 = sshll.u32 %s547_s7, 2  ;;  %s7719_s28 = sadd.s32 4294967286, %s11342_s24 }
 0x16a   : > { %p646_p5 = scmp.gt.s32.totalorder %s7719_s28, 0  ;;  %p7720_p7 = scmp.lt.s32.totalorder %s7719_s28, 3 }
 0x16b   : > { %s15084_s30 = sld [smem:[#allocation42_spill]]  ;;  %s558_s0 = scalar_lea.vmem [#allocation16], %s11771_s9 }
 0x16c   : > { %s15128_s28 = smov (!%p646_p5, %s7719_s28), 0  ;;  %p7727_p9 = scmp.ge.s32.totalorder %s11342_s24, 4 }
 0x16d   : > { %s15130_s28 = smov (!%p7720_p7, %s15128_s28), 3  ;;  %v670_v0 = vld [vmem:[%s11730_s5 + $0x8] sm:$0xff] (!%p7727_p9)  ;;  %v672_v2 = vld [vmem:[%s11730_s5 + $0x18] sm:$0xff] (!%p7727_p9)  ;;  %v669_v5 = vld [vmem:[%s11730_s5] sm:$0xff] (!%p7727_p9)  ;;  %s15085_s6 = sld [smem:[#allocation33_spill]] (!%p7727_p9) }
 0x16e   : > { %s7725_s4 = sshll.u32 %s15130_s28, 2  ;;  %664 = sbr.rel (%p7727_p9) target bundleno = 1102 (0x44e), region = 92  ;;  %v674_v1 = vld [vmem:[%s11730_s5 + $0x28] sm:$0xff] (!%p7727_p9)  ;;  %v676_v4 = vld [vmem:[%s11730_s5 + $0x38] sm:$0xff] (!%p7727_p9)  ;;  %v673_v6 = vld [vmem:[%s11730_s5 + $0x20] sm:$0xff] (!%p7727_p9) }
 0x16f   : > { %p651_p10 = scmp.lt.s32.totalorder %s7725_s4, 15  ;;  %v7778_v3 = vpack.c.bf16 (!%p7727_p9), %v674_v1, %v670_v0  ;;  %v8290_v7 = vpack.c.bf16 (!%p7727_p9), %v676_v4, %v672_v2  ;;  %v7780_v8 = vpack.c.bf16 (!%p7727_p9), %v673_v6, %v669_v5  ;;  %v671_v9 = vld [vmem:[%s11730_s5 + $0x10] sm:$0xff] (!%p7727_p9)  ;;  %v678_v11 = vld [vmem:[%s11730_s5 + $0x48] sm:$0xff] (!%p7727_p9)  ;;  %v680_v14 = vld [vmem:[%s11730_s5 + $0x58] sm:$0xff] (!%p7727_p9) }
 0x170   : > { %v675_v10 = vld [vmem:[%s11730_s5 + $0x30] sm:$0xff] (!%p7727_p9)  ;;  %v682_v13 = vld [vmem:[%s11730_s5 + $0x68] sm:$0xff] (!%p7727_p9)  ;;  %v684_v15 = vld [vmem:[%s11730_s5 + $0x78] sm:$0xff] (!%p7727_p9) }
 0x171   : > { %s15132_s4 = smov (!%p651_p10, %s7725_s4), 15  ;;  %7779 = vmatprep.subr.bf16.mxu0 (!%p7727_p9), %v7778_v3  ;;  %v8292_v12 = vpack.c.bf16 (!%p7727_p9), %v675_v10, %v671_v9  ;;  %8291 = vmatprep.subr.bf16.mxu1 (!%p7727_p9), %v8290_v7  ;;  %v7782_v16 = vpack.c.bf16 (!%p7727_p9), %v682_v13, %v678_v11  ;;  %v8294_v17 = vpack.c.bf16 (!%p7727_p9), %v684_v15, %v680_v14  ;;  %v677_v18 = vld [vmem:[%s11730_s5 + $0x40] sm:$0xff] (!%p7727_p9)  ;;  %v679_v20 = vld [vmem:[%s11730_s5 + $0x50] sm:$0xff] (!%p7727_p9)  ;;  %v686_v23 = vld [vmem:[%s11730_s5 + $0x88] sm:$0xff] (!%p7727_p9) }
 0x172   : > { %s7726_s27 = sshll.u32 %s15132_s4, 1  ;;  %7781 = vmatpush1.bf16.msra.mxu0 (!%p7727_p9), %v7780_v8  ;;  %v681_v19 = vld [vmem:[%s11730_s5 + $0x60] sm:$0xff] (!%p7727_p9)  ;;  %v683_v22 = vld [vmem:[%s11730_s5 + $0x70] sm:$0xff] (!%p7727_p9)  ;;  %v690_v24 = vld [vmem:[%s11730_s5 + $0xa8] sm:$0xff] (!%p7727_p9) }
 0x173   : > { %s11777_s21 = scalar_lea.vmem %s15084_s30, %s7726_s27  ;;  %8293 = vmatpush1.bf16.msra.mxu1 (!%p7727_p9), %v8292_v12  ;;  %v7784_v21 = vpack.c.bf16 (!%p7727_p9), %v681_v19, %v677_v18  ;;  %7783 = vmatprep.subr.bf16.mxu0 (!%p7727_p9), %v7782_v16  ;;  %v8296_v25 = vpack.c.bf16 (!%p7727_p9), %v683_v22, %v679_v20  ;;  %v7786_v26 = vpack.c.bf16 (!%p7727_p9), %v690_v24, %v686_v23  ;;  %v688_v27 = vld [vmem:[%s11730_s5 + $0x98] sm:$0xff] (!%p7727_p9)  ;;  %v685_v29 = vld [vmem:[%s11730_s5 + $0x80] sm:$0xff] (!%p7727_p9)  ;;  %v687_v32 = vld [vmem:[%s11730_s5 + $0x90] sm:$0xff] (!%p7727_p9) }
 0x174   : > { %8295 = vmatprep.subr.bf16.mxu1 (!%p7727_p9), %v8294_v17  ;;  %v692_v28 = vld [vmem:[%s11730_s5 + $0xb8] sm:$0xff] (!%p7727_p9)  ;;  %v689_v31 = vld [vmem:[%s11730_s5 + $0xa0] sm:$0xff] (!%p7727_p9)  ;;  %v691_v33 = vld [vmem:[%s11730_s5 + $0xb0] sm:$0xff] (!%p7727_p9) }
 0x175   : > { %v8298_v30 = vpack.c.bf16 %v692_v28, %v688_v27  ;;  %v7788_v34 = vpack.c.bf16 %v689_v31, %v685_v29  ;;  %v694_v35 = vld [vmem:[%s11730_s5 + $0xc8] sm:$0xff]  ;;  %v696_v37 = vld [vmem:[%s11730_s5 + $0xd8] sm:$0xff]  ;;  %v8300_v38 = vpack.c.bf16 %v691_v33, %v687_v32  ;;  %v693_v41 = vld [vmem:[%s11730_s5 + $0xc0] sm:$0xff] }
 0x176   : > { %7785 = vmatpush1.bf16.msra.mxu0 %v7784_v21  ;;  %v698_v36 = vld [vmem:[%s11730_s5 + $0xe8] sm:$0xff]  ;;  %v700_v40 = vld [vmem:[%s11730_s5 + $0xf8] sm:$0xff]  ;;  %v697_v42 = vld [vmem:[%s11730_s5 + $0xe0] sm:$0xff] }
 0x177   : > { %8297 = vmatpush1.bf16.msra.mxu1 %v8296_v25  ;;  %7787 = vmatprep.subr.bf16.mxu0 %v7786_v26  ;;  %v7790_v39 = vpack.c.bf16 %v698_v36, %v694_v35  ;;  %v8302_v43 = vpack.c.bf16 %v700_v40, %v696_v37  ;;  %v695_v44 = vld [vmem:[%s11730_s5 + $0xd0] sm:$0xff]  ;;  %v702_v46 = vld [vmem:[%s11730_s5 + $0x108] sm:$0xff]  ;;  %v704_v48 = vld [vmem:[%s11730_s5 + $0x118] sm:$0xff]  ;;  %v7792_v50 = vpack.c.bf16 %v697_v42, %v693_v41 }
 0x178   : > { %8299 = vmatprep.subr.bf16.mxu1 %v8298_v30  ;;  %v699_v45 = vld [vmem:[%s11730_s5 + $0xf0] sm:$0xff]  ;;  %v706_v47 = vld [vmem:[%s11730_s5 + $0x128] sm:$0xff]  ;;  %v708_v49 = vld [vmem:[%s11730_s5 + $0x138] sm:$0xff] }
 0x179   : > { %v8304_v51 = vpack.c.bf16 %v699_v45, %v695_v44  ;;  %v7794_v52 = vpack.c.bf16 %v706_v47, %v702_v46  ;;  %v701_v53 = vld [vmem:[%s11730_s5 + $0x100] sm:$0xff]  ;;  %v703_v55 = vld [vmem:[%s11730_s5 + $0x110] sm:$0xff]  ;;  %v8306_v56 = vpack.c.bf16 %v708_v49, %v704_v48  ;;  %v710_v58 = vld [vmem:[%s11730_s5 + $0x148] sm:$0xff]  ;;  %v11222_v46 = vmov 1983009808  }
 0x17a   : > { %7789 = vmatpush1.bf16.msra.mxu0 %v7788_v34  ;;  %v705_v54 = vld [vmem:[%s11730_s5 + $0x120] sm:$0xff]  ;;  %v707_v57 = vld [vmem:[%s11730_s5 + $0x130] sm:$0xff]  ;;  %v714_v59 = vld [vmem:[%s11730_s5 + $0x168] sm:$0xff]  ;;  %v1699_v47 = vunpack.c.l.s4 %v11222_v46  ;;  %v1701_v48 = vlaneseq }
 0x17b   : > { %8301 = vmatpush1.bf16.msra.mxu1 %v8300_v38  ;;  %7791 = vmatprep.subr.bf16.mxu0 %v7790_v39  ;;  %v712_v60 = vld [vmem:[%s11730_s5 + $0x158] sm:$0xff]  ;;  %v7796_v62 = vpack.c.bf16 %v705_v54, %v701_v53  ;;  %v8308_v63 = vpack.c.bf16 %v707_v57, %v703_v55  ;;  %v7798_v0 = vpack.c.bf16 %v714_v59, %v710_v58  ;;  %v709_v1 = vld [vmem:[%s11730_s5 + $0x140] sm:$0xff]  ;;  %v711_v3 = vld [vmem:[%s11730_s5 + $0x150] sm:$0xff] }
 0x17c   : > { %8303 = vmatprep.subr.bf16.mxu1 %v8302_v43  ;;  %v716_v61 = vld [vmem:[%s11730_s5 + $0x178] sm:$0xff]  ;;  %v713_v2 = vld [vmem:[%s11730_s5 + $0x160] sm:$0xff]  ;;  %v715_v5 = vld [vmem:[%s11730_s5 + $0x170] sm:$0xff] }
 0x17d   : > { %v8310_v4 = vpack.c.bf16 %v716_v61, %v712_v60  ;;  %v718_v6 = vld [vmem:[%s11730_s5 + $0x188] sm:$0xff]  ;;  %v720_v8 = vld [vmem:[%s11730_s5 + $0x198] sm:$0xff]  ;;  %v7800_v10 = vpack.c.bf16 %v713_v2, %v709_v1  ;;  %v8312_v11 = vpack.c.bf16 %v715_v5, %v711_v3  ;;  %v717_v13 = vld [vmem:[%s11730_s5 + $0x180] sm:$0xff]  ;;  %v1700_v61 = vunpack.c.0.s8 %v1699_v47 }
 0x17e   : > { %7793 = vmatpush1.bf16.msra.mxu0 %v7792_v50  ;;  %v722_v7 = vld [vmem:[%s11730_s5 + $0x1a8] sm:$0xff]  ;;  %v724_v9 = vld [vmem:[%s11730_s5 + $0x1b8] sm:$0xff]  ;;  %v721_v14 = vld [vmem:[%s11730_s5 + $0x1a0] sm:$0xff] }
 0x17f   : > { %8305 = vmatpush1.bf16.msra.mxu1 %v8304_v51  ;;  %7795 = vmatprep.subr.bf16.mxu0 %v7794_v52  ;;  %v7802_v12 = vpack.c.bf16 %v722_v7, %v718_v6  ;;  %v719_v15 = vld [vmem:[%s11730_s5 + $0x190] sm:$0xff]  ;;  %v8314_v16 = vpack.c.bf16 %v724_v9, %v720_v8  ;;  %v726_v18 = vld [vmem:[%s11730_s5 + $0x1c8] sm:$0xff]  ;;  %v728_v20 = vld [vmem:[%s11730_s5 + $0x1d8] sm:$0xff]  ;;  %v7804_v22 = vpack.c.bf16 %v721_v14, %v717_v13 }
 0x180   : > { %8307 = vmatprep.subr.bf16.mxu1 %v8306_v56  ;;  %v723_v17 = vld [vmem:[%s11730_s5 + $0x1b0] sm:$0xff]  ;;  %v730_v19 = vld [vmem:[%s11730_s5 + $0x1e8] sm:$0xff]  ;;  %v732_v21 = vld [vmem:[%s11730_s5 + $0x1f8] sm:$0xff] }
 0x181   : > { %v8316_v23 = vpack.c.bf16 %v723_v17, %v719_v15  ;;  %v7806_v24 = vpack.c.bf16 %v730_v19, %v726_v18  ;;  %v725_v25 = vld [vmem:[%s11730_s5 + $0x1c0] sm:$0xff]  ;;  %v727_v27 = vld [vmem:[%s11730_s5 + $0x1d0] sm:$0xff]  ;;  %v8318_v28 = vpack.c.bf16 %v732_v21, %v728_v20  ;;  %v734_v30 = vld [vmem:[%s11730_s5 + $0x208] sm:$0xff] }
 0x182   : > { %7797 = vmatpush1.bf16.msra.mxu0 %v7796_v62  ;;  %v729_v26 = vld [vmem:[%s11730_s5 + $0x1e0] sm:$0xff]  ;;  %v731_v29 = vld [vmem:[%s11730_s5 + $0x1f0] sm:$0xff]  ;;  %v738_v31 = vld [vmem:[%s11730_s5 + $0x228] sm:$0xff]  ;;  %v1702_v62 = vshrl.u32 %v1701_v48, 7 }
 0x183   : > { %8309 = vmatpush1.bf16.msra.mxu1 %v8308_v63  ;;  %7799 = vmatprep.subr.bf16.mxu0 %v7798_v0  ;;  %v736_v32 = vld [vmem:[%s11730_s5 + $0x218] sm:$0xff]  ;;  %v7808_v34 = vpack.c.bf16 %v729_v26, %v725_v25  ;;  %v8320_v35 = vpack.c.bf16 %v731_v29, %v727_v27  ;;  %v7810_v36 = vpack.c.bf16 %v738_v31, %v734_v30  ;;  %v733_v37 = vld [vmem:[%s11730_s5 + $0x200] sm:$0xff]  ;;  %v735_v39 = vld [vmem:[%s11730_s5 + $0x210] sm:$0xff] }
 0x184   : > { %8311 = vmatprep.subr.bf16.mxu1 %v8310_v4  ;;  %v740_v33 = vld [vmem:[%s11730_s5 + $0x238] sm:$0xff]  ;;  %v737_v38 = vld [vmem:[%s11730_s5 + $0x220] sm:$0xff]  ;;  %v739_v41 = vld [vmem:[%s11730_s5 + $0x230] sm:$0xff] }
 0x185   : > { %v8322_v40 = vpack.c.bf16 %v740_v33, %v736_v32  ;;  %v742_v42 = vld [vmem:[%s11730_s5 + $0x248] sm:$0xff]  ;;  %v744_v44 = vld [vmem:[%s11730_s5 + $0x258] sm:$0xff]  ;;  %v7812_v49 = vpack.c.bf16 %v737_v38, %v733_v37  ;;  %v8324_v50 = vpack.c.bf16 %v739_v41, %v735_v39  ;;  %v741_v52 = vld [vmem:[%s11730_s5 + $0x240] sm:$0xff] }
 0x186   : > { %7801 = vmatpush1.bf16.msra.mxu0 %v7800_v10  ;;  %v746_v43 = vld [vmem:[%s11730_s5 + $0x268] sm:$0xff]  ;;  %v748_v45 = vld [vmem:[%s11730_s5 + $0x278] sm:$0xff]  ;;  %v745_v53 = vld [vmem:[%s11730_s5 + $0x260] sm:$0xff] }
 0x187   : > { %8313 = vmatpush1.bf16.msra.mxu1 %v8312_v11  ;;  %7803 = vmatprep.subr.bf16.mxu0 %v7802_v12  ;;  %v7814_v51 = vpack.c.bf16 %v746_v43, %v742_v42  ;;  %v743_v54 = vld [vmem:[%s11730_s5 + $0x250] sm:$0xff]  ;;  %v8326_v55 = vpack.c.bf16 %v748_v45, %v744_v44  ;;  %v750_v57 = vld [vmem:[%s11730_s5 + $0x288] sm:$0xff]  ;;  %v752_v59 = vld [vmem:[%s11730_s5 + $0x298] sm:$0xff]  ;;  %v7816_v63 = vpack.c.bf16 %v745_v53, %v741_v52 }
 0x188   : > { %8315 = vmatprep.subr.bf16.mxu1 %v8314_v16  ;;  %v747_v56 = vld [vmem:[%s11730_s5 + $0x270] sm:$0xff]  ;;  %v754_v58 = vld [vmem:[%s11730_s5 + $0x2a8] sm:$0xff]  ;;  %v756_v60 = vld [vmem:[%s11730_s5 + $0x2b8] sm:$0xff]  ;;  %v11875_v11 = vsub.s32 %v1700_v61, %v1702_v62 }
 0x189   : > { %v8328_v0 = vpack.c.bf16 %v747_v56, %v743_v54  ;;  %v7818_v1 = vpack.c.bf16 %v754_v58, %v750_v57  ;;  %v749_v2 = vld [vmem:[%s11730_s5 + $0x280] sm:$0xff]  ;;  %v751_v4 = vld [vmem:[%s11730_s5 + $0x290] sm:$0xff]  ;;  %v8330_v5 = vpack.c.bf16 %v756_v60, %v752_v59  ;;  %v758_v7 = vld [vmem:[%s11730_s5 + $0x2c8] sm:$0xff] }
 0x18a   : > { %7805 = vmatpush1.bf16.msra.mxu0 %v7804_v22  ;;  %v753_v3 = vld [vmem:[%s11730_s5 + $0x2a0] sm:$0xff]  ;;  %v755_v6 = vld [vmem:[%s11730_s5 + $0x2b0] sm:$0xff]  ;;  %v762_v8 = vld [vmem:[%s11730_s5 + $0x2e8] sm:$0xff] }
 0x18b   : > { %8317 = vmatpush1.bf16.msra.mxu1 %v8316_v23  ;;  %7807 = vmatprep.subr.bf16.mxu0 %v7806_v24  ;;  %v760_v9 = vld [vmem:[%s11730_s5 + $0x2d8] sm:$0xff]  ;;  %v7820_v12 = vpack.c.bf16 %v753_v3, %v749_v2  ;;  %v757_v13 = vld [vmem:[%s11730_s5 + $0x2c0] sm:$0xff]  ;;  %v8332_v14 = vpack.c.bf16 %v755_v6, %v751_v4  ;;  %v7822_v15 = vpack.c.bf16 %v762_v8, %v758_v7  ;;  %v759_v17 = vld [vmem:[%s11730_s5 + $0x2d0] sm:$0xff] }
 0x18c   : > { %8319 = vmatprep.subr.bf16.mxu1 %v8318_v28  ;;  %v764_v10 = vld [vmem:[%s11730_s5 + $0x2f8] sm:$0xff]  ;;  %v761_v16 = vld [vmem:[%s11730_s5 + $0x2e0] sm:$0xff]  ;;  %v763_v18 = vld [vmem:[%s11730_s5 + $0x2f0] sm:$0xff] }
 0x18d   : > { %v8334_v19 = vpack.c.bf16 %v764_v10, %v760_v9  ;;  %v766_v20 = vld [vmem:[%s11730_s5 + $0x308] sm:$0xff]  ;;  %v11886_v22 = vld [vmem:[%s15085_s6] sm:$0xff]  ;;  %v7824_v26 = vpack.c.bf16 %v761_v16, %v757_v13  ;;  %v8336_v27 = vpack.c.bf16 %v763_v18, %v759_v17  ;;  %v765_v29 = vld [vmem:[%s11730_s5 + $0x300] sm:$0xff] }
 0x18e   : > { %7809 = vmatpush1.bf16.msra.mxu0 %v7808_v34  ;;  %v770_v21 = vld [vmem:[%s11730_s5 + $0x328] sm:$0xff]  ;;  %v768_v23 = vld [vmem:[%s11730_s5 + $0x318] sm:$0xff]  ;;  %v11892_v25 = vrot.slane %v11886_v22, %v11875_v11  ;;  %v769_v30 = vld [vmem:[%s11730_s5 + $0x320] sm:$0xff]  ;;  %v1697_v7 = vcombine.high %v11886_v22, %v11886_v22 }
 0x18f   : > { %8321 = vmatpush1.bf16.msra.mxu1 %v8320_v35  ;;  %7811 = vmatprep.subr.bf16.mxu0 %v7810_v36  ;;  %v772_v24 = vld [vmem:[%s11730_s5 + $0x338] sm:$0xff]  ;;  %v7826_v28 = vpack.c.bf16 %v770_v21, %v766_v20  ;;  %v767_v31 = vld [vmem:[%s11730_s5 + $0x310] sm:$0xff]  ;;  %v774_v35 = vld [vmem:[%s11730_s5 + $0x348] sm:$0xff]  ;;  %v7828_v39 = vpack.c.bf16 %v769_v30, %v765_v29 }
 0x190   : > { %8323 = vmatprep.subr.bf16.mxu1 %v8322_v40  ;;  %v1712_v32 = vcombine.high %v11892_v25, %v11892_v25  ;;  %v8338_v33 = vpack.c.bf16 %v772_v24, %v768_v23  ;;  %v771_v34 = vld [vmem:[%s11730_s5 + $0x330] sm:$0xff]  ;;  %v778_v36 = vld [vmem:[%s11730_s5 + $0x368] sm:$0xff]  ;;  %v776_v37 = vld [vmem:[%s11730_s5 + $0x358] sm:$0xff]  ;;  %v11937_v23 = vrot.slane %v1697_v7, %v11875_v11 }
 0x191   : > { %v780_v38 = vld [vmem:[%s11730_s5 + $0x378] sm:$0xff]  ;;  %v8340_v40 = vpack.c.bf16 %v771_v34, %v767_v31  ;;  %v7830_v41 = vpack.c.bf16 %v778_v36, %v774_v35  ;;  %v773_v42 = vld [vmem:[%s11730_s5 + $0x340] sm:$0xff]  ;;  %v775_v44 = vld [vmem:[%s11730_s5 + $0x350] sm:$0xff] }
 0x192   : > { %7813 = vmatpush1.bf16.msra.mxu0 %v7812_v49  ;;  %1845 = vmatprep.mubr.f32.mxu0 %v1712_v32  ;;  %v777_v43 = vld [vmem:[%s11730_s5 + $0x360] sm:$0xff]  ;;  %v8342_v45 = vpack.c.bf16 %v780_v38, %v776_v37  ;;  %v779_v46 = vld [vmem:[%s11730_s5 + $0x370] sm:$0xff]  ;;  %v782_v47 = vld [vmem:[%s11730_s5 + $0x388] sm:$0xff]  ;;  %v1713_v37 = vcombine.high %v11937_v23, %v11937_v23 }
 0x193   : > { %8325 = vmatpush1.bf16.msra.mxu1 %v8324_v50  ;;  %7815 = vmatprep.subr.bf16.mxu0 %v7814_v51  ;;  %v786_v48 = vld [vmem:[%s11730_s5 + $0x3a8] sm:$0xff]  ;;  %v784_v49 = vld [vmem:[%s11730_s5 + $0x398] sm:$0xff]  ;;  %v7832_v51 = vpack.c.bf16 %v777_v43, %v773_v42  ;;  %v8344_v52 = vpack.c.bf16 %v779_v46, %v775_v44  ;;  %v781_v54 = vld [vmem:[%s11730_s5 + $0x380] sm:$0xff] }
 0x194   : > { %8327 = vmatprep.subr.bf16.mxu1 %v8326_v55  ;;  %2413 = vmatprep.mubr.f32.mxu1 %v1712_v32  ;;  %v788_v50 = vld [vmem:[%s11730_s5 + $0x3b8] sm:$0xff]  ;;  %v7834_v53 = vpack.c.bf16 %v786_v48, %v782_v47  ;;  %v785_v55 = vld [vmem:[%s11730_s5 + $0x3a0] sm:$0xff]  ;;  %v783_v56 = vld [vmem:[%s11730_s5 + $0x390] sm:$0xff] }
 0x195   : > { %v8346_v57 = vpack.c.bf16 %v788_v50, %v784_v49  ;;  %v787_v58 = vld [vmem:[%s11730_s5 + $0x3b0] sm:$0xff]  ;;  %v790_v59 = vld [vmem:[%s11730_s5 + $0x3c8] sm:$0xff]  ;;  %v792_v61 = vld [vmem:[%s11730_s5 + $0x3d8] sm:$0xff] }
 0x196   : > { %7817 = vmatpush1.bf16.msra.mxu0 %v7816_v63  ;;  %v794_v60 = vld [vmem:[%s11730_s5 + $0x3e8] sm:$0xff]  ;;  %v796_v62 = vld [vmem:[%s11730_s5 + $0x3f8] sm:$0xff]  ;;  %v7836_v63 = vpack.c.bf16 %v785_v55, %v781_v54  ;;  %v789_v2 = vld [vmem:[%s11730_s5 + $0x3c0] sm:$0xff] }
 0x197   : > { %8329 = vmatpush1.bf16.msra.mxu1 %v8328_v0  ;;  %7819 = vmatprep.subr.bf16.mxu0 %v7818_v1  ;;  %v8348_v0 = vpack.c.bf16 %v787_v58, %v783_v56  ;;  %v7838_v1 = vpack.c.bf16 %v794_v60, %v790_v59  ;;  %v793_v3 = vld [vmem:[%s11730_s5 + $0x3e0] sm:$0xff]  ;;  %v791_v4 = vld [vmem:[%s11730_s5 + $0x3d0] sm:$0xff]  ;;  %v798_v8 = vld [vmem:[%s11730_s5 + $0x408] sm:$0xff] }
 0x198   : > { %8331 = vmatprep.subr.bf16.mxu1 %v8330_v5  ;;  %v8350_v5 = vpack.c.bf16 %v796_v62, %v792_v61  ;;  %v795_v6 = vld [vmem:[%s11730_s5 + $0x3f0] sm:$0xff]  ;;  %v802_v9 = vld [vmem:[%s11730_s5 + $0x428] sm:$0xff]  ;;  %v800_v10 = vld [vmem:[%s11730_s5 + $0x418] sm:$0xff]  ;;  %v7840_v13 = vpack.c.bf16 %v793_v3, %v789_v2 }
 0x199   : > { %v797_v16 = vld [vmem:[%s11730_s5 + $0x400] sm:$0xff]  ;;  %v799_v18 = vld [vmem:[%s11730_s5 + $0x410] sm:$0xff]  ;;  %v806_v21 = vld [vmem:[%s11730_s5 + $0x448] sm:$0xff] }
 0x19a   : > { %7821 = vmatpush1.bf16.msra.mxu0 %v7820_v12  ;;  %v804_v12 = vld [vmem:[%s11730_s5 + $0x438] sm:$0xff]  ;;  %v801_v17 = vld [vmem:[%s11730_s5 + $0x420] sm:$0xff]  ;;  %v803_v20 = vld [vmem:[%s11730_s5 + $0x430] sm:$0xff] }
 0x19b   : > { %8333 = vmatpush1.bf16.msra.mxu1 %v8332_v14  ;;  %7823 = vmatprep.subr.bf16.mxu0 %v7822_v15  ;;  %v8352_v14 = vpack.c.bf16 %v795_v6, %v791_v4  ;;  %v7842_v15 = vpack.c.bf16 %v802_v9, %v798_v8  ;;  %v810_v22 = vld [vmem:[%s11730_s5 + $0x468] sm:$0xff]  ;;  %v808_v24 = vld [vmem:[%s11730_s5 + $0x458] sm:$0xff]  ;;  %v805_v30 = vld [vmem:[%s11730_s5 + $0x440] sm:$0xff] }
 0x19c   : > { %8335 = vmatprep.subr.bf16.mxu1 %v8334_v19  ;;  %v8354_v19 = vpack.c.bf16 %v804_v12, %v800_v10  ;;  %v7846_v29 = vpack.c.bf16 %v810_v22, %v806_v21  ;;  %v809_v31 = vld [vmem:[%s11730_s5 + $0x460] sm:$0xff]  ;;  %v807_v32 = vld [vmem:[%s11730_s5 + $0x450] sm:$0xff]  ;;  %v814_v35 = vld [vmem:[%s11730_s5 + $0x488] sm:$0xff] }
 0x19d   : > { %v811_v34 = vld [vmem:[%s11730_s5 + $0x470] sm:$0xff]  ;;  %v818_v36 = vld [vmem:[%s11730_s5 + $0x4a8] sm:$0xff]  ;;  %v816_v38 = vld [vmem:[%s11730_s5 + $0x498] sm:$0xff] }
 0x19e   : > { %7825 = vmatpush1.bf16.msra.mxu0 %v7824_v26  ;;  %v812_v26 = vld [vmem:[%s11730_s5 + $0x478] sm:$0xff]  ;;  %v7850_v42 = vpack.c.bf16 %v818_v36, %v814_v35  ;;  %v813_v43 = vld [vmem:[%s11730_s5 + $0x480] sm:$0xff]  ;;  %v819_v47 = vld [vmem:[%s11730_s5 + $0x4b0] sm:$0xff] }
 0x19f   : > { %8337 = vmatpush1.bf16.msra.mxu1 %v8336_v27  ;;  %7827 = vmatprep.subr.bf16.mxu0 %v7826_v28  ;;  %v7844_v27 = vpack.c.bf16 %v801_v17, %v797_v16  ;;  %v8356_v28 = vpack.c.bf16 %v803_v20, %v799_v18  ;;  %v817_v44 = vld [vmem:[%s11730_s5 + $0x4a0] sm:$0xff]  ;;  %v822_v48 = vld [vmem:[%s11730_s5 + $0x4c8] sm:$0xff]  ;;  %v828_v50 = vld [vmem:[%s11730_s5 + $0x4f8] sm:$0xff] }
 0x1a0   : > { %8339 = vmatprep.subr.bf16.mxu1 %v8338_v33  ;;  %v8358_v33 = vpack.c.bf16 %v812_v26, %v808_v24  ;;  %v826_v49 = vld [vmem:[%s11730_s5 + $0x4e8] sm:$0xff]  ;;  %v821_v54 = vld [vmem:[%s11730_s5 + $0x4c0] sm:$0xff]  ;;  %v823_v56 = vld [vmem:[%s11730_s5 + $0x4d0] sm:$0xff] }
 0x1a1   : > { %v825_v55 = vld [vmem:[%s11730_s5 + $0x4e0] sm:$0xff]  ;;  %v827_v58 = vld [vmem:[%s11730_s5 + $0x4f0] sm:$0xff]  ;;  %v830_v59 = vld [vmem:[%s11730_s5 + $0x508] sm:$0xff] }
 0x1a2   : > { %7829 = vmatpush1.bf16.msra.mxu0 %v7828_v39  ;;  %v820_v39 = vld [vmem:[%s11730_s5 + $0x4b8] sm:$0xff]  ;;  %v834_v60 = vld [vmem:[%s11730_s5 + $0x528] sm:$0xff]  ;;  %v829_v2 = vld [vmem:[%s11730_s5 + $0x500] sm:$0xff] }
 0x1a3   : > { %8341 = vmatpush1.bf16.msra.mxu1 %v8340_v40  ;;  %7831 = vmatprep.subr.bf16.mxu0 %v7830_v41  ;;  %v7848_v40 = vpack.c.bf16 %v809_v31, %v805_v30  ;;  %v8360_v41 = vpack.c.bf16 %v811_v34, %v807_v32  ;;  %v8362_v46 = vpack.c.bf16 %v820_v39, %v816_v38  ;;  %v832_v61 = vld [vmem:[%s11730_s5 + $0x518] sm:$0xff]  ;;  %v833_v3 = vld [vmem:[%s11730_s5 + $0x520] sm:$0xff]  ;;  %v831_v4 = vld [vmem:[%s11730_s5 + $0x510] sm:$0xff] }
 0x1a4   : > { %8343 = vmatprep.subr.bf16.mxu1 %v8342_v45  ;;  %v815_v45 = vld [vmem:[%s11730_s5 + $0x490] sm:$0xff]  ;;  %v836_v62 = vld [vmem:[%s11730_s5 + $0x538] sm:$0xff]  ;;  %v838_v7 = vld [vmem:[%s11730_s5 + $0x548] sm:$0xff]  ;;  %v7860_v12 = vpack.c.bf16 %v833_v3, %v829_v2 }
 0x1a5   : > { %v835_v6 = vld [vmem:[%s11730_s5 + $0x530] sm:$0xff]  ;;  %v842_v8 = vld [vmem:[%s11730_s5 + $0x568] sm:$0xff]  ;;  %v840_v9 = vld [vmem:[%s11730_s5 + $0x558] sm:$0xff] }
 0x1a6   : > { %7833 = vmatpush1.bf16.msra.mxu0 %v7832_v51  ;;  %v7852_v51 = vpack.c.bf16 %v817_v44, %v813_v43  ;;  %v844_v10 = vld [vmem:[%s11730_s5 + $0x578] sm:$0xff]  ;;  %v841_v16 = vld [vmem:[%s11730_s5 + $0x560] sm:$0xff]  ;;  %v839_v17 = vld [vmem:[%s11730_s5 + $0x550] sm:$0xff] }
 0x1a7   : > { %8345 = vmatpush1.bf16.msra.mxu1 %v8344_v52  ;;  %7835 = vmatprep.subr.bf16.mxu0 %v7834_v53  ;;  %v8364_v52 = vpack.c.bf16 %v819_v47, %v815_v45  ;;  %v7854_v53 = vpack.c.bf16 %v826_v49, %v822_v48  ;;  %v8374_v18 = vpack.c.bf16 %v844_v10, %v840_v9  ;;  %v846_v20 = vld [vmem:[%s11730_s5 + $0x588] sm:$0xff]  ;;  %v848_v22 = vld [vmem:[%s11730_s5 + $0x598] sm:$0xff]  ;;  %v849_v30 = vld [vmem:[%s11730_s5 + $0x5a0] sm:$0xff] }
 0x1a8   : > { %8347 = vmatprep.subr.bf16.mxu1 %v8346_v57  ;;  %v850_v21 = vld [vmem:[%s11730_s5 + $0x5a8] sm:$0xff]  ;;  %v852_v24 = vld [vmem:[%s11730_s5 + $0x5b8] sm:$0xff]  ;;  %v847_v31 = vld [vmem:[%s11730_s5 + $0x590] sm:$0xff] }
 0x1a9   : > { %v8378_v32 = vpack.c.bf16 %v852_v24, %v848_v22  ;;  %v854_v34 = vld [vmem:[%s11730_s5 + $0x5c8] sm:$0xff]  ;;  %v856_v36 = vld [vmem:[%s11730_s5 + $0x5d8] sm:$0xff]  ;;  %v855_v43 = vld [vmem:[%s11730_s5 + $0x5d0] sm:$0xff] }
 0x1aa   : > { %7837 = vmatpush1.bf16.msra.mxu0 %v7836_v63  ;;  %v7856_v63 = vpack.c.bf16 %v825_v55, %v821_v54  ;;  %v858_v35 = vld [vmem:[%s11730_s5 + $0x5e8] sm:$0xff]  ;;  %v859_v45 = vld [vmem:[%s11730_s5 + $0x5f0] sm:$0xff]  ;;  %v864_v48 = vld [vmem:[%s11730_s5 + $0x618] sm:$0xff] }
 0x1ab   : > { %8349 = vmatpush1.bf16.msra.mxu1 %v8348_v0  ;;  %7839 = vmatprep.subr.bf16.mxu0 %v7838_v1  ;;  %v8368_v0 = vpack.c.bf16 %v827_v58, %v823_v56  ;;  %v7858_v1 = vpack.c.bf16 %v834_v60, %v830_v59  ;;  %v866_v47 = vld [vmem:[%s11730_s5 + $0x628] sm:$0xff]  ;;  %v868_v49 = vld [vmem:[%s11730_s5 + $0x638] sm:$0xff]  ;;  %v863_v54 = vld [vmem:[%s11730_s5 + $0x610] sm:$0xff] }
 0x1ac   : > { %8351 = vmatprep.subr.bf16.mxu1 %v8350_v5  ;;  %v8370_v5 = vpack.c.bf16 %v836_v62, %v832_v61  ;;  %v8386_v55 = vpack.c.bf16 %v868_v49, %v864_v48  ;;  %v867_v56 = vld [vmem:[%s11730_s5 + $0x630] sm:$0xff]  ;;  %v874_v58 = vld [vmem:[%s11730_s5 + $0x668] sm:$0xff]  ;;  %v872_v59 = vld [vmem:[%s11730_s5 + $0x658] sm:$0xff] }
 0x1ad   : > { %v876_v60 = vld [vmem:[%s11730_s5 + $0x678] sm:$0xff]  ;;  %v8388_v62 = vpack.c.bf16 %v867_v56, %v863_v54  ;;  %v871_v2 = vld [vmem:[%s11730_s5 + $0x650] sm:$0xff]  ;;  %v914_v56 = vld [vmem:[%s11730_s5 + $0x7a8] sm:$0xff] }
 0x1ae   : > { %7841 = vmatpush1.bf16.msra.mxu0 %v7840_v13  ;;  %v8372_v13 = vpack.c.bf16 %v835_v6, %v831_v4  ;;  %v8390_v3 = vpack.c.bf16 %v876_v60, %v872_v59  ;;  %v875_v4 = vld [vmem:[%s11730_s5 + $0x670] sm:$0xff]  ;;  %v882_v6 = vld [vmem:[%s11730_s5 + $0x6a8] sm:$0xff] }
 0x1af   : > { %8353 = vmatpush1.bf16.msra.mxu1 %v8352_v14  ;;  %7843 = vmatprep.subr.bf16.mxu0 %v7842_v15  ;;  %v7862_v14 = vpack.c.bf16 %v842_v8, %v838_v7  ;;  %v837_v15 = vld [vmem:[%s11730_s5 + $0x540] sm:$0xff]  ;;  %v880_v7 = vld [vmem:[%s11730_s5 + $0x698] sm:$0xff]  ;;  %v8392_v10 = vpack.c.bf16 %v875_v4, %v871_v2  ;;  %v907_v54 = vld [vmem:[%s11730_s5 + $0x770] sm:$0xff] }
 0x1b0   : > { %8355 = vmatprep.subr.bf16.mxu1 %v8354_v19  ;;  %v843_v19 = vld [vmem:[%s11730_s5 + $0x570] sm:$0xff]  ;;  %v7864_v26 = vpack.c.bf16 %v841_v16, %v837_v15  ;;  %v884_v8 = vld [vmem:[%s11730_s5 + $0x6b8] sm:$0xff]  ;;  %v922_v4 = vld [vmem:[%s11730_s5 + $0x7e8] sm:$0xff] }
 0x1b1   : > { %1846 = vmatmul.mubr.f32.vlgmr.msra.gmra.mrb[0].mxu0 %v11892_v25  ;;  %v879_v15 = vld [vmem:[%s11730_s5 + $0x690] sm:$0xff]  ;;  %v8394_v16 = vpack.c.bf16 %v884_v8, %v880_v7 }
 0x1b2   : > { %7845 = vmatpush1.bf16.msra.mxu0 %v7844_v27  ;;  %2414 = vmatmul.mubr.f32.vlgmr.msra.gmra.mrb[0].mxu1 %v11892_v25  ;;  %v824_v25 = vld [vmem:[%s11730_s5 + $0x4d8] sm:$0xff]  ;;  %v8376_v27 = vpack.c.bf16 %v843_v19, %v839_v17  ;;  %v883_v17 = vld [vmem:[%s11730_s5 + $0x6b0] sm:$0xff]  ;;  %v890_v19 = vld [vmem:[%s11730_s5 + $0x6e8] sm:$0xff] }
 0x1b3   : > { %8357 = vmatpush1.bf16.msra.mxu1 %v8356_v28  ;;  %7847 = vmatprep.subr.bf16.mxu0 %v7846_v29  ;;  %v8366_v57 = vpack.c.bf16 %v828_v50, %v824_v25  ;;  %v7866_v28 = vpack.c.bf16 %v850_v21, %v846_v20  ;;  %v845_v29 = vld [vmem:[%s11730_s5 + $0x580] sm:$0xff]  ;;  %v8384_v50 = vpack.c.bf16 %v859_v45, %v855_v43  ;;  %v888_v20 = vld [vmem:[%s11730_s5 + $0x6d8] sm:$0xff]  ;;  %v899_v43 = vld [vmem:[%s11730_s5 + $0x730] sm:$0xff] }
 0x1b4   : > { %8359 = vmatprep.subr.bf16.mxu1 %v8358_v33  ;;  %1916 = vmatprep.mubr.f32.mxu0 %v1713_v37  ;;  %v851_v33 = vld [vmem:[%s11730_s5 + $0x5b0] sm:$0xff]  ;;  %v7868_v38 = vpack.c.bf16 %v849_v30, %v845_v29  ;;  %v892_v21 = vld [vmem:[%s11730_s5 + $0x6f8] sm:$0xff]  ;;  %v8396_v24 = vpack.c.bf16 %v883_v17, %v879_v15  ;;  %v906_v45 = vld [vmem:[%s11730_s5 + $0x768] sm:$0xff] }
 0x1b5   : > { %2484 = vmatprep.mubr.f32.mxu1 %v1713_v37  ;;  %v860_v37 = vld [vmem:[%s11730_s5 + $0x5f8] sm:$0xff]  ;;  %v8380_v39 = vpack.c.bf16 %v851_v33, %v847_v31  ;;  %v887_v29 = vld [vmem:[%s11730_s5 + $0x6d0] sm:$0xff]  ;;  %v8398_v30 = vpack.c.bf16 %v892_v21, %v888_v20  ;;  %v898_v33 = vld [vmem:[%s11730_s5 + $0x728] sm:$0xff] }
 0x1b6   : > { %7849 = vmatpush1.bf16.msra.mxu0 %v7848_v40  ;;  %v7870_v40 = vpack.c.bf16 %v858_v35, %v854_v34  ;;  %v8382_v44 = vpack.c.bf16 %v860_v37, %v856_v36  ;;  %v891_v31 = vld [vmem:[%s11730_s5 + $0x6f0] sm:$0xff]  ;;  %v896_v34 = vld [vmem:[%s11730_s5 + $0x718] sm:$0xff]  ;;  %v930_v17 = vld [vmem:[%s11730_s5 + $0x828] sm:$0xff] }
 0x1b7   : > { %8361 = vmatpush1.bf16.msra.mxu1 %v8360_v41  ;;  %7851 = vmatprep.subr.bf16.mxu0 %v7850_v42  ;;  %v853_v41 = vld [vmem:[%s11730_s5 + $0x5c0] sm:$0xff]  ;;  %v900_v35 = vld [vmem:[%s11730_s5 + $0x738] sm:$0xff]  ;;  %v8400_v37 = vpack.c.bf16 %v891_v31, %v887_v29  ;;  %v915_v2 = vld [vmem:[%s11730_s5 + $0x7b0] sm:$0xff] }
 0x1b8   : > { %8363 = vmatprep.subr.bf16.mxu1 %v8362_v46  ;;  %v857_v42 = vld [vmem:[%s11730_s5 + $0x5e0] sm:$0xff]  ;;  %v862_v46 = vld [vmem:[%s11730_s5 + $0x608] sm:$0xff]  ;;  %v923_v15 = vld [vmem:[%s11730_s5 + $0x7f0] sm:$0xff] }
 0x1b9   : > { %v7872_v25 = vpack.c.bf16 %v857_v42, %v853_v41  ;;  %v895_v41 = vld [vmem:[%s11730_s5 + $0x710] sm:$0xff]  ;;  %v8402_v42 = vpack.c.bf16 %v900_v35, %v896_v34  ;;  %v938_v31 = vld [vmem:[%s11730_s5 + $0x868] sm:$0xff]  ;;  %v12076_v35 = vld [vmem:[%s15085_s6 + $0x8] sm:$0xff] }
 0x1ba   : > { %7853 = vmatpush1.bf16.msra.mxu0 %v7852_v51  ;;  %v7874_v51 = vpack.c.bf16 %v866_v47, %v862_v46  ;;  %v904_v46 = vld [vmem:[%s11730_s5 + $0x758] sm:$0xff]  ;;  %v8404_v49 = vpack.c.bf16 %v899_v43, %v895_v41  ;;  %v931_v29 = vld [vmem:[%s11730_s5 + $0x830] sm:$0xff]  ;;  %v12083_v41 = vrot.slane %v12076_v35, %v11875_v11 }
 0x1bb   : > { %8365 = vmatpush1.bf16.msra.mxu1 %v8364_v52  ;;  %7855 = vmatprep.subr.bf16.mxu0 %v7854_v53  ;;  %v861_v52 = vld [vmem:[%s11730_s5 + $0x600] sm:$0xff]  ;;  %v908_v47 = vld [vmem:[%s11730_s5 + $0x778] sm:$0xff]  ;;  %v939_v43 = vld [vmem:[%s11730_s5 + $0x870] sm:$0xff] }
 0x1bc   : > { %8367 = vmatprep.subr.bf16.mxu1 %v8366_v57  ;;  %v865_v53 = vld [vmem:[%s11730_s5 + $0x620] sm:$0xff]  ;;  %v870_v57 = vld [vmem:[%s11730_s5 + $0x648] sm:$0xff] }
 0x1bd   : > { %v7876_v61 = vpack.c.bf16 %v865_v53, %v861_v52  ;;  %v903_v52 = vld [vmem:[%s11730_s5 + $0x750] sm:$0xff]  ;;  %v8406_v53 = vpack.c.bf16 %v908_v47, %v904_v46  ;;  %v944_v46 = vld [vmem:[%s11730_s5 + $0x898] sm:$0xff] }
 0x1be   : > { %7857 = vmatpush1.bf16.msra.mxu0 %v7856_v63  ;;  %v7878_v63 = vpack.c.bf16 %v874_v58, %v870_v57  ;;  %v912_v57 = vld [vmem:[%s11730_s5 + $0x798] sm:$0xff]  ;;  %v8408_v60 = vpack.c.bf16 %v907_v54, %v903_v52  ;;  %v945_v52 = vld [vmem:[%s11730_s5 + $0x8a0] sm:$0xff] }
 0x1bf   : > { %8369 = vmatpush1.bf16.msra.mxu1 %v8368_v0  ;;  %7859 = vmatprep.subr.bf16.mxu0 %v7858_v1  ;;  %v869_v0 = vld [vmem:[%s11730_s5 + $0x640] sm:$0xff]  ;;  %v916_v58 = vld [vmem:[%s11730_s5 + $0x7b8] sm:$0xff] }
 0x1c0   : > { %8371 = vmatprep.subr.bf16.mxu1 %v8370_v5  ;;  %v873_v1 = vld [vmem:[%s11730_s5 + $0x660] sm:$0xff]  ;;  %v878_v5 = vld [vmem:[%s11730_s5 + $0x688] sm:$0xff]  ;;  %v948_v47 = vld [vmem:[%s11730_s5 + $0x8b8] sm:$0xff] }
 0x1c1   : > { %v7880_v9 = vpack.c.bf16 %v873_v1, %v869_v0  ;;  %v911_v0 = vld [vmem:[%s11730_s5 + $0x790] sm:$0xff]  ;;  %v8410_v1 = vpack.c.bf16 %v916_v58, %v912_v57  ;;  %v8426_v54 = vpack.c.bf16 %v948_v47, %v944_v46  ;;  %v954_v57 = vld [vmem:[%s11730_s5 + $0x8e8] sm:$0xff]  ;;  %v956_v58 = vld [vmem:[%s11730_s5 + $0x8f8] sm:$0xff] }
 0x1c2   : > { %7861 = vmatpush1.bf16.msra.mxu0 %v7860_v12  ;;  %v7882_v12 = vpack.c.bf16 %v882_v6, %v878_v5  ;;  %v920_v5 = vld [vmem:[%s11730_s5 + $0x7d8] sm:$0xff]  ;;  %v8412_v8 = vpack.c.bf16 %v915_v2, %v911_v0  ;;  %v951_v0 = vld [vmem:[%s11730_s5 + $0x8d0] sm:$0xff] }
 0x1c3   : > { %8373 = vmatpush1.bf16.msra.mxu1 %v8372_v13  ;;  %7863 = vmatprep.subr.bf16.mxu0 %v7862_v14  ;;  %v877_v13 = vld [vmem:[%s11730_s5 + $0x680] sm:$0xff]  ;;  %v924_v6 = vld [vmem:[%s11730_s5 + $0x7f8] sm:$0xff]  ;;  %v955_v2 = vld [vmem:[%s11730_s5 + $0x8f0] sm:$0xff] }
 0x1c4   : > { %8375 = vmatprep.subr.bf16.mxu1 %v8374_v18  ;;  %v881_v14 = vld [vmem:[%s11730_s5 + $0x6a0] sm:$0xff]  ;;  %v886_v18 = vld [vmem:[%s11730_s5 + $0x6c8] sm:$0xff]  ;;  %v984_v46 = vld [vmem:[%s11730_s5 + $0x9d8] sm:$0xff] }
 0x1c5   : > { %v7884_v22 = vpack.c.bf16 %v881_v14, %v877_v13  ;;  %v919_v13 = vld [vmem:[%s11730_s5 + $0x7d0] sm:$0xff]  ;;  %v8414_v14 = vpack.c.bf16 %v924_v6, %v920_v5  ;;  %v960_v5 = vld [vmem:[%s11730_s5 + $0x918] sm:$0xff] }
 0x1c6   : > { %7865 = vmatpush1.bf16.msra.mxu0 %v7864_v26  ;;  %v7886_v26 = vpack.c.bf16 %v890_v19, %v886_v18  ;;  %v928_v18 = vld [vmem:[%s11730_s5 + $0x818] sm:$0xff]  ;;  %v8416_v21 = vpack.c.bf16 %v923_v15, %v919_v13  ;;  %v959_v13 = vld [vmem:[%s11730_s5 + $0x910] sm:$0xff] }
 0x1c7   : > { %8377 = vmatpush1.bf16.msra.mxu1 %v8376_v27  ;;  %7867 = vmatprep.subr.bf16.mxu0 %v7866_v28  ;;  %v885_v27 = vld [vmem:[%s11730_s5 + $0x6c0] sm:$0xff]  ;;  %v932_v19 = vld [vmem:[%s11730_s5 + $0x838] sm:$0xff]  ;;  %v963_v15 = vld [vmem:[%s11730_s5 + $0x930] sm:$0xff] }
 0x1c8   : > { %8379 = vmatprep.subr.bf16.mxu1 %v8378_v32  ;;  %v889_v28 = vld [vmem:[%s11730_s5 + $0x6e0] sm:$0xff]  ;;  %v894_v32 = vld [vmem:[%s11730_s5 + $0x708] sm:$0xff]  ;;  %v964_v6 = vld [vmem:[%s11730_s5 + $0x938] sm:$0xff] }
 0x1c9   : > { %v7888_v36 = vpack.c.bf16 %v889_v28, %v885_v27  ;;  %v927_v27 = vld [vmem:[%s11730_s5 + $0x810] sm:$0xff]  ;;  %v8418_v28 = vpack.c.bf16 %v932_v19, %v928_v18  ;;  %v968_v18 = vld [vmem:[%s11730_s5 + $0x958] sm:$0xff] }
 0x1ca   : > { %7869 = vmatpush1.bf16.msra.mxu0 %v7868_v38  ;;  %v7890_v38 = vpack.c.bf16 %v898_v33, %v894_v32  ;;  %v936_v32 = vld [vmem:[%s11730_s5 + $0x858] sm:$0xff] }
 0x1cb   : > { %8381 = vmatpush1.bf16.msra.mxu1 %v8380_v39  ;;  %7871 = vmatprep.subr.bf16.mxu0 %v7870_v40  ;;  %v893_v39 = vld [vmem:[%s11730_s5 + $0x700] sm:$0xff]  ;;  %v940_v33 = vld [vmem:[%s11730_s5 + $0x878] sm:$0xff] }
 0x1cc   : > { %8383 = vmatprep.subr.bf16.mxu1 %v8382_v44  ;;  %v897_v40 = vld [vmem:[%s11730_s5 + $0x720] sm:$0xff]  ;;  %v902_v44 = vld [vmem:[%s11730_s5 + $0x748] sm:$0xff]  ;;  %v972_v19 = vld [vmem:[%s11730_s5 + $0x978] sm:$0xff] }
 0x1cd   : > { %v7892_v48 = vpack.c.bf16 %v897_v40, %v893_v39  ;;  %v937_v39 = vld [vmem:[%s11730_s5 + $0x860] sm:$0xff]  ;;  %v935_v40 = vld [vmem:[%s11730_s5 + $0x850] sm:$0xff]  ;;  %v988_v47 = vld [vmem:[%s11730_s5 + $0x9f8] sm:$0xff] }
 0x1ce   : > { %7873 = vmatpush1.bf16.msra.mxu0 %v7872_v25  ;;  %v7894_v25 = vpack.c.bf16 %v906_v45, %v902_v44  ;;  %v942_v44 = vld [vmem:[%s11730_s5 + $0x888] sm:$0xff] }
 0x1cf   : > { %8385 = vmatpush1.bf16.msra.mxu1 %v8384_v50  ;;  %7875 = vmatprep.subr.bf16.mxu0 %v7874_v51  ;;  %v901_v50 = vld [vmem:[%s11730_s5 + $0x740] sm:$0xff]  ;;  %v946_v45 = vld [vmem:[%s11730_s5 + $0x8a8] sm:$0xff] }
 0x1d0   : > { %8387 = vmatprep.subr.bf16.mxu1 %v8386_v55  ;;  %v905_v51 = vld [vmem:[%s11730_s5 + $0x760] sm:$0xff]  ;;  %v910_v55 = vld [vmem:[%s11730_s5 + $0x788] sm:$0xff] }
 0x1d1   : > { %v7896_v59 = vpack.c.bf16 %v905_v51, %v901_v50  ;;  %v7914_v50 = vpack.c.bf16 %v946_v45, %v942_v44  ;;  %v941_v51 = vld [vmem:[%s11730_s5 + $0x880] sm:$0xff]  ;;  %v982_v44 = vld [vmem:[%s11730_s5 + $0x9c8] sm:$0xff] }
 0x1d2   : > { %7877 = vmatpush1.bf16.msra.mxu0 %v7876_v61  ;;  %v7898_v61 = vpack.c.bf16 %v914_v56, %v910_v55  ;;  %v947_v55 = vld [vmem:[%s11730_s5 + $0x8b0] sm:$0xff]  ;;  %v950_v56 = vld [vmem:[%s11730_s5 + $0x8c8] sm:$0xff] }
 0x1d3   : > { %8389 = vmatpush1.bf16.msra.mxu1 %v8388_v62  ;;  %7879 = vmatprep.subr.bf16.mxu0 %v7878_v63  ;;  %v909_v62 = vld [vmem:[%s11730_s5 + $0x780] sm:$0xff]  ;;  %v986_v45 = vld [vmem:[%s11730_s5 + $0x9e8] sm:$0xff] }
 0x1d4   : > { %8391 = vmatprep.subr.bf16.mxu1 %v8390_v3  ;;  %v913_v63 = vld [vmem:[%s11730_s5 + $0x7a0] sm:$0xff]  ;;  %v918_v3 = vld [vmem:[%s11730_s5 + $0x7c8] sm:$0xff] }
 0x1d5   : > { %v7900_v7 = vpack.c.bf16 %v913_v63, %v909_v62  ;;  %v949_v62 = vld [vmem:[%s11730_s5 + $0x8c0] sm:$0xff] }
 0x1d6   : > { %7881 = vmatpush1.bf16.msra.mxu0 %v7880_v9  ;;  %v7902_v9 = vpack.c.bf16 %v922_v4, %v918_v3  ;;  %v953_v63 = vld [vmem:[%s11730_s5 + $0x8e0] sm:$0xff]  ;;  %v958_v3 = vld [vmem:[%s11730_s5 + $0x908] sm:$0xff] }
 0x1d7   : > { %8393 = vmatpush1.bf16.msra.mxu1 %v8392_v10  ;;  %7883 = vmatprep.subr.bf16.mxu0 %v7882_v12  ;;  %v917_v10 = vld [vmem:[%s11730_s5 + $0x7c0] sm:$0xff]  ;;  %v962_v4 = vld [vmem:[%s11730_s5 + $0x928] sm:$0xff] }
 0x1d8   : > { %8395 = vmatprep.subr.bf16.mxu1 %v8394_v16  ;;  %v921_v12 = vld [vmem:[%s11730_s5 + $0x7e0] sm:$0xff]  ;;  %v926_v16 = vld [vmem:[%s11730_s5 + $0x808] sm:$0xff] }
 0x1d9   : > { %v7904_v20 = vpack.c.bf16 %v921_v12, %v917_v10  ;;  %v957_v10 = vld [vmem:[%s11730_s5 + $0x900] sm:$0xff] }
 0x1da   : > { %7885 = vmatpush1.bf16.msra.mxu0 %v7884_v22  ;;  %v7906_v22 = vpack.c.bf16 %v930_v17, %v926_v16  ;;  %v961_v12 = vld [vmem:[%s11730_s5 + $0x920] sm:$0xff]  ;;  %v966_v16 = vld [vmem:[%s11730_s5 + $0x948] sm:$0xff] }
 0x1db   : > { %8397 = vmatpush1.bf16.msra.mxu1 %v8396_v24  ;;  %7887 = vmatprep.subr.bf16.mxu0 %v7886_v26  ;;  %v925_v24 = vld [vmem:[%s11730_s5 + $0x800] sm:$0xff]  ;;  %v970_v17 = vld [vmem:[%s11730_s5 + $0x968] sm:$0xff] }
 0x1dc   : > { %8399 = vmatprep.subr.bf16.mxu1 %v8398_v30  ;;  %v929_v26 = vld [vmem:[%s11730_s5 + $0x820] sm:$0xff]  ;;  %v934_v30 = vld [vmem:[%s11730_s5 + $0x848] sm:$0xff] }
 0x1dd   : > { %v7908_v34 = vpack.c.bf16 %v929_v26, %v925_v24  ;;  %v965_v24 = vld [vmem:[%s11730_s5 + $0x940] sm:$0xff] }
 0x1de   : > { %7889 = vmatpush1.bf16.msra.mxu0 %v7888_v36  ;;  %v8420_v36 = vpack.c.bf16 %v931_v29, %v927_v27  ;;  %v969_v26 = vld [vmem:[%s11730_s5 + $0x960] sm:$0xff]  ;;  %v967_v27 = vld [vmem:[%s11730_s5 + $0x950] sm:$0xff] }
 0x1df   : > { %8401 = vmatpush1.bf16.msra.mxu1 %v8400_v37  ;;  %7891 = vmatprep.subr.bf16.mxu0 %v7890_v38  ;;  %v7910_v37 = vpack.c.bf16 %v938_v31, %v934_v30  ;;  %v933_v38 = vld [vmem:[%s11730_s5 + $0x840] sm:$0xff]  ;;  %v971_v29 = vld [vmem:[%s11730_s5 + $0x970] sm:$0xff]  ;;  %v974_v30 = vld [vmem:[%s11730_s5 + $0x988] sm:$0xff] }
 0x1e0   : > { %8403 = vmatprep.subr.bf16.mxu1 %v8402_v42  ;;  %v8422_v42 = vpack.c.bf16 %v940_v33, %v936_v32  ;;  %v978_v31 = vld [vmem:[%s11730_s5 + $0x9a8] sm:$0xff]  ;;  %v976_v32 = vld [vmem:[%s11730_s5 + $0x998] sm:$0xff] }
 0x1e1   : > { %v980_v33 = vld [vmem:[%s11730_s5 + $0x9b8] sm:$0xff] }
 0x1e2   : > { %7893 = vmatpush1.bf16.msra.mxu0 %v7892_v48  ;;  %v1729_v48 = vcombine.high %v12083_v41, %v12083_v41 }
 0x1e3   : > { %8405 = vmatpush1.bf16.msra.mxu1 %v8404_v49  ;;  %7895 = vmatprep.subr.bf16.mxu0 %v7894_v25  ;;  %v7912_v49 = vpack.c.bf16 %v937_v39, %v933_v38  ;;  %v8424_v25 = vpack.c.bf16 %v939_v43, %v935_v40  ;;  %v973_v38 = vld [vmem:[%s11730_s5 + $0x980] sm:$0xff]  ;;  %v975_v40 = vld [vmem:[%s11730_s5 + $0x990] sm:$0xff] }
 0x1e4   : > { %8407 = vmatprep.subr.bf16.mxu1 %v8406_v53  ;;  %v943_v53 = vld [vmem:[%s11730_s5 + $0x890] sm:$0xff]  ;;  %v977_v39 = vld [vmem:[%s11730_s5 + $0x9a0] sm:$0xff] }
 0x1e5   : > { %v979_v43 = vld [vmem:[%s11730_s5 + $0x9b0] sm:$0xff] }
 0x1e6   : > { %7897 = vmatpush1.bf16.msra.mxu0 %v7896_v59  ;;  %v7916_v59 = vpack.c.bf16 %v945_v52, %v941_v51  ;;  %v985_v51 = vld [vmem:[%s11730_s5 + $0x9e0] sm:$0xff]  ;;  %v983_v52 = vld [vmem:[%s11730_s5 + $0x9d0] sm:$0xff] }
 0x1e7   : > { %8409 = vmatpush1.bf16.msra.mxu1 %v8408_v60  ;;  %7899 = vmatprep.subr.bf16.mxu0 %v7898_v61  ;;  %v8428_v60 = vpack.c.bf16 %v947_v55, %v943_v53  ;;  %v7918_v61 = vpack.c.bf16 %v954_v57, %v950_v56  ;;  %v8446_v53 = vpack.c.bf16 %v988_v47, %v984_v46  ;;  %v990_v55 = vld [vmem:[%s11730_s5 + $0xa08] sm:$0xff]  ;;  %v992_v57 = vld [vmem:[%s11730_s5 + $0xa18] sm:$0xff] }
 0x1e8   : > { %8411 = vmatprep.subr.bf16.mxu1 %v8410_v1  ;;  %v994_v56 = vld [vmem:[%s11730_s5 + $0xa28] sm:$0xff]  ;;  %v1028_v46 = vld [vmem:[%s11730_s5 + $0xb38] sm:$0xff] }
 0x1ea   : > { %7901 = vmatpush1.bf16.msra.mxu0 %v7900_v7  ;;  %v7920_v7 = vpack.c.bf16 %v953_v63, %v949_v62  ;;  %v993_v62 = vld [vmem:[%s11730_s5 + $0xa20] sm:$0xff]  ;;  %v991_v63 = vld [vmem:[%s11730_s5 + $0xa10] sm:$0xff] }
 0x1eb   : > { %8413 = vmatpush1.bf16.msra.mxu1 %v8412_v8  ;;  %7903 = vmatprep.subr.bf16.mxu0 %v7902_v9  ;;  %v8432_v8 = vpack.c.bf16 %v955_v2, %v951_v0  ;;  %v7922_v9 = vpack.c.bf16 %v962_v4, %v958_v3  ;;  %v998_v2 = vld [vmem:[%s11730_s5 + $0xa48] sm:$0xff]  ;;  %v1000_v4 = vld [vmem:[%s11730_s5 + $0xa58] sm:$0xff] }
 0x1ec   : > { %8415 = vmatprep.subr.bf16.mxu1 %v8414_v14  ;;  %v8434_v14 = vpack.c.bf16 %v964_v6, %v960_v5  ;;  %v1002_v3 = vld [vmem:[%s11730_s5 + $0xa68] sm:$0xff]  ;;  %v1004_v5 = vld [vmem:[%s11730_s5 + $0xa78] sm:$0xff] }
 0x1ee   : > { %7905 = vmatpush1.bf16.msra.mxu0 %v7904_v20  ;;  %v7924_v20 = vpack.c.bf16 %v961_v12, %v957_v10  ;;  %v1001_v10 = vld [vmem:[%s11730_s5 + $0xa60] sm:$0xff]  ;;  %v999_v12 = vld [vmem:[%s11730_s5 + $0xa50] sm:$0xff] }
 0x1ef   : > { %8417 = vmatpush1.bf16.msra.mxu1 %v8416_v21  ;;  %7907 = vmatprep.subr.bf16.mxu0 %v7906_v22  ;;  %v8436_v21 = vpack.c.bf16 %v963_v15, %v959_v13  ;;  %v7926_v22 = vpack.c.bf16 %v970_v17, %v966_v16  ;;  %v8454_v13 = vpack.c.bf16 %v1004_v5, %v1000_v4  ;;  %v1006_v15 = vld [vmem:[%s11730_s5 + $0xa88] sm:$0xff]  ;;  %v1008_v17 = vld [vmem:[%s11730_s5 + $0xa98] sm:$0xff] }
 0x1f0   : > { %8419 = vmatprep.subr.bf16.mxu1 %v8418_v28  ;;  %v8438_v28 = vpack.c.bf16 %v972_v19, %v968_v18  ;;  %v1010_v16 = vld [vmem:[%s11730_s5 + $0xaa8] sm:$0xff]  ;;  %v1012_v18 = vld [vmem:[%s11730_s5 + $0xab8] sm:$0xff] }
 0x1f1   : > { %1917 = vmatmul.mubr.f32.vlgmr.msra.gmra.mrb[0].mxu0 %v11937_v23  ;;  %v1044_v4 = vld [vmem:[%s11730_s5 + $0xbb8] sm:$0xff] }
 0x1f2   : > { %7909 = vmatpush1.bf16.msra.mxu0 %v7908_v34  ;;  %2485 = vmatmul.mubr.f32.vlgmr.msra.gmra.mrb[0].mxu1 %v11937_v23  ;;  %v952_v23 = vld [vmem:[%s11730_s5 + $0x8d8] sm:$0xff]  ;;  %v7928_v34 = vpack.c.bf16 %v969_v26, %v965_v24  ;;  %v1009_v24 = vld [vmem:[%s11730_s5 + $0xaa0] sm:$0xff]  ;;  %v1007_v26 = vld [vmem:[%s11730_s5 + $0xa90] sm:$0xff] }
 0x1f3   : > { %8421 = vmatpush1.bf16.msra.mxu1 %v8420_v36  ;;  %7911 = vmatprep.subr.bf16.mxu0 %v7910_v37  ;;  %v8430_v1 = vpack.c.bf16 %v956_v58, %v952_v23  ;;  %v8440_v36 = vpack.c.bf16 %v971_v29, %v967_v27  ;;  %v7930_v37 = vpack.c.bf16 %v978_v31, %v974_v30  ;;  %v996_v23 = vld [vmem:[%s11730_s5 + $0xa38] sm:$0xff]  ;;  %v1014_v29 = vld [vmem:[%s11730_s5 + $0xac8] sm:$0xff] }
 0x1f4   : > { %8423 = vmatprep.subr.bf16.mxu1 %v8422_v42  ;;  %1987 = vmatprep.mubr.f32.mxu0 %v1729_v48  ;;  %v8442_v42 = vpack.c.bf16 %v980_v33, %v976_v32  ;;  %v8450_v0 = vpack.c.bf16 %v996_v23, %v992_v57  ;;  %v8458_v27 = vpack.c.bf16 %v1012_v18, %v1008_v17  ;;  %v1018_v30 = vld [vmem:[%s11730_s5 + $0xae8] sm:$0xff]  ;;  %v1016_v31 = vld [vmem:[%s11730_s5 + $0xad8] sm:$0xff] }
 0x1f5   : > { %2555 = vmatprep.mubr.f32.mxu1 %v1729_v48  ;;  %v7932_v48 = vpack.c.bf16 %v977_v39, %v973_v38  ;;  %v1020_v32 = vld [vmem:[%s11730_s5 + $0xaf8] sm:$0xff]  ;;  %v1017_v38 = vld [vmem:[%s11730_s5 + $0xae0] sm:$0xff]  ;;  %v1015_v39 = vld [vmem:[%s11730_s5 + $0xad0] sm:$0xff] }
 0x1f6   : > { %7913 = vmatpush1.bf16.msra.mxu0 %v7912_v49  ;;  %v8444_v49 = vpack.c.bf16 %v979_v43, %v975_v40  ;;  %v8462_v40 = vpack.c.bf16 %v1020_v32, %v1016_v31  ;;  %v1022_v43 = vld [vmem:[%s11730_s5 + $0xb08] sm:$0xff]  ;;  %v1036_v57 = vld [vmem:[%s11730_s5 + $0xb78] sm:$0xff] }
 0x1f7   : > { %8425 = vmatpush1.bf16.msra.mxu1 %v8424_v25  ;;  %7915 = vmatprep.subr.bf16.mxu0 %v7914_v50  ;;  %v7934_v25 = vpack.c.bf16 %v986_v45, %v982_v44  ;;  %v981_v50 = vld [vmem:[%s11730_s5 + $0x9c0] sm:$0xff]  ;;  %v1026_v44 = vld [vmem:[%s11730_s5 + $0xb28] sm:$0xff]  ;;  %v1024_v45 = vld [vmem:[%s11730_s5 + $0xb18] sm:$0xff] }
 0x1f8   : > { %8427 = vmatprep.subr.bf16.mxu1 %v8426_v54  ;;  %v987_v54 = vld [vmem:[%s11730_s5 + $0x9f0] sm:$0xff]  ;;  %v7936_v58 = vpack.c.bf16 %v985_v51, %v981_v50  ;;  %v1025_v50 = vld [vmem:[%s11730_s5 + $0xb20] sm:$0xff]  ;;  %v1052_v17 = vld [vmem:[%s11730_s5 + $0xbf8] sm:$0xff] }
 0x1f9   : > { %v1023_v51 = vld [vmem:[%s11730_s5 + $0xb10] sm:$0xff]  ;;  %v1056_v31 = vld [vmem:[%s11730_s5 + $0xc18] sm:$0xff] }
 0x1fa   : > { %7917 = vmatpush1.bf16.msra.mxu0 %v7916_v59  ;;  %v8448_v59 = vpack.c.bf16 %v987_v54, %v983_v52  ;;  %v8466_v52 = vpack.c.bf16 %v1028_v46, %v1024_v45  ;;  %v1030_v54 = vld [vmem:[%s11730_s5 + $0xb48] sm:$0xff]  ;;  %v1060_v32 = vld [vmem:[%s11730_s5 + $0xc38] sm:$0xff] }
 0x1fb   : > { %8429 = vmatpush1.bf16.msra.mxu1 %v8428_v60  ;;  %7919 = vmatprep.subr.bf16.mxu0 %v7918_v61  ;;  %v7938_v60 = vpack.c.bf16 %v994_v56, %v990_v55  ;;  %v989_v61 = vld [vmem:[%s11730_s5 + $0xa00] sm:$0xff]  ;;  %v1034_v55 = vld [vmem:[%s11730_s5 + $0xb68] sm:$0xff]  ;;  %v1032_v56 = vld [vmem:[%s11730_s5 + $0xb58] sm:$0xff] }
 0x1fc   : > { %8431 = vmatprep.subr.bf16.mxu1 %v8430_v1  ;;  %v995_v1 = vld [vmem:[%s11730_s5 + $0xa30] sm:$0xff]  ;;  %v7940_v6 = vpack.c.bf16 %v993_v62, %v989_v61  ;;  %v1033_v61 = vld [vmem:[%s11730_s5 + $0xb60] sm:$0xff]  ;;  %v1064_v45 = vld [vmem:[%s11730_s5 + $0xc58] sm:$0xff] }
 0x1fd   : > { %v1031_v62 = vld [vmem:[%s11730_s5 + $0xb50] sm:$0xff]  ;;  %v1068_v46 = vld [vmem:[%s11730_s5 + $0xc78] sm:$0xff] }
 0x1fe   : > { %7921 = vmatpush1.bf16.msra.mxu0 %v7920_v7  ;;  %v8452_v7 = vpack.c.bf16 %v995_v1, %v991_v63  ;;  %v8470_v63 = vpack.c.bf16 %v1036_v57, %v1032_v56  ;;  %v1038_v1 = vld [vmem:[%s11730_s5 + $0xb88] sm:$0xff]  ;;  %v1072_v57 = vld [vmem:[%s11730_s5 + $0xc98] sm:$0xff] }
 0x1ff   : > { %8433 = vmatpush1.bf16.msra.mxu1 %v8432_v8  ;;  %7923 = vmatprep.subr.bf16.mxu0 %v7922_v9  ;;  %v7942_v8 = vpack.c.bf16 %v1002_v3, %v998_v2  ;;  %v997_v9 = vld [vmem:[%s11730_s5 + $0xa40] sm:$0xff]  ;;  %v1042_v2 = vld [vmem:[%s11730_s5 + $0xba8] sm:$0xff]  ;;  %v1040_v3 = vld [vmem:[%s11730_s5 + $0xb98] sm:$0xff] }
 0x200   : > { %8435 = vmatprep.subr.bf16.mxu1 %v8434_v14  ;;  %v1003_v14 = vld [vmem:[%s11730_s5 + $0xa70] sm:$0xff]  ;;  %v7944_v19 = vpack.c.bf16 %v1001_v10, %v997_v9  ;;  %v1041_v9 = vld [vmem:[%s11730_s5 + $0xba0] sm:$0xff] }
 0x201   : > { %v1039_v10 = vld [vmem:[%s11730_s5 + $0xb90] sm:$0xff] }
 0x202   : > { %7925 = vmatpush1.bf16.msra.mxu0 %v7924_v20  ;;  %v8456_v20 = vpack.c.bf16 %v1003_v14, %v999_v12  ;;  %v8474_v12 = vpack.c.bf16 %v1044_v4, %v1040_v3  ;;  %v1046_v14 = vld [vmem:[%s11730_s5 + $0xbc8] sm:$0xff]  ;;  %v1084_v4 = vld [vmem:[%s11730_s5 + $0xcf8] sm:$0xff] }
 0x203   : > { %8437 = vmatpush1.bf16.msra.mxu1 %v8436_v21  ;;  %7927 = vmatprep.subr.bf16.mxu0 %v7926_v22  ;;  %v7946_v21 = vpack.c.bf16 %v1010_v16, %v1006_v15  ;;  %v1005_v22 = vld [vmem:[%s11730_s5 + $0xa80] sm:$0xff]  ;;  %v1050_v15 = vld [vmem:[%s11730_s5 + $0xbe8] sm:$0xff]  ;;  %v1048_v16 = vld [vmem:[%s11730_s5 + $0xbd8] sm:$0xff] }
 0x204   : > { %8439 = vmatprep.subr.bf16.mxu1 %v8438_v28  ;;  %v1011_v28 = vld [vmem:[%s11730_s5 + $0xab0] sm:$0xff]  ;;  %v7948_v33 = vpack.c.bf16 %v1009_v24, %v1005_v22  ;;  %v1049_v22 = vld [vmem:[%s11730_s5 + $0xbe0] sm:$0xff]  ;;  %v1082_v3 = vld [vmem:[%s11730_s5 + $0xce8] sm:$0xff] }
 0x205   : > { %v1047_v24 = vld [vmem:[%s11730_s5 + $0xbd0] sm:$0xff] }
 0x206   : > { %7929 = vmatpush1.bf16.msra.mxu0 %v7928_v34  ;;  %v8460_v34 = vpack.c.bf16 %v1011_v28, %v1007_v26  ;;  %v8478_v26 = vpack.c.bf16 %v1052_v17, %v1048_v16  ;;  %v1054_v28 = vld [vmem:[%s11730_s5 + $0xc08] sm:$0xff]  ;;  %v1088_v16 = vld [vmem:[%s11730_s5 + $0xd18] sm:$0xff] }
 0x207   : > { %8441 = vmatpush1.bf16.msra.mxu1 %v8440_v36  ;;  %7931 = vmatprep.subr.bf16.mxu0 %v7930_v37  ;;  %v7950_v36 = vpack.c.bf16 %v1018_v30, %v1014_v29  ;;  %v1013_v37 = vld [vmem:[%s11730_s5 + $0xac0] sm:$0xff]  ;;  %v1058_v29 = vld [vmem:[%s11730_s5 + $0xc28] sm:$0xff]  ;;  %v1714_v30 = vcombine.high %v12076_v35, %v12076_v35  ;;  %v1059_v35 = vld [vmem:[%s11730_s5 + $0xc30] sm:$0xff] }
 0x208   : > { %8443 = vmatprep.subr.bf16.mxu1 %v8442_v42  ;;  %v1019_v42 = vld [vmem:[%s11730_s5 + $0xaf0] sm:$0xff]  ;;  %v7952_v47 = vpack.c.bf16 %v1017_v38, %v1013_v37  ;;  %v1053_v37 = vld [vmem:[%s11730_s5 + $0xc00] sm:$0xff]  ;;  %v1092_v17 = vld [vmem:[%s11730_s5 + $0xd38] sm:$0xff] }
 0x209   : > { %v1057_v38 = vld [vmem:[%s11730_s5 + $0xc20] sm:$0xff] }
 0x20a   : > { %7933 = vmatpush1.bf16.msra.mxu0 %v7932_v48  ;;  %v8464_v48 = vpack.c.bf16 %v1019_v42, %v1015_v39  ;;  %v1055_v39 = vld [vmem:[%s11730_s5 + $0xc10] sm:$0xff]  ;;  %v1062_v42 = vld [vmem:[%s11730_s5 + $0xc48] sm:$0xff] }
 0x20b   : > { %8445 = vmatpush1.bf16.msra.mxu1 %v8444_v49  ;;  %7935 = vmatprep.subr.bf16.mxu0 %v7934_v25  ;;  %v7954_v49 = vpack.c.bf16 %v1026_v44, %v1022_v43  ;;  %v1021_v25 = vld [vmem:[%s11730_s5 + $0xb00] sm:$0xff]  ;;  %v1066_v43 = vld [vmem:[%s11730_s5 + $0xc68] sm:$0xff]  ;;  %v12215_v44 = vrot.slane %v1714_v30, %v11875_v11  ;;  %v1096_v30 = vld [vmem:[%s11730_s5 + $0xd58] sm:$0xff] }
 0x20c   : > { %8447 = vmatprep.subr.bf16.mxu1 %v8446_v53  ;;  %v1027_v53 = vld [vmem:[%s11730_s5 + $0xb30] sm:$0xff]  ;;  %v7956_v23 = vpack.c.bf16 %v1025_v50, %v1021_v25  ;;  %v1061_v25 = vld [vmem:[%s11730_s5 + $0xc40] sm:$0xff] }
 0x20d   : > { %v1065_v50 = vld [vmem:[%s11730_s5 + $0xc60] sm:$0xff]  ;;  %v1730_v56 = vcombine.high %v12215_v44, %v12215_v44 }
 0x20e   : > { %7937 = vmatpush1.bf16.msra.mxu0 %v7936_v58  ;;  %v8468_v58 = vpack.c.bf16 %v1027_v53, %v1023_v51  ;;  %v1063_v51 = vld [vmem:[%s11730_s5 + $0xc50] sm:$0xff] }
 0x20f   : > { %8449 = vmatpush1.bf16.msra.mxu1 %v8448_v59  ;;  %7939 = vmatprep.subr.bf16.mxu0 %v7938_v60  ;;  %v7958_v59 = vpack.c.bf16 %v1034_v55, %v1030_v54  ;;  %v1029_v60 = vld [vmem:[%s11730_s5 + $0xb40] sm:$0xff]  ;;  %v1067_v53 = vld [vmem:[%s11730_s5 + $0xc70] sm:$0xff]  ;;  %v1070_v54 = vld [vmem:[%s11730_s5 + $0xc88] sm:$0xff] }
 0x210   : > { %8451 = vmatprep.subr.bf16.mxu1 %v8450_v0  ;;  %v1035_v0 = vld [vmem:[%s11730_s5 + $0xb70] sm:$0xff]  ;;  %v7960_v5 = vpack.c.bf16 %v1033_v61, %v1029_v60  ;;  %v1074_v55 = vld [vmem:[%s11730_s5 + $0xca8] sm:$0xff]  ;;  %v1069_v61 = vld [vmem:[%s11730_s5 + $0xc80] sm:$0xff] }
 0x211   : > { %v7978_v60 = vpack.c.bf16 %v1074_v55, %v1070_v54  ;;  %v1114_v54 = vld [vmem:[%s11730_s5 + $0xde8] sm:$0xff]  ;;  %v1112_v55 = vld [vmem:[%s11730_s5 + $0xdd8] sm:$0xff] }
 0x212   : > { %7941 = vmatpush1.bf16.msra.mxu0 %v7940_v6  ;;  %v8472_v6 = vpack.c.bf16 %v1035_v0, %v1031_v62  ;;  %v1073_v62 = vld [vmem:[%s11730_s5 + $0xca0] sm:$0xff] }
 0x213   : > { %8453 = vmatpush1.bf16.msra.mxu1 %v8452_v7  ;;  %7943 = vmatprep.subr.bf16.mxu0 %v7942_v8  ;;  %v7962_v7 = vpack.c.bf16 %v1042_v2, %v1038_v1  ;;  %v1037_v8 = vld [vmem:[%s11730_s5 + $0xb80] sm:$0xff]  ;;  %v1075_v1 = vld [vmem:[%s11730_s5 + $0xcb0] sm:$0xff]  ;;  %v1078_v2 = vld [vmem:[%s11730_s5 + $0xcc8] sm:$0xff] }
 0x214   : > { %8455 = vmatprep.subr.bf16.mxu1 %v8454_v13  ;;  %v1043_v13 = vld [vmem:[%s11730_s5 + $0xbb0] sm:$0xff]  ;;  %v7964_v18 = vpack.c.bf16 %v1041_v9, %v1037_v8  ;;  %v1077_v8 = vld [vmem:[%s11730_s5 + $0xcc0] sm:$0xff] }
 0x215   : > { %v1081_v9 = vld [vmem:[%s11730_s5 + $0xce0] sm:$0xff] }
 0x216   : > { %7945 = vmatpush1.bf16.msra.mxu0 %v7944_v19  ;;  %v8476_v19 = vpack.c.bf16 %v1043_v13, %v1039_v10  ;;  %v1079_v10 = vld [vmem:[%s11730_s5 + $0xcd0] sm:$0xff] }
 0x217   : > { %8457 = vmatpush1.bf16.msra.mxu1 %v8456_v20  ;;  %7947 = vmatprep.subr.bf16.mxu0 %v7946_v21  ;;  %v7966_v20 = vpack.c.bf16 %v1050_v15, %v1046_v14  ;;  %v1045_v21 = vld [vmem:[%s11730_s5 + $0xbc0] sm:$0xff]  ;;  %v1083_v13 = vld [vmem:[%s11730_s5 + $0xcf0] sm:$0xff]  ;;  %v1086_v14 = vld [vmem:[%s11730_s5 + $0xd08] sm:$0xff] }
 0x218   : > { %8459 = vmatprep.subr.bf16.mxu1 %v8458_v27  ;;  %v1051_v27 = vld [vmem:[%s11730_s5 + $0xbf0] sm:$0xff]  ;;  %v1090_v15 = vld [vmem:[%s11730_s5 + $0xd28] sm:$0xff] }
 0x21a   : > { %7949 = vmatpush1.bf16.msra.mxu0 %v7948_v33  ;;  %v7968_v33 = vpack.c.bf16 %v1049_v22, %v1045_v21  ;;  %v1085_v21 = vld [vmem:[%s11730_s5 + $0xd00] sm:$0xff] }
 0x21b   : > { %8461 = vmatpush1.bf16.msra.mxu1 %v8460_v34  ;;  %7951 = vmatprep.subr.bf16.mxu0 %v7950_v36  ;;  %v8480_v34 = vpack.c.bf16 %v1051_v27, %v1047_v24  ;;  %v7970_v36 = vpack.c.bf16 %v1058_v29, %v1054_v28  ;;  %v1089_v22 = vld [vmem:[%s11730_s5 + $0xd20] sm:$0xff]  ;;  %v1087_v24 = vld [vmem:[%s11730_s5 + $0xd10] sm:$0xff]  ;;  %v1094_v28 = vld [vmem:[%s11730_s5 + $0xd48] sm:$0xff] }
 0x21c   : > { %8463 = vmatprep.subr.bf16.mxu1 %v8462_v40  ;;  %v8482_v40 = vpack.c.bf16 %v1060_v32, %v1056_v31  ;;  %v1091_v27 = vld [vmem:[%s11730_s5 + $0xd30] sm:$0xff]  ;;  %v1098_v29 = vld [vmem:[%s11730_s5 + $0xd68] sm:$0xff]  ;;  %v1100_v31 = vld [vmem:[%s11730_s5 + $0xd78] sm:$0xff]  ;;  %v7988_v32 = vpack.c.bf16 %v1089_v22, %v1085_v21 }
 0x21d   : > { %v1127_v21 = vld [vmem:[%s11730_s5 + $0xe50] sm:$0xff] }
 0x21e   : > { %7953 = vmatpush1.bf16.msra.mxu0 %v7952_v47  ;;  %v7972_v47 = vpack.c.bf16 %v1057_v38, %v1053_v37  ;;  %v1097_v37 = vld [vmem:[%s11730_s5 + $0xd60] sm:$0xff]  ;;  %v1095_v38 = vld [vmem:[%s11730_s5 + $0xd50] sm:$0xff] }
 0x21f   : > { %8465 = vmatpush1.bf16.msra.mxu1 %v8464_v48  ;;  %7955 = vmatprep.subr.bf16.mxu0 %v7954_v49  ;;  %v8484_v48 = vpack.c.bf16 %v1059_v35, %v1055_v39  ;;  %v7974_v49 = vpack.c.bf16 %v1066_v43, %v1062_v42  ;;  %v8502_v39 = vpack.c.bf16 %v1100_v31, %v1096_v30  ;;  %v1102_v35 = vld [vmem:[%s11730_s5 + $0xd88] sm:$0xff]  ;;  %v1104_v43 = vld [vmem:[%s11730_s5 + $0xd98] sm:$0xff] }
 0x220   : > { %8467 = vmatprep.subr.bf16.mxu1 %v8466_v52  ;;  %v8486_v52 = vpack.c.bf16 %v1068_v46, %v1064_v45  ;;  %v1106_v42 = vld [vmem:[%s11730_s5 + $0xda8] sm:$0xff]  ;;  %v1108_v45 = vld [vmem:[%s11730_s5 + $0xdb8] sm:$0xff] }
 0x222   : > { %7957 = vmatpush1.bf16.msra.mxu0 %v7956_v23  ;;  %v1076_v23 = vld [vmem:[%s11730_s5 + $0xcb8] sm:$0xff] }
 0x223   : > { %8469 = vmatpush1.bf16.msra.mxu1 %v8468_v58  ;;  %7959 = vmatprep.subr.bf16.mxu0 %v7958_v59  ;;  %v7976_v58 = vpack.c.bf16 %v1065_v50, %v1061_v25  ;;  %v8488_v59 = vpack.c.bf16 %v1067_v53, %v1063_v51  ;;  %v8490_v0 = vpack.c.bf16 %v1076_v23, %v1072_v57  ;;  %v1105_v25 = vld [vmem:[%s11730_s5 + $0xda0] sm:$0xff]  ;;  %v1103_v50 = vld [vmem:[%s11730_s5 + $0xd90] sm:$0xff]  ;;  %v1110_v53 = vld [vmem:[%s11730_s5 + $0xdc8] sm:$0xff] }
 0x224   : > { %8471 = vmatprep.subr.bf16.mxu1 %v8470_v63  ;;  %v1071_v63 = vld [vmem:[%s11730_s5 + $0xc90] sm:$0xff]  ;;  %v8506_v51 = vpack.c.bf16 %v1108_v45, %v1104_v43 }
 0x226   : > { %7961 = vmatpush1.bf16.msra.mxu0 %v7960_v5  ;;  %v7980_v5 = vpack.c.bf16 %v1073_v62, %v1069_v61  ;;  %v1111_v61 = vld [vmem:[%s11730_s5 + $0xdd0] sm:$0xff] }
 0x227   : > { %8473 = vmatpush1.bf16.msra.mxu1 %v8472_v6  ;;  %7963 = vmatprep.subr.bf16.mxu0 %v7962_v7  ;;  %v8492_v6 = vpack.c.bf16 %v1075_v1, %v1071_v63  ;;  %v7982_v7 = vpack.c.bf16 %v1082_v3, %v1078_v2  ;;  %v1115_v63 = vld [vmem:[%s11730_s5 + $0xdf0] sm:$0xff]  ;;  %v1122_v1 = vld [vmem:[%s11730_s5 + $0xe28] sm:$0xff]  ;;  %v1120_v2 = vld [vmem:[%s11730_s5 + $0xe18] sm:$0xff] }
 0x228   : > { %8475 = vmatprep.subr.bf16.mxu1 %v8474_v12  ;;  %v1124_v3 = vld [vmem:[%s11730_s5 + $0xe38] sm:$0xff] }
 0x22a   : > { %7965 = vmatpush1.bf16.msra.mxu0 %v7964_v18  ;;  %v7984_v18 = vpack.c.bf16 %v1081_v9, %v1077_v8  ;;  %v1119_v8 = vld [vmem:[%s11730_s5 + $0xe10] sm:$0xff]  ;;  %v8514_v9 = vpack.c.bf16 %v1124_v3, %v1120_v2 }
 0x22b   : > { %8477 = vmatpush1.bf16.msra.mxu1 %v8476_v19  ;;  %7967 = vmatprep.subr.bf16.mxu0 %v7966_v20  ;;  %v8496_v19 = vpack.c.bf16 %v1083_v13, %v1079_v10  ;;  %v7986_v20 = vpack.c.bf16 %v1090_v15, %v1086_v14  ;;  %v1123_v10 = vld [vmem:[%s11730_s5 + $0xe30] sm:$0xff]  ;;  %v1130_v13 = vld [vmem:[%s11730_s5 + $0xe68] sm:$0xff]  ;;  %v1128_v14 = vld [vmem:[%s11730_s5 + $0xe58] sm:$0xff] }
 0x22c   : > { %8479 = vmatprep.subr.bf16.mxu1 %v8478_v26  ;;  %v8498_v26 = vpack.c.bf16 %v1092_v17, %v1088_v16  ;;  %v1132_v15 = vld [vmem:[%s11730_s5 + $0xe78] sm:$0xff]  ;;  %v8516_v17 = vpack.c.bf16 %v1123_v10, %v1119_v8  ;;  %v1163_v8 = vld [vmem:[%s11730_s5 + $0xf70] sm:$0xff]  ;;  %v1170_v10 = vld [vmem:[%s11730_s5 + $0xfa8] sm:$0xff] }
 0x22d   : > { %v8518_v22 = vpack.c.bf16 %v1132_v15, %v1128_v14 }
 0x22e   : > { %7969 = vmatpush1.bf16.msra.mxu0 %v7968_v33  ;;  %v8500_v33 = vpack.c.bf16 %v1091_v27, %v1087_v24  ;;  %v1131_v24 = vld [vmem:[%s11730_s5 + $0xe70] sm:$0xff]  ;;  %v1138_v27 = vld [vmem:[%s11730_s5 + $0xea8] sm:$0xff] }
 0x22f   : > { %8481 = vmatpush1.bf16.msra.mxu1 %v8480_v34  ;;  %7971 = vmatprep.subr.bf16.mxu0 %v7970_v36  ;;  %v7990_v34 = vpack.c.bf16 %v1098_v29, %v1094_v28  ;;  %v1093_v36 = vld [vmem:[%s11730_s5 + $0xd40] sm:$0xff]  ;;  %v1136_v28 = vld [vmem:[%s11730_s5 + $0xe98] sm:$0xff]  ;;  %v8520_v31 = vpack.c.bf16 %v1131_v24, %v1127_v21  ;;  %v1171_v21 = vld [vmem:[%s11730_s5 + $0xfb0] sm:$0xff] }
 0x230   : > { %8483 = vmatprep.subr.bf16.mxu1 %v8482_v40  ;;  %v1099_v40 = vld [vmem:[%s11730_s5 + $0xd70] sm:$0xff]  ;;  %v7992_v46 = vpack.c.bf16 %v1097_v37, %v1093_v36  ;;  %v1140_v29 = vld [vmem:[%s11730_s5 + $0xeb8] sm:$0xff]  ;;  %v1178_v24 = vld [vmem:[%s11730_s5 + $0xfe8] sm:$0xff] }
 0x231   : > { %1988 = vmatmul.mubr.f32.vlgmr.msra.gmra.mrb[0].mxu0 %v12083_v41  ;;  %v1135_v36 = vld [vmem:[%s11730_s5 + $0xe90] sm:$0xff]  ;;  %v8522_v37 = vpack.c.bf16 %v1140_v29, %v1136_v28 }
 0x232   : > { %7973 = vmatpush1.bf16.msra.mxu0 %v7972_v47  ;;  %2556 = vmatmul.mubr.f32.vlgmr.msra.gmra.mrb[0].mxu1 %v12083_v41  ;;  %v1080_v41 = vld [vmem:[%s11730_s5 + $0xcd8] sm:$0xff]  ;;  %v8504_v47 = vpack.c.bf16 %v1099_v40, %v1095_v38  ;;  %v1139_v38 = vld [vmem:[%s11730_s5 + $0xeb0] sm:$0xff]  ;;  %v1146_v40 = vld [vmem:[%s11730_s5 + $0xee8] sm:$0xff] }
 0x233   : > { %8485 = vmatpush1.bf16.msra.mxu1 %v8484_v48  ;;  %7975 = vmatprep.subr.bf16.mxu0 %v7974_v49  ;;  %v8494_v12 = vpack.c.bf16 %v1084_v4, %v1080_v41  ;;  %v7994_v48 = vpack.c.bf16 %v1106_v42, %v1102_v35  ;;  %v1101_v49 = vld [vmem:[%s11730_s5 + $0xd80] sm:$0xff]  ;;  %v8512_v4 = vpack.c.bf16 %v1115_v63, %v1111_v61  ;;  %v1144_v35 = vld [vmem:[%s11730_s5 + $0xed8] sm:$0xff]  ;;  %v1155_v61 = vld [vmem:[%s11730_s5 + $0xf30] sm:$0xff] }
 0x234   : > { %8487 = vmatprep.subr.bf16.mxu1 %v8486_v52  ;;  %2058 = vmatprep.mubr.f32.mxu0 %v1730_v56  ;;  %v1107_v52 = vld [vmem:[%s11730_s5 + $0xdb0] sm:$0xff]  ;;  %v7996_v57 = vpack.c.bf16 %v1105_v25, %v1101_v49  ;;  %v1148_v42 = vld [vmem:[%s11730_s5 + $0xef8] sm:$0xff]  ;;  %v8524_v45 = vpack.c.bf16 %v1139_v38, %v1135_v36  ;;  %v1162_v63 = vld [vmem:[%s11730_s5 + $0xf68] sm:$0xff] }
 0x235   : > { %2626 = vmatprep.mubr.f32.mxu1 %v1730_v56  ;;  %v1116_v56 = vld [vmem:[%s11730_s5 + $0xdf8] sm:$0xff]  ;;  %v8508_v23 = vpack.c.bf16 %v1107_v52, %v1103_v50  ;;  %v1143_v49 = vld [vmem:[%s11730_s5 + $0xed0] sm:$0xff]  ;;  %v8526_v25 = vpack.c.bf16 %v1148_v42, %v1144_v35  ;;  %v1154_v52 = vld [vmem:[%s11730_s5 + $0xf28] sm:$0xff] }
 0x236   : > { %7977 = vmatpush1.bf16.msra.mxu0 %v7976_v58  ;;  %v7998_v58 = vpack.c.bf16 %v1114_v54, %v1110_v53  ;;  %v8510_v62 = vpack.c.bf16 %v1116_v56, %v1112_v55  ;;  %v1147_v50 = vld [vmem:[%s11730_s5 + $0xef0] sm:$0xff]  ;;  %v1152_v53 = vld [vmem:[%s11730_s5 + $0xf18] sm:$0xff]  ;;  %v1186_v38 = vld [vmem:[%s11730_s5 + $0x1028] sm:$0xff] }
 0x237   : > { %8489 = vmatpush1.bf16.msra.mxu1 %v8488_v59  ;;  %7979 = vmatprep.subr.bf16.mxu0 %v7978_v60  ;;  %v1109_v59 = vld [vmem:[%s11730_s5 + $0xdc0] sm:$0xff]  ;;  %v1156_v54 = vld [vmem:[%s11730_s5 + $0xf38] sm:$0xff]  ;;  %v8528_v56 = vpack.c.bf16 %v1147_v50, %v1143_v49  ;;  %v1179_v36 = vld [vmem:[%s11730_s5 + $0xff0] sm:$0xff] }
 0x238   : > { %8491 = vmatprep.subr.bf16.mxu1 %v8490_v0  ;;  %v1113_v60 = vld [vmem:[%s11730_s5 + $0xde0] sm:$0xff]  ;;  %v1118_v0 = vld [vmem:[%s11730_s5 + $0xe08] sm:$0xff] }
 0x239   : > { %v8000_v41 = vpack.c.bf16 %v1113_v60, %v1109_v59  ;;  %v1151_v59 = vld [vmem:[%s11730_s5 + $0xf10] sm:$0xff]  ;;  %v8530_v60 = vpack.c.bf16 %v1156_v54, %v1152_v53  ;;  %v12346_v35 = vld [vmem:[%s15085_s6 + $0x10] sm:$0xff]  ;;  %v1192_v53 = vld [vmem:[%s11730_s5 + $0x1058] sm:$0xff] }
 0x23a   : > { %7981 = vmatpush1.bf16.msra.mxu0 %v7980_v5  ;;  %v8002_v5 = vpack.c.bf16 %v1122_v1, %v1118_v0  ;;  %v1160_v0 = vld [vmem:[%s11730_s5 + $0xf58] sm:$0xff]  ;;  %v8532_v3 = vpack.c.bf16 %v1155_v61, %v1151_v59  ;;  %v1190_v50 = vld [vmem:[%s11730_s5 + $0x1048] sm:$0xff]  ;;  %v1191_v59 = vld [vmem:[%s11730_s5 + $0x1050] sm:$0xff] }
 0x23b   : > { %8493 = vmatpush1.bf16.msra.mxu1 %v8492_v6  ;;  %7983 = vmatprep.subr.bf16.mxu0 %v7982_v7  ;;  %v1117_v6 = vld [vmem:[%s11730_s5 + $0xe00] sm:$0xff]  ;;  %v1164_v1 = vld [vmem:[%s11730_s5 + $0xf78] sm:$0xff]  ;;  %v1195_v61 = vld [vmem:[%s11730_s5 + $0x1070] sm:$0xff] }
 0x23c   : > { %8495 = vmatprep.subr.bf16.mxu1 %v8494_v12  ;;  %v1121_v7 = vld [vmem:[%s11730_s5 + $0xe20] sm:$0xff]  ;;  %v1126_v12 = vld [vmem:[%s11730_s5 + $0xe48] sm:$0xff]  ;;  %v1196_v54 = vld [vmem:[%s11730_s5 + $0x1078] sm:$0xff] }
 0x23d   : > { %v8004_v16 = vpack.c.bf16 %v1121_v7, %v1117_v6  ;;  %v1159_v6 = vld [vmem:[%s11730_s5 + $0xf50] sm:$0xff]  ;;  %v8534_v7 = vpack.c.bf16 %v1164_v1, %v1160_v0  ;;  %v1200_v1 = vld [vmem:[%s11730_s5 + $0x1098] sm:$0xff] }
 0x23e   : > { %7985 = vmatpush1.bf16.msra.mxu0 %v7984_v18  ;;  %v8006_v18 = vpack.c.bf16 %v1130_v13, %v1126_v12  ;;  %v1168_v12 = vld [vmem:[%s11730_s5 + $0xf98] sm:$0xff]  ;;  %v8536_v15 = vpack.c.bf16 %v1163_v8, %v1159_v6  ;;  %v1201_v6 = vld [vmem:[%s11730_s5 + $0x10a0] sm:$0xff] }
 0x23f   : > { %8497 = vmatpush1.bf16.msra.mxu1 %v8496_v19  ;;  %7987 = vmatprep.subr.bf16.mxu0 %v7986_v20  ;;  %v1125_v19 = vld [vmem:[%s11730_s5 + $0xe40] sm:$0xff]  ;;  %v1172_v13 = vld [vmem:[%s11730_s5 + $0xfb8] sm:$0xff] }
 0x240   : > { %8499 = vmatprep.subr.bf16.mxu1 %v8498_v26  ;;  %v1129_v20 = vld [vmem:[%s11730_s5 + $0xe60] sm:$0xff]  ;;  %v1134_v26 = vld [vmem:[%s11730_s5 + $0xe88] sm:$0xff] }
 0x241   : > { %v8008_v30 = vpack.c.bf16 %v1129_v20, %v1125_v19  ;;  %v1167_v19 = vld [vmem:[%s11730_s5 + $0xf90] sm:$0xff]  ;;  %v8538_v20 = vpack.c.bf16 %v1172_v13, %v1168_v12  ;;  %v1210_v12 = vld [vmem:[%s11730_s5 + $0x10e8] sm:$0xff]  ;;  %v1212_v13 = vld [vmem:[%s11730_s5 + $0x10f8] sm:$0xff] }
 0x242   : > { %7989 = vmatpush1.bf16.msra.mxu0 %v7988_v32  ;;  %v8010_v32 = vpack.c.bf16 %v1138_v27, %v1134_v26  ;;  %v1176_v26 = vld [vmem:[%s11730_s5 + $0xfd8] sm:$0xff]  ;;  %v8540_v29 = vpack.c.bf16 %v1171_v21, %v1167_v19  ;;  %v1207_v19 = vld [vmem:[%s11730_s5 + $0x10d0] sm:$0xff] }
 0x243   : > { %8501 = vmatpush1.bf16.msra.mxu1 %v8500_v33  ;;  %7991 = vmatprep.subr.bf16.mxu0 %v7990_v34  ;;  %v1133_v33 = vld [vmem:[%s11730_s5 + $0xe80] sm:$0xff]  ;;  %v1180_v27 = vld [vmem:[%s11730_s5 + $0xff8] sm:$0xff]  ;;  %v1211_v21 = vld [vmem:[%s11730_s5 + $0x10f0] sm:$0xff] }
 0x244   : > { %8503 = vmatprep.subr.bf16.mxu1 %v8502_v39  ;;  %v1137_v34 = vld [vmem:[%s11730_s5 + $0xea0] sm:$0xff]  ;;  %v1142_v39 = vld [vmem:[%s11730_s5 + $0xec8] sm:$0xff] }
 0x245   : > { %v8012_v43 = vpack.c.bf16 %v1137_v34, %v1133_v33  ;;  %v1175_v33 = vld [vmem:[%s11730_s5 + $0xfd0] sm:$0xff]  ;;  %v8542_v34 = vpack.c.bf16 %v1180_v27, %v1176_v26  ;;  %v1216_v26 = vld [vmem:[%s11730_s5 + $0x1118] sm:$0xff] }
 0x246   : > { %7993 = vmatpush1.bf16.msra.mxu0 %v7992_v46  ;;  %v8014_v46 = vpack.c.bf16 %v1146_v40, %v1142_v39  ;;  %v1184_v39 = vld [vmem:[%s11730_s5 + $0x1018] sm:$0xff] }
 0x247   : > { %8505 = vmatpush1.bf16.msra.mxu1 %v8504_v47  ;;  %7995 = vmatprep.subr.bf16.mxu0 %v7994_v48  ;;  %v1141_v47 = vld [vmem:[%s11730_s5 + $0xec0] sm:$0xff]  ;;  %v1188_v40 = vld [vmem:[%s11730_s5 + $0x1038] sm:$0xff] }
 0x248   : > { %8507 = vmatprep.subr.bf16.mxu1 %v8506_v51  ;;  %v1145_v48 = vld [vmem:[%s11730_s5 + $0xee0] sm:$0xff]  ;;  %v1150_v51 = vld [vmem:[%s11730_s5 + $0xf08] sm:$0xff]  ;;  %v8546_v49 = vpack.c.bf16 %v1188_v40, %v1184_v39  ;;  %v1220_v27 = vld [vmem:[%s11730_s5 + $0x1138] sm:$0xff] }
 0x249   : > { %v8016_v55 = vpack.c.bf16 %v1145_v48, %v1141_v47  ;;  %v1185_v47 = vld [vmem:[%s11730_s5 + $0x1020] sm:$0xff]  ;;  %v1183_v48 = vld [vmem:[%s11730_s5 + $0x1010] sm:$0xff]  ;;  %v1224_v39 = vld [vmem:[%s11730_s5 + $0x1158] sm:$0xff] }
 0x24a   : > { %7997 = vmatpush1.bf16.msra.mxu0 %v7996_v57  ;;  %v8018_v57 = vpack.c.bf16 %v1154_v52, %v1150_v51  ;;  %v1194_v51 = vld [vmem:[%s11730_s5 + $0x1068] sm:$0xff]  ;;  %v12356_v52 = vrot.slane %v12346_v35, %v11875_v11  ;;  %v1228_v40 = vld [vmem:[%s11730_s5 + $0x1178] sm:$0xff] }
 0x24b   : > { %8509 = vmatpush1.bf16.msra.mxu1 %v8508_v23  ;;  %7999 = vmatprep.subr.bf16.mxu0 %v7998_v58  ;;  %v1149_v23 = vld [vmem:[%s11730_s5 + $0xf00] sm:$0xff] }
 0x24c   : > { %8511 = vmatprep.subr.bf16.mxu1 %v8510_v62  ;;  %v1153_v58 = vld [vmem:[%s11730_s5 + $0xf20] sm:$0xff]  ;;  %v1158_v62 = vld [vmem:[%s11730_s5 + $0xf48] sm:$0xff]  ;;  %v1746_v0 = vcombine.high %v12356_v52, %v12356_v52 }
 0x24d   : > { %v8020_v2 = vpack.c.bf16 %v1153_v58, %v1149_v23  ;;  %v1189_v23 = vld [vmem:[%s11730_s5 + $0x1040] sm:$0xff] }
 0x24e   : > { %8001 = vmatpush1.bf16.msra.mxu0 %v8000_v41  ;;  %v8022_v41 = vpack.c.bf16 %v1162_v63, %v1158_v62  ;;  %v1193_v58 = vld [vmem:[%s11730_s5 + $0x1060] sm:$0xff]  ;;  %v1198_v62 = vld [vmem:[%s11730_s5 + $0x1088] sm:$0xff] }
 0x24f   : > { %8513 = vmatpush1.bf16.msra.mxu1 %v8512_v4  ;;  %8003 = vmatprep.subr.bf16.mxu0 %v8002_v5  ;;  %v1157_v4 = vld [vmem:[%s11730_s5 + $0xf40] sm:$0xff]  ;;  %v1202_v63 = vld [vmem:[%s11730_s5 + $0x10a8] sm:$0xff] }
 0x250   : > { %8515 = vmatprep.subr.bf16.mxu1 %v8514_v9  ;;  %v1161_v5 = vld [vmem:[%s11730_s5 + $0xf60] sm:$0xff]  ;;  %v1166_v9 = vld [vmem:[%s11730_s5 + $0xf88] sm:$0xff] }
 0x251   : > { %v8024_v14 = vpack.c.bf16 %v1161_v5, %v1157_v4  ;;  %v8042_v4 = vpack.c.bf16 %v1202_v63, %v1198_v62  ;;  %v1197_v5 = vld [vmem:[%s11730_s5 + $0x1080] sm:$0xff]  ;;  %v1238_v62 = vld [vmem:[%s11730_s5 + $0x11c8] sm:$0xff] }
 0x252   : > { %8005 = vmatpush1.bf16.msra.mxu0 %v8004_v16  ;;  %v8026_v16 = vpack.c.bf16 %v1170_v10, %v1166_v9  ;;  %v1203_v9 = vld [vmem:[%s11730_s5 + $0x10b0] sm:$0xff]  ;;  %v1206_v10 = vld [vmem:[%s11730_s5 + $0x10c8] sm:$0xff] }
 0x253   : > { %8517 = vmatpush1.bf16.msra.mxu1 %v8516_v17  ;;  %8007 = vmatprep.subr.bf16.mxu0 %v8006_v18  ;;  %v1165_v17 = vld [vmem:[%s11730_s5 + $0xf80] sm:$0xff]  ;;  %v1242_v63 = vld [vmem:[%s11730_s5 + $0x11e8] sm:$0xff] }
 0x254   : > { %8519 = vmatprep.subr.bf16.mxu1 %v8518_v22  ;;  %v1169_v18 = vld [vmem:[%s11730_s5 + $0xfa0] sm:$0xff]  ;;  %v1174_v22 = vld [vmem:[%s11730_s5 + $0xfc8] sm:$0xff] }
 0x255   : > { %v8028_v28 = vpack.c.bf16 %v1169_v18, %v1165_v17  ;;  %v1205_v17 = vld [vmem:[%s11730_s5 + $0x10c0] sm:$0xff] }
 0x256   : > { %8009 = vmatpush1.bf16.msra.mxu0 %v8008_v30  ;;  %v8030_v30 = vpack.c.bf16 %v1178_v24, %v1174_v22  ;;  %v1209_v18 = vld [vmem:[%s11730_s5 + $0x10e0] sm:$0xff]  ;;  %v1214_v22 = vld [vmem:[%s11730_s5 + $0x1108] sm:$0xff] }
 0x257   : > { %8521 = vmatpush1.bf16.msra.mxu1 %v8520_v31  ;;  %8011 = vmatprep.subr.bf16.mxu0 %v8010_v32  ;;  %v1173_v31 = vld [vmem:[%s11730_s5 + $0xfc0] sm:$0xff]  ;;  %v1218_v24 = vld [vmem:[%s11730_s5 + $0x1128] sm:$0xff] }
 0x258   : > { %8523 = vmatprep.subr.bf16.mxu1 %v8522_v37  ;;  %v1177_v32 = vld [vmem:[%s11730_s5 + $0xfe0] sm:$0xff]  ;;  %v1182_v37 = vld [vmem:[%s11730_s5 + $0x1008] sm:$0xff] }
 0x259   : > { %v8032_v42 = vpack.c.bf16 %v1177_v32, %v1173_v31  ;;  %v1213_v31 = vld [vmem:[%s11730_s5 + $0x1100] sm:$0xff] }
 0x25a   : > { %8013 = vmatpush1.bf16.msra.mxu0 %v8012_v43  ;;  %v8544_v43 = vpack.c.bf16 %v1179_v36, %v1175_v33  ;;  %v1217_v32 = vld [vmem:[%s11730_s5 + $0x1120] sm:$0xff]  ;;  %v1215_v33 = vld [vmem:[%s11730_s5 + $0x1110] sm:$0xff] }
 0x25b   : > { %8525 = vmatpush1.bf16.msra.mxu1 %v8524_v45  ;;  %8015 = vmatprep.subr.bf16.mxu0 %v8014_v46  ;;  %v8034_v45 = vpack.c.bf16 %v1186_v38, %v1182_v37  ;;  %v1181_v46 = vld [vmem:[%s11730_s5 + $0x1000] sm:$0xff]  ;;  %v1219_v36 = vld [vmem:[%s11730_s5 + $0x1130] sm:$0xff]  ;;  %v1222_v37 = vld [vmem:[%s11730_s5 + $0x1148] sm:$0xff] }
 0x25c   : > { %8527 = vmatprep.subr.bf16.mxu1 %v8526_v25  ;;  %v1187_v25 = vld [vmem:[%s11730_s5 + $0x1030] sm:$0xff]  ;;  %v1226_v38 = vld [vmem:[%s11730_s5 + $0x1168] sm:$0xff] }
 0x25e   : > { %8017 = vmatpush1.bf16.msra.mxu0 %v8016_v55  ;;  %v8036_v55 = vpack.c.bf16 %v1185_v47, %v1181_v46  ;;  %v1221_v46 = vld [vmem:[%s11730_s5 + $0x1140] sm:$0xff] }
 0x25f   : > { %8529 = vmatpush1.bf16.msra.mxu1 %v8528_v56  ;;  %8019 = vmatprep.subr.bf16.mxu0 %v8018_v57  ;;  %v8548_v56 = vpack.c.bf16 %v1187_v25, %v1183_v48  ;;  %v8038_v57 = vpack.c.bf16 %v1194_v51, %v1190_v50  ;;  %v1225_v47 = vld [vmem:[%s11730_s5 + $0x1160] sm:$0xff]  ;;  %v1223_v48 = vld [vmem:[%s11730_s5 + $0x1150] sm:$0xff]  ;;  %v1230_v50 = vld [vmem:[%s11730_s5 + $0x1188] sm:$0xff] }
 0x260   : > { %8531 = vmatprep.subr.bf16.mxu1 %v8530_v60  ;;  %v8550_v60 = vpack.c.bf16 %v1196_v54, %v1192_v53  ;;  %v1227_v25 = vld [vmem:[%s11730_s5 + $0x1170] sm:$0xff]  ;;  %v1234_v51 = vld [vmem:[%s11730_s5 + $0x11a8] sm:$0xff]  ;;  %v1232_v53 = vld [vmem:[%s11730_s5 + $0x1198] sm:$0xff] }
 0x261   : > { %v1236_v54 = vld [vmem:[%s11730_s5 + $0x11b8] sm:$0xff] }
 0x262   : > { %8021 = vmatpush1.bf16.msra.mxu0 %v8020_v2  ;;  %v1204_v2 = vld [vmem:[%s11730_s5 + $0x10b8] sm:$0xff] }
 0x263   : > { %8533 = vmatpush1.bf16.msra.mxu1 %v8532_v3  ;;  %8023 = vmatprep.subr.bf16.mxu0 %v8022_v41  ;;  %v8040_v3 = vpack.c.bf16 %v1193_v58, %v1189_v23  ;;  %v8552_v41 = vpack.c.bf16 %v1195_v61, %v1191_v59  ;;  %v8554_v8 = vpack.c.bf16 %v1204_v2, %v1200_v1  ;;  %v1229_v23 = vld [vmem:[%s11730_s5 + $0x1180] sm:$0xff]  ;;  %v1231_v59 = vld [vmem:[%s11730_s5 + $0x1190] sm:$0xff]  ;;  %v1244_v1 = vld [vmem:[%s11730_s5 + $0x11f8] sm:$0xff] }
 0x264   : > { %8535 = vmatprep.subr.bf16.mxu1 %v8534_v7  ;;  %v1199_v7 = vld [vmem:[%s11730_s5 + $0x1090] sm:$0xff]  ;;  %v1233_v58 = vld [vmem:[%s11730_s5 + $0x11a0] sm:$0xff] }
 0x265   : > { %v1235_v61 = vld [vmem:[%s11730_s5 + $0x11b0] sm:$0xff]  ;;  %v8060_v2 = vpack.c.bf16 %v1233_v58, %v1229_v23  ;;  %v1273_v23 = vld [vmem:[%s11730_s5 + $0x12e0] sm:$0xff] }
 0x266   : > { %8025 = vmatpush1.bf16.msra.mxu0 %v8024_v14  ;;  %v8044_v14 = vpack.c.bf16 %v1201_v6, %v1197_v5  ;;  %v1241_v5 = vld [vmem:[%s11730_s5 + $0x11e0] sm:$0xff]  ;;  %v1239_v6 = vld [vmem:[%s11730_s5 + $0x11d0] sm:$0xff] }
 0x267   : > { %8537 = vmatpush1.bf16.msra.mxu1 %v8536_v15  ;;  %8027 = vmatprep.subr.bf16.mxu0 %v8026_v16  ;;  %v8556_v15 = vpack.c.bf16 %v1203_v9, %v1199_v7  ;;  %v8046_v16 = vpack.c.bf16 %v1210_v12, %v1206_v10  ;;  %v1246_v9 = vld [vmem:[%s11730_s5 + $0x1208] sm:$0xff]  ;;  %v1248_v12 = vld [vmem:[%s11730_s5 + $0x1218] sm:$0xff]  ;;  %v1271_v58 = vld [vmem:[%s11730_s5 + $0x12d0] sm:$0xff] }
 0x268   : > { %8539 = vmatprep.subr.bf16.mxu1 %v8538_v20  ;;  %v1250_v10 = vld [vmem:[%s11730_s5 + $0x1228] sm:$0xff] }
 0x26a   : > { %8029 = vmatpush1.bf16.msra.mxu0 %v8028_v28  ;;  %v8048_v28 = vpack.c.bf16 %v1209_v18, %v1205_v17  ;;  %v1249_v17 = vld [vmem:[%s11730_s5 + $0x1220] sm:$0xff]  ;;  %v1247_v18 = vld [vmem:[%s11730_s5 + $0x1210] sm:$0xff] }
 0x26b   : > { %8541 = vmatpush1.bf16.msra.mxu1 %v8540_v29  ;;  %8031 = vmatprep.subr.bf16.mxu0 %v8030_v30  ;;  %v8560_v29 = vpack.c.bf16 %v1211_v21, %v1207_v19  ;;  %v8050_v30 = vpack.c.bf16 %v1218_v24, %v1214_v22  ;;  %v1254_v21 = vld [vmem:[%s11730_s5 + $0x1248] sm:$0xff]  ;;  %v1256_v24 = vld [vmem:[%s11730_s5 + $0x1258] sm:$0xff] }
 0x26c   : > { %8543 = vmatprep.subr.bf16.mxu1 %v8542_v34  ;;  %v8562_v34 = vpack.c.bf16 %v1220_v27, %v1216_v26  ;;  %v1258_v22 = vld [vmem:[%s11730_s5 + $0x1268] sm:$0xff]  ;;  %v1260_v26 = vld [vmem:[%s11730_s5 + $0x1278] sm:$0xff] }
 0x26e   : > { %8033 = vmatpush1.bf16.msra.mxu0 %v8032_v42  ;;  %v8052_v42 = vpack.c.bf16 %v1217_v32, %v1213_v31  ;;  %v1257_v31 = vld [vmem:[%s11730_s5 + $0x1260] sm:$0xff]  ;;  %v1255_v32 = vld [vmem:[%s11730_s5 + $0x1250] sm:$0xff] }
 0x26f   : > { %8545 = vmatpush1.bf16.msra.mxu1 %v8544_v43  ;;  %8035 = vmatprep.subr.bf16.mxu0 %v8034_v45  ;;  %v8564_v43 = vpack.c.bf16 %v1219_v36, %v1215_v33  ;;  %v8054_v45 = vpack.c.bf16 %v1226_v38, %v1222_v37  ;;  %v8582_v33 = vpack.c.bf16 %v1260_v26, %v1256_v24  ;;  %v1262_v36 = vld [vmem:[%s11730_s5 + $0x1288] sm:$0xff]  ;;  %v1264_v38 = vld [vmem:[%s11730_s5 + $0x1298] sm:$0xff] }
 0x270   : > { %8547 = vmatprep.subr.bf16.mxu1 %v8546_v49  ;;  %v8566_v49 = vpack.c.bf16 %v1228_v40, %v1224_v39  ;;  %v1266_v37 = vld [vmem:[%s11730_s5 + $0x12a8] sm:$0xff]  ;;  %v1268_v39 = vld [vmem:[%s11730_s5 + $0x12b8] sm:$0xff] }
 0x271   : > { %2059 = vmatmul.mubr.f32.vlgmr.msra.gmra.mrb[0].mxu0 %v12215_v44  ;;  %v1300_v24 = vld [vmem:[%s11730_s5 + $0x13b8] sm:$0xff] }
 0x272   : > { %8037 = vmatpush1.bf16.msra.mxu0 %v8036_v55  ;;  %2627 = vmatmul.mubr.f32.vlgmr.msra.gmra.mrb[0].mxu1 %v12215_v44  ;;  %v1208_v44 = vld [vmem:[%s11730_s5 + $0x10d8] sm:$0xff]  ;;  %v8056_v55 = vpack.c.bf16 %v1225_v47, %v1221_v46  ;;  %v1265_v46 = vld [vmem:[%s11730_s5 + $0x12a0] sm:$0xff]  ;;  %v1263_v47 = vld [vmem:[%s11730_s5 + $0x1290] sm:$0xff] }
 0x273   : > { %8549 = vmatpush1.bf16.msra.mxu1 %v8548_v56  ;;  %8039 = vmatprep.subr.bf16.mxu0 %v8038_v57  ;;  %v8558_v20 = vpack.c.bf16 %v1212_v13, %v1208_v44  ;;  %v8568_v56 = vpack.c.bf16 %v1227_v25, %v1223_v48  ;;  %v8058_v57 = vpack.c.bf16 %v1234_v51, %v1230_v50  ;;  %v1252_v44 = vld [vmem:[%s11730_s5 + $0x1238] sm:$0xff]  ;;  %v1270_v25 = vld [vmem:[%s11730_s5 + $0x12c8] sm:$0xff] }
 0x274   : > { %8551 = vmatprep.subr.bf16.mxu1 %v8550_v60  ;;  %2129 = vmatprep.mubr.f32.mxu0 %v1746_v0  ;;  %v8570_v60 = vpack.c.bf16 %v1236_v54, %v1232_v53  ;;  %v8578_v19 = vpack.c.bf16 %v1252_v44, %v1248_v12  ;;  %v8586_v48 = vpack.c.bf16 %v1268_v39, %v1264_v38  ;;  %v1274_v50 = vld [vmem:[%s11730_s5 + $0x12e8] sm:$0xff]  ;;  %v1272_v51 = vld [vmem:[%s11730_s5 + $0x12d8] sm:$0xff] }
 0x275   : > { %2697 = vmatprep.mubr.f32.mxu1 %v1746_v0  ;;  %v1240_v0 = vld [vmem:[%s11730_s5 + $0x11d8] sm:$0xff] }
 0x276   : > { %8041 = vmatpush1.bf16.msra.mxu0 %v8040_v3  ;;  %v8572_v3 = vpack.c.bf16 %v1235_v61, %v1231_v59  ;;  %v8574_v7 = vpack.c.bf16 %v1244_v1, %v1240_v0  ;;  %v1276_v53 = vld [vmem:[%s11730_s5 + $0x12f8] sm:$0xff]  ;;  %v1278_v61 = vld [vmem:[%s11730_s5 + $0x1308] sm:$0xff] }
 0x277   : > { %8553 = vmatpush1.bf16.msra.mxu1 %v8552_v41  ;;  %8043 = vmatprep.subr.bf16.mxu0 %v8042_v4  ;;  %v8062_v41 = vpack.c.bf16 %v1242_v63, %v1238_v62  ;;  %v1237_v4 = vld [vmem:[%s11730_s5 + $0x11c0] sm:$0xff]  ;;  %v8590_v59 = vpack.c.bf16 %v1276_v53, %v1272_v51  ;;  %v1282_v62 = vld [vmem:[%s11730_s5 + $0x1328] sm:$0xff]  ;;  %v1280_v63 = vld [vmem:[%s11730_s5 + $0x1318] sm:$0xff] }
 0x278   : > { %8555 = vmatprep.subr.bf16.mxu1 %v8554_v8  ;;  %v1243_v8 = vld [vmem:[%s11730_s5 + $0x11f0] sm:$0xff]  ;;  %v8064_v13 = vpack.c.bf16 %v1241_v5, %v1237_v4  ;;  %v1284_v0 = vld [vmem:[%s11730_s5 + $0x1338] sm:$0xff]  ;;  %v1281_v4 = vld [vmem:[%s11730_s5 + $0x1320] sm:$0xff] }
 0x279   : > { %v1279_v5 = vld [vmem:[%s11730_s5 + $0x1310] sm:$0xff]  ;;  %v1292_v12 = vld [vmem:[%s11730_s5 + $0x1378] sm:$0xff] }
 0x27a   : > { %8045 = vmatpush1.bf16.msra.mxu0 %v8044_v14  ;;  %v8576_v14 = vpack.c.bf16 %v1243_v8, %v1239_v6  ;;  %v8594_v6 = vpack.c.bf16 %v1284_v0, %v1280_v63  ;;  %v1286_v8 = vld [vmem:[%s11730_s5 + $0x1348] sm:$0xff]  ;;  %v1308_v38 = vld [vmem:[%s11730_s5 + $0x13f8] sm:$0xff] }
 0x27b   : > { %8557 = vmatpush1.bf16.msra.mxu1 %v8556_v15  ;;  %8047 = vmatprep.subr.bf16.mxu0 %v8046_v16  ;;  %v8066_v15 = vpack.c.bf16 %v1250_v10, %v1246_v9  ;;  %v1245_v16 = vld [vmem:[%s11730_s5 + $0x1200] sm:$0xff]  ;;  %v1290_v9 = vld [vmem:[%s11730_s5 + $0x1368] sm:$0xff]  ;;  %v1288_v10 = vld [vmem:[%s11730_s5 + $0x1358] sm:$0xff] }
 0x27c   : > { %8559 = vmatprep.subr.bf16.mxu1 %v8558_v20  ;;  %v1251_v20 = vld [vmem:[%s11730_s5 + $0x1230] sm:$0xff]  ;;  %v8068_v27 = vpack.c.bf16 %v1249_v17, %v1245_v16  ;;  %v1289_v16 = vld [vmem:[%s11730_s5 + $0x1360] sm:$0xff]  ;;  %v1312_v51 = vld [vmem:[%s11730_s5 + $0x1418] sm:$0xff] }
 0x27d   : > { %v1287_v17 = vld [vmem:[%s11730_s5 + $0x1350] sm:$0xff]  ;;  %v1316_v53 = vld [vmem:[%s11730_s5 + $0x1438] sm:$0xff] }
 0x27e   : > { %8049 = vmatpush1.bf16.msra.mxu0 %v8048_v28  ;;  %v8580_v28 = vpack.c.bf16 %v1251_v20, %v1247_v18  ;;  %v8598_v18 = vpack.c.bf16 %v1292_v12, %v1288_v10  ;;  %v1294_v20 = vld [vmem:[%s11730_s5 + $0x1388] sm:$0xff]  ;;  %v1320_v63 = vld [vmem:[%s11730_s5 + $0x1458] sm:$0xff] }
 0x27f   : > { %8561 = vmatpush1.bf16.msra.mxu1 %v8560_v29  ;;  %8051 = vmatprep.subr.bf16.mxu0 %v8050_v30  ;;  %v8070_v29 = vpack.c.bf16 %v1258_v22, %v1254_v21  ;;  %v1253_v30 = vld [vmem:[%s11730_s5 + $0x1240] sm:$0xff]  ;;  %v1298_v21 = vld [vmem:[%s11730_s5 + $0x13a8] sm:$0xff]  ;;  %v1296_v22 = vld [vmem:[%s11730_s5 + $0x1398] sm:$0xff] }
 0x280   : > { %8563 = vmatprep.subr.bf16.mxu1 %v8562_v34  ;;  %v1259_v34 = vld [vmem:[%s11730_s5 + $0x1270] sm:$0xff]  ;;  %v8072_v40 = vpack.c.bf16 %v1257_v31, %v1253_v30  ;;  %v1297_v30 = vld [vmem:[%s11730_s5 + $0x13a0] sm:$0xff]  ;;  %v1324_v0 = vld [vmem:[%s11730_s5 + $0x1478] sm:$0xff] }
 0x281   : > { %v1295_v31 = vld [vmem:[%s11730_s5 + $0x1390] sm:$0xff]  ;;  %v1328_v12 = vld [vmem:[%s11730_s5 + $0x1498] sm:$0xff] }
 0x282   : > { %8053 = vmatpush1.bf16.msra.mxu0 %v8052_v42  ;;  %v8584_v42 = vpack.c.bf16 %v1259_v34, %v1255_v32  ;;  %v8602_v32 = vpack.c.bf16 %v1300_v24, %v1296_v22  ;;  %v1302_v34 = vld [vmem:[%s11730_s5 + $0x13c8] sm:$0xff]  ;;  %v1340_v24 = vld [vmem:[%s11730_s5 + $0x14f8] sm:$0xff] }
 0x283   : > { %8565 = vmatpush1.bf16.msra.mxu1 %v8564_v43  ;;  %8055 = vmatprep.subr.bf16.mxu0 %v8054_v45  ;;  %v8074_v43 = vpack.c.bf16 %v1266_v37, %v1262_v36  ;;  %v1261_v45 = vld [vmem:[%s11730_s5 + $0x1280] sm:$0xff]  ;;  %v1306_v36 = vld [vmem:[%s11730_s5 + $0x13e8] sm:$0xff]  ;;  %v1304_v37 = vld [vmem:[%s11730_s5 + $0x13d8] sm:$0xff] }
 0x284   : > { %8567 = vmatprep.subr.bf16.mxu1 %v8566_v49  ;;  %v1267_v49 = vld [vmem:[%s11730_s5 + $0x12b0] sm:$0xff]  ;;  %v8076_v54 = vpack.c.bf16 %v1265_v46, %v1261_v45  ;;  %v1305_v45 = vld [vmem:[%s11730_s5 + $0x13e0] sm:$0xff]  ;;  %v1338_v22 = vld [vmem:[%s11730_s5 + $0x14e8] sm:$0xff] }
 0x285   : > { %v1303_v46 = vld [vmem:[%s11730_s5 + $0x13d0] sm:$0xff] }
 0x286   : > { %8057 = vmatpush1.bf16.msra.mxu0 %v8056_v55  ;;  %v8588_v55 = vpack.c.bf16 %v1267_v49, %v1263_v47  ;;  %v8606_v47 = vpack.c.bf16 %v1308_v38, %v1304_v37  ;;  %v1310_v49 = vld [vmem:[%s11730_s5 + $0x1408] sm:$0xff]  ;;  %v1344_v37 = vld [vmem:[%s11730_s5 + $0x1518] sm:$0xff] }
 0x287   : > { %8569 = vmatpush1.bf16.msra.mxu1 %v8568_v56  ;;  %8059 = vmatprep.subr.bf16.mxu0 %v8058_v57  ;;  %v8078_v56 = vpack.c.bf16 %v1274_v50, %v1270_v25  ;;  %v1269_v57 = vld [vmem:[%s11730_s5 + $0x12c0] sm:$0xff]  ;;  %v1314_v25 = vld [vmem:[%s11730_s5 + $0x1428] sm:$0xff]  ;;  %v1731_v50 = vcombine.high %v12346_v35, %v12346_v35  ;;  %v1315_v35 = vld [vmem:[%s11730_s5 + $0x1430] sm:$0xff] }
 0x288   : > { %8571 = vmatprep.subr.bf16.mxu1 %v8570_v60  ;;  %v1275_v60 = vld [vmem:[%s11730_s5 + $0x12f0] sm:$0xff]  ;;  %v8080_v1 = vpack.c.bf16 %v1273_v23, %v1269_v57  ;;  %v1309_v57 = vld [vmem:[%s11730_s5 + $0x1400] sm:$0xff]  ;;  %v1348_v38 = vld [vmem:[%s11730_s5 + $0x1538] sm:$0xff] }
 0x289   : > { %v1313_v23 = vld [vmem:[%s11730_s5 + $0x1420] sm:$0xff] }
 0x28a   : > { %8061 = vmatpush1.bf16.msra.mxu0 %v8060_v2  ;;  %v8592_v2 = vpack.c.bf16 %v1275_v60, %v1271_v58  ;;  %v1311_v58 = vld [vmem:[%s11730_s5 + $0x1410] sm:$0xff]  ;;  %v1318_v60 = vld [vmem:[%s11730_s5 + $0x1448] sm:$0xff] }
 0x28b   : > { %8573 = vmatpush1.bf16.msra.mxu1 %v8572_v3  ;;  %8063 = vmatprep.subr.bf16.mxu0 %v8062_v41  ;;  %v8082_v3 = vpack.c.bf16 %v1282_v62, %v1278_v61  ;;  %v1277_v41 = vld [vmem:[%s11730_s5 + $0x1300] sm:$0xff]  ;;  %v1322_v61 = vld [vmem:[%s11730_s5 + $0x1468] sm:$0xff]  ;;  %v12493_v62 = vrot.slane %v1731_v50, %v11875_v11  ;;  %v1352_v50 = vld [vmem:[%s11730_s5 + $0x1558] sm:$0xff] }
 0x28c   : > { %8575 = vmatprep.subr.bf16.mxu1 %v8574_v7  ;;  %v1283_v7 = vld [vmem:[%s11730_s5 + $0x1330] sm:$0xff]  ;;  %v8084_v44 = vpack.c.bf16 %v1281_v4, %v1277_v41  ;;  %v1317_v41 = vld [vmem:[%s11730_s5 + $0x1440] sm:$0xff] }
 0x28d   : > { %v1321_v4 = vld [vmem:[%s11730_s5 + $0x1460] sm:$0xff]  ;;  %v1747_v10 = vcombine.high %v12493_v62, %v12493_v62 }
 0x28e   : > { %8065 = vmatpush1.bf16.msra.mxu0 %v8064_v13  ;;  %v8596_v13 = vpack.c.bf16 %v1283_v7, %v1279_v5  ;;  %v1319_v5 = vld [vmem:[%s11730_s5 + $0x1450] sm:$0xff] }
 0x28f   : > { %8577 = vmatpush1.bf16.msra.mxu1 %v8576_v14  ;;  %8067 = vmatprep.subr.bf16.mxu0 %v8066_v15  ;;  %v8086_v14 = vpack.c.bf16 %v1290_v9, %v1286_v8  ;;  %v1285_v15 = vld [vmem:[%s11730_s5 + $0x1340] sm:$0xff]  ;;  %v1323_v7 = vld [vmem:[%s11730_s5 + $0x1470] sm:$0xff]  ;;  %v1326_v8 = vld [vmem:[%s11730_s5 + $0x1488] sm:$0xff] }
 0x290   : > { %8579 = vmatprep.subr.bf16.mxu1 %v8578_v19  ;;  %v1291_v19 = vld [vmem:[%s11730_s5 + $0x1370] sm:$0xff]  ;;  %v8088_v26 = vpack.c.bf16 %v1289_v16, %v1285_v15  ;;  %v1330_v9 = vld [vmem:[%s11730_s5 + $0x14a8] sm:$0xff]  ;;  %v1325_v16 = vld [vmem:[%s11730_s5 + $0x1480] sm:$0xff] }
 0x291   : > { %v8106_v15 = vpack.c.bf16 %v1330_v9, %v1326_v8  ;;  %v1370_v8 = vld [vmem:[%s11730_s5 + $0x15e8] sm:$0xff]  ;;  %v1368_v9 = vld [vmem:[%s11730_s5 + $0x15d8] sm:$0xff] }
 0x292   : > { %8069 = vmatpush1.bf16.msra.mxu0 %v8068_v27  ;;  %v8600_v27 = vpack.c.bf16 %v1291_v19, %v1287_v17  ;;  %v1329_v17 = vld [vmem:[%s11730_s5 + $0x14a0] sm:$0xff] }
 0x293   : > { %8581 = vmatpush1.bf16.msra.mxu1 %v8580_v28  ;;  %8071 = vmatprep.subr.bf16.mxu0 %v8070_v29  ;;  %v8090_v28 = vpack.c.bf16 %v1298_v21, %v1294_v20  ;;  %v1293_v29 = vld [vmem:[%s11730_s5 + $0x1380] sm:$0xff]  ;;  %v1331_v20 = vld [vmem:[%s11730_s5 + $0x14b0] sm:$0xff]  ;;  %v1334_v21 = vld [vmem:[%s11730_s5 + $0x14c8] sm:$0xff] }
 0x294   : > { %8583 = vmatprep.subr.bf16.mxu1 %v8582_v33  ;;  %v1299_v33 = vld [vmem:[%s11730_s5 + $0x13b0] sm:$0xff]  ;;  %v8092_v39 = vpack.c.bf16 %v1297_v30, %v1293_v29  ;;  %v1333_v29 = vld [vmem:[%s11730_s5 + $0x14c0] sm:$0xff] }
 0x295   : > { %v1337_v30 = vld [vmem:[%s11730_s5 + $0x14e0] sm:$0xff] }
 0x296   : > { %8073 = vmatpush1.bf16.msra.mxu0 %v8072_v40  ;;  %v8604_v40 = vpack.c.bf16 %v1299_v33, %v1295_v31  ;;  %v1335_v31 = vld [vmem:[%s11730_s5 + $0x14d0] sm:$0xff] }
 0x297   : > { %8585 = vmatpush1.bf16.msra.mxu1 %v8584_v42  ;;  %8075 = vmatprep.subr.bf16.mxu0 %v8074_v43  ;;  %v8094_v42 = vpack.c.bf16 %v1306_v36, %v1302_v34  ;;  %v1301_v43 = vld [vmem:[%s11730_s5 + $0x13c0] sm:$0xff]  ;;  %v1339_v33 = vld [vmem:[%s11730_s5 + $0x14f0] sm:$0xff]  ;;  %v1342_v34 = vld [vmem:[%s11730_s5 + $0x1508] sm:$0xff] }
 0x298   : > { %8587 = vmatprep.subr.bf16.mxu1 %v8586_v48  ;;  %v1307_v48 = vld [vmem:[%s11730_s5 + $0x13f0] sm:$0xff]  ;;  %v1346_v36 = vld [vmem:[%s11730_s5 + $0x1528] sm:$0xff] }
 0x29a   : > { %8077 = vmatpush1.bf16.msra.mxu0 %v8076_v54  ;;  %v8096_v54 = vpack.c.bf16 %v1305_v45, %v1301_v43  ;;  %v1341_v43 = vld [vmem:[%s11730_s5 + $0x1500] sm:$0xff] }
 0x29b   : > { %8589 = vmatpush1.bf16.msra.mxu1 %v8588_v55  ;;  %8079 = vmatprep.subr.bf16.mxu0 %v8078_v56  ;;  %v8608_v55 = vpack.c.bf16 %v1307_v48, %v1303_v46  ;;  %v8098_v56 = vpack.c.bf16 %v1314_v25, %v1310_v49  ;;  %v1345_v45 = vld [vmem:[%s11730_s5 + $0x1520] sm:$0xff]  ;;  %v1343_v46 = vld [vmem:[%s11730_s5 + $0x1510] sm:$0xff]  ;;  %v1350_v49 = vld [vmem:[%s11730_s5 + $0x1548] sm:$0xff] }
 0x29c   : > { %8591 = vmatprep.subr.bf16.mxu1 %v8590_v59  ;;  %v8610_v59 = vpack.c.bf16 %v1316_v53, %v1312_v51  ;;  %v1347_v48 = vld [vmem:[%s11730_s5 + $0x1530] sm:$0xff]  ;;  %v1354_v25 = vld [vmem:[%s11730_s5 + $0x1568] sm:$0xff]  ;;  %v1356_v51 = vld [vmem:[%s11730_s5 + $0x1578] sm:$0xff]  ;;  %v8116_v53 = vpack.c.bf16 %v1345_v45, %v1341_v43 }
 0x29d   : > { %v1383_v43 = vld [vmem:[%s11730_s5 + $0x1650] sm:$0xff] }
 0x29e   : > { %8081 = vmatpush1.bf16.msra.mxu0 %v8080_v1  ;;  %v8100_v1 = vpack.c.bf16 %v1313_v23, %v1309_v57  ;;  %v1353_v57 = vld [vmem:[%s11730_s5 + $0x1560] sm:$0xff]  ;;  %v1351_v23 = vld [vmem:[%s11730_s5 + $0x1550] sm:$0xff] }
 0x29f   : > { %8593 = vmatpush1.bf16.msra.mxu1 %v8592_v2  ;;  %8083 = vmatprep.subr.bf16.mxu0 %v8082_v3  ;;  %v8612_v2 = vpack.c.bf16 %v1315_v35, %v1311_v58  ;;  %v8102_v3 = vpack.c.bf16 %v1322_v61, %v1318_v60  ;;  %v8630_v58 = vpack.c.bf16 %v1356_v51, %v1352_v50  ;;  %v1358_v35 = vld [vmem:[%s11730_s5 + $0x1588] sm:$0xff]  ;;  %v1360_v61 = vld [vmem:[%s11730_s5 + $0x1598] sm:$0xff] }
 0x2a0   : > { %8595 = vmatprep.subr.bf16.mxu1 %v8594_v6  ;;  %v8614_v6 = vpack.c.bf16 %v1324_v0, %v1320_v63  ;;  %v1362_v60 = vld [vmem:[%s11730_s5 + $0x15a8] sm:$0xff]  ;;  %v1364_v63 = vld [vmem:[%s11730_s5 + $0x15b8] sm:$0xff] }
 0x2a2   : > { %8085 = vmatpush1.bf16.msra.mxu0 %v8084_v44  ;;  %v1332_v44 = vld [vmem:[%s11730_s5 + $0x14b8] sm:$0xff] }
 0x2a3   : > { %8597 = vmatpush1.bf16.msra.mxu1 %v8596_v13  ;;  %8087 = vmatprep.subr.bf16.mxu0 %v8086_v14  ;;  %v8104_v13 = vpack.c.bf16 %v1321_v4, %v1317_v41  ;;  %v8616_v14 = vpack.c.bf16 %v1323_v7, %v1319_v5  ;;  %v8618_v19 = vpack.c.bf16 %v1332_v44, %v1328_v12  ;;  %v1361_v41 = vld [vmem:[%s11730_s5 + $0x15a0] sm:$0xff]  ;;  %v1359_v4 = vld [vmem:[%s11730_s5 + $0x1590] sm:$0xff]  ;;  %v1366_v7 = vld [vmem:[%s11730_s5 + $0x15c8] sm:$0xff] }
 0x2a4   : > { %8599 = vmatprep.subr.bf16.mxu1 %v8598_v18  ;;  %v1327_v18 = vld [vmem:[%s11730_s5 + $0x1490] sm:$0xff]  ;;  %v8634_v5 = vpack.c.bf16 %v1364_v63, %v1360_v61 }
 0x2a6   : > { %8089 = vmatpush1.bf16.msra.mxu0 %v8088_v26  ;;  %v8108_v26 = vpack.c.bf16 %v1329_v17, %v1325_v16  ;;  %v1367_v16 = vld [vmem:[%s11730_s5 + $0x15d0] sm:$0xff] }
 0x2a7   : > { %8601 = vmatpush1.bf16.msra.mxu1 %v8600_v27  ;;  %8091 = vmatprep.subr.bf16.mxu0 %v8090_v28  ;;  %v8620_v27 = vpack.c.bf16 %v1331_v20, %v1327_v18  ;;  %v8110_v28 = vpack.c.bf16 %v1338_v22, %v1334_v21  ;;  %v1371_v18 = vld [vmem:[%s11730_s5 + $0x15f0] sm:$0xff]  ;;  %v1378_v20 = vld [vmem:[%s11730_s5 + $0x1628] sm:$0xff]  ;;  %v1376_v21 = vld [vmem:[%s11730_s5 + $0x1618] sm:$0xff] }
 0x2a8   : > { %8603 = vmatprep.subr.bf16.mxu1 %v8602_v32  ;;  %v1380_v22 = vld [vmem:[%s11730_s5 + $0x1638] sm:$0xff] }
 0x2aa   : > { %8093 = vmatpush1.bf16.msra.mxu0 %v8092_v39  ;;  %v8112_v39 = vpack.c.bf16 %v1337_v30, %v1333_v29  ;;  %v1375_v29 = vld [vmem:[%s11730_s5 + $0x1610] sm:$0xff]  ;;  %v8642_v30 = vpack.c.bf16 %v1380_v22, %v1376_v21 }
 0x2ab   : > { %8605 = vmatpush1.bf16.msra.mxu1 %v8604_v40  ;;  %8095 = vmatprep.subr.bf16.mxu0 %v8094_v42  ;;  %v8624_v40 = vpack.c.bf16 %v1339_v33, %v1335_v31  ;;  %v8114_v42 = vpack.c.bf16 %v1346_v36, %v1342_v34  ;;  %v1379_v31 = vld [vmem:[%s11730_s5 + $0x1630] sm:$0xff]  ;;  %v1386_v33 = vld [vmem:[%s11730_s5 + $0x1668] sm:$0xff]  ;;  %v1384_v34 = vld [vmem:[%s11730_s5 + $0x1658] sm:$0xff] }
 0x2ac   : > { %8607 = vmatprep.subr.bf16.mxu1 %v8606_v47  ;;  %v8626_v47 = vpack.c.bf16 %v1348_v38, %v1344_v37  ;;  %v1388_v36 = vld [vmem:[%s11730_s5 + $0x1678] sm:$0xff]  ;;  %v8644_v38 = vpack.c.bf16 %v1379_v31, %v1375_v29  ;;  %v1419_v29 = vld [vmem:[%s11730_s5 + $0x1770] sm:$0xff]  ;;  %v1426_v31 = vld [vmem:[%s11730_s5 + $0x17a8] sm:$0xff] }
 0x2ad   : > { %v8646_v45 = vpack.c.bf16 %v1388_v36, %v1384_v34 }
 0x2ae   : > { %8097 = vmatpush1.bf16.msra.mxu0 %v8096_v54  ;;  %v8628_v54 = vpack.c.bf16 %v1347_v48, %v1343_v46  ;;  %v1387_v46 = vld [vmem:[%s11730_s5 + $0x1670] sm:$0xff]  ;;  %v1394_v48 = vld [vmem:[%s11730_s5 + $0x16a8] sm:$0xff] }
 0x2af   : > { %8609 = vmatpush1.bf16.msra.mxu1 %v8608_v55  ;;  %8099 = vmatprep.subr.bf16.mxu0 %v8098_v56  ;;  %v8118_v55 = vpack.c.bf16 %v1354_v25, %v1350_v49  ;;  %v1349_v56 = vld [vmem:[%s11730_s5 + $0x1540] sm:$0xff]  ;;  %v1392_v49 = vld [vmem:[%s11730_s5 + $0x1698] sm:$0xff]  ;;  %v8648_v51 = vpack.c.bf16 %v1387_v46, %v1383_v43  ;;  %v1427_v43 = vld [vmem:[%s11730_s5 + $0x17b0] sm:$0xff] }
 0x2b0   : > { %8611 = vmatprep.subr.bf16.mxu1 %v8610_v59  ;;  %v1355_v59 = vld [vmem:[%s11730_s5 + $0x1570] sm:$0xff]  ;;  %v8120_v0 = vpack.c.bf16 %v1353_v57, %v1349_v56  ;;  %v1396_v25 = vld [vmem:[%s11730_s5 + $0x16b8] sm:$0xff]  ;;  %v1434_v46 = vld [vmem:[%s11730_s5 + $0x17e8] sm:$0xff] }
 0x2b1   : > { %2130 = vmatmul.mubr.f32.vlgmr.msra.gmra.mrb[0].mxu0 %v12356_v52  ;;  %v1391_v56 = vld [vmem:[%s11730_s5 + $0x1690] sm:$0xff]  ;;  %v8650_v57 = vpack.c.bf16 %v1396_v25, %v1392_v49 }
 0x2b2   : > { %8101 = vmatpush1.bf16.msra.mxu0 %v8100_v1  ;;  %2698 = vmatmul.mubr.f32.vlgmr.msra.gmra.mrb[0].mxu1 %v12356_v52  ;;  %v1336_v52 = vld [vmem:[%s11730_s5 + $0x14d8] sm:$0xff]  ;;  %v8632_v1 = vpack.c.bf16 %v1355_v59, %v1351_v23  ;;  %v1395_v23 = vld [vmem:[%s11730_s5 + $0x16b0] sm:$0xff]  ;;  %v1402_v59 = vld [vmem:[%s11730_s5 + $0x16e8] sm:$0xff] }
 0x2b3   : > { %8613 = vmatpush1.bf16.msra.mxu1 %v8612_v2  ;;  %8103 = vmatprep.subr.bf16.mxu0 %v8102_v3  ;;  %v8622_v32 = vpack.c.bf16 %v1340_v24, %v1336_v52  ;;  %v8122_v2 = vpack.c.bf16 %v1362_v60, %v1358_v35  ;;  %v1357_v3 = vld [vmem:[%s11730_s5 + $0x1580] sm:$0xff]  ;;  %v8640_v24 = vpack.c.bf16 %v1371_v18, %v1367_v16  ;;  %v1400_v35 = vld [vmem:[%s11730_s5 + $0x16d8] sm:$0xff]  ;;  %v1411_v16 = vld [vmem:[%s11730_s5 + $0x1730] sm:$0xff] }
 0x2b4   : > { %8615 = vmatprep.subr.bf16.mxu1 %v8614_v6  ;;  %2200 = vmatprep.mubr.f32.mxu0 %v1747_v10  ;;  %v1363_v6 = vld [vmem:[%s11730_s5 + $0x15b0] sm:$0xff]  ;;  %v8124_v12 = vpack.c.bf16 %v1361_v41, %v1357_v3  ;;  %v1404_v60 = vld [vmem:[%s11730_s5 + $0x16f8] sm:$0xff]  ;;  %v8652_v63 = vpack.c.bf16 %v1395_v23, %v1391_v56  ;;  %v1418_v18 = vld [vmem:[%s11730_s5 + $0x1768] sm:$0xff] }
 0x2b5   : > { %2768 = vmatprep.mubr.f32.mxu1 %v1747_v10  ;;  %v1372_v10 = vld [vmem:[%s11730_s5 + $0x15f8] sm:$0xff]  ;;  %v8636_v44 = vpack.c.bf16 %v1363_v6, %v1359_v4  ;;  %v1399_v3 = vld [vmem:[%s11730_s5 + $0x16d0] sm:$0xff]  ;;  %v8654_v41 = vpack.c.bf16 %v1404_v60, %v1400_v35  ;;  %v1410_v6 = vld [vmem:[%s11730_s5 + $0x1728] sm:$0xff] }
 0x2b6   : > { %8105 = vmatpush1.bf16.msra.mxu0 %v8104_v13  ;;  %v8126_v13 = vpack.c.bf16 %v1370_v8, %v1366_v7  ;;  %v8638_v17 = vpack.c.bf16 %v1372_v10, %v1368_v9  ;;  %v1403_v4 = vld [vmem:[%s11730_s5 + $0x16f0] sm:$0xff]  ;;  %v1408_v7 = vld [vmem:[%s11730_s5 + $0x1718] sm:$0xff]  ;;  %v1442_v23 = vld [vmem:[%s11730_s5 + $0x1828] sm:$0xff] }
 0x2b7   : > { %8617 = vmatpush1.bf16.msra.mxu1 %v8616_v14  ;;  %8107 = vmatprep.subr.bf16.mxu0 %v8106_v15  ;;  %v1365_v14 = vld [vmem:[%s11730_s5 + $0x15c0] sm:$0xff]  ;;  %v1412_v8 = vld [vmem:[%s11730_s5 + $0x1738] sm:$0xff]  ;;  %v8656_v10 = vpack.c.bf16 %v1403_v4, %v1399_v3  ;;  %v1435_v56 = vld [vmem:[%s11730_s5 + $0x17f0] sm:$0xff] }
 0x2b8   : > { %8619 = vmatprep.subr.bf16.mxu1 %v8618_v19  ;;  %v1369_v15 = vld [vmem:[%s11730_s5 + $0x15e0] sm:$0xff]  ;;  %v1374_v19 = vld [vmem:[%s11730_s5 + $0x1608] sm:$0xff]  ;;  %v12624_v35 = vld [vmem:[%s15085_s6 + $0x18] sm:$0xff] }
 0x2b9   : > { %v8128_v52 = vpack.c.bf16 %v1369_v15, %v1365_v14  ;;  %v1407_v14 = vld [vmem:[%s11730_s5 + $0x1710] sm:$0xff]  ;;  %v8658_v15 = vpack.c.bf16 %v1412_v8, %v1408_v7  ;;  %v1446_v4 = vld [vmem:[%s11730_s5 + $0x1848] sm:$0xff]  ;;  %v1448_v7 = vld [vmem:[%s11730_s5 + $0x1858] sm:$0xff] }
 0x2ba   : > { %8109 = vmatpush1.bf16.msra.mxu0 %v8108_v26  ;;  %v8130_v26 = vpack.c.bf16 %v1378_v20, %v1374_v19  ;;  %v1416_v19 = vld [vmem:[%s11730_s5 + $0x1758] sm:$0xff]  ;;  %v8660_v22 = vpack.c.bf16 %v1411_v16, %v1407_v14  ;;  %v1447_v14 = vld [vmem:[%s11730_s5 + $0x1850] sm:$0xff] }
 0x2bb   : > { %8621 = vmatpush1.bf16.msra.mxu1 %v8620_v27  ;;  %8111 = vmatprep.subr.bf16.mxu0 %v8110_v28  ;;  %v1373_v27 = vld [vmem:[%s11730_s5 + $0x1600] sm:$0xff]  ;;  %v1420_v20 = vld [vmem:[%s11730_s5 + $0x1778] sm:$0xff]  ;;  %v1451_v16 = vld [vmem:[%s11730_s5 + $0x1870] sm:$0xff] }
 0x2bc   : > { %8623 = vmatprep.subr.bf16.mxu1 %v8622_v32  ;;  %v1377_v28 = vld [vmem:[%s11730_s5 + $0x1620] sm:$0xff]  ;;  %v1382_v32 = vld [vmem:[%s11730_s5 + $0x1648] sm:$0xff]  ;;  %v1452_v8 = vld [vmem:[%s11730_s5 + $0x1878] sm:$0xff] }
 0x2bd   : > { %v8132_v37 = vpack.c.bf16 %v1377_v28, %v1373_v27  ;;  %v1415_v27 = vld [vmem:[%s11730_s5 + $0x1750] sm:$0xff]  ;;  %v8662_v28 = vpack.c.bf16 %v1420_v20, %v1416_v19  ;;  %v1456_v20 = vld [vmem:[%s11730_s5 + $0x1898] sm:$0xff] }
 0x2be   : > { %8113 = vmatpush1.bf16.msra.mxu0 %v8112_v39  ;;  %v8134_v39 = vpack.c.bf16 %v1386_v33, %v1382_v32  ;;  %v1424_v32 = vld [vmem:[%s11730_s5 + $0x1798] sm:$0xff]  ;;  %v8664_v36 = vpack.c.bf16 %v1419_v29, %v1415_v27  ;;  %v1457_v27 = vld [vmem:[%s11730_s5 + $0x18a0] sm:$0xff] }
 0x2bf   : > { %8625 = vmatpush1.bf16.msra.mxu1 %v8624_v40  ;;  %8115 = vmatprep.subr.bf16.mxu0 %v8114_v42  ;;  %v1381_v40 = vld [vmem:[%s11730_s5 + $0x1640] sm:$0xff]  ;;  %v1428_v33 = vld [vmem:[%s11730_s5 + $0x17b8] sm:$0xff] }
 0x2c0   : > { %8627 = vmatprep.subr.bf16.mxu1 %v8626_v47  ;;  %v1385_v42 = vld [vmem:[%s11730_s5 + $0x1660] sm:$0xff]  ;;  %v1390_v47 = vld [vmem:[%s11730_s5 + $0x1688] sm:$0xff] }
 0x2c1   : > { %v8136_v50 = vpack.c.bf16 %v1385_v42, %v1381_v40  ;;  %v1423_v40 = vld [vmem:[%s11730_s5 + $0x1790] sm:$0xff]  ;;  %v8666_v42 = vpack.c.bf16 %v1428_v33, %v1424_v32  ;;  %v1466_v32 = vld [vmem:[%s11730_s5 + $0x18e8] sm:$0xff]  ;;  %v1468_v33 = vld [vmem:[%s11730_s5 + $0x18f8] sm:$0xff] }
 0x2c2   : > { %8117 = vmatpush1.bf16.msra.mxu0 %v8116_v53  ;;  %v8138_v53 = vpack.c.bf16 %v1394_v48, %v1390_v47  ;;  %v1432_v47 = vld [vmem:[%s11730_s5 + $0x17d8] sm:$0xff]  ;;  %v8668_v25 = vpack.c.bf16 %v1427_v43, %v1423_v40  ;;  %v1463_v40 = vld [vmem:[%s11730_s5 + $0x18d0] sm:$0xff] }
 0x2c3   : > { %8629 = vmatpush1.bf16.msra.mxu1 %v8628_v54  ;;  %8119 = vmatprep.subr.bf16.mxu0 %v8118_v55  ;;  %v1389_v54 = vld [vmem:[%s11730_s5 + $0x1680] sm:$0xff]  ;;  %v1436_v48 = vld [vmem:[%s11730_s5 + $0x17f8] sm:$0xff]  ;;  %v1467_v43 = vld [vmem:[%s11730_s5 + $0x18f0] sm:$0xff] }
 0x2c4   : > { %8631 = vmatprep.subr.bf16.mxu1 %v8630_v58  ;;  %v1393_v55 = vld [vmem:[%s11730_s5 + $0x16a0] sm:$0xff]  ;;  %v1398_v58 = vld [vmem:[%s11730_s5 + $0x16c8] sm:$0xff] }
 0x2c5   : > { %v8140_v61 = vpack.c.bf16 %v1393_v55, %v1389_v54  ;;  %v1431_v54 = vld [vmem:[%s11730_s5 + $0x17d0] sm:$0xff]  ;;  %v8670_v55 = vpack.c.bf16 %v1436_v48, %v1432_v47  ;;  %v1472_v47 = vld [vmem:[%s11730_s5 + $0x1918] sm:$0xff] }
 0x2c6   : > { %8121 = vmatpush1.bf16.msra.mxu0 %v8120_v0  ;;  %v8142_v0 = vpack.c.bf16 %v1402_v59, %v1398_v58  ;;  %v1440_v58 = vld [vmem:[%s11730_s5 + $0x1818] sm:$0xff] }
 0x2c7   : > { %8633 = vmatpush1.bf16.msra.mxu1 %v8632_v1  ;;  %8123 = vmatprep.subr.bf16.mxu0 %v8122_v2  ;;  %v1397_v1 = vld [vmem:[%s11730_s5 + $0x16c0] sm:$0xff]  ;;  %v1444_v59 = vld [vmem:[%s11730_s5 + $0x1838] sm:$0xff] }
 0x2c8   : > { %8635 = vmatprep.subr.bf16.mxu1 %v8634_v5  ;;  %v1401_v2 = vld [vmem:[%s11730_s5 + $0x16e0] sm:$0xff]  ;;  %v1406_v5 = vld [vmem:[%s11730_s5 + $0x1708] sm:$0xff]  ;;  %v8674_v3 = vpack.c.bf16 %v1444_v59, %v1440_v58  ;;  %v1476_v48 = vld [vmem:[%s11730_s5 + $0x1938] sm:$0xff] }
 0x2c9   : > { %v8144_v9 = vpack.c.bf16 %v1401_v2, %v1397_v1  ;;  %v1441_v1 = vld [vmem:[%s11730_s5 + $0x1820] sm:$0xff]  ;;  %v1439_v2 = vld [vmem:[%s11730_s5 + $0x1810] sm:$0xff]  ;;  %v1480_v58 = vld [vmem:[%s11730_s5 + $0x1958] sm:$0xff] }
 0x2ca   : > { %8125 = vmatpush1.bf16.msra.mxu0 %v8124_v12  ;;  %v8146_v12 = vpack.c.bf16 %v1410_v6, %v1406_v5  ;;  %v1450_v5 = vld [vmem:[%s11730_s5 + $0x1868] sm:$0xff]  ;;  %v12634_v6 = vrot.slane %v12624_v35, %v11875_v11  ;;  %v1484_v59 = vld [vmem:[%s11730_s5 + $0x1978] sm:$0xff] }
 0x2cb   : > { %8637 = vmatpush1.bf16.msra.mxu1 %v8636_v44  ;;  %8127 = vmatprep.subr.bf16.mxu0 %v8126_v13  ;;  %v1405_v44 = vld [vmem:[%s11730_s5 + $0x1700] sm:$0xff] }
 0x2cc   : > { %8639 = vmatprep.subr.bf16.mxu1 %v8638_v17  ;;  %v1409_v13 = vld [vmem:[%s11730_s5 + $0x1720] sm:$0xff]  ;;  %v1414_v17 = vld [vmem:[%s11730_s5 + $0x1748] sm:$0xff]  ;;  %v1763_v19 = vcombine.high %v12634_v6, %v12634_v6 }
 0x2cd   : > { %v8148_v21 = vpack.c.bf16 %v1409_v13, %v1405_v44  ;;  %v1445_v44 = vld [vmem:[%s11730_s5 + $0x1840] sm:$0xff] }
 0x2ce   : > { %8129 = vmatpush1.bf16.msra.mxu0 %v8128_v52  ;;  %v8150_v52 = vpack.c.bf16 %v1418_v18, %v1414_v17  ;;  %v1449_v13 = vld [vmem:[%s11730_s5 + $0x1860] sm:$0xff]  ;;  %v1454_v17 = vld [vmem:[%s11730_s5 + $0x1888] sm:$0xff] }
 0x2cf   : > { %8641 = vmatpush1.bf16.msra.mxu1 %v8640_v24  ;;  %8131 = vmatprep.subr.bf16.mxu0 %v8130_v26  ;;  %v1413_v24 = vld [vmem:[%s11730_s5 + $0x1740] sm:$0xff]  ;;  %v1458_v18 = vld [vmem:[%s11730_s5 + $0x18a8] sm:$0xff] }
 0x2d0   : > { %8643 = vmatprep.subr.bf16.mxu1 %v8642_v30  ;;  %v1417_v26 = vld [vmem:[%s11730_s5 + $0x1760] sm:$0xff]  ;;  %v1422_v30 = vld [vmem:[%s11730_s5 + $0x1788] sm:$0xff] }
 0x2d1   : > { %v8152_v34 = vpack.c.bf16 %v1417_v26, %v1413_v24  ;;  %v8170_v24 = vpack.c.bf16 %v1458_v18, %v1454_v17  ;;  %v1453_v26 = vld [vmem:[%s11730_s5 + $0x1880] sm:$0xff]  ;;  %v1494_v17 = vld [vmem:[%s11730_s5 + $0x19c8] sm:$0xff] }
 0x2d2   : > { %8133 = vmatpush1.bf16.msra.mxu0 %v8132_v37  ;;  %v8154_v37 = vpack.c.bf16 %v1426_v31, %v1422_v30  ;;  %v1459_v30 = vld [vmem:[%s11730_s5 + $0x18b0] sm:$0xff]  ;;  %v1462_v31 = vld [vmem:[%s11730_s5 + $0x18c8] sm:$0xff] }
 0x2d3   : > { %8645 = vmatpush1.bf16.msra.mxu1 %v8644_v38  ;;  %8135 = vmatprep.subr.bf16.mxu0 %v8134_v39  ;;  %v1421_v38 = vld [vmem:[%s11730_s5 + $0x1780] sm:$0xff]  ;;  %v1498_v18 = vld [vmem:[%s11730_s5 + $0x19e8] sm:$0xff] }
 0x2d4   : > { %8647 = vmatprep.subr.bf16.mxu1 %v8646_v45  ;;  %v1425_v39 = vld [vmem:[%s11730_s5 + $0x17a0] sm:$0xff]  ;;  %v1430_v45 = vld [vmem:[%s11730_s5 + $0x17c8] sm:$0xff] }
 0x2d5   : > { %v8156_v49 = vpack.c.bf16 %v1425_v39, %v1421_v38  ;;  %v1461_v38 = vld [vmem:[%s11730_s5 + $0x18c0] sm:$0xff] }
 0x2d6   : > { %8137 = vmatpush1.bf16.msra.mxu0 %v8136_v50  ;;  %v8158_v50 = vpack.c.bf16 %v1434_v46, %v1430_v45  ;;  %v1465_v39 = vld [vmem:[%s11730_s5 + $0x18e0] sm:$0xff]  ;;  %v1470_v45 = vld [vmem:[%s11730_s5 + $0x1908] sm:$0xff] }
 0x2d7   : > { %8649 = vmatpush1.bf16.msra.mxu1 %v8648_v51  ;;  %8139 = vmatprep.subr.bf16.mxu0 %v8138_v53  ;;  %v1429_v51 = vld [vmem:[%s11730_s5 + $0x17c0] sm:$0xff]  ;;  %v1474_v46 = vld [vmem:[%s11730_s5 + $0x1928] sm:$0xff] }
 0x2d8   : > { %8651 = vmatprep.subr.bf16.mxu1 %v8650_v57  ;;  %v1433_v53 = vld [vmem:[%s11730_s5 + $0x17e0] sm:$0xff]  ;;  %v1438_v57 = vld [vmem:[%s11730_s5 + $0x1808] sm:$0xff] }
 0x2d9   : > { %v8160_v60 = vpack.c.bf16 %v1433_v53, %v1429_v51  ;;  %v1469_v51 = vld [vmem:[%s11730_s5 + $0x1900] sm:$0xff] }
 0x2da   : > { %8141 = vmatpush1.bf16.msra.mxu0 %v8140_v61  ;;  %v8672_v61 = vpack.c.bf16 %v1435_v56, %v1431_v54  ;;  %v1473_v53 = vld [vmem:[%s11730_s5 + $0x1920] sm:$0xff]  ;;  %v1471_v54 = vld [vmem:[%s11730_s5 + $0x1910] sm:$0xff] }
 0x2db   : > { %8653 = vmatpush1.bf16.msra.mxu1 %v8652_v63  ;;  %8143 = vmatprep.subr.bf16.mxu0 %v8142_v0  ;;  %v8162_v63 = vpack.c.bf16 %v1442_v23, %v1438_v57  ;;  %v1437_v0 = vld [vmem:[%s11730_s5 + $0x1800] sm:$0xff]  ;;  %v1475_v56 = vld [vmem:[%s11730_s5 + $0x1930] sm:$0xff]  ;;  %v1478_v57 = vld [vmem:[%s11730_s5 + $0x1948] sm:$0xff] }
 0x2dc   : > { %8655 = vmatprep.subr.bf16.mxu1 %v8654_v41  ;;  %v1443_v41 = vld [vmem:[%s11730_s5 + $0x1830] sm:$0xff]  ;;  %v1482_v23 = vld [vmem:[%s11730_s5 + $0x1968] sm:$0xff] }
 0x2de   : > { %8145 = vmatpush1.bf16.msra.mxu0 %v8144_v9  ;;  %v8164_v9 = vpack.c.bf16 %v1441_v1, %v1437_v0  ;;  %v1477_v0 = vld [vmem:[%s11730_s5 + $0x1940] sm:$0xff] }
 0x2df   : > { %8657 = vmatpush1.bf16.msra.mxu1 %v8656_v10  ;;  %8147 = vmatprep.subr.bf16.mxu0 %v8146_v12  ;;  %v8676_v10 = vpack.c.bf16 %v1443_v41, %v1439_v2  ;;  %v8166_v12 = vpack.c.bf16 %v1450_v5, %v1446_v4  ;;  %v1481_v1 = vld [vmem:[%s11730_s5 + $0x1960] sm:$0xff]  ;;  %v1479_v2 = vld [vmem:[%s11730_s5 + $0x1950] sm:$0xff]  ;;  %v1486_v4 = vld [vmem:[%s11730_s5 + $0x1988] sm:$0xff] }
 0x2e0   : > { %8659 = vmatprep.subr.bf16.mxu1 %v8658_v15  ;;  %v8678_v15 = vpack.c.bf16 %v1452_v8, %v1448_v7  ;;  %v1483_v41 = vld [vmem:[%s11730_s5 + $0x1970] sm:$0xff]  ;;  %v1490_v5 = vld [vmem:[%s11730_s5 + $0x19a8] sm:$0xff]  ;;  %v1488_v7 = vld [vmem:[%s11730_s5 + $0x1998] sm:$0xff] }
 0x2e1   : > { %v1492_v8 = vld [vmem:[%s11730_s5 + $0x19b8] sm:$0xff] }
 0x2e2   : > { %8149 = vmatpush1.bf16.msra.mxu0 %v8148_v21  ;;  %v1460_v21 = vld [vmem:[%s11730_s5 + $0x18b8] sm:$0xff] }
 0x2e3   : > { %8661 = vmatpush1.bf16.msra.mxu1 %v8660_v22  ;;  %8151 = vmatprep.subr.bf16.mxu0 %v8150_v52  ;;  %v8168_v22 = vpack.c.bf16 %v1449_v13, %v1445_v44  ;;  %v8680_v52 = vpack.c.bf16 %v1451_v16, %v1447_v14  ;;  %v8682_v29 = vpack.c.bf16 %v1460_v21, %v1456_v20  ;;  %v1485_v44 = vld [vmem:[%s11730_s5 + $0x1980] sm:$0xff]  ;;  %v1487_v14 = vld [vmem:[%s11730_s5 + $0x1990] sm:$0xff]  ;;  %v1500_v20 = vld [vmem:[%s11730_s5 + $0x19f8] sm:$0xff] }
 0x2e4   : > { %8663 = vmatprep.subr.bf16.mxu1 %v8662_v28  ;;  %v1455_v28 = vld [vmem:[%s11730_s5 + $0x1890] sm:$0xff]  ;;  %v1489_v13 = vld [vmem:[%s11730_s5 + $0x19a0] sm:$0xff] }
 0x2e5   : > { %v1491_v16 = vld [vmem:[%s11730_s5 + $0x19b0] sm:$0xff]  ;;  %v8188_v21 = vpack.c.bf16 %v1489_v13, %v1485_v44  ;;  %v1529_v44 = vld [vmem:[%s11730_s5 + $0x1ae0] sm:$0xff] }
 0x2e6   : > { %8153 = vmatpush1.bf16.msra.mxu0 %v8152_v34  ;;  %v8172_v34 = vpack.c.bf16 %v1457_v27, %v1453_v26  ;;  %v1497_v26 = vld [vmem:[%s11730_s5 + $0x19e0] sm:$0xff]  ;;  %v1495_v27 = vld [vmem:[%s11730_s5 + $0x19d0] sm:$0xff] }
 0x2e7   : > { %8665 = vmatpush1.bf16.msra.mxu1 %v8664_v36  ;;  %8155 = vmatprep.subr.bf16.mxu0 %v8154_v37  ;;  %v8684_v36 = vpack.c.bf16 %v1459_v30, %v1455_v28  ;;  %v8174_v37 = vpack.c.bf16 %v1466_v32, %v1462_v31  ;;  %v1502_v30 = vld [vmem:[%s11730_s5 + $0x1a08] sm:$0xff]  ;;  %v1504_v32 = vld [vmem:[%s11730_s5 + $0x1a18] sm:$0xff]  ;;  %v1527_v13 = vld [vmem:[%s11730_s5 + $0x1ad0] sm:$0xff] }
 0x2e8   : > { %8667 = vmatprep.subr.bf16.mxu1 %v8666_v42  ;;  %v1506_v31 = vld [vmem:[%s11730_s5 + $0x1a28] sm:$0xff] }
 0x2ea   : > { %8157 = vmatpush1.bf16.msra.mxu0 %v8156_v49  ;;  %v8176_v49 = vpack.c.bf16 %v1465_v39, %v1461_v38  ;;  %v1505_v38 = vld [vmem:[%s11730_s5 + $0x1a20] sm:$0xff]  ;;  %v1503_v39 = vld [vmem:[%s11730_s5 + $0x1a10] sm:$0xff] }
 0x2eb   : > { %8669 = vmatpush1.bf16.msra.mxu1 %v8668_v25  ;;  %8159 = vmatprep.subr.bf16.mxu0 %v8158_v50  ;;  %v8688_v25 = vpack.c.bf16 %v1467_v43, %v1463_v40  ;;  %v8178_v50 = vpack.c.bf16 %v1474_v46, %v1470_v45  ;;  %v1510_v43 = vld [vmem:[%s11730_s5 + $0x1a48] sm:$0xff]  ;;  %v1512_v46 = vld [vmem:[%s11730_s5 + $0x1a58] sm:$0xff] }
 0x2ec   : > { %8671 = vmatprep.subr.bf16.mxu1 %v8670_v55  ;;  %v8690_v55 = vpack.c.bf16 %v1476_v48, %v1472_v47  ;;  %v1514_v45 = vld [vmem:[%s11730_s5 + $0x1a68] sm:$0xff]  ;;  %v1516_v47 = vld [vmem:[%s11730_s5 + $0x1a78] sm:$0xff] }
 0x2ee   : > { %8161 = vmatpush1.bf16.msra.mxu0 %v8160_v60  ;;  %v8180_v60 = vpack.c.bf16 %v1473_v53, %v1469_v51  ;;  %v1513_v51 = vld [vmem:[%s11730_s5 + $0x1a60] sm:$0xff]  ;;  %v1511_v53 = vld [vmem:[%s11730_s5 + $0x1a50] sm:$0xff] }
 0x2ef   : > { %8673 = vmatpush1.bf16.msra.mxu1 %v8672_v61  ;;  %8163 = vmatprep.subr.bf16.mxu0 %v8162_v63  ;;  %v8692_v61 = vpack.c.bf16 %v1475_v56, %v1471_v54  ;;  %v8182_v63 = vpack.c.bf16 %v1482_v23, %v1478_v57  ;;  %v8710_v54 = vpack.c.bf16 %v1516_v47, %v1512_v46  ;;  %v1518_v56 = vld [vmem:[%s11730_s5 + $0x1a88] sm:$0xff]  ;;  %v1520_v23 = vld [vmem:[%s11730_s5 + $0x1a98] sm:$0xff] }
 0x2f0   : > { %8675 = vmatprep.subr.bf16.mxu1 %v8674_v3  ;;  %v8694_v3 = vpack.c.bf16 %v1484_v59, %v1480_v58  ;;  %v1522_v57 = vld [vmem:[%s11730_s5 + $0x1aa8] sm:$0xff]  ;;  %v1524_v58 = vld [vmem:[%s11730_s5 + $0x1ab8] sm:$0xff] }
 0x2f1   : > { %2201 = vmatmul.mubr.f32.vlgmr.msra.gmra.mrb[0].mxu0 %v12493_v62  ;;  %v1556_v46 = vld [vmem:[%s11730_s5 + $0x1bb8] sm:$0xff] }
 0x2f2   : > { %8165 = vmatpush1.bf16.msra.mxu0 %v8164_v9  ;;  %2769 = vmatmul.mubr.f32.vlgmr.msra.gmra.mrb[0].mxu1 %v12493_v62  ;;  %v1464_v62 = vld [vmem:[%s11730_s5 + $0x18d8] sm:$0xff]  ;;  %v8184_v9 = vpack.c.bf16 %v1481_v1, %v1477_v0  ;;  %v1521_v0 = vld [vmem:[%s11730_s5 + $0x1aa0] sm:$0xff]  ;;  %v1519_v1 = vld [vmem:[%s11730_s5 + $0x1a90] sm:$0xff] }
 0x2f3   : > { %8677 = vmatpush1.bf16.msra.mxu1 %v8676_v10  ;;  %8167 = vmatprep.subr.bf16.mxu0 %v8166_v12  ;;  %v8686_v42 = vpack.c.bf16 %v1468_v33, %v1464_v62  ;;  %v8696_v10 = vpack.c.bf16 %v1483_v41, %v1479_v2  ;;  %v8186_v12 = vpack.c.bf16 %v1490_v5, %v1486_v4  ;;  %v1508_v62 = vld [vmem:[%s11730_s5 + $0x1a38] sm:$0xff]  ;;  %v1526_v41 = vld [vmem:[%s11730_s5 + $0x1ac8] sm:$0xff] }
 0x2f4   : > { %8679 = vmatprep.subr.bf16.mxu1 %v8678_v15  ;;  %2271 = vmatprep.mubr.f32.mxu0 %v1763_v19  ;;  %v8698_v15 = vpack.c.bf16 %v1492_v8, %v1488_v7  ;;  %v8706_v40 = vpack.c.bf16 %v1508_v62, %v1504_v32  ;;  %v8714_v2 = vpack.c.bf16 %v1524_v58, %v1520_v23  ;;  %v1530_v4 = vld [vmem:[%s11730_s5 + $0x1ae8] sm:$0xff]  ;;  %v1528_v5 = vld [vmem:[%s11730_s5 + $0x1ad8] sm:$0xff] }
 0x2f5   : > { %2839 = vmatprep.mubr.f32.mxu1 %v1763_v19  ;;  %v1496_v19 = vld [vmem:[%s11730_s5 + $0x19d8] sm:$0xff] }
 0x2f6   : > { %8169 = vmatpush1.bf16.msra.mxu0 %v8168_v22  ;;  %v8700_v22 = vpack.c.bf16 %v1491_v16, %v1487_v14  ;;  %v8702_v28 = vpack.c.bf16 %v1500_v20, %v1496_v19  ;;  %v1532_v7 = vld [vmem:[%s11730_s5 + $0x1af8] sm:$0xff]  ;;  %v1534_v16 = vld [vmem:[%s11730_s5 + $0x1b08] sm:$0xff] }
 0x2f7   : > { %8681 = vmatpush1.bf16.msra.mxu1 %v8680_v52  ;;  %8171 = vmatprep.subr.bf16.mxu0 %v8170_v24  ;;  %v8190_v52 = vpack.c.bf16 %v1498_v18, %v1494_v17  ;;  %v1493_v24 = vld [vmem:[%s11730_s5 + $0x19c0] sm:$0xff]  ;;  %v8718_v14 = vpack.c.bf16 %v1532_v7, %v1528_v5  ;;  %v1538_v17 = vld [vmem:[%s11730_s5 + $0x1b28] sm:$0xff]  ;;  %v1536_v18 = vld [vmem:[%s11730_s5 + $0x1b18] sm:$0xff] }
 0x2f8   : > { %8683 = vmatprep.subr.bf16.mxu1 %v8682_v29  ;;  %v1499_v29 = vld [vmem:[%s11730_s5 + $0x19f0] sm:$0xff]  ;;  %v8192_v33 = vpack.c.bf16 %v1497_v26, %v1493_v24  ;;  %v1540_v19 = vld [vmem:[%s11730_s5 + $0x1b38] sm:$0xff]  ;;  %v1537_v24 = vld [vmem:[%s11730_s5 + $0x1b20] sm:$0xff] }
 0x2f9   : > { %v1535_v26 = vld [vmem:[%s11730_s5 + $0x1b10] sm:$0xff]  ;;  %v1548_v32 = vld [vmem:[%s11730_s5 + $0x1b78] sm:$0xff] }
 0x2fa   : > { %8173 = vmatpush1.bf16.msra.mxu0 %v8172_v34  ;;  %v8704_v34 = vpack.c.bf16 %v1499_v29, %v1495_v27  ;;  %v8722_v27 = vpack.c.bf16 %v1540_v19, %v1536_v18  ;;  %v1542_v29 = vld [vmem:[%s11730_s5 + $0x1b48] sm:$0xff]  ;;  %v1564_v23 = vld [vmem:[%s11730_s5 + $0x1bf8] sm:$0xff] }
 0x2fb   : > { %8685 = vmatpush1.bf16.msra.mxu1 %v8684_v36  ;;  %8175 = vmatprep.subr.bf16.mxu0 %v8174_v37  ;;  %v8194_v36 = vpack.c.bf16 %v1506_v31, %v1502_v30  ;;  %v1501_v37 = vld [vmem:[%s11730_s5 + $0x1a00] sm:$0xff]  ;;  %v1546_v30 = vld [vmem:[%s11730_s5 + $0x1b68] sm:$0xff]  ;;  %v1544_v31 = vld [vmem:[%s11730_s5 + $0x1b58] sm:$0xff] }
 0x2fc   : > { %8687 = vmatprep.subr.bf16.mxu1 %v8686_v42  ;;  %v1507_v42 = vld [vmem:[%s11730_s5 + $0x1a30] sm:$0xff]  ;;  %v8196_v48 = vpack.c.bf16 %v1505_v38, %v1501_v37  ;;  %v1545_v37 = vld [vmem:[%s11730_s5 + $0x1b60] sm:$0xff]  ;;  %v1568_v5 = vld [vmem:[%s11730_s5 + $0x1c18] sm:$0xff] }
 0x2fd   : > { %v1543_v38 = vld [vmem:[%s11730_s5 + $0x1b50] sm:$0xff]  ;;  %v1572_v7 = vld [vmem:[%s11730_s5 + $0x1c38] sm:$0xff] }
 0x2fe   : > { %8177 = vmatpush1.bf16.msra.mxu0 %v8176_v49  ;;  %v8708_v49 = vpack.c.bf16 %v1507_v42, %v1503_v39  ;;  %v8726_v39 = vpack.c.bf16 %v1548_v32, %v1544_v31  ;;  %v1550_v42 = vld [vmem:[%s11730_s5 + $0x1b88] sm:$0xff]  ;;  %v1576_v18 = vld [vmem:[%s11730_s5 + $0x1c58] sm:$0xff] }
 0x2ff   : > { %8689 = vmatpush1.bf16.msra.mxu1 %v8688_v25  ;;  %8179 = vmatprep.subr.bf16.mxu0 %v8178_v50  ;;  %v8198_v25 = vpack.c.bf16 %v1514_v45, %v1510_v43  ;;  %v1509_v50 = vld [vmem:[%s11730_s5 + $0x1a40] sm:$0xff]  ;;  %v1554_v43 = vld [vmem:[%s11730_s5 + $0x1ba8] sm:$0xff]  ;;  %v1552_v45 = vld [vmem:[%s11730_s5 + $0x1b98] sm:$0xff] }
 0x300   : > { %8691 = vmatprep.subr.bf16.mxu1 %v8690_v55  ;;  %v1515_v55 = vld [vmem:[%s11730_s5 + $0x1a70] sm:$0xff]  ;;  %v8200_v59 = vpack.c.bf16 %v1513_v51, %v1509_v50  ;;  %v1553_v50 = vld [vmem:[%s11730_s5 + $0x1ba0] sm:$0xff]  ;;  %v1580_v19 = vld [vmem:[%s11730_s5 + $0x1c78] sm:$0xff] }
 0x301   : > { %v1551_v51 = vld [vmem:[%s11730_s5 + $0x1b90] sm:$0xff]  ;;  %v1584_v32 = vld [vmem:[%s11730_s5 + $0x1c98] sm:$0xff] }
 0x302   : > { %8181 = vmatpush1.bf16.msra.mxu0 %v8180_v60  ;;  %v8712_v60 = vpack.c.bf16 %v1515_v55, %v1511_v53  ;;  %v8730_v53 = vpack.c.bf16 %v1556_v46, %v1552_v45  ;;  %v1558_v55 = vld [vmem:[%s11730_s5 + $0x1bc8] sm:$0xff]  ;;  %v1596_v46 = vld [vmem:[%s11730_s5 + $0x1cf8] sm:$0xff] }
 0x303   : > { %8693 = vmatpush1.bf16.msra.mxu1 %v8692_v61  ;;  %8183 = vmatprep.subr.bf16.mxu0 %v8182_v63  ;;  %v8202_v61 = vpack.c.bf16 %v1522_v57, %v1518_v56  ;;  %v1517_v63 = vld [vmem:[%s11730_s5 + $0x1a80] sm:$0xff]  ;;  %v1562_v56 = vld [vmem:[%s11730_s5 + $0x1be8] sm:$0xff]  ;;  %v1560_v57 = vld [vmem:[%s11730_s5 + $0x1bd8] sm:$0xff] }
 0x304   : > { %8695 = vmatprep.subr.bf16.mxu1 %v8694_v3  ;;  %v1523_v3 = vld [vmem:[%s11730_s5 + $0x1ab0] sm:$0xff]  ;;  %v8204_v8 = vpack.c.bf16 %v1521_v0, %v1517_v63  ;;  %v1561_v63 = vld [vmem:[%s11730_s5 + $0x1be0] sm:$0xff]  ;;  %v1594_v45 = vld [vmem:[%s11730_s5 + $0x1ce8] sm:$0xff] }
 0x305   : > { %v1559_v0 = vld [vmem:[%s11730_s5 + $0x1bd0] sm:$0xff] }
 0x306   : > { %8185 = vmatpush1.bf16.msra.mxu0 %v8184_v9  ;;  %v8716_v9 = vpack.c.bf16 %v1523_v3, %v1519_v1  ;;  %v8734_v1 = vpack.c.bf16 %v1564_v23, %v1560_v57  ;;  %v1566_v3 = vld [vmem:[%s11730_s5 + $0x1c08] sm:$0xff]  ;;  %v1600_v57 = vld [vmem:[%s11730_s5 + $0x1d18] sm:$0xff] }
 0x307   : > { %8697 = vmatpush1.bf16.msra.mxu1 %v8696_v10  ;;  %8187 = vmatprep.subr.bf16.mxu0 %v8186_v12  ;;  %v8206_v10 = vpack.c.bf16 %v1530_v4, %v1526_v41  ;;  %v1525_v12 = vld [vmem:[%s11730_s5 + $0x1ac0] sm:$0xff]  ;;  %v1570_v41 = vld [vmem:[%s11730_s5 + $0x1c28] sm:$0xff]  ;;  %v1748_v4 = vcombine.high %v12624_v35, %v12624_v35  ;;  %v1571_v35 = vld [vmem:[%s11730_s5 + $0x1c30] sm:$0xff] }
 0x308   : > { %8699 = vmatprep.subr.bf16.mxu1 %v8698_v15  ;;  %v1531_v15 = vld [vmem:[%s11730_s5 + $0x1af0] sm:$0xff]  ;;  %v8208_v20 = vpack.c.bf16 %v1529_v44, %v1525_v12  ;;  %v1565_v12 = vld [vmem:[%s11730_s5 + $0x1c00] sm:$0xff]  ;;  %v1604_v23 = vld [vmem:[%s11730_s5 + $0x1d38] sm:$0xff] }
 0x309   : > { %v1569_v44 = vld [vmem:[%s11730_s5 + $0x1c20] sm:$0xff] }
 0x30a   : > { %8189 = vmatpush1.bf16.msra.mxu0 %v8188_v21  ;;  %v8720_v21 = vpack.c.bf16 %v1531_v15, %v1527_v13  ;;  %v1567_v13 = vld [vmem:[%s11730_s5 + $0x1c10] sm:$0xff]  ;;  %v1574_v15 = vld [vmem:[%s11730_s5 + $0x1c48] sm:$0xff] }
 0x30b   : > { %8701 = vmatpush1.bf16.msra.mxu1 %v8700_v22  ;;  %8191 = vmatprep.subr.bf16.mxu0 %v8190_v52  ;;  %v8210_v22 = vpack.c.bf16 %v1538_v17, %v1534_v16  ;;  %v1533_v52 = vld [vmem:[%s11730_s5 + $0x1b00] sm:$0xff]  ;;  %v1578_v16 = vld [vmem:[%s11730_s5 + $0x1c68] sm:$0xff]  ;;  %v12771_v17 = vrot.slane %v1748_v4, %v11875_v11  ;;  %v1608_v4 = vld [vmem:[%s11730_s5 + $0x1d58] sm:$0xff] }
 0x30c   : > { %8703 = vmatprep.subr.bf16.mxu1 %v8702_v28  ;;  %v1539_v28 = vld [vmem:[%s11730_s5 + $0x1b30] sm:$0xff]  ;;  %v8212_v62 = vpack.c.bf16 %v1537_v24, %v1533_v52  ;;  %v1573_v52 = vld [vmem:[%s11730_s5 + $0x1c40] sm:$0xff] }
 0x30d   : > { %v1577_v24 = vld [vmem:[%s11730_s5 + $0x1c60] sm:$0xff]  ;;  %v1764_v31 = vcombine.high %v12771_v17, %v12771_v17 }
 0x30e   : > { %8193 = vmatpush1.bf16.msra.mxu0 %v8192_v33  ;;  %v8724_v33 = vpack.c.bf16 %v1539_v28, %v1535_v26  ;;  %v1575_v26 = vld [vmem:[%s11730_s5 + $0x1c50] sm:$0xff] }
 0x30f   : > { %8705 = vmatpush1.bf16.msra.mxu1 %v8704_v34  ;;  %8195 = vmatprep.subr.bf16.mxu0 %v8194_v36  ;;  %v8214_v34 = vpack.c.bf16 %v1546_v30, %v1542_v29  ;;  %v1541_v36 = vld [vmem:[%s11730_s5 + $0x1b40] sm:$0xff]  ;;  %v1579_v28 = vld [vmem:[%s11730_s5 + $0x1c70] sm:$0xff]  ;;  %v1582_v29 = vld [vmem:[%s11730_s5 + $0x1c88] sm:$0xff] }
 0x310   : > { %8707 = vmatprep.subr.bf16.mxu1 %v8706_v40  ;;  %v1547_v40 = vld [vmem:[%s11730_s5 + $0x1b70] sm:$0xff]  ;;  %v8216_v47 = vpack.c.bf16 %v1545_v37, %v1541_v36  ;;  %v1586_v30 = vld [vmem:[%s11730_s5 + $0x1ca8] sm:$0xff]  ;;  %v1581_v37 = vld [vmem:[%s11730_s5 + $0x1c80] sm:$0xff] }
 0x311   : > { %v8234_v36 = vpack.c.bf16 %v1586_v30, %v1582_v29  ;;  %v1626_v29 = vld [vmem:[%s11730_s5 + $0x1de8] sm:$0xff]  ;;  %v1624_v30 = vld [vmem:[%s11730_s5 + $0x1dd8] sm:$0xff] }
 0x312   : > { %8197 = vmatpush1.bf16.msra.mxu0 %v8196_v48  ;;  %v8728_v48 = vpack.c.bf16 %v1547_v40, %v1543_v38  ;;  %v1585_v38 = vld [vmem:[%s11730_s5 + $0x1ca0] sm:$0xff] }
 0x313   : > { %8709 = vmatpush1.bf16.msra.mxu1 %v8708_v49  ;;  %8199 = vmatprep.subr.bf16.mxu0 %v8198_v25  ;;  %v8218_v49 = vpack.c.bf16 %v1554_v43, %v1550_v42  ;;  %v1549_v25 = vld [vmem:[%s11730_s5 + $0x1b80] sm:$0xff]  ;;  %v1587_v42 = vld [vmem:[%s11730_s5 + $0x1cb0] sm:$0xff]  ;;  %v1590_v43 = vld [vmem:[%s11730_s5 + $0x1cc8] sm:$0xff] }
 0x314   : > { %8711 = vmatprep.subr.bf16.mxu1 %v8710_v54  ;;  %v1555_v54 = vld [vmem:[%s11730_s5 + $0x1bb0] sm:$0xff]  ;;  %v8220_v58 = vpack.c.bf16 %v1553_v50, %v1549_v25  ;;  %v1589_v25 = vld [vmem:[%s11730_s5 + $0x1cc0] sm:$0xff] }
 0x315   : > { %v1593_v50 = vld [vmem:[%s11730_s5 + $0x1ce0] sm:$0xff] }
 0x316   : > { %8201 = vmatpush1.bf16.msra.mxu0 %v8200_v59  ;;  %v8732_v59 = vpack.c.bf16 %v1555_v54, %v1551_v51  ;;  %v1591_v51 = vld [vmem:[%s11730_s5 + $0x1cd0] sm:$0xff] }
 0x317   : > { %8713 = vmatpush1.bf16.msra.mxu1 %v8712_v60  ;;  %8203 = vmatprep.subr.bf16.mxu0 %v8202_v61  ;;  %v8222_v60 = vpack.c.bf16 %v1562_v56, %v1558_v55  ;;  %v1557_v61 = vld [vmem:[%s11730_s5 + $0x1bc0] sm:$0xff]  ;;  %v1595_v54 = vld [vmem:[%s11730_s5 + $0x1cf0] sm:$0xff]  ;;  %v1598_v55 = vld [vmem:[%s11730_s5 + $0x1d08] sm:$0xff] }
 0x318   : > { %8715 = vmatprep.subr.bf16.mxu1 %v8714_v2  ;;  %v1563_v2 = vld [vmem:[%s11730_s5 + $0x1bf0] sm:$0xff]  ;;  %v1602_v56 = vld [vmem:[%s11730_s5 + $0x1d28] sm:$0xff] }
 0x31a   : > { %8205 = vmatpush1.bf16.msra.mxu0 %v8204_v8  ;;  %v8224_v8 = vpack.c.bf16 %v1561_v63, %v1557_v61  ;;  %v1597_v61 = vld [vmem:[%s11730_s5 + $0x1d00] sm:$0xff] }
 0x31b   : > { %8717 = vmatpush1.bf16.msra.mxu1 %v8716_v9  ;;  %8207 = vmatprep.subr.bf16.mxu0 %v8206_v10  ;;  %v8736_v9 = vpack.c.bf16 %v1563_v2, %v1559_v0  ;;  %v8226_v10 = vpack.c.bf16 %v1570_v41, %v1566_v3  ;;  %v1601_v63 = vld [vmem:[%s11730_s5 + $0x1d20] sm:$0xff]  ;;  %v1599_v0 = vld [vmem:[%s11730_s5 + $0x1d10] sm:$0xff]  ;;  %v1606_v3 = vld [vmem:[%s11730_s5 + $0x1d48] sm:$0xff] }
 0x31c   : > { %8719 = vmatprep.subr.bf16.mxu1 %v8718_v14  ;;  %v8738_v14 = vpack.c.bf16 %v1572_v7, %v1568_v5  ;;  %v1603_v2 = vld [vmem:[%s11730_s5 + $0x1d30] sm:$0xff]  ;;  %v1610_v41 = vld [vmem:[%s11730_s5 + $0x1d68] sm:$0xff]  ;;  %v1612_v5 = vld [vmem:[%s11730_s5 + $0x1d78] sm:$0xff]  ;;  %v8244_v7 = vpack.c.bf16 %v1601_v63, %v1597_v61 }
 0x31d   : > { %v1639_v61 = vld [vmem:[%s11730_s5 + $0x1e50] sm:$0xff] }
 0x31e   : > { %8209 = vmatpush1.bf16.msra.mxu0 %v8208_v20  ;;  %v8228_v20 = vpack.c.bf16 %v1569_v44, %v1565_v12  ;;  %v1609_v12 = vld [vmem:[%s11730_s5 + $0x1d60] sm:$0xff]  ;;  %v1607_v44 = vld [vmem:[%s11730_s5 + $0x1d50] sm:$0xff] }
 0x31f   : > { %8721 = vmatpush1.bf16.msra.mxu1 %v8720_v21  ;;  %8211 = vmatprep.subr.bf16.mxu0 %v8210_v22  ;;  %v8740_v21 = vpack.c.bf16 %v1571_v35, %v1567_v13  ;;  %v8230_v22 = vpack.c.bf16 %v1578_v16, %v1574_v15  ;;  %v8758_v13 = vpack.c.bf16 %v1612_v5, %v1608_v4  ;;  %v1614_v35 = vld [vmem:[%s11730_s5 + $0x1d88] sm:$0xff]  ;;  %v1616_v16 = vld [vmem:[%s11730_s5 + $0x1d98] sm:$0xff] }
 0x320   : > { %8723 = vmatprep.subr.bf16.mxu1 %v8722_v27  ;;  %v8742_v27 = vpack.c.bf16 %v1580_v19, %v1576_v18  ;;  %v1618_v15 = vld [vmem:[%s11730_s5 + $0x1da8] sm:$0xff]  ;;  %v1620_v18 = vld [vmem:[%s11730_s5 + $0x1db8] sm:$0xff] }
 0x322   : > { %8213 = vmatpush1.bf16.msra.mxu0 %v8212_v62  ;;  %v1588_v62 = vld [vmem:[%s11730_s5 + $0x1cb8] sm:$0xff] }
 0x323   : > { %8725 = vmatpush1.bf16.msra.mxu1 %v8724_v33  ;;  %8215 = vmatprep.subr.bf16.mxu0 %v8214_v34  ;;  %v8232_v33 = vpack.c.bf16 %v1577_v24, %v1573_v52  ;;  %v8744_v34 = vpack.c.bf16 %v1579_v28, %v1575_v26  ;;  %v8746_v40 = vpack.c.bf16 %v1588_v62, %v1584_v32  ;;  %v1617_v52 = vld [vmem:[%s11730_s5 + $0x1da0] sm:$0xff]  ;;  %v1615_v24 = vld [vmem:[%s11730_s5 + $0x1d90] sm:$0xff]  ;;  %v1622_v28 = vld [vmem:[%s11730_s5 + $0x1dc8] sm:$0xff] }
 0x324   : > { %8727 = vmatprep.subr.bf16.mxu1 %v8726_v39  ;;  %v1583_v39 = vld [vmem:[%s11730_s5 + $0x1c90] sm:$0xff]  ;;  %v8762_v26 = vpack.c.bf16 %v1620_v18, %v1616_v16 }
 0x326   : > { %8217 = vmatpush1.bf16.msra.mxu0 %v8216_v47  ;;  %v8236_v47 = vpack.c.bf16 %v1585_v38, %v1581_v37  ;;  %v1623_v37 = vld [vmem:[%s11730_s5 + $0x1dd0] sm:$0xff] }
 0x327   : > { %8729 = vmatpush1.bf16.msra.mxu1 %v8728_v48  ;;  %8219 = vmatprep.subr.bf16.mxu0 %v8218_v49  ;;  %v8748_v48 = vpack.c.bf16 %v1587_v42, %v1583_v39  ;;  %v8238_v49 = vpack.c.bf16 %v1594_v45, %v1590_v43  ;;  %v1627_v39 = vld [vmem:[%s11730_s5 + $0x1df0] sm:$0xff]  ;;  %v1634_v42 = vld [vmem:[%s11730_s5 + $0x1e28] sm:$0xff]  ;;  %v1632_v43 = vld [vmem:[%s11730_s5 + $0x1e18] sm:$0xff] }
 0x328   : > { %8731 = vmatprep.subr.bf16.mxu1 %v8730_v53  ;;  %v1636_v45 = vld [vmem:[%s11730_s5 + $0x1e38] sm:$0xff] }
 0x32a   : > { %8221 = vmatpush1.bf16.msra.mxu0 %v8220_v58  ;;  %v8240_v58 = vpack.c.bf16 %v1593_v50, %v1589_v25  ;;  %v1631_v25 = vld [vmem:[%s11730_s5 + $0x1e10] sm:$0xff]  ;;  %v8770_v50 = vpack.c.bf16 %v1636_v45, %v1632_v43 }
 0x32b   : > { %8733 = vmatpush1.bf16.msra.mxu1 %v8732_v59  ;;  %8223 = vmatprep.subr.bf16.mxu0 %v8222_v60  ;;  %v8752_v59 = vpack.c.bf16 %v1595_v54, %v1591_v51  ;;  %v8242_v60 = vpack.c.bf16 %v1602_v56, %v1598_v55  ;;  %v1635_v51 = vld [vmem:[%s11730_s5 + $0x1e30] sm:$0xff]  ;;  %v1642_v54 = vld [vmem:[%s11730_s5 + $0x1e68] sm:$0xff]  ;;  %v1640_v55 = vld [vmem:[%s11730_s5 + $0x1e58] sm:$0xff] }
 0x32c   : > { %8735 = vmatprep.subr.bf16.mxu1 %v8734_v1  ;;  %v8754_v1 = vpack.c.bf16 %v1604_v23, %v1600_v57  ;;  %v1644_v56 = vld [vmem:[%s11730_s5 + $0x1e78] sm:$0xff]  ;;  %v8772_v23 = vpack.c.bf16 %v1635_v51, %v1631_v25  ;;  %v1675_v25 = vld [vmem:[%s11730_s5 + $0x1f70] sm:$0xff]  ;;  %v1682_v51 = vld [vmem:[%s11730_s5 + $0x1fa8] sm:$0xff] }
 0x32d   : > { %v8774_v63 = vpack.c.bf16 %v1644_v56, %v1640_v55 }
 0x32e   : > { %8225 = vmatpush1.bf16.msra.mxu0 %v8224_v8  ;;  %v8756_v8 = vpack.c.bf16 %v1603_v2, %v1599_v0  ;;  %v1643_v0 = vld [vmem:[%s11730_s5 + $0x1e70] sm:$0xff]  ;;  %v1650_v2 = vld [vmem:[%s11730_s5 + $0x1ea8] sm:$0xff] }
 0x32f   : > { %8737 = vmatpush1.bf16.msra.mxu1 %v8736_v9  ;;  %8227 = vmatprep.subr.bf16.mxu0 %v8226_v10  ;;  %v8246_v9 = vpack.c.bf16 %v1610_v41, %v1606_v3  ;;  %v1605_v10 = vld [vmem:[%s11730_s5 + $0x1d40] sm:$0xff]  ;;  %v1648_v3 = vld [vmem:[%s11730_s5 + $0x1e98] sm:$0xff]  ;;  %v8776_v5 = vpack.c.bf16 %v1643_v0, %v1639_v61  ;;  %v1683_v61 = vld [vmem:[%s11730_s5 + $0x1fb0] sm:$0xff] }
 0x330   : > { %8739 = vmatprep.subr.bf16.mxu1 %v8738_v14  ;;  %v1611_v14 = vld [vmem:[%s11730_s5 + $0x1d70] sm:$0xff]  ;;  %v8248_v19 = vpack.c.bf16 %v1609_v12, %v1605_v10  ;;  %v1652_v41 = vld [vmem:[%s11730_s5 + $0x1eb8] sm:$0xff]  ;;  %v1690_v0 = vld [vmem:[%s11730_s5 + $0x1fe8] sm:$0xff] }
 0x331   : > { %2272 = vmatmul.mubr.f32.vlgmr.msra.gmra.mrb[0].mxu0 %v12634_v6  ;;  %v1647_v10 = vld [vmem:[%s11730_s5 + $0x1e90] sm:$0xff]  ;;  %v8778_v12 = vpack.c.bf16 %v1652_v41, %v1648_v3 }
 0x332   : > { %8229 = vmatpush1.bf16.msra.mxu0 %v8228_v20  ;;  %2840 = vmatmul.mubr.f32.vlgmr.msra.gmra.mrb[0].mxu1 %v12634_v6  ;;  %v1592_v6 = vld [vmem:[%s11730_s5 + $0x1cd8] sm:$0xff]  ;;  %v8760_v20 = vpack.c.bf16 %v1611_v14, %v1607_v44  ;;  %v1651_v44 = vld [vmem:[%s11730_s5 + $0x1eb0] sm:$0xff]  ;;  %v1658_v14 = vld [vmem:[%s11730_s5 + $0x1ee8] sm:$0xff] }
 0x333   : > { %8741 = vmatpush1.bf16.msra.mxu1 %v8740_v21  ;;  %8231 = vmatprep.subr.bf16.mxu0 %v8230_v22  ;;  %v8750_v53 = vpack.c.bf16 %v1596_v46, %v1592_v6  ;;  %v8250_v21 = vpack.c.bf16 %v1618_v15, %v1614_v35  ;;  %v1613_v22 = vld [vmem:[%s11730_s5 + $0x1d80] sm:$0xff]  ;;  %v8768_v46 = vpack.c.bf16 %v1627_v39, %v1623_v37  ;;  %v1656_v35 = vld [vmem:[%s11730_s5 + $0x1ed8] sm:$0xff]  ;;  %v1667_v37 = vld [vmem:[%s11730_s5 + $0x1f30] sm:$0xff] }
 0x334   : > { %8743 = vmatprep.subr.bf16.mxu1 %v8742_v27  ;;  %2342 = vmatprep.mubr.f32.mxu0 %v1764_v31  ;;  %v1619_v27 = vld [vmem:[%s11730_s5 + $0x1db0] sm:$0xff]  ;;  %v8252_v32 = vpack.c.bf16 %v1617_v52, %v1613_v22  ;;  %v1660_v15 = vld [vmem:[%s11730_s5 + $0x1ef8] sm:$0xff]  ;;  %v8780_v18 = vpack.c.bf16 %v1651_v44, %v1647_v10  ;;  %v1674_v39 = vld [vmem:[%s11730_s5 + $0x1f68] sm:$0xff] }
 0x335   : > { %2910 = vmatprep.mubr.f32.mxu1 %v1764_v31  ;;  %v1628_v31 = vld [vmem:[%s11730_s5 + $0x1df8] sm:$0xff]  ;;  %v8764_v62 = vpack.c.bf16 %v1619_v27, %v1615_v24  ;;  %v1655_v22 = vld [vmem:[%s11730_s5 + $0x1ed0] sm:$0xff]  ;;  %v8782_v52 = vpack.c.bf16 %v1660_v15, %v1656_v35  ;;  %v1666_v27 = vld [vmem:[%s11730_s5 + $0x1f28] sm:$0xff] }
 0x336   : > { %8233 = vmatpush1.bf16.msra.mxu0 %v8232_v33  ;;  %v8254_v33 = vpack.c.bf16 %v1626_v29, %v1622_v28  ;;  %v8766_v38 = vpack.c.bf16 %v1628_v31, %v1624_v30  ;;  %v1659_v24 = vld [vmem:[%s11730_s5 + $0x1ef0] sm:$0xff]  ;;  %v1664_v28 = vld [vmem:[%s11730_s5 + $0x1f18] sm:$0xff] }
 0x337   : > { %8745 = vmatpush1.bf16.msra.mxu1 %v8744_v34  ;;  %8235 = vmatprep.subr.bf16.mxu0 %v8234_v36  ;;  %v1621_v34 = vld [vmem:[%s11730_s5 + $0x1dc0] sm:$0xff]  ;;  %v1668_v29 = vld [vmem:[%s11730_s5 + $0x1f38] sm:$0xff]  ;;  %v8784_v31 = vpack.c.bf16 %v1659_v24, %v1655_v22  ;;  %v1691_v10 = vld [vmem:[%s11730_s5 + $0x1ff0] sm:$0xff] }
 0x338   : > { %8747 = vmatprep.subr.bf16.mxu1 %v8746_v40  ;;  %v1625_v36 = vld [vmem:[%s11730_s5 + $0x1de0] sm:$0xff]  ;;  %v1630_v40 = vld [vmem:[%s11730_s5 + $0x1e08] sm:$0xff] }
 0x339   : > { %v8256_v6 = vpack.c.bf16 %v1625_v36, %v1621_v34  ;;  %v1663_v34 = vld [vmem:[%s11730_s5 + $0x1f10] sm:$0xff]  ;;  %v8786_v36 = vpack.c.bf16 %v1668_v29, %v1664_v28 }
 0x33a   : > { %8237 = vmatpush1.bf16.msra.mxu0 %v8236_v47  ;;  %v8258_v47 = vpack.c.bf16 %v1634_v42, %v1630_v40  ;;  %v1672_v40 = vld [vmem:[%s11730_s5 + $0x1f58] sm:$0xff]  ;;  %v8788_v45 = vpack.c.bf16 %v1667_v37, %v1663_v34 }
 0x33b   : > { %8749 = vmatpush1.bf16.msra.mxu1 %v8748_v48  ;;  %8239 = vmatprep.subr.bf16.mxu0 %v8238_v49  ;;  %v1629_v48 = vld [vmem:[%s11730_s5 + $0x1e00] sm:$0xff]  ;;  %v1676_v42 = vld [vmem:[%s11730_s5 + $0x1f78] sm:$0xff] }
 0x33c   : > { %8751 = vmatprep.subr.bf16.mxu1 %v8750_v53  ;;  %v1633_v49 = vld [vmem:[%s11730_s5 + $0x1e20] sm:$0xff]  ;;  %v1638_v53 = vld [vmem:[%s11730_s5 + $0x1e48] sm:$0xff] }
 0x33d   : > { %v8260_v57 = vpack.c.bf16 %v1633_v49, %v1629_v48  ;;  %v1671_v48 = vld [vmem:[%s11730_s5 + $0x1f50] sm:$0xff]  ;;  %v8790_v49 = vpack.c.bf16 %v1676_v42, %v1672_v40 }
 0x33e   : > { %8241 = vmatpush1.bf16.msra.mxu0 %v8240_v58  ;;  %v8262_v58 = vpack.c.bf16 %v1642_v54, %v1638_v53  ;;  %v1680_v53 = vld [vmem:[%s11730_s5 + $0x1f98] sm:$0xff]  ;;  %v8792_v56 = vpack.c.bf16 %v1675_v25, %v1671_v48 }
 0x33f   : > { %8753 = vmatpush1.bf16.msra.mxu1 %v8752_v59  ;;  %8243 = vmatprep.subr.bf16.mxu0 %v8242_v60  ;;  %v1637_v59 = vld [vmem:[%s11730_s5 + $0x1e40] sm:$0xff]  ;;  %v1684_v54 = vld [vmem:[%s11730_s5 + $0x1fb8] sm:$0xff] }
 0x340   : > { %8755 = vmatprep.subr.bf16.mxu1 %v8754_v1  ;;  %v1641_v60 = vld [vmem:[%s11730_s5 + $0x1e60] sm:$0xff]  ;;  %v1646_v1 = vld [vmem:[%s11730_s5 + $0x1e88] sm:$0xff] }
 0x341   : > { %v8264_v4 = vpack.c.bf16 %v1641_v60, %v1637_v59  ;;  %v1679_v59 = vld [vmem:[%s11730_s5 + $0x1f90] sm:$0xff]  ;;  %v8794_v60 = vpack.c.bf16 %v1684_v54, %v1680_v53 }
 0x342   : > { %8245 = vmatpush1.bf16.msra.mxu0 %v8244_v7  ;;  %v8266_v7 = vpack.c.bf16 %v1650_v2, %v1646_v1  ;;  %v1688_v1 = vld [vmem:[%s11730_s5 + $0x1fd8] sm:$0xff]  ;;  %v8796_v41 = vpack.c.bf16 %v1683_v61, %v1679_v59 }
 0x343   : > { %8757 = vmatpush1.bf16.msra.mxu1 %v8756_v8  ;;  %8247 = vmatprep.subr.bf16.mxu0 %v8246_v9  ;;  %v1645_v8 = vld [vmem:[%s11730_s5 + $0x1e80] sm:$0xff]  ;;  %v1692_v2 = vld [vmem:[%s11730_s5 + $0x1ff8] sm:$0xff] }
 0x344   : > { %8759 = vmatprep.subr.bf16.mxu1 %v8758_v13  ;;  %v1649_v9 = vld [vmem:[%s11730_s5 + $0x1ea0] sm:$0xff]  ;;  %v1654_v13 = vld [vmem:[%s11730_s5 + $0x1ec8] sm:$0xff] }
 0x345   : > { %v8268_v16 = vpack.c.bf16 %v1649_v9, %v1645_v8  ;;  %v8798_v8 = vpack.c.bf16 %v1692_v2, %v1688_v1  ;;  %v1687_v9 = vld [vmem:[%s11730_s5 + $0x1fd0] sm:$0xff] }
 0x346   : > { %8249 = vmatpush1.bf16.msra.mxu0 %v8248_v19  ;;  %v8270_v19 = vpack.c.bf16 %v1658_v14, %v1654_v13  ;;  %v8800_v44 = vpack.c.bf16 %v1691_v10, %v1687_v9 }
 0x347   : > { %8761 = vmatpush1.bf16.msra.mxu1 %v8760_v20  ;;  %8251 = vmatprep.subr.bf16.mxu0 %v8250_v21  ;;  %v1653_v20 = vld [vmem:[%s11730_s5 + $0x1ec0] sm:$0xff] }
 0x348   : > { %8763 = vmatprep.subr.bf16.mxu1 %v8762_v26  ;;  %v1657_v21 = vld [vmem:[%s11730_s5 + $0x1ee0] sm:$0xff]  ;;  %v1662_v26 = vld [vmem:[%s11730_s5 + $0x1f08] sm:$0xff] }
 0x349   : > { %v8272_v30 = vpack.c.bf16 %v1657_v21, %v1653_v20 }
 0x34a   : > { %8253 = vmatpush1.bf16.msra.mxu0 %v8252_v32  ;;  %v8274_v32 = vpack.c.bf16 %v1666_v27, %v1662_v26 }
 0x34b   : > { %8765 = vmatpush1.bf16.msra.mxu1 %v8764_v62  ;;  %8255 = vmatprep.subr.bf16.mxu0 %v8254_v33  ;;  %v1661_v62 = vld [vmem:[%s11730_s5 + $0x1f00] sm:$0xff] }
 0x34c   : > { %8767 = vmatprep.subr.bf16.mxu1 %v8766_v38  ;;  %v1665_v33 = vld [vmem:[%s11730_s5 + $0x1f20] sm:$0xff]  ;;  %v1670_v38 = vld [vmem:[%s11730_s5 + $0x1f48] sm:$0xff] }
 0x34d   : > { %v8276_v43 = vpack.c.bf16 %v1665_v33, %v1661_v62 }
 0x34e   : > { %8257 = vmatpush1.bf16.msra.mxu0 %v8256_v6  ;;  %v8278_v6 = vpack.c.bf16 %v1674_v39, %v1670_v38 }
 0x34f   : > { %8769 = vmatpush1.bf16.msra.mxu1 %v8768_v46  ;;  %8259 = vmatprep.subr.bf16.mxu0 %v8258_v47  ;;  %v1669_v46 = vld [vmem:[%s11730_s5 + $0x1f40] sm:$0xff] }
 0x350   : > { %8771 = vmatprep.subr.bf16.mxu1 %v8770_v50  ;;  %v1673_v47 = vld [vmem:[%s11730_s5 + $0x1f60] sm:$0xff]  ;;  %v1678_v50 = vld [vmem:[%s11730_s5 + $0x1f88] sm:$0xff] }
 0x351   : > { %v8280_v55 = vpack.c.bf16 %v1673_v47, %v1669_v46 }
 0x352   : > { %8261 = vmatpush1.bf16.msra.mxu0 %v8260_v57  ;;  %v8282_v57 = vpack.c.bf16 %v1682_v51, %v1678_v50 }
 0x353   : > { %8773 = vmatpush1.bf16.msra.mxu1 %v8772_v23  ;;  %8263 = vmatprep.subr.bf16.mxu0 %v8262_v58  ;;  %v1677_v23 = vld [vmem:[%s11730_s5 + $0x1f80] sm:$0xff] }
 0x354   : > { %8775 = vmatprep.subr.bf16.mxu1 %v8774_v63  ;;  %v1681_v58 = vld [vmem:[%s11730_s5 + $0x1fa0] sm:$0xff]  ;;  %v1686_v63 = vld [vmem:[%s11730_s5 + $0x1fc8] sm:$0xff] }
 0x355   : > { %v8284_v3 = vpack.c.bf16 %v1681_v58, %v1677_v23 }
 0x356   : > { %8265 = vmatpush1.bf16.msra.mxu0 %v8264_v4  ;;  %v8286_v4 = vpack.c.bf16 %v1690_v0, %v1686_v63 }
 0x357   : > { %8777 = vmatpush1.bf16.msra.mxu1 %v8776_v5  ;;  %8267 = vmatprep.subr.bf16.mxu0 %v8266_v7  ;;  %v1685_v5 = vld [vmem:[%s11730_s5 + $0x1fc0] sm:$0xff] }
 0x358   : > { %8779 = vmatprep.subr.bf16.mxu1 %v8778_v12  ;;  %v1689_v7 = vld [vmem:[%s11730_s5 + $0x1fe0] sm:$0xff]  ;;  %s7775_s5 = sshll.u32 %s11342_s24, 3 }
 0x359   : > { %v8288_v12 = vpack.c.bf16 %v1689_v7, %v1685_v5  ;;  %s2941_s27 = scalar_lea.vmem [#allocation2], %s7775_s5 }
 0x35a   : > { %8269 = vmatpush1.bf16.msra.mxu0 %v8268_v16 }
 0x35b   : > { %8781 = vmatpush1.bf16.msra.mxu1 %v8780_v18  ;;  %8271 = vmatprep.subr.bf16.mxu0 %v8270_v19 }
 0x35c   : > { %8783 = vmatprep.subr.bf16.mxu1 %v8782_v52 }
 0x35e   : > { %8273 = vmatpush1.bf16.msra.mxu0 %v8272_v30 }
 0x35f   : > { %8785 = vmatpush1.bf16.msra.mxu1 %v8784_v31  ;;  %8275 = vmatprep.subr.bf16.mxu0 %v8274_v32 }
 0x360   : > { %8787 = vmatprep.subr.bf16.mxu1 %v8786_v36 }
 0x362   : > { %8277 = vmatpush1.bf16.msra.mxu0 %v8276_v43 }
 0x363   : > { %8789 = vmatpush1.bf16.msra.mxu1 %v8788_v45  ;;  %8279 = vmatprep.subr.bf16.mxu0 %v8278_v6 }
 0x364   : > { %8791 = vmatprep.subr.bf16.mxu1 %v8790_v49 }
 0x366   : > { %8281 = vmatpush1.bf16.msra.mxu0 %v8280_v55 }
 0x367   : > { %8793 = vmatpush1.bf16.msra.mxu1 %v8792_v56  ;;  %8283 = vmatprep.subr.bf16.mxu0 %v8282_v57 }
 0x368   : > { %8795 = vmatprep.subr.bf16.mxu1 %v8794_v60 }
 0x36a   : > { %8285 = vmatpush1.bf16.msra.mxu0 %v8284_v3 }
 0x36b   : > { %8797 = vmatpush1.bf16.msra.mxu1 %v8796_v41  ;;  %8287 = vmatprep.subr.bf16.mxu0 %v8286_v4 }
 0x36c   : > { %8799 = vmatprep.subr.bf16.mxu1 %v8798_v8 }
 0x36e   : > { %8289 = vmatpush1.bf16.msra.mxu0 %v8288_v12 }
 0x36f   : > { %8801 = vmatpush1.bf16.msra.mxu1 %v8800_v44 }
 0x371   : > { %2343 = vmatmul.mubr.f32.vlgmr.msra.gmra.mrb[0].mxu0 %v12771_v17 }
 0x372   : > { %2911 = vmatmul.mubr.f32.vlgmr.msra.gmra.mrb[0].mxu1 %v12771_v17 }
 0x444   : > { %v2344_v13 = vpop.f32.mrb[0].mxu0 }
 0x445   : > { %v2912_v14 = vpop.f32.mrb[0].mxu1  ;;  %v2346_v35 = vpop.f32.mrb[1].mxu0 }
 0x446   : > { %v2921_v15 = vcombine.low %v2344_v13, %v2346_v35  ;;  %v2914_v16 = vpop.f32.mrb[1].mxu1 }
 0x447   : > { %v2922_v18 = vcombine.low %v2912_v14, %v2914_v16 }
 0x448   : > { %v2929_v19 = vrot.slane %v2921_v15, %v11875_v11 }
 0x449   : > { %v2936_v20 = vrot.slane %v2922_v18, %v11875_v11 }
 0x44b   : > { %v2937_v21 = vcombine.low %v2929_v19, %v2936_v20 }
 0x44d   : > { %2942 = vst [vmem:[%s2941_s27] sm:$0xff] %v2937_v21 }
 0x44e PF: > { %p2944_p0 = scmp.lt.s32.totalorder %s11342_s24, 6 }
 0x450   : > { %p2945_p11 = pnand %p7727_p9, %p2944_p0 }
 0x451   : > { %v3157_v11 = vld [vmem:[%s11741_s20 + $0x408] sm:$0xff] (!%p2945_p11)  ;;  %v3159_v17 = vld [vmem:[%s11741_s20 + $0x418] sm:$0xff] (!%p2945_p11)  ;;  %v3156_v26 = vld [vmem:[%s11741_s20 + $0x400] sm:$0xff] (!%p2945_p11)  ;;  %s7730_s2 = sadd.s32 (!%p2945_p11), 4294967292, %s11342_s24 }
 0x452   : > { %2948 = sbr.rel (%p2945_p11) target bundleno = 1583 (0x62f), region = 96  ;;  %v3653_v22 = vld [vmem:[%s11741_s20 + $0x808] sm:$0xff] (!%p2945_p11)  ;;  %v8802_v52 = vpack.c.bf16 (!%p2945_p11), %v3159_v17, %v3157_v11  ;;  %v3655_v24 = vld [vmem:[%s11741_s20 + $0x818] sm:$0xff] (!%p2945_p11)  ;;  %v3158_v27 = vld [vmem:[%s11741_s20 + $0x410] sm:$0xff] (!%p2945_p11)  ;;  %s7776_s29 = sshll.u32 (!%p2945_p11), %s7730_s2, 2 }
 0x453   : > { %v9058_v28 = vpack.c.bf16 (!%p2945_p11), %v3655_v24, %v3653_v22  ;;  %v8804_v29 = vpack.c.bf16 (!%p2945_p11), %v3158_v27, %v3156_v26  ;;  %v3652_v30 = vld [vmem:[%s11741_s20 + $0x800] sm:$0xff] (!%p2945_p11)  ;;  %v3654_v31 = vld [vmem:[%s11741_s20 + $0x810] sm:$0xff] (!%p2945_p11)  ;;  %v3161_v32 = vld [vmem:[%s11741_s20 + $0x428] sm:$0xff] (!%p2945_p11) }
 0x454   : > { %8803 = vmatprep.subr.bf16.mxu1 (!%p2945_p11), %v8802_v52  ;;  %v9060_v62 = vpack.c.bf16 (!%p2945_p11), %v3654_v31, %v3652_v30  ;;  %v3163_v33 = vld [vmem:[%s11741_s20 + $0x438] sm:$0xff] (!%p2945_p11)  ;;  %v3657_v34 = vld [vmem:[%s11741_s20 + $0x828] sm:$0xff] (!%p2945_p11)  ;;  %v3160_v39 = vld [vmem:[%s11741_s20 + $0x420] sm:$0xff] (!%p2945_p11) }
 0x455   : > { %v3659_v36 = vld [vmem:[%s11741_s20 + $0x838] sm:$0xff] (!%p2945_p11)  ;;  %9059 = vmatprep.subr.bf16.mxu0 (!%p2945_p11), %v9058_v28  ;;  %8805 = vmatpush1.bf16.msra.mxu1 (!%p2945_p11), %v8804_v29  ;;  %v8806_v37 = vpack.c.bf16 (!%p2945_p11), %v3163_v33, %v3161_v32  ;;  %v3162_v40 = vld [vmem:[%s11741_s20 + $0x430] sm:$0xff] (!%p2945_p11)  ;;  %v3656_v42 = vld [vmem:[%s11741_s20 + $0x820] sm:$0xff] (!%p2945_p11) }
 0x456   : > { %v9062_v38 = vpack.c.bf16 (!%p2945_p11), %v3659_v36, %v3657_v34  ;;  %9061 = vmatpush1.bf16.msra.mxu0 (!%p2945_p11), %v9060_v62  ;;  %v8808_v43 = vpack.c.bf16 (!%p2945_p11), %v3162_v40, %v3160_v39  ;;  %v3658_v45 = vld [vmem:[%s11741_s20 + $0x830] sm:$0xff] (!%p2945_p11)  ;;  %v3165_v6 = vld [vmem:[%s11741_s20 + $0x448] sm:$0xff] (!%p2945_p11)  ;;  %v3167_v46 = vld [vmem:[%s11741_s20 + $0x458] sm:$0xff] (!%p2945_p11) }
 0x457   : > { %8807 = vmatprep.subr.bf16.mxu1 (!%p2945_p11), %v8806_v37  ;;  %v9064_v47 = vpack.c.bf16 (!%p2945_p11), %v3658_v45, %v3656_v42  ;;  %v8810_v48 = vpack.c.bf16 (!%p2945_p11), %v3167_v46, %v3165_v6  ;;  %v3661_v49 = vld [vmem:[%s11741_s20 + $0x848] sm:$0xff] (!%p2945_p11)  ;;  %v3663_v25 = vld [vmem:[%s11741_s20 + $0x858] sm:$0xff] (!%p2945_p11)  ;;  %v3164_v50 = vld [vmem:[%s11741_s20 + $0x440] sm:$0xff] (!%p2945_p11) }
 0x458   : > { %9063 = vmatprep.subr.bf16.mxu0 (!%p2945_p11), %v9062_v38  ;;  %v9066_v51 = vpack.c.bf16 (!%p2945_p11), %v3663_v25, %v3661_v49  ;;  %v3166_v53 = vld [vmem:[%s11741_s20 + $0x450] sm:$0xff] (!%p2945_p11)  ;;  %v3660_v54 = vld [vmem:[%s11741_s20 + $0x840] sm:$0xff] (!%p2945_p11)  ;;  %v3169_v57 = vld [vmem:[%s11741_s20 + $0x468] sm:$0xff] (!%p2945_p11) }
 0x459   : > { %v3662_v55 = vld [vmem:[%s11741_s20 + $0x850] sm:$0xff]  ;;  %8809 = vmatpush1.bf16.msra.mxu1 %v8808_v43  ;;  %v8812_v56 = vpack.c.bf16 %v3166_v53, %v3164_v50  ;;  %v3171_v23 = vld [vmem:[%s11741_s20 + $0x478] sm:$0xff]  ;;  %v3665_v58 = vld [vmem:[%s11741_s20 + $0x868] sm:$0xff] }
 0x45a   : > { %9065 = vmatpush1.bf16.msra.mxu0 %v9064_v47  ;;  %8811 = vmatprep.subr.bf16.mxu1 %v8810_v48  ;;  %v9068_v59 = vpack.c.bf16 %v3662_v55, %v3660_v54  ;;  %v8814_v60 = vpack.c.bf16 %v3171_v23, %v3169_v57  ;;  %v3667_v61 = vld [vmem:[%s11741_s20 + $0x878] sm:$0xff]  ;;  %v3168_v63 = vld [vmem:[%s11741_s20 + $0x460] sm:$0xff]  ;;  %v3170_v0 = vld [vmem:[%s11741_s20 + $0x470] sm:$0xff] }
 0x45b   : > { %9067 = vmatprep.subr.bf16.mxu0 %v9066_v51  ;;  %v9070_v1 = vpack.c.bf16 %v3667_v61, %v3665_v58  ;;  %v3664_v2 = vld [vmem:[%s11741_s20 + $0x860] sm:$0xff]  ;;  %v3666_v3 = vld [vmem:[%s11741_s20 + $0x870] sm:$0xff]  ;;  %v3173_v41 = vld [vmem:[%s11741_s20 + $0x488] sm:$0xff]  ;;  %v8816_v8 = vpack.c.bf16 %v3170_v0, %v3168_v63 }
 0x45c   : > { %v3175_v4 = vld [vmem:[%s11741_s20 + $0x498] sm:$0xff]  ;;  %v3669_v5 = vld [vmem:[%s11741_s20 + $0x888] sm:$0xff]  ;;  %v9072_v9 = vpack.c.bf16 %v3666_v3, %v3664_v2  ;;  %v3172_v12 = vld [vmem:[%s11741_s20 + $0x480] sm:$0xff] }
 0x45d   : > { %v3671_v7 = vld [vmem:[%s11741_s20 + $0x898] sm:$0xff]  ;;  %8813 = vmatpush1.bf16.msra.mxu1 %v8812_v56  ;;  %v8818_v10 = vpack.c.bf16 %v3175_v4, %v3173_v41  ;;  %v3174_v44 = vld [vmem:[%s11741_s20 + $0x490] sm:$0xff]  ;;  %v3668_v13 = vld [vmem:[%s11741_s20 + $0x880] sm:$0xff]  ;;  %v2952_v41 = vlaneseq }
 0x45e   : > { %9069 = vmatpush1.bf16.msra.mxu0 %v9068_v59  ;;  %8815 = vmatprep.subr.bf16.mxu1 %v8814_v60  ;;  %v9074_v14 = vpack.c.bf16 %v3671_v7, %v3669_v5  ;;  %v3670_v35 = vld [vmem:[%s11741_s20 + $0x890] sm:$0xff]  ;;  %v3177_v15 = vld [vmem:[%s11741_s20 + $0x4a8] sm:$0xff]  ;;  %v3179_v16 = vld [vmem:[%s11741_s20 + $0x4b8] sm:$0xff]  ;;  %v8820_v20 = vpack.c.bf16 %v3174_v44, %v3172_v12 }
 0x45f   : > { %9071 = vmatprep.subr.bf16.mxu0 %v9070_v1  ;;  %v3673_v18 = vld [vmem:[%s11741_s20 + $0x8a8] sm:$0xff]  ;;  %v3675_v19 = vld [vmem:[%s11741_s20 + $0x8b8] sm:$0xff]  ;;  %v9076_v21 = vpack.c.bf16 %v3670_v35, %v3668_v13  ;;  %v8822_v11 = vpack.c.bf16 %v3179_v16, %v3177_v15  ;;  %v3176_v17 = vld [vmem:[%s11741_s20 + $0x4a0] sm:$0xff]  ;;  %v2953_v16 = vshrl.u32 %v2952_v41, 7 }
 0x460   : > { %v3178_v22 = vld [vmem:[%s11741_s20 + $0x4b0] sm:$0xff]  ;;  %v3672_v52 = vld [vmem:[%s11741_s20 + $0x8a0] sm:$0xff]  ;;  %v9078_v24 = vpack.c.bf16 %v3675_v19, %v3673_v18  ;;  %v3181_v27 = vld [vmem:[%s11741_s20 + $0x4c8] sm:$0xff]  ;;  %v11223_v18 = vmov 1983009808  }
 0x461   : > { %8817 = vmatpush1.bf16.msra.mxu1 %v8816_v8  ;;  %v3674_v26 = vld [vmem:[%s11741_s20 + $0x8b0] sm:$0xff]  ;;  %v3183_v28 = vld [vmem:[%s11741_s20 + $0x4d8] sm:$0xff]  ;;  %v3677_v29 = vld [vmem:[%s11741_s20 + $0x8c8] sm:$0xff]  ;;  %v8824_v31 = vpack.c.bf16 %v3178_v22, %v3176_v17  ;;  %v2971_v19 = vunpack.c.l.s4 %v11223_v18 }
 0x462   : > { %9073 = vmatpush1.bf16.msra.mxu0 %v9072_v9  ;;  %8819 = vmatprep.subr.bf16.mxu1 %v8818_v10  ;;  %v3679_v30 = vld [vmem:[%s11741_s20 + $0x8d8] sm:$0xff]  ;;  %v9080_v32 = vpack.c.bf16 %v3674_v26, %v3672_v52  ;;  %v8826_v62 = vpack.c.bf16 %v3183_v28, %v3181_v27  ;;  %v3180_v33 = vld [vmem:[%s11741_s20 + $0x4c0] sm:$0xff]  ;;  %v3182_v34 = vld [vmem:[%s11741_s20 + $0x4d0] sm:$0xff] }
 0x463   : > { %9075 = vmatprep.subr.bf16.mxu0 %v9074_v14  ;;  %v3676_v36 = vld [vmem:[%s11741_s20 + $0x8c0] sm:$0xff]  ;;  %v9082_v37 = vpack.c.bf16 %v3679_v30, %v3677_v29  ;;  %v3678_v38 = vld [vmem:[%s11741_s20 + $0x8d0] sm:$0xff]  ;;  %v3185_v39 = vld [vmem:[%s11741_s20 + $0x4e8] sm:$0xff]  ;;  %v8828_v45 = vpack.c.bf16 %v3182_v34, %v3180_v33  ;;  %v12998_v33 = vsub.s32 0, %v2953_v16  ;;  %v2972_v34 = vunpack.c.0.s8 %v2971_v19 }
 0x464   : > { %v3187_v40 = vld [vmem:[%s11741_s20 + $0x4f8] sm:$0xff]  ;;  %v3681_v42 = vld [vmem:[%s11741_s20 + $0x8e8] sm:$0xff]  ;;  %v9084_v6 = vpack.c.bf16 %v3678_v38, %v3676_v36  ;;  %v3184_v47 = vld [vmem:[%s11741_s20 + $0x4e0] sm:$0xff] }
 0x465   : > { %8821 = vmatpush1.bf16.msra.mxu1 %v8820_v20  ;;  %v3683_v43 = vld [vmem:[%s11741_s20 + $0x8f8] sm:$0xff]  ;;  %v8830_v46 = vpack.c.bf16 %v3187_v40, %v3185_v39  ;;  %v3186_v48 = vld [vmem:[%s11741_s20 + $0x4f0] sm:$0xff]  ;;  %v3680_v49 = vld [vmem:[%s11741_s20 + $0x8e0] sm:$0xff]  ;;  %v13003_v40 = vsub.s32 1, %v2953_v16 }
 0x466   : > { %9077 = vmatpush1.bf16.msra.mxu0 %v9076_v21  ;;  %8823 = vmatprep.subr.bf16.mxu1 %v8822_v11  ;;  %v9086_v25 = vpack.c.bf16 %v3683_v43, %v3681_v42  ;;  %v3682_v50 = vld [vmem:[%s11741_s20 + $0x8f0] sm:$0xff]  ;;  %v3189_v51 = vld [vmem:[%s11741_s20 + $0x508] sm:$0xff]  ;;  %v3191_v53 = vld [vmem:[%s11741_s20 + $0x518] sm:$0xff]  ;;  %v8832_v56 = vpack.c.bf16 %v3186_v48, %v3184_v47  ;;  %v13005_v42 = vsub.s32 2, %v2953_v16  ;;  %v13007_v43 = vsub.s32 3, %v2953_v16 }
 0x467   : > { %9079 = vmatprep.subr.bf16.mxu0 %v9078_v24  ;;  %v3685_v54 = vld [vmem:[%s11741_s20 + $0x908] sm:$0xff]  ;;  %v3687_v55 = vld [vmem:[%s11741_s20 + $0x918] sm:$0xff]  ;;  %v9088_v57 = vpack.c.bf16 %v3682_v50, %v3680_v49  ;;  %v8834_v23 = vpack.c.bf16 %v3191_v53, %v3189_v51  ;;  %v3188_v58 = vld [vmem:[%s11741_s20 + $0x500] sm:$0xff]  ;;  %v13011_v51 = vsub.s32 %v2972_v34, %v2953_v16 }
 0x468   : > { %v3190_v59 = vld [vmem:[%s11741_s20 + $0x510] sm:$0xff]  ;;  %v3684_v60 = vld [vmem:[%s11741_s20 + $0x900] sm:$0xff]  ;;  %v9090_v61 = vpack.c.bf16 %v3687_v55, %v3685_v54  ;;  %v3193_v0 = vld [vmem:[%s11741_s20 + $0x528] sm:$0xff] }
 0x469   : > { %8825 = vmatpush1.bf16.msra.mxu1 %v8824_v31  ;;  %v3686_v63 = vld [vmem:[%s11741_s20 + $0x910] sm:$0xff]  ;;  %v3195_v1 = vld [vmem:[%s11741_s20 + $0x538] sm:$0xff]  ;;  %v3689_v2 = vld [vmem:[%s11741_s20 + $0x928] sm:$0xff]  ;;  %v8836_v4 = vpack.c.bf16 %v3190_v59, %v3188_v58 }
 0x46a   : > { %9081 = vmatpush1.bf16.msra.mxu0 %v9080_v32  ;;  %8827 = vmatprep.subr.bf16.mxu1 %v8826_v62  ;;  %v3691_v3 = vld [vmem:[%s11741_s20 + $0x938] sm:$0xff]  ;;  %v9092_v5 = vpack.c.bf16 %v3686_v63, %v3684_v60  ;;  %v8838_v7 = vpack.c.bf16 %v3195_v1, %v3193_v0  ;;  %v3192_v8 = vld [vmem:[%s11741_s20 + $0x520] sm:$0xff]  ;;  %v3194_v9 = vld [vmem:[%s11741_s20 + $0x530] sm:$0xff] }
 0x46b   : > { %9083 = vmatprep.subr.bf16.mxu0 %v9082_v37  ;;  %v3688_v10 = vld [vmem:[%s11741_s20 + $0x920] sm:$0xff]  ;;  %v9094_v12 = vpack.c.bf16 %v3691_v3, %v3689_v2  ;;  %v3690_v44 = vld [vmem:[%s11741_s20 + $0x930] sm:$0xff]  ;;  %v3197_v13 = vld [vmem:[%s11741_s20 + $0x548] sm:$0xff]  ;;  %v8840_v20 = vpack.c.bf16 %v3194_v9, %v3192_v8 }
 0x46c   : > { %v3199_v14 = vld [vmem:[%s11741_s20 + $0x558] sm:$0xff]  ;;  %v3693_v35 = vld [vmem:[%s11741_s20 + $0x948] sm:$0xff]  ;;  %v3196_v21 = vld [vmem:[%s11741_s20 + $0x540] sm:$0xff]  ;;  %v9096_v17 = vpack.c.bf16 %v3690_v44, %v3688_v10 }
 0x46d   : > { %8829 = vmatpush1.bf16.msra.mxu1 %v8828_v45  ;;  %v3695_v15 = vld [vmem:[%s11741_s20 + $0x958] sm:$0xff]  ;;  %v3198_v11 = vld [vmem:[%s11741_s20 + $0x550] sm:$0xff]  ;;  %v8842_v22 = vpack.c.bf16 %v3199_v14, %v3197_v13  ;;  %v3692_v52 = vld [vmem:[%s11741_s20 + $0x940] sm:$0xff] }
 0x46e   : > { %9085 = vmatpush1.bf16.msra.mxu0 %v9084_v6  ;;  %8831 = vmatprep.subr.bf16.mxu1 %v8830_v46  ;;  %v3694_v24 = vld [vmem:[%s11741_s20 + $0x950] sm:$0xff]  ;;  %v3201_v26 = vld [vmem:[%s11741_s20 + $0x568] sm:$0xff]  ;;  %v9098_v27 = vpack.c.bf16 %v3695_v15, %v3693_v35  ;;  %v3203_v28 = vld [vmem:[%s11741_s20 + $0x578] sm:$0xff]  ;;  %v8844_v36 = vpack.c.bf16 %v3198_v11, %v3196_v21 }
 0x46f   : > { %9087 = vmatprep.subr.bf16.mxu0 %v9086_v25  ;;  %v3697_v29 = vld [vmem:[%s11741_s20 + $0x968] sm:$0xff]  ;;  %v3699_v30 = vld [vmem:[%s11741_s20 + $0x978] sm:$0xff]  ;;  %v3200_v31 = vld [vmem:[%s11741_s20 + $0x560] sm:$0xff]  ;;  %v9100_v45 = vpack.c.bf16 %v3694_v24, %v3692_v52  ;;  %v8846_v6 = vpack.c.bf16 %v3203_v28, %v3201_v26 }
 0x470   : > { %v3202_v32 = vld [vmem:[%s11741_s20 + $0x570] sm:$0xff]  ;;  %v3696_v62 = vld [vmem:[%s11741_s20 + $0x960] sm:$0xff]  ;;  %v3205_v38 = vld [vmem:[%s11741_s20 + $0x588] sm:$0xff]  ;;  %v9102_v46 = vpack.c.bf16 %v3699_v30, %v3697_v29 }
 0x471   : > { %8833 = vmatpush1.bf16.msra.mxu1 %v8832_v56  ;;  %v3698_v37 = vld [vmem:[%s11741_s20 + $0x970] sm:$0xff]  ;;  %v3207_v39 = vld [vmem:[%s11741_s20 + $0x598] sm:$0xff]  ;;  %v3701_v47 = vld [vmem:[%s11741_s20 + $0x988] sm:$0xff]  ;;  %v8848_v49 = vpack.c.bf16 %v3202_v32, %v3200_v31 }
 0x472   : > { %9089 = vmatpush1.bf16.msra.mxu0 %v9088_v57  ;;  %8835 = vmatprep.subr.bf16.mxu1 %v8834_v23  ;;  %v3703_v48 = vld [vmem:[%s11741_s20 + $0x998] sm:$0xff]  ;;  %v9104_v25 = vpack.c.bf16 %v3698_v37, %v3696_v62  ;;  %v8850_v50 = vpack.c.bf16 %v3207_v39, %v3205_v38  ;;  %v3118_v53 = vld [vmem:[#allocation7 + $0x4] sm:$0xf]  ;;  %v3204_v59 = vld [vmem:[%s11741_s20 + $0x580] sm:$0xff] }
 0x473   : > { %9091 = vmatprep.subr.bf16.mxu0 %v9090_v61  ;;  %v3123_v54 = vrot.slane %v3118_v53, %v12998_v33  ;;  %v3127_v55 = vrot.slane %v3118_v53, %v13003_v40  ;;  %v3131_v56 = vrot.slane %v3118_v53, %v13005_v42  ;;  %v3135_v57 = vrot.slane %v3118_v53, %v13007_v43  ;;  %v3614_v23 = vld [vmem:[#allocation7 + $0x8] sm:$0xf]  ;;  %v3206_v60 = vld [vmem:[%s11741_s20 + $0x590] sm:$0xff]  ;;  %v3700_v61 = vld [vmem:[%s11741_s20 + $0x980] sm:$0xff] }
 0x474   : > { %v9106_v58 = vpack.c.bf16 %v3703_v48, %v3701_v47  ;;  %v3619_v63 = vrot.slane %v3614_v23, %v12998_v33  ;;  %v3623_v0 = vrot.slane %v3614_v23, %v13003_v40  ;;  %v3702_v1 = vld [vmem:[%s11741_s20 + $0x990] sm:$0xff]  ;;  %v3209_v2 = vld [vmem:[%s11741_s20 + $0x5a8] sm:$0xff]  ;;  %v3211_v3 = vld [vmem:[%s11741_s20 + $0x5b8] sm:$0xff] }
 0x475   : > { %8837 = vmatpush1.bf16.msra.mxu1 %v8836_v4  ;;  %v3136_v41 = vcombine.low %v3123_v54, %v3127_v55  ;;  %v3137_v4 = vcombine.low %v3131_v56, %v3135_v57  ;;  %v3705_v8 = vld [vmem:[%s11741_s20 + $0x9a8] sm:$0xff]  ;;  %v3707_v9 = vld [vmem:[%s11741_s20 + $0x9b8] sm:$0xff]  ;;  %v3208_v44 = vld [vmem:[%s11741_s20 + $0x5a0] sm:$0xff]  ;;  %v9108_v15 = vpack.c.bf16 %v3702_v1, %v3700_v61  ;;  %v8854_v16 = vpack.c.bf16 %v3211_v3, %v3209_v2 }
 0x476   : > { %9093 = vmatpush1.bf16.msra.mxu0 %v9092_v5  ;;  %8839 = vmatprep.subr.bf16.mxu1 %v8838_v7  ;;  %v3627_v5 = vrot.slane %v3614_v23, %v13005_v42  ;;  %v3631_v7 = vrot.slane %v3614_v23, %v13007_v43  ;;  %v3632_v10 = vcombine.low %v3619_v63, %v3623_v0  ;;  %v3210_v18 = vld [vmem:[%s11741_s20 + $0x5b0] sm:$0xff]  ;;  %v3704_v19 = vld [vmem:[%s11741_s20 + $0x9a0] sm:$0xff]  ;;  %v3215_v52 = vld [vmem:[%s11741_s20 + $0x5d8] sm:$0xff] }
 0x477   : > { %9095 = vmatprep.subr.bf16.mxu0 %v9094_v12  ;;  %v8852_v12 = vpack.c.bf16 %v3206_v60, %v3204_v59  ;;  %v3144_v13 = vrot.slane %v3136_v41, %v13011_v51  ;;  %v3151_v14 = vrot.slane %v3137_v4, %v13011_v51  ;;  %v9110_v11 = vpack.c.bf16 %v3707_v9, %v3705_v8  ;;  %v3711_v28 = vld [vmem:[%s11741_s20 + $0x9d8] sm:$0xff]  ;;  %v3214_v37 = vld [vmem:[%s11741_s20 + $0x5d0] sm:$0xff]  ;;  %v3708_v38 = vld [vmem:[%s11741_s20 + $0x9c0] sm:$0xff] }
 0x478   : > { %v3633_v35 = vcombine.low %v3627_v5, %v3631_v7  ;;  %v3640_v21 = vrot.slane %v3632_v10, %v13011_v51  ;;  %v3613_v29 = vld [vmem:[#allocation2 + $0x10] sm:$0xff]  ;;  %v8856_v30 = vpack.c.bf16 %v3210_v18, %v3208_v44  ;;  %v3216_v57 = vld [vmem:[%s11741_s20 + $0x5e0] sm:$0xff]  ;;  %v3218_v23 = vld [vmem:[%s11741_s20 + $0x5f0] sm:$0xff] }
 0x479   : > { %8841 = vmatpush1.bf16.msra.mxu1 %v8840_v20  ;;  %v3117_v20 = vld [vmem:[#allocation2 + $0x8] sm:$0xff]  ;;  %v3152_v24 = vcombine.low %v3144_v13, %v3151_v14  ;;  %v3221_v0 = vld [vmem:[%s11741_s20 + $0x608] sm:$0xff]  ;;  %v3223_v1 = vld [vmem:[%s11741_s20 + $0x618] sm:$0xff]  ;;  %v8864_v5 = vpack.c.bf16 %v3218_v23, %v3216_v57 }
 0x47a   : > { %9097 = vmatpush1.bf16.msra.mxu0 %v9096_v17  ;;  %8843 = vmatprep.subr.bf16.mxu1 %v8842_v22  ;;  %v3706_v17 = vld [vmem:[%s11741_s20 + $0x9b0] sm:$0xff]  ;;  %v3213_v22 = vld [vmem:[%s11741_s20 + $0x5c8] sm:$0xff]  ;;  %v3647_v26 = vrot.slane %v3633_v35, %v13011_v51  ;;  %v3719_v4 = vld [vmem:[%s11741_s20 + $0xa18] sm:$0xff]  ;;  %v8866_v9 = vpack.c.bf16 %v3223_v1, %v3221_v0 }
 0x47b   : > { %9099 = vmatprep.subr.bf16.mxu0 %v9098_v27  ;;  %v3709_v27 = vld [vmem:[%s11741_s20 + $0x9c8] sm:$0xff]  ;;  %v3154_v31 = vadd.f32 %v3152_v24, %v3117_v20  ;;  %v9112_v62 = vpack.c.bf16 %v3706_v17, %v3704_v19  ;;  %v8858_v34 = vpack.c.bf16 %v3215_v52, %v3213_v22  ;;  %v3714_v60 = vld [vmem:[%s11741_s20 + $0x9f0] sm:$0xff]  ;;  %v3220_v10 = vld [vmem:[%s11741_s20 + $0x600] sm:$0xff] }
 0x47c   : > { %v3648_v32 = vcombine.low %v3640_v21, %v3647_v26  ;;  %v9114_v39 = vpack.c.bf16 %v3711_v28, %v3709_v27  ;;  %v3717_v41 = vld [vmem:[%s11741_s20 + $0xa08] sm:$0xff]  ;;  %v3716_v44 = vld [vmem:[%s11741_s20 + $0xa00] sm:$0xff]  ;;  %v3718_v14 = vld [vmem:[%s11741_s20 + $0xa10] sm:$0xff] }
 0x47d   : > { %8845 = vmatpush1.bf16.msra.mxu1 %v8844_v36  ;;  %v3212_v36 = vld [vmem:[%s11741_s20 + $0x5c0] sm:$0xff]  ;;  %v3155_v47 = vmax.f32 %v3154_v31, 0.0  ;;  %v9122_v13 = vpack.c.bf16 %v3719_v4, %v3717_v41  ;;  %v3225_v35 = vld [vmem:[%s11741_s20 + $0x628] sm:$0xff]  ;;  %v3723_v19 = vld [vmem:[%s11741_s20 + $0xa38] sm:$0xff] }
 0x47e   : > { %9101 = vmatpush1.bf16.msra.mxu0 %v9100_v45  ;;  %8847 = vmatprep.subr.bf16.mxu1 %v8846_v6  ;;  %v3710_v45 = vld [vmem:[%s11741_s20 + $0x9d0] sm:$0xff]  ;;  %v3217_v6 = vld [vmem:[%s11741_s20 + $0x5e8] sm:$0xff]  ;;  %v3650_v48 = vadd.f32 %v3648_v32, %v3613_v29  ;;  %v3224_v22 = vld [vmem:[%s11741_s20 + $0x620] sm:$0xff] }
 0x47f   : > { %9103 = vmatprep.subr.bf16.mxu0 %v9102_v46  ;;  %v3219_v46 = vld [vmem:[%s11741_s20 + $0x5f8] sm:$0xff]  ;;  %v3292_v53 = vrot.slane %v3155_v47, %v13011_v51  ;;  %v9116_v55 = vpack.c.bf16 %v3710_v45, %v3708_v38  ;;  %v3285_v61 = vcombine.high %v3155_v47, %v3155_v47  ;;  %v3721_v18 = vld [vmem:[%s11741_s20 + $0xa28] sm:$0xff]  ;;  %v3226_v52 = vld [vmem:[%s11741_s20 + $0x630] sm:$0xff] }
 0x480   : > { %v3651_v54 = vmax.f32 %v3650_v48, 0.0  ;;  %v8862_v56 = vpack.c.bf16 %v3219_v46, %v3217_v6  ;;  %v3720_v24 = vld [vmem:[%s11741_s20 + $0xa20] sm:$0xff]  ;;  %v9126_v26 = vpack.c.bf16 %v3723_v19, %v3721_v18  ;;  %v3722_v27 = vld [vmem:[%s11741_s20 + $0xa30] sm:$0xff]  ;;  %v3229_v28 = vld [vmem:[%s11741_s20 + $0x648] sm:$0xff] }
 0x481   : > { %8849 = vmatpush1.bf16.msra.mxu1 %v8848_v49  ;;  %v3713_v49 = vld [vmem:[%s11741_s20 + $0x9e8] sm:$0xff]  ;;  %v3300_v63 = vcombine.high %v3292_v53, %v3292_v53  ;;  %v3231_v29 = vld [vmem:[%s11741_s20 + $0x658] sm:$0xff]  ;;  %v3228_v38 = vld [vmem:[%s11741_s20 + $0x640] sm:$0xff] }
 0x482   : > { %9105 = vmatpush1.bf16.msra.mxu0 %v9104_v25  ;;  %8851 = vmatprep.subr.bf16.mxu1 %v8850_v50  ;;  %v3715_v25 = vld [vmem:[%s11741_s20 + $0x9f8] sm:$0xff]  ;;  %v8860_v50 = vpack.c.bf16 %v3214_v37, %v3212_v36  ;;  %v3788_v2 = vrot.slane %v3651_v54, %v13011_v51  ;;  %v3781_v3 = vcombine.high %v3651_v54, %v3651_v54  ;;  %v3725_v31 = vld [vmem:[%s11741_s20 + $0xa48] sm:$0xff]  ;;  %v3724_v45 = vld [vmem:[%s11741_s20 + $0xa40] sm:$0xff] }
 0x483   : > { %9107 = vmatprep.subr.bf16.mxu0 %v9106_v58  ;;  %v3712_v58 = vld [vmem:[%s11741_s20 + $0x9e0] sm:$0xff]  ;;  %v9118_v59 = vpack.c.bf16 %v3715_v25, %v3713_v49  ;;  %3370 = vmatprep.mubr.f32.mxu1 %v3300_v63  ;;  %v3727_v32 = vld [vmem:[%s11741_s20 + $0xa58] sm:$0xff]  ;;  %v9128_v36 = vpack.c.bf16 %v3722_v27, %v3720_v24  ;;  %v8874_v37 = vpack.c.bf16 %v3231_v29, %v3229_v28  ;;  %v3726_v46 = vld [vmem:[%s11741_s20 + $0xa50] sm:$0xff] }
 0x484   : > { %v3796_v7 = vcombine.high %v3788_v2, %v3788_v2  ;;  %v9120_v8 = vpack.c.bf16 %v3714_v60, %v3712_v58  ;;  %v13071_v20 = vrot.slane %v3781_v3, %v13011_v51  ;;  %v9130_v6 = vpack.c.bf16 %v3727_v32, %v3725_v31  ;;  %v3233_v47 = vld [vmem:[%s11741_s20 + $0x668] sm:$0xff]  ;;  %v3235_v48 = vld [vmem:[%s11741_s20 + $0x678] sm:$0xff]  ;;  %v3728_v57 = vld [vmem:[%s11741_s20 + $0xa60] sm:$0xff] }
 0x485   : > { %8853 = vmatpush1.bf16.msra.mxu1 %v8852_v12  ;;  %v3222_v12 = vld [vmem:[%s11741_s20 + $0x610] sm:$0xff]  ;;  %v3729_v49 = vld [vmem:[%s11741_s20 + $0xa68] sm:$0xff]  ;;  %v3731_v25 = vld [vmem:[%s11741_s20 + $0xa78] sm:$0xff]  ;;  %v8878_v54 = vpack.c.bf16 %v3235_v48, %v3233_v47 }
 0x486   : > { %9109 = vmatpush1.bf16.msra.mxu0 %v9108_v15  ;;  %8855 = vmatprep.subr.bf16.mxu1 %v8854_v16  ;;  %v3227_v15 = vld [vmem:[%s11741_s20 + $0x638] sm:$0xff]  ;;  %v13066_v16 = vrot.slane %v3285_v61, %v13011_v51  ;;  %v8868_v21 = vpack.c.bf16 %v3222_v12, %v3220_v10  ;;  %v9134_v23 = vpack.c.bf16 %v3731_v25, %v3729_v49  ;;  %v3730_v58 = vld [vmem:[%s11741_s20 + $0xa70] sm:$0xff]  ;;  %v3733_v61 = vld [vmem:[%s11741_s20 + $0xa88] sm:$0xff] }
 0x487   : > { %9111 = vmatprep.subr.bf16.mxu0 %v9110_v11  ;;  %3866 = vmatprep.mubr.f32.mxu0 %v3796_v7  ;;  %v9124_v11 = vpack.c.bf16 %v3718_v14, %v3716_v44  ;;  %v8870_v17 = vpack.c.bf16 %v3227_v15, %v3225_v35  ;;  %v3239_v60 = vld [vmem:[%s11741_s20 + $0x698] sm:$0xff]  ;;  %v9136_v1 = vpack.c.bf16 %v3730_v58, %v3728_v57  ;;  %v3236_v3 = vld [vmem:[%s11741_s20 + $0x680] sm:$0xff]  ;;  %v3238_v41 = vld [vmem:[%s11741_s20 + $0x690] sm:$0xff] }
 0x488   : > { %v3735_v63 = vld [vmem:[%s11741_s20 + $0xa98] sm:$0xff]  ;;  %v3732_v4 = vld [vmem:[%s11741_s20 + $0xa80] sm:$0xff]  ;;  %v3734_v7 = vld [vmem:[%s11741_s20 + $0xa90] sm:$0xff]  ;;  %v8884_v44 = vpack.c.bf16 %v3238_v41, %v3236_v3 }
 0x489   : > { %8857 = vmatpush1.bf16.msra.mxu1 %v8856_v30  ;;  %v3301_v30 = vcombine.high %v13066_v16, %v13066_v16  ;;  %v3737_v10 = vld [vmem:[%s11741_s20 + $0xaa8] sm:$0xff]  ;;  %v3739_v12 = vld [vmem:[%s11741_s20 + $0xab8] sm:$0xff]  ;;  %v3240_v35 = vld [vmem:[%s11741_s20 + $0x6a0] sm:$0xff] }
 0x48a   : > { %9113 = vmatpush1.bf16.msra.mxu0 %v9112_v62  ;;  %8859 = vmatprep.subr.bf16.mxu1 %v8858_v34  ;;  %v3797_v62 = vcombine.high %v13071_v20, %v13071_v20  ;;  %v8872_v34 = vpack.c.bf16 %v3226_v52, %v3224_v22  ;;  %v3242_v15 = vld [vmem:[%s11741_s20 + $0x6b0] sm:$0xff]  ;;  %v3736_v18 = vld [vmem:[%s11741_s20 + $0xaa0] sm:$0xff]  ;;  %v9142_v19 = vpack.c.bf16 %v3739_v12, %v3737_v10  ;;  %v3741_v22 = vld [vmem:[%s11741_s20 + $0xac8] sm:$0xff] }
 0x48b   : > { %9115 = vmatprep.subr.bf16.mxu0 %v9114_v39  ;;  %v3230_v39 = vld [vmem:[%s11741_s20 + $0x650] sm:$0xff]  ;;  %v3743_v52 = vld [vmem:[%s11741_s20 + $0xad8] sm:$0xff]  ;;  %v8888_v24 = vpack.c.bf16 %v3242_v15, %v3240_v35  ;;  %v3244_v28 = vld [vmem:[%s11741_s20 + $0x6c0] sm:$0xff] }
 0x48c   : > { %v3246_v29 = vld [vmem:[%s11741_s20 + $0x6d0] sm:$0xff]  ;;  %v9146_v31 = vpack.c.bf16 %v3743_v52, %v3741_v22  ;;  %v3744_v47 = vld [vmem:[%s11741_s20 + $0xae0] sm:$0xff]  ;;  %v3253_v25 = vld [vmem:[%s11741_s20 + $0x708] sm:$0xff] }
 0x48d   : > { %8861 = vmatpush1.bf16.msra.mxu1 %v8860_v50  ;;  %v8876_v50 = vpack.c.bf16 %v3230_v39, %v3228_v38  ;;  %v3742_v32 = vld [vmem:[%s11741_s20 + $0xad0] sm:$0xff]  ;;  %v8892_v38 = vpack.c.bf16 %v3246_v29, %v3244_v28  ;;  %v3261_v12 = vld [vmem:[%s11741_s20 + $0x748] sm:$0xff] }
 0x48e   : > { %9117 = vmatpush1.bf16.msra.mxu0 %v9116_v55  ;;  %8863 = vmatprep.subr.bf16.mxu1 %v8862_v56  ;;  %v3232_v55 = vld [vmem:[%s11741_s20 + $0x660] sm:$0xff]  ;;  %v3234_v56 = vld [vmem:[%s11741_s20 + $0x670] sm:$0xff]  ;;  %v3265_v52 = vld [vmem:[%s11741_s20 + $0x768] sm:$0xff] }
 0x48f   : > { %9119 = vmatprep.subr.bf16.mxu0 %v9118_v59  ;;  %v3237_v59 = vld [vmem:[%s11741_s20 + $0x688] sm:$0xff]  ;;  %v8880_v0 = vpack.c.bf16 %v3234_v56, %v3232_v55  ;;  %v3746_v49 = vld [vmem:[%s11741_s20 + $0xaf0] sm:$0xff] }
 0x490   : > { %v9152_v56 = vpack.c.bf16 %v3746_v49, %v3744_v47  ;;  %v3254_v58 = vld [vmem:[%s11741_s20 + $0x710] sm:$0xff] }
 0x491   : > { %8865 = vmatpush1.bf16.msra.mxu1 %v8864_v5  ;;  %v9138_v5 = vpack.c.bf16 %v3735_v63, %v3733_v61  ;;  %v3750_v61 = vld [vmem:[%s11741_s20 + $0xb10] sm:$0xff]  ;;  %v3257_v63 = vld [vmem:[%s11741_s20 + $0x728] sm:$0xff] }
 0x492   : > { %9121 = vmatpush1.bf16.msra.mxu0 %v9120_v8  ;;  %8867 = vmatprep.subr.bf16.mxu1 %v8866_v9  ;;  %v3241_v8 = vld [vmem:[%s11741_s20 + $0x6a8] sm:$0xff]  ;;  %v3243_v9 = vld [vmem:[%s11741_s20 + $0x6b8] sm:$0xff]  ;;  %v3754_v10 = vld [vmem:[%s11741_s20 + $0xb30] sm:$0xff] }
 0x493   : > { %9123 = vmatprep.subr.bf16.mxu0 %v9122_v13  ;;  %v9140_v13 = vpack.c.bf16 %v3734_v7, %v3732_v4  ;;  %v8886_v14 = vpack.c.bf16 %v3243_v9, %v3241_v8  ;;  %v3258_v7 = vld [vmem:[%s11741_s20 + $0x730] sm:$0xff]  ;;  %v3752_v8 = vld [vmem:[%s11741_s20 + $0xb20] sm:$0xff] }
 0x494   : > { %3371 = vmatmul.mubr.f32.vlgmr.msra.gmra.mrb[0].mxu1 %v3292_v53  ;;  %v9132_v53 = vpack.c.bf16 %v3726_v46, %v3724_v45  ;;  %v3250_v46 = vld [vmem:[%s11741_s20 + $0x6f0] sm:$0xff]  ;;  %v9160_v15 = vpack.c.bf16 %v3754_v10, %v3752_v8 }
 0x495   : > { %8869 = vmatpush1.bf16.msra.mxu1 %v8868_v21  ;;  %3867 = vmatmul.mubr.f32.vlgmr.msra.gmra.mrb[0].mxu0 %v3788_v2  ;;  %v8882_v2 = vpack.c.bf16 %v3239_v60, %v3237_v59  ;;  %v3738_v21 = vld [vmem:[%s11741_s20 + $0xab0] sm:$0xff]  ;;  %v3748_v59 = vld [vmem:[%s11741_s20 + $0xb00] sm:$0xff] }
 0x496   : > { %9125 = vmatpush1.bf16.msra.mxu0 %v9124_v11  ;;  %8871 = vmatprep.subr.bf16.mxu1 %v8870_v17  ;;  %v3245_v11 = vld [vmem:[%s11741_s20 + $0x6c8] sm:$0xff]  ;;  %v3247_v17 = vld [vmem:[%s11741_s20 + $0x6d8] sm:$0xff]  ;;  %v9156_v41 = vpack.c.bf16 %v3750_v61, %v3748_v59  ;;  %v3758_v22 = vld [vmem:[%s11741_s20 + $0xb50] sm:$0xff] }
 0x497   : > { %9127 = vmatprep.subr.bf16.mxu0 %v9126_v26  ;;  %3441 = vmatprep.mubr.f32.mxu1 %v3301_v30  ;;  %v9144_v26 = vpack.c.bf16 %v3738_v21, %v3736_v18  ;;  %v8890_v27 = vpack.c.bf16 %v3247_v17, %v3245_v11  ;;  %v3740_v30 = vld [vmem:[%s11741_s20 + $0xac0] sm:$0xff]  ;;  %v3262_v21 = vld [vmem:[%s11741_s20 + $0x750] sm:$0xff] }
 0x498   : > { %3937 = vmatprep.mubr.f32.mxu0 %v3797_v62  ;;  %v3249_v62 = vld [vmem:[%s11741_s20 + $0x6e8] sm:$0xff]  ;;  %v9148_v39 = vpack.c.bf16 %v3742_v32, %v3740_v30  ;;  %v3756_v11 = vld [vmem:[%s11741_s20 + $0xb40] sm:$0xff]  ;;  %v3266_v32 = vld [vmem:[%s11741_s20 + $0x770] sm:$0xff] }
 0x499   : > { %8873 = vmatpush1.bf16.msra.mxu1 %v8872_v34  ;;  %v3251_v34 = vld [vmem:[%s11741_s20 + $0x6f8] sm:$0xff]  ;;  %v9164_v29 = vpack.c.bf16 %v3758_v22, %v3756_v11  ;;  %v3270_v49 = vld [vmem:[%s11741_s20 + $0x790] sm:$0xff] }
 0x49a   : > { %9129 = vmatpush1.bf16.msra.mxu0 %v9128_v36  ;;  %8875 = vmatprep.subr.bf16.mxu1 %v8874_v37  ;;  %v3745_v36 = vld [vmem:[%s11741_s20 + $0xae8] sm:$0xff]  ;;  %v3747_v37 = vld [vmem:[%s11741_s20 + $0xaf8] sm:$0xff]  ;;  %v8894_v45 = vpack.c.bf16 %v3251_v34, %v3249_v62  ;;  %v3760_v62 = vld [vmem:[%s11741_s20 + $0xb60] sm:$0xff] }
 0x49b   : > { %9131 = vmatprep.subr.bf16.mxu0 %v9130_v6  ;;  %v3248_v6 = vld [vmem:[%s11741_s20 + $0x6e0] sm:$0xff]  ;;  %v9150_v48 = vpack.c.bf16 %v3747_v37, %v3745_v36  ;;  %v3762_v36 = vld [vmem:[%s11741_s20 + $0xb70] sm:$0xff]  ;;  %v3269_v37 = vld [vmem:[%s11741_s20 + $0x788] sm:$0xff] }
 0x49c   : > { %v8896_v55 = vpack.c.bf16 %v3250_v46, %v3248_v6  ;;  %v9168_v46 = vpack.c.bf16 %v3762_v36, %v3760_v62  ;;  %v3274_v61 = vld [vmem:[%s11741_s20 + $0x7b0] sm:$0xff] }
 0x49d   : > { %8877 = vmatpush1.bf16.msra.mxu1 %v8876_v50  ;;  %v3255_v50 = vld [vmem:[%s11741_s20 + $0x718] sm:$0xff]  ;;  %v3278_v10 = vld [vmem:[%s11741_s20 + $0x7d0] sm:$0xff] }
 0x49e   : > { %9133 = vmatpush1.bf16.msra.mxu0 %v9132_v53  ;;  %8879 = vmatprep.subr.bf16.mxu1 %v8878_v54  ;;  %v3749_v53 = vld [vmem:[%s11741_s20 + $0xb08] sm:$0xff]  ;;  %v3751_v54 = vld [vmem:[%s11741_s20 + $0xb18] sm:$0xff]  ;;  %v8898_v57 = vpack.c.bf16 %v3255_v50, %v3253_v25  ;;  %v3764_v25 = vld [vmem:[%s11741_s20 + $0xb80] sm:$0xff] }
 0x49f   : > { %9135 = vmatprep.subr.bf16.mxu0 %v9134_v23  ;;  %v3252_v23 = vld [vmem:[%s11741_s20 + $0x700] sm:$0xff]  ;;  %v9154_v60 = vpack.c.bf16 %v3751_v54, %v3749_v53  ;;  %v3766_v53 = vld [vmem:[%s11741_s20 + $0xb90] sm:$0xff]  ;;  %v3273_v54 = vld [vmem:[%s11741_s20 + $0x7a8] sm:$0xff] }
 0x4a0   : > { %v8900_v3 = vpack.c.bf16 %v3254_v58, %v3252_v23  ;;  %v9172_v58 = vpack.c.bf16 %v3766_v53, %v3764_v25  ;;  %v3282_v22 = vld [vmem:[%s11741_s20 + $0x7f0] sm:$0xff]  ;;  %v3990_v25 = vld [vmem:[%s11741_s20 + $0xc20] sm:$0xff] }
 0x4a1   : > { %8881 = vmatpush1.bf16.msra.mxu1 %v8880_v0  ;;  %v3259_v0 = vld [vmem:[%s11741_s20 + $0x738] sm:$0xff]  ;;  %v2990_v62 = vld [vmem:[%s11741_s20 + $0x10] sm:$0xff] }
 0x4a2   : > { %9137 = vmatpush1.bf16.msra.mxu0 %v9136_v1  ;;  %8883 = vmatprep.subr.bf16.mxu1 %v8882_v2  ;;  %v3753_v1 = vld [vmem:[%s11741_s20 + $0xb28] sm:$0xff]  ;;  %v3755_v2 = vld [vmem:[%s11741_s20 + $0xb38] sm:$0xff]  ;;  %v8902_v4 = vpack.c.bf16 %v3259_v0, %v3257_v63  ;;  %v3768_v63 = vld [vmem:[%s11741_s20 + $0xba0] sm:$0xff] }
 0x4a3   : > { %9139 = vmatprep.subr.bf16.mxu0 %v9138_v5  ;;  %v3256_v5 = vld [vmem:[%s11741_s20 + $0x720] sm:$0xff]  ;;  %v9158_v9 = vpack.c.bf16 %v3755_v2, %v3753_v1  ;;  %v3770_v1 = vld [vmem:[%s11741_s20 + $0xbb0] sm:$0xff]  ;;  %v3277_v2 = vld [vmem:[%s11741_s20 + $0x7c8] sm:$0xff] }
 0x4a4   : > { %v8904_v35 = vpack.c.bf16 %v3258_v7, %v3256_v5  ;;  %v9176_v7 = vpack.c.bf16 %v3770_v1, %v3768_v63  ;;  %v3992_v53 = vld [vmem:[%s11741_s20 + $0xc30] sm:$0xff] }
 0x4a5   : > { %8885 = vmatpush1.bf16.msra.mxu1 %v8884_v44  ;;  %v3263_v44 = vld [vmem:[%s11741_s20 + $0x758] sm:$0xff] }
 0x4a6   : > { %9141 = vmatpush1.bf16.msra.mxu0 %v9140_v13  ;;  %8887 = vmatprep.subr.bf16.mxu1 %v8886_v14  ;;  %v3757_v13 = vld [vmem:[%s11741_s20 + $0xb48] sm:$0xff]  ;;  %v3759_v14 = vld [vmem:[%s11741_s20 + $0xb58] sm:$0xff]  ;;  %v8906_v18 = vpack.c.bf16 %v3263_v44, %v3261_v12  ;;  %v3772_v12 = vld [vmem:[%s11741_s20 + $0xbc0] sm:$0xff] }
 0x4a7   : > { %9143 = vmatprep.subr.bf16.mxu0 %v9142_v19  ;;  %v3260_v19 = vld [vmem:[%s11741_s20 + $0x740] sm:$0xff]  ;;  %v9162_v17 = vpack.c.bf16 %v3759_v14, %v3757_v13  ;;  %v3774_v13 = vld [vmem:[%s11741_s20 + $0xbd0] sm:$0xff]  ;;  %v3281_v14 = vld [vmem:[%s11741_s20 + $0x7e8] sm:$0xff] }
 0x4a8   : > { %v8908_v28 = vpack.c.bf16 %v3262_v21, %v3260_v19  ;;  %v9180_v21 = vpack.c.bf16 %v3774_v13, %v3772_v12  ;;  %v3996_v12 = vld [vmem:[%s11741_s20 + $0xc50] sm:$0xff] }
 0x4a9   : > { %8889 = vmatpush1.bf16.msra.mxu1 %v8888_v24  ;;  %v3267_v24 = vld [vmem:[%s11741_s20 + $0x778] sm:$0xff] }
 0x4aa   : > { %9145 = vmatpush1.bf16.msra.mxu0 %v9144_v26  ;;  %8891 = vmatprep.subr.bf16.mxu1 %v8890_v27  ;;  %v3761_v26 = vld [vmem:[%s11741_s20 + $0xb68] sm:$0xff]  ;;  %v3763_v27 = vld [vmem:[%s11741_s20 + $0xb78] sm:$0xff]  ;;  %v8910_v30 = vpack.c.bf16 %v3267_v24, %v3265_v52  ;;  %v3776_v52 = vld [vmem:[%s11741_s20 + $0xbe0] sm:$0xff] }
 0x4ab   : > { %9147 = vmatprep.subr.bf16.mxu0 %v9146_v31  ;;  %v3264_v31 = vld [vmem:[%s11741_s20 + $0x760] sm:$0xff]  ;;  %v9166_v34 = vpack.c.bf16 %v3763_v27, %v3761_v26  ;;  %v3778_v26 = vld [vmem:[%s11741_s20 + $0xbf0] sm:$0xff]  ;;  %v2989_v27 = vld [vmem:[%s11741_s20 + $0x8] sm:$0xff] }
 0x4ac   : > { %v8912_v6 = vpack.c.bf16 %v3266_v32, %v3264_v31  ;;  %v2988_v32 = vld [vmem:[%s11741_s20] sm:$0xff] }
 0x4ad   : > { %8893 = vmatpush1.bf16.msra.mxu1 %v8892_v38  ;;  %v3271_v38 = vld [vmem:[%s11741_s20 + $0x798] sm:$0xff] }
 0x4ae   : > { %9149 = vmatpush1.bf16.msra.mxu0 %v9148_v39  ;;  %8895 = vmatprep.subr.bf16.mxu1 %v8894_v45  ;;  %v3765_v39 = vld [vmem:[%s11741_s20 + $0xb88] sm:$0xff]  ;;  %v3767_v45 = vld [vmem:[%s11741_s20 + $0xb98] sm:$0xff]  ;;  %v8914_v47 = vpack.c.bf16 %v3271_v38, %v3269_v37  ;;  %v3986_v37 = vld [vmem:[%s11741_s20 + $0xc00] sm:$0xff] }
 0x4af   : > { %9151 = vmatprep.subr.bf16.mxu0 %v9150_v48  ;;  %v3268_v48 = vld [vmem:[%s11741_s20 + $0x780] sm:$0xff]  ;;  %v9170_v50 = vpack.c.bf16 %v3767_v45, %v3765_v39  ;;  %v3988_v38 = vld [vmem:[%s11741_s20 + $0xc10] sm:$0xff]  ;;  %v2993_v39 = vld [vmem:[%s11741_s20 + $0x28] sm:$0xff] }
 0x4b0   : > { %v8916_v23 = vpack.c.bf16 %v3270_v49, %v3268_v48  ;;  %v2992_v48 = vld [vmem:[%s11741_s20 + $0x20] sm:$0xff]  ;;  %v2994_v49 = vld [vmem:[%s11741_s20 + $0x30] sm:$0xff] }
 0x4b1   : > { %8897 = vmatpush1.bf16.msra.mxu1 %v8896_v55  ;;  %v3275_v55 = vld [vmem:[%s11741_s20 + $0x7b8] sm:$0xff]  ;;  %v8936_v63 = vpack.c.bf16 %v2994_v49, %v2992_v48  ;;  %v3006_v48 = vld [vmem:[%s11741_s20 + $0x90] sm:$0xff]  ;;  %v4002_v49 = vld [vmem:[%s11741_s20 + $0xc80] sm:$0xff] }
 0x4b2   : > { %9153 = vmatpush1.bf16.msra.mxu0 %v9152_v56  ;;  %8899 = vmatprep.subr.bf16.mxu1 %v8898_v57  ;;  %v3769_v56 = vld [vmem:[%s11741_s20 + $0xba8] sm:$0xff]  ;;  %v3771_v57 = vld [vmem:[%s11741_s20 + $0xbb8] sm:$0xff]  ;;  %v8918_v59 = vpack.c.bf16 %v3275_v55, %v3273_v54 }
 0x4b3   : > { %9155 = vmatprep.subr.bf16.mxu0 %v9154_v60  ;;  %v3272_v60 = vld [vmem:[%s11741_s20 + $0x7a0] sm:$0xff]  ;;  %v9174_v0 = vpack.c.bf16 %v3771_v57, %v3769_v56  ;;  %v2997_v54 = vld [vmem:[%s11741_s20 + $0x48] sm:$0xff]  ;;  %v2999_v55 = vld [vmem:[%s11741_s20 + $0x58] sm:$0xff]  ;;  %v9188_v56 = vpack.c.bf16 %v3988_v38, %v3986_v37 }
 0x4b4   : > { %v8920_v5 = vpack.c.bf16 %v3274_v61, %v3272_v60  ;;  %v8938_v1 = vpack.c.bf16 %v2999_v55, %v2997_v54  ;;  %v4005_v37 = vld [vmem:[%s11741_s20 + $0xc98] sm:$0xff]  ;;  %v3009_v55 = vld [vmem:[%s11741_s20 + $0xa8] sm:$0xff] }
 0x4b5   : > { %8901 = vmatpush1.bf16.msra.mxu1 %v8900_v3  ;;  %v3279_v3 = vld [vmem:[%s11741_s20 + $0x7d8] sm:$0xff] }
 0x4b6   : > { %9157 = vmatpush1.bf16.msra.mxu0 %v9156_v41  ;;  %8903 = vmatprep.subr.bf16.mxu1 %v8902_v4  ;;  %v3773_v41 = vld [vmem:[%s11741_s20 + $0xbc8] sm:$0xff]  ;;  %v3775_v4 = vld [vmem:[%s11741_s20 + $0xbd8] sm:$0xff]  ;;  %v8922_v8 = vpack.c.bf16 %v3279_v3, %v3277_v2 }
 0x4b7   : > { %9159 = vmatprep.subr.bf16.mxu0 %v9158_v9  ;;  %v3276_v9 = vld [vmem:[%s11741_s20 + $0x7c0] sm:$0xff]  ;;  %v9178_v44 = vpack.c.bf16 %v3775_v4, %v3773_v41  ;;  %v3995_v2 = vld [vmem:[%s11741_s20 + $0xc48] sm:$0xff]  ;;  %v3997_v3 = vld [vmem:[%s11741_s20 + $0xc58] sm:$0xff] }
 0x4b8   : > { %v8924_v19 = vpack.c.bf16 %v3278_v10, %v3276_v9  ;;  %v3948_v4 = vld [vmem:[#allocation7 + $0xc] sm:$0xf]  ;;  %v2998_v9 = vld [vmem:[%s11741_s20 + $0x50] sm:$0xff]  ;;  %v3994_v10 = vld [vmem:[%s11741_s20 + $0xc40] sm:$0xff] }
 0x4b9   : > { %8905 = vmatpush1.bf16.msra.mxu1 %v8904_v35  ;;  %v3283_v35 = vld [vmem:[%s11741_s20 + $0x7f8] sm:$0xff]  ;;  %v3961_v13 = vrot.slane %v3948_v4, %v13005_v42 }
 0x4ba   : > { %9161 = vmatpush1.bf16.msra.mxu0 %v9160_v15  ;;  %8907 = vmatprep.subr.bf16.mxu1 %v8906_v18  ;;  %v3777_v15 = vld [vmem:[%s11741_s20 + $0xbe8] sm:$0xff]  ;;  %v3779_v18 = vld [vmem:[%s11741_s20 + $0xbf8] sm:$0xff]  ;;  %v8926_v11 = vpack.c.bf16 %v3283_v35, %v3281_v14  ;;  %v9194_v14 = vpack.c.bf16 %v3997_v3, %v3995_v2  ;;  %v4006_v2 = vld [vmem:[%s11741_s20 + $0xca0] sm:$0xff] }
 0x4bb   : > { %9163 = vmatprep.subr.bf16.mxu0 %v9162_v17  ;;  %v3280_v17 = vld [vmem:[%s11741_s20 + $0x7e0] sm:$0xff]  ;;  %v9182_v24 = vpack.c.bf16 %v3779_v18, %v3777_v15  ;;  %v3001_v35 = vld [vmem:[%s11741_s20 + $0x68] sm:$0xff]  ;;  %v3003_v15 = vld [vmem:[%s11741_s20 + $0x78] sm:$0xff] }
 0x4bc   : > { %v8928_v31 = vpack.c.bf16 %v3282_v22, %v3280_v17  ;;  %v3999_v18 = vld [vmem:[%s11741_s20 + $0xc68] sm:$0xff]  ;;  %v3000_v17 = vld [vmem:[%s11741_s20 + $0x60] sm:$0xff] }
 0x4bd   : > { %8909 = vmatpush1.bf16.msra.mxu1 %v8908_v28  ;;  %v2991_v28 = vld [vmem:[%s11741_s20 + $0x18] sm:$0xff]  ;;  %v2949_v22 = vld [vmem:[#allocation2] sm:$0xff] }
 0x4be   : > { %9165 = vmatpush1.bf16.msra.mxu0 %v9164_v29  ;;  %8911 = vmatprep.subr.bf16.mxu1 %v8910_v30  ;;  %v3987_v29 = vld [vmem:[%s11741_s20 + $0xc08] sm:$0xff]  ;;  %v3989_v30 = vld [vmem:[%s11741_s20 + $0xc18] sm:$0xff]  ;;  %v8930_v36 = vpack.c.bf16 %v2991_v28, %v2989_v27  ;;  %v3998_v27 = vld [vmem:[%s11741_s20 + $0xc60] sm:$0xff] }
 0x4bf   : > { %9167 = vmatprep.subr.bf16.mxu0 %v9166_v34  ;;  %v9184_v34 = vpack.c.bf16 %v3778_v26, %v3776_v52  ;;  %v9186_v45 = vpack.c.bf16 %v3989_v30, %v3987_v29  ;;  %v3002_v26 = vld [vmem:[%s11741_s20 + $0x70] sm:$0xff] }
 0x4c0   : > { %v4000_v28 = vld [vmem:[%s11741_s20 + $0xc70] sm:$0xff] }
 0x4c1   : > { %8913 = vmatpush1.bf16.msra.mxu1 %v8912_v6  ;;  %v2995_v6 = vld [vmem:[%s11741_s20 + $0x38] sm:$0xff] }
 0x4c2   : > { %9169 = vmatpush1.bf16.msra.mxu0 %v9168_v46  ;;  %8915 = vmatprep.subr.bf16.mxu1 %v8914_v47  ;;  %v3991_v46 = vld [vmem:[%s11741_s20 + $0xc28] sm:$0xff]  ;;  %v3993_v47 = vld [vmem:[%s11741_s20 + $0xc38] sm:$0xff]  ;;  %v8934_v57 = vpack.c.bf16 %v2995_v6, %v2993_v39  ;;  %v3004_v6 = vld [vmem:[%s11741_s20 + $0x80] sm:$0xff] }
 0x4c3   : > { %9171 = vmatprep.subr.bf16.mxu0 %v9170_v50  ;;  %v8932_v50 = vpack.c.bf16 %v2990_v62, %v2988_v32  ;;  %v3005_v32 = vld [vmem:[%s11741_s20 + $0x88] sm:$0xff]  ;;  %v3007_v62 = vld [vmem:[%s11741_s20 + $0x98] sm:$0xff] }
 0x4c5   : > { %8917 = vmatpush1.bf16.msra.mxu1 %v8916_v23  ;;  %v2950_v23 = vld [vmem:[#allocation7] sm:$0xf] }
 0x4c6   : > { %9173 = vmatpush1.bf16.msra.mxu0 %v9172_v58  ;;  %8919 = vmatprep.subr.bf16.mxu1 %v8918_v59  ;;  %v9190_v58 = vpack.c.bf16 %v3993_v47, %v3991_v46  ;;  %v2955_v59 = vrot.slane %v2950_v23, %v12998_v33  ;;  %v2959_v60 = vrot.slane %v2950_v23, %v13003_v40 }
 0x4c7   : > { %9175 = vmatprep.subr.bf16.mxu0 %v9174_v0  ;;  %v2963_v61 = vrot.slane %v2950_v23, %v13005_v42  ;;  %v9192_v0 = vpack.c.bf16 %v3992_v53, %v3990_v25  ;;  %v2967_v41 = vrot.slane %v2950_v23, %v13007_v43  ;;  %v9200_v46 = vpack.c.bf16 %v4000_v28, %v3998_v27  ;;  %v4004_v25 = vld [vmem:[%s11741_s20 + $0xc90] sm:$0xff]  ;;  %v4009_v23 = vld [vmem:[%s11741_s20 + $0xcb8] sm:$0xff]  ;;  %v3021_v27 = vld [vmem:[%s11741_s20 + $0x108] sm:$0xff] }
 0x4c8   : > { %v8946_v47 = vpack.c.bf16 %v3007_v62, %v3005_v32  ;;  %v3023_v28 = vld [vmem:[%s11741_s20 + $0x118] sm:$0xff] }
 0x4c9   : > { %8921 = vmatpush1.bf16.msra.mxu1 %v8920_v5  ;;  %v2996_v5 = vld [vmem:[%s11741_s20 + $0x40] sm:$0xff]  ;;  %v8962_v62 = vpack.c.bf16 %v3023_v28, %v3021_v27  ;;  %v4036_v27 = vld [vmem:[%s11741_s20 + $0xd90] sm:$0xff]  ;;  %v3041_v28 = vld [vmem:[%s11741_s20 + $0x1a8] sm:$0xff] }
 0x4ca   : > { %9177 = vmatpush1.bf16.msra.mxu0 %v9176_v7  ;;  %8923 = vmatprep.subr.bf16.mxu1 %v8922_v8  ;;  %v2968_v7 = vcombine.low %v2955_v59, %v2959_v60  ;;  %v3957_v8 = vrot.slane %v3948_v4, %v13003_v40  ;;  %v8940_v42 = vpack.c.bf16 %v2998_v9, %v2996_v5  ;;  %v4008_v5 = vld [vmem:[%s11741_s20 + $0xcb0] sm:$0xff]  ;;  %v4013_v9 = vld [vmem:[%s11741_s20 + $0xcd8] sm:$0xff] }
 0x4cb   : > { %9179 = vmatprep.subr.bf16.mxu0 %v9178_v44  ;;  %v2969_v44 = vcombine.low %v2963_v61, %v2967_v41  ;;  %v8948_v60 = vpack.c.bf16 %v3006_v48, %v3004_v6  ;;  %v9204_v61 = vpack.c.bf16 %v4004_v25, %v4002_v49  ;;  %v3027_v6 = vld [vmem:[%s11741_s20 + $0x138] sm:$0xff] }
 0x4cd   : > { %8925 = vmatpush1.bf16.msra.mxu1 %v8924_v19  ;;  %v4001_v19 = vld [vmem:[%s11741_s20 + $0xc78] sm:$0xff] }
 0x4ce   : > { %9181 = vmatpush1.bf16.msra.mxu0 %v9180_v21  ;;  %8927 = vmatprep.subr.bf16.mxu1 %v8926_v11  ;;  %v2983_v21 = vrot.slane %v2969_v44, %v13011_v51  ;;  %v9208_v44 = vpack.c.bf16 %v4008_v5, %v4006_v2  ;;  %v4026_v5 = vld [vmem:[%s11741_s20 + $0xd40] sm:$0xff] }
 0x4cf   : > { %9183 = vmatprep.subr.bf16.mxu0 %v9182_v24  ;;  %v8942_v24 = vpack.c.bf16 %v3003_v15, %v3001_v35  ;;  %v4010_v35 = vld [vmem:[%s11741_s20 + $0xcc0] sm:$0xff] }
 0x4d1   : > { %8929 = vmatpush1.bf16.msra.mxu1 %v8928_v31  ;;  %v9198_v31 = vpack.c.bf16 %v4001_v19, %v3999_v18  ;;  %v3019_v18 = vld [vmem:[%s11741_s20 + $0xf8] sm:$0xff]  ;;  %v4015_v19 = vld [vmem:[%s11741_s20 + $0xce8] sm:$0xff] }
 0x4d2   : > { %9185 = vmatpush1.bf16.msra.mxu0 %v9184_v34  ;;  %8931 = vmatprep.subr.bf16.mxu1 %v8930_v36  ;;  %v3947_v34 = vld [vmem:[#allocation2 + $0x18] sm:$0xff]  ;;  %v4003_v36 = vld [vmem:[%s11741_s20 + $0xc88] sm:$0xff] }
 0x4d3   : > { %9187 = vmatprep.subr.bf16.mxu0 %v9186_v45  ;;  %v8944_v45 = vpack.c.bf16 %v3002_v26, %v3000_v17  ;;  %v9202_v54 = vpack.c.bf16 %v4005_v37, %v4003_v36  ;;  %v3016_v17 = vld [vmem:[%s11741_s20 + $0xe0] sm:$0xff]  ;;  %v4016_v26 = vld [vmem:[%s11741_s20 + $0xcf0] sm:$0xff] }
 0x4d4   : > { %3442 = vmatmul.mubr.f32.vlgmr.msra.gmra.mrb[0].mxu1 %v13066_v16  ;;  %v3953_v16 = vrot.slane %v3948_v4, %v12998_v33  ;;  %v2976_v33 = vrot.slane %v2968_v7, %v13011_v51  ;;  %v3013_v7 = vld [vmem:[%s11741_s20 + $0xc8] sm:$0xff]  ;;  %v3022_v36 = vld [vmem:[%s11741_s20 + $0x110] sm:$0xff]  ;;  %v4018_v37 = vld [vmem:[%s11741_s20 + $0xd00] sm:$0xff] }
 0x4d5   : > { %8933 = vmatpush1.bf16.msra.mxu1 %v8932_v50  ;;  %3938 = vmatmul.mubr.f32.vlgmr.msra.gmra.mrb[0].mxu0 %v13071_v20  ;;  %v3965_v20 = vrot.slane %v3948_v4, %v13007_v43  ;;  %v9196_v43 = vpack.c.bf16 %v3996_v12, %v3994_v10 }
 0x4d6   : > { %9189 = vmatpush1.bf16.msra.mxu0 %v9188_v56  ;;  %8935 = vmatprep.subr.bf16.mxu1 %v8934_v57  ;;  %v3966_v40 = vcombine.low %v3953_v16, %v3957_v8  ;;  %v2984_v29 = vcombine.low %v2976_v33, %v2983_v21  ;;  %v3011_v56 = vld [vmem:[%s11741_s20 + $0xb8] sm:$0xff]  ;;  %v4007_v57 = vld [vmem:[%s11741_s20 + $0xca8] sm:$0xff]  ;;  %v4012_v33 = vld [vmem:[%s11741_s20 + $0xcd0] sm:$0xff] }
 0x4d7   : > { %9191 = vmatprep.subr.bf16.mxu0 %v9190_v58  ;;  %v3967_v11 = vcombine.low %v3961_v13, %v3965_v20  ;;  %v9206_v4 = vpack.c.bf16 %v4009_v23, %v4007_v57  ;;  %v3015_v16 = vld [vmem:[%s11741_s20 + $0xd8] sm:$0xff]  ;;  %v4011_v8 = vld [vmem:[%s11741_s20 + $0xcc8] sm:$0xff]  ;;  %v3012_v20 = vld [vmem:[%s11741_s20 + $0xc0] sm:$0xff] }
 0x4d8   : > { %v3974_v52 = vrot.slane %v3966_v40, %v13011_v51  ;;  %v2986_v38 = vadd.f32 %v2984_v29, %v2949_v22  ;;  %v8954_v13 = vpack.c.bf16 %v3015_v16, %v3013_v7  ;;  %v9210_v15 = vpack.c.bf16 %v4013_v9, %v4011_v8  ;;  %v3017_v40 = vld [vmem:[%s11741_s20 + $0xe8] sm:$0xff]  ;;  %v4017_v21 = vld [vmem:[%s11741_s20 + $0xcf8] sm:$0xff]  ;;  %v3018_v22 = vld [vmem:[%s11741_s20 + $0xf0] sm:$0xff] }
 0x4d9   : > { %8937 = vmatpush1.bf16.msra.mxu1 %v8936_v63  ;;  %v3981_v30 = vrot.slane %v3967_v11, %v13011_v51  ;;  %v8950_v63 = vpack.c.bf16 %v3011_v56, %v3009_v55  ;;  %v4019_v29 = vld [vmem:[%s11741_s20 + $0xd08] sm:$0xff]  ;;  %v4022_v55 = vld [vmem:[%s11741_s20 + $0xd20] sm:$0xff]  ;;  %v4024_v57 = vld [vmem:[%s11741_s20 + $0xd30] sm:$0xff] }
 0x4da   : > { %9193 = vmatpush1.bf16.msra.mxu0 %v9192_v0  ;;  %8939 = vmatprep.subr.bf16.mxu1 %v8938_v1  ;;  %v13247_v50 = vmax.f32 %v2986_v38, 0.0  ;;  %v3008_v0 = vld [vmem:[%s11741_s20 + $0xa0] sm:$0xff]  ;;  %v3010_v1 = vld [vmem:[%s11741_s20 + $0xb0] sm:$0xff]  ;;  %v3029_v23 = vld [vmem:[%s11741_s20 + $0x148] sm:$0xff] }
 0x4db   : > { %9195 = vmatprep.subr.bf16.mxu0 %v9194_v14  ;;  %v3982_v39 = vcombine.low %v3974_v52, %v3981_v30  ;;  %v8952_v12 = vpack.c.bf16 %v3010_v1, %v3008_v0  ;;  %v3014_v14 = vld [vmem:[%s11741_s20 + $0xd0] sm:$0xff]  ;;  %v4014_v52 = vld [vmem:[%s11741_s20 + $0xce0] sm:$0xff]  ;;  %v4021_v30 = vld [vmem:[%s11741_s20 + $0xd18] sm:$0xff]  ;;  %v9224_v1 = vpack.c.bf16 %v4024_v57, %v4022_v55 }
 0x4dc   : > { %v13255_v58 = vrot.slane %v13247_v50, %v13011_v51  ;;  %v8956_v11 = vpack.c.bf16 %v3014_v14, %v3012_v20  ;;  %v9216_v32 = vpack.c.bf16 %v4016_v26, %v4014_v52  ;;  %v9218_v38 = vpack.c.bf16 %v4021_v30, %v4019_v29  ;;  %v4028_v16 = vld [vmem:[%s11741_s20 + $0xd50] sm:$0xff]  ;;  %v3033_v8 = vld [vmem:[%s11741_s20 + $0x168] sm:$0xff]  ;;  %v3035_v9 = vld [vmem:[%s11741_s20 + $0x178] sm:$0xff] }
 0x4dd   : > { %8941 = vmatpush1.bf16.msra.mxu1 %v8940_v42  ;;  %v3984_v53 = vadd.f32 %v3982_v39, %v3947_v34  ;;  %v9212_v42 = vpack.c.bf16 %v4012_v33, %v4010_v35  ;;  %v3020_v34 = vld [vmem:[%s11741_s20 + $0x100] sm:$0xff]  ;;  %v4020_v39 = vld [vmem:[%s11741_s20 + $0xd10] sm:$0xff]  ;;  %v8974_v20 = vpack.c.bf16 %v3035_v9, %v3033_v8  ;;  %v3043_v29 = vld [vmem:[%s11741_s20 + $0x1b8] sm:$0xff] }
 0x4de   : > { %9197 = vmatpush1.bf16.msra.mxu0 %v9196_v43  ;;  %8943 = vmatprep.subr.bf16.mxu1 %v8942_v24  ;;  %v3464_v3 = vcombine.high %v13255_v58, %v13255_v58  ;;  %v8958_v43 = vpack.c.bf16 %v3019_v18, %v3017_v40  ;;  %v9214_v24 = vpack.c.bf16 %v4017_v21, %v4015_v19  ;;  %v3032_v14 = vld [vmem:[%s11741_s20 + $0x160] sm:$0xff]  ;;  %v3034_v35 = vld [vmem:[%s11741_s20 + $0x170] sm:$0xff]  ;;  %v3037_v18 = vld [vmem:[%s11741_s20 + $0x188] sm:$0xff] }
 0x4df   : > { %9199 = vmatprep.subr.bf16.mxu0 %v9198_v31  ;;  %v13257_v59 = vmax.f32 %v3984_v53, 0.0  ;;  %v8960_v31 = vpack.c.bf16 %v3018_v22, %v3016_v17  ;;  %v8964_v48 = vpack.c.bf16 %v3022_v36, %v3020_v34  ;;  %v9220_v49 = vpack.c.bf16 %v4020_v39, %v4018_v37  ;;  %v3024_v53 = vld [vmem:[%s11741_s20 + $0x120] sm:$0xff]  ;;  %v4032_v40 = vld [vmem:[%s11741_s20 + $0xd70] sm:$0xff]  ;;  %v3039_v19 = vld [vmem:[%s11741_s20 + $0x198] sm:$0xff] }
 0x4e0   : > { %3534 = vmatprep.mubr.f32.mxu1 %v3464_v3  ;;  %v3028_v3 = vld [vmem:[%s11741_s20 + $0x140] sm:$0xff]  ;;  %v4035_v21 = vld [vmem:[%s11741_s20 + $0xd88] sm:$0xff]  ;;  %v8978_v17 = vpack.c.bf16 %v3039_v19, %v3037_v18  ;;  %v3038_v52 = vld [vmem:[%s11741_s20 + $0x190] sm:$0xff]  ;;  %v8982_v34 = vpack.c.bf16 %v3043_v29, %v3041_v28 }
 0x4e1   : > { %8945 = vmatpush1.bf16.msra.mxu1 %v8944_v45  ;;  %v13266_v41 = vrot.slane %v13257_v59, %v13011_v51  ;;  %v3025_v45 = vld [vmem:[%s11741_s20 + $0x128] sm:$0xff]  ;;  %v3036_v22 = vld [vmem:[%s11741_s20 + $0x180] sm:$0xff]  ;;  %v3042_v37 = vld [vmem:[%s11741_s20 + $0x1b0] sm:$0xff] }
 0x4e2   : > { %9201 = vmatpush1.bf16.msra.mxu0 %v9200_v46  ;;  %8947 = vmatprep.subr.bf16.mxu1 %v8946_v47  ;;  %v4023_v46 = vld [vmem:[%s11741_s20 + $0xd28] sm:$0xff]  ;;  %v4025_v47 = vld [vmem:[%s11741_s20 + $0xd38] sm:$0xff]  ;;  %v8966_v25 = vpack.c.bf16 %v3027_v6, %v3025_v45  ;;  %v3040_v36 = vld [vmem:[%s11741_s20 + $0x1a0] sm:$0xff] }
 0x4e3   : > { %9203 = vmatprep.subr.bf16.mxu0 %v9202_v54  ;;  %v4130_v10 = vcombine.high %v13266_v41, %v13266_v41  ;;  %v3026_v54 = vld [vmem:[%s11741_s20 + $0x130] sm:$0xff]  ;;  %v9222_v56 = vpack.c.bf16 %v4025_v47, %v4023_v46  ;;  %v4039_v30 = vld [vmem:[%s11741_s20 + $0xda8] sm:$0xff]  ;;  %v3047_v46 = vld [vmem:[%s11741_s20 + $0x1d8] sm:$0xff] }
 0x4e4   : > { %v8968_v0 = vpack.c.bf16 %v3026_v54, %v3024_v53  ;;  %v4040_v45 = vld [vmem:[%s11741_s20 + $0xdb0] sm:$0xff]  ;;  %v3045_v6 = vld [vmem:[%s11741_s20 + $0x1c8] sm:$0xff]  ;;  %v3044_v54 = vld [vmem:[%s11741_s20 + $0x1c0] sm:$0xff] }
 0x4e5   : > { %8949 = vmatpush1.bf16.msra.mxu1 %v8948_v60  ;;  %4200 = vmatprep.mubr.f32.mxu0 %v4130_v10  ;;  %v3031_v60 = vld [vmem:[%s11741_s20 + $0x158] sm:$0xff]  ;;  %v4031_v10 = vld [vmem:[%s11741_s20 + $0xd68] sm:$0xff]  ;;  %v8986_v53 = vpack.c.bf16 %v3047_v46, %v3045_v6  ;;  %v3046_v55 = vld [vmem:[%s11741_s20 + $0x1d0] sm:$0xff] }
 0x4e6   : > { %9205 = vmatpush1.bf16.msra.mxu0 %v9204_v61  ;;  %8951 = vmatprep.subr.bf16.mxu1 %v8950_v63  ;;  %v4027_v61 = vld [vmem:[%s11741_s20 + $0xd48] sm:$0xff]  ;;  %v4029_v63 = vld [vmem:[%s11741_s20 + $0xd58] sm:$0xff]  ;;  %v8970_v2 = vpack.c.bf16 %v3031_v60, %v3029_v23  ;;  %v4044_v23 = vld [vmem:[%s11741_s20 + $0xdd0] sm:$0xff] }
 0x4e7   : > { %9207 = vmatprep.subr.bf16.mxu0 %v9206_v4  ;;  %v3030_v4 = vld [vmem:[%s11741_s20 + $0x150] sm:$0xff]  ;;  %v9226_v7 = vpack.c.bf16 %v4029_v63, %v4027_v61  ;;  %v4043_v47 = vld [vmem:[%s11741_s20 + $0xdc8] sm:$0xff]  ;;  %v3051_v61 = vld [vmem:[%s11741_s20 + $0x1f8] sm:$0xff] }
 0x4e8   : > { %v3049_v60 = vld [vmem:[%s11741_s20 + $0x1e8] sm:$0xff]  ;;  %v4048_v8 = vld [vmem:[%s11741_s20 + $0xdf0] sm:$0xff]  ;;  %v4050_v18 = vld [vmem:[%s11741_s20 + $0xe00] sm:$0xff] }
 0x4e9   : > { %8953 = vmatpush1.bf16.msra.mxu1 %v8952_v12  ;;  %v4033_v12 = vld [vmem:[%s11741_s20 + $0xd78] sm:$0xff]  ;;  %v4047_v63 = vld [vmem:[%s11741_s20 + $0xde8] sm:$0xff]  ;;  %v4052_v19 = vld [vmem:[%s11741_s20 + $0xe10] sm:$0xff] }
 0x4ea   : > { %9209 = vmatpush1.bf16.msra.mxu0 %v9208_v44  ;;  %8955 = vmatprep.subr.bf16.mxu1 %v8954_v13  ;;  %v8972_v44 = vpack.c.bf16 %v3030_v4, %v3028_v3  ;;  %v9228_v13 = vpack.c.bf16 %v4028_v16, %v4026_v5  ;;  %v9230_v33 = vpack.c.bf16 %v4033_v12, %v4031_v10  ;;  %v3048_v4 = vld [vmem:[%s11741_s20 + $0x1e0] sm:$0xff]  ;;  %v3050_v5 = vld [vmem:[%s11741_s20 + $0x1f0] sm:$0xff]  ;;  %v3053_v9 = vld [vmem:[%s11741_s20 + $0x208] sm:$0xff] }
 0x4eb   : > { %9211 = vmatprep.subr.bf16.mxu0 %v9210_v15  ;;  %v4030_v15 = vld [vmem:[%s11741_s20 + $0xd60] sm:$0xff]  ;;  %v8990_v3 = vpack.c.bf16 %v3051_v61, %v3049_v60  ;;  %v3055_v10 = vld [vmem:[%s11741_s20 + $0x218] sm:$0xff]  ;;  %v3449_v12 = vcombine.high %v13247_v50, %v13247_v50  ;;  %v4064_v61 = vld [vmem:[%s11741_s20 + $0xe70] sm:$0xff] }
 0x4ec   : > { %v4054_v28 = vld [vmem:[%s11741_s20 + $0xe20] sm:$0xff] }
 0x4ed   : > { %8957 = vmatpush1.bf16.msra.mxu1 %v8956_v11  ;;  %v4037_v11 = vld [vmem:[%s11741_s20 + $0xd98] sm:$0xff]  ;;  %v4058_v6 = vld [vmem:[%s11741_s20 + $0xe40] sm:$0xff] }
 0x4ee   : > { %9213 = vmatpush1.bf16.msra.mxu0 %v9212_v42  ;;  %8959 = vmatprep.subr.bf16.mxu1 %v8958_v43  ;;  %v8976_v42 = vpack.c.bf16 %v3034_v35, %v3032_v14  ;;  %v9232_v43 = vpack.c.bf16 %v4032_v40, %v4030_v15  ;;  %v9234_v26 = vpack.c.bf16 %v4037_v11, %v4035_v21  ;;  %v3054_v40 = vld [vmem:[%s11741_s20 + $0x210] sm:$0xff]  ;;  %v3057_v21 = vld [vmem:[%s11741_s20 + $0x228] sm:$0xff]  ;;  %v3059_v11 = vld [vmem:[%s11741_s20 + $0x238] sm:$0xff] }
 0x4ef   : > { %9215 = vmatprep.subr.bf16.mxu0 %v9214_v24  ;;  %v4034_v24 = vld [vmem:[%s11741_s20 + $0xd80] sm:$0xff]  ;;  %v8992_v14 = vpack.c.bf16 %v3050_v5, %v3048_v4  ;;  %v8994_v15 = vpack.c.bf16 %v3055_v10, %v3053_v9  ;;  %v4068_v10 = vld [vmem:[%s11741_s20 + $0xe90] sm:$0xff] }
 0x4f1   : > { %8961 = vmatpush1.bf16.msra.mxu1 %v8960_v31  ;;  %v4041_v31 = vld [vmem:[%s11741_s20 + $0xdb8] sm:$0xff] }
 0x4f2   : > { %9217 = vmatpush1.bf16.msra.mxu0 %v9216_v32  ;;  %8963 = vmatprep.subr.bf16.mxu1 %v8962_v62  ;;  %v8980_v32 = vpack.c.bf16 %v3038_v52, %v3036_v22  ;;  %v9236_v62 = vpack.c.bf16 %v4036_v27, %v4034_v24  ;;  %v9238_v39 = vpack.c.bf16 %v4041_v31, %v4039_v30  ;;  %v3058_v27 = vld [vmem:[%s11741_s20 + $0x230] sm:$0xff]  ;;  %v3061_v31 = vld [vmem:[%s11741_s20 + $0x248] sm:$0xff] }
 0x4f3   : > { %9219 = vmatprep.subr.bf16.mxu0 %v9218_v38  ;;  %v4038_v38 = vld [vmem:[%s11741_s20 + $0xda0] sm:$0xff]  ;;  %v9252_v52 = vpack.c.bf16 %v4052_v19, %v4050_v18  ;;  %v8998_v24 = vpack.c.bf16 %v3059_v11, %v3057_v21  ;;  %v4056_v30 = vld [vmem:[%s11741_s20 + $0xe30] sm:$0xff]  ;;  %v3077_v21 = vld [vmem:[%s11741_s20 + $0x2c8] sm:$0xff] }
 0x4f4   : > { %v4070_v18 = vld [vmem:[%s11741_s20 + $0xea0] sm:$0xff]  ;;  %v4072_v19 = vld [vmem:[%s11741_s20 + $0xeb0] sm:$0xff]  ;;  %v3079_v11 = vld [vmem:[%s11741_s20 + $0x2d8] sm:$0xff] }
 0x4f5   : > { %8965 = vmatpush1.bf16.msra.mxu1 %v8964_v48  ;;  %v4045_v48 = vld [vmem:[%s11741_s20 + $0xdd8] sm:$0xff] }
 0x4f6   : > { %9221 = vmatpush1.bf16.msra.mxu0 %v9220_v49  ;;  %8967 = vmatprep.subr.bf16.mxu1 %v8966_v25  ;;  %v8984_v49 = vpack.c.bf16 %v3042_v37, %v3040_v36  ;;  %v9240_v25 = vpack.c.bf16 %v4040_v45, %v4038_v38  ;;  %v9242_v57 = vpack.c.bf16 %v4045_v48, %v4043_v47  ;;  %v3060_v45 = vld [vmem:[%s11741_s20 + $0x240] sm:$0xff]  ;;  %v4060_v47 = vld [vmem:[%s11741_s20 + $0xe50] sm:$0xff]  ;;  %v3065_v48 = vld [vmem:[%s11741_s20 + $0x268] sm:$0xff] }
 0x4f7   : > { %9223 = vmatprep.subr.bf16.mxu0 %v9222_v56  ;;  %v4042_v56 = vld [vmem:[%s11741_s20 + $0xdc0] sm:$0xff]  ;;  %v9256_v38 = vpack.c.bf16 %v4056_v30, %v4054_v28  ;;  %v4076_v30 = vld [vmem:[%s11741_s20 + $0xed0] sm:$0xff] }
 0x4f8   : > { %v4074_v28 = vld [vmem:[%s11741_s20 + $0xec0] sm:$0xff] }
 0x4f9   : > { %8969 = vmatpush1.bf16.msra.mxu1 %v8968_v0  ;;  %v4049_v0 = vld [vmem:[%s11741_s20 + $0xdf8] sm:$0xff] }
 0x4fa   : > { %9225 = vmatpush1.bf16.msra.mxu0 %v9224_v1  ;;  %8971 = vmatprep.subr.bf16.mxu1 %v8970_v2  ;;  %v8988_v1 = vpack.c.bf16 %v3046_v55, %v3044_v54  ;;  %v9244_v2 = vpack.c.bf16 %v4044_v23, %v4042_v56  ;;  %v9246_v16 = vpack.c.bf16 %v4049_v0, %v4047_v63  ;;  %v3064_v56 = vld [vmem:[%s11741_s20 + $0x260] sm:$0xff]  ;;  %v3069_v63 = vld [vmem:[%s11741_s20 + $0x288] sm:$0xff]  ;;  %v3071_v0 = vld [vmem:[%s11741_s20 + $0x298] sm:$0xff] }
 0x4fb   : > { %9227 = vmatprep.subr.bf16.mxu0 %v9226_v7  ;;  %v4046_v7 = vld [vmem:[%s11741_s20 + $0xde0] sm:$0xff]  ;;  %v9260_v54 = vpack.c.bf16 %v4060_v47, %v4058_v6  ;;  %v9010_v5 = vpack.c.bf16 %v3071_v0, %v3069_v63  ;;  %v4080_v6 = vld [vmem:[%s11741_s20 + $0xef0] sm:$0xff]  ;;  %v3087_v47 = vld [vmem:[%s11741_s20 + $0x318] sm:$0xff] }
 0x4fc   : > { %v9248_v35 = vpack.c.bf16 %v4048_v8, %v4046_v7  ;;  %v4062_v23 = vld [vmem:[%s11741_s20 + $0xe60] sm:$0xff]  ;;  %v4087_v63 = vld [vmem:[%s11741_s20 + $0xf28] sm:$0xff]  ;;  %v4089_v0 = vld [vmem:[%s11741_s20 + $0xf38] sm:$0xff] }
 0x4fd   : > { %8973 = vmatpush1.bf16.msra.mxu1 %v8972_v44  ;;  %v4051_v44 = vld [vmem:[%s11741_s20 + $0xe08] sm:$0xff]  ;;  %v9264_v4 = vpack.c.bf16 %v4064_v61, %v4062_v23  ;;  %v3068_v7 = vld [vmem:[%s11741_s20 + $0x280] sm:$0xff]  ;;  %v4084_v23 = vld [vmem:[%s11741_s20 + $0xf10] sm:$0xff] }
 0x4fe   : > { %9229 = vmatpush1.bf16.msra.mxu0 %v9228_v13  ;;  %8975 = vmatprep.subr.bf16.mxu1 %v8974_v20  ;;  %v4053_v13 = vld [vmem:[%s11741_s20 + $0xe18] sm:$0xff]  ;;  %v4115_v20 = vcombine.high %v13257_v59, %v13257_v59  ;;  %v13366_v59 = vrot.slane %v3449_v12, %v13011_v51  ;;  %v4066_v8 = vld [vmem:[%s11741_s20 + $0xe80] sm:$0xff]  ;;  %v3073_v12 = vld [vmem:[%s11741_s20 + $0x2a8] sm:$0xff] }
 0x4ff   : > { %9231 = vmatprep.subr.bf16.mxu0 %v9230_v33  ;;  %v3052_v33 = vld [vmem:[%s11741_s20 + $0x200] sm:$0xff]  ;;  %v9250_v50 = vpack.c.bf16 %v4053_v13, %v4051_v44  ;;  %v3075_v44 = vld [vmem:[%s11741_s20 + $0x2b8] sm:$0xff]  ;;  %v4071_v13 = vld [vmem:[%s11741_s20 + $0xea8] sm:$0xff] }
 0x500   : > { %v8996_v22 = vpack.c.bf16 %v3054_v40, %v3052_v33  ;;  %v3072_v33 = vld [vmem:[%s11741_s20 + $0x2a0] sm:$0xff]  ;;  %v3074_v40 = vld [vmem:[%s11741_s20 + $0x2b0] sm:$0xff]  ;;  %v3091_v61 = vld [vmem:[%s11741_s20 + $0x338] sm:$0xff] }
 0x501   : > { %8977 = vmatpush1.bf16.msra.mxu1 %v8976_v42  ;;  %v4055_v42 = vld [vmem:[%s11741_s20 + $0xe28] sm:$0xff] }
 0x502   : > { %9233 = vmatpush1.bf16.msra.mxu0 %v9232_v43  ;;  %8979 = vmatprep.subr.bf16.mxu1 %v8978_v17  ;;  %v4057_v43 = vld [vmem:[%s11741_s20 + $0xe38] sm:$0xff]  ;;  %v13371_v17 = vrot.slane %v4115_v20, %v13011_v51 }
 0x503   : > { %9235 = vmatprep.subr.bf16.mxu0 %v9234_v26  ;;  %v3056_v26 = vld [vmem:[%s11741_s20 + $0x220] sm:$0xff]  ;;  %v9254_v29 = vpack.c.bf16 %v4057_v43, %v4055_v42  ;;  %v3063_v51 = vld [vmem:[%s11741_s20 + $0x258] sm:$0xff]  ;;  %v4075_v42 = vld [vmem:[%s11741_s20 + $0xec8] sm:$0xff] }
 0x504   : > { %v4131_v36 = vcombine.high %v13371_v17, %v13371_v17  ;;  %v9000_v37 = vpack.c.bf16 %v3058_v27, %v3056_v26  ;;  %v4073_v20 = vld [vmem:[%s11741_s20 + $0xeb8] sm:$0xff]  ;;  %v3076_v26 = vld [vmem:[%s11741_s20 + $0x2c0] sm:$0xff]  ;;  %v3078_v27 = vld [vmem:[%s11741_s20 + $0x2d0] sm:$0xff] }
 0x505   : > { %8981 = vmatpush1.bf16.msra.mxu1 %v8980_v32  ;;  %v3465_v32 = vcombine.high %v13366_v59, %v13366_v59  ;;  %v4077_v43 = vld [vmem:[%s11741_s20 + $0xed8] sm:$0xff] }
 0x506   : > { %9237 = vmatpush1.bf16.msra.mxu0 %v9236_v62  ;;  %8983 = vmatprep.subr.bf16.mxu1 %v8982_v34  ;;  %v4059_v62 = vld [vmem:[%s11741_s20 + $0xe48] sm:$0xff]  ;;  %v4061_v34 = vld [vmem:[%s11741_s20 + $0xe58] sm:$0xff] }
 0x507   : > { %9239 = vmatprep.subr.bf16.mxu0 %v9238_v39  ;;  %v9002_v39 = vpack.c.bf16 %v3063_v51, %v3061_v31  ;;  %v9258_v46 = vpack.c.bf16 %v4061_v34, %v4059_v62  ;;  %v3081_v31 = vld [vmem:[%s11741_s20 + $0x2e8] sm:$0xff]  ;;  %v3083_v51 = vld [vmem:[%s11741_s20 + $0x2f8] sm:$0xff]  ;;  %v9020_v34 = vpack.c.bf16 %v3078_v27, %v3076_v26  ;;  %v4094_v26 = vld [vmem:[%s11741_s20 + $0xf60] sm:$0xff] }
 0x508   : > { %v4081_v62 = vld [vmem:[%s11741_s20 + $0xef8] sm:$0xff] }
 0x509   : > { %8985 = vmatpush1.bf16.msra.mxu1 %v8984_v49  ;;  %v3067_v49 = vld [vmem:[%s11741_s20 + $0x278] sm:$0xff] }
 0x50a   : > { %9241 = vmatpush1.bf16.msra.mxu0 %v9240_v25  ;;  %8987 = vmatprep.subr.bf16.mxu1 %v8986_v53  ;;  %v4065_v25 = vld [vmem:[%s11741_s20 + $0xe78] sm:$0xff]  ;;  %v9006_v55 = vpack.c.bf16 %v3067_v49, %v3065_v48  ;;  %v4083_v48 = vld [vmem:[%s11741_s20 + $0xf08] sm:$0xff] }
 0x50b   : > { %9243 = vmatprep.subr.bf16.mxu0 %v9242_v57  ;;  %v3066_v57 = vld [vmem:[%s11741_s20 + $0x270] sm:$0xff]  ;;  %v4085_v49 = vld [vmem:[%s11741_s20 + $0xf18] sm:$0xff] }
 0x50d   : > { %8989 = vmatpush1.bf16.msra.mxu1 %v8988_v1  ;;  %v4067_v1 = vld [vmem:[%s11741_s20 + $0xe88] sm:$0xff] }
 0x50e   : > { %9245 = vmatpush1.bf16.msra.mxu0 %v9244_v2  ;;  %8991 = vmatprep.subr.bf16.mxu1 %v8990_v3  ;;  %v4069_v2 = vld [vmem:[%s11741_s20 + $0xe98] sm:$0xff]  ;;  %v9008_v3 = vpack.c.bf16 %v3066_v57, %v3064_v56  ;;  %v4082_v56 = vld [vmem:[%s11741_s20 + $0xf00] sm:$0xff]  ;;  %v9282_v57 = vpack.c.bf16 %v4085_v49, %v4083_v48 }
 0x50f   : > { %9247 = vmatprep.subr.bf16.mxu0 %v9246_v16  ;;  %v3070_v16 = vld [vmem:[%s11741_s20 + $0x290] sm:$0xff]  ;;  %v9266_v9 = vpack.c.bf16 %v4069_v2, %v4067_v1  ;;  %v9284_v2 = vpack.c.bf16 %v4084_v23, %v4082_v56  ;;  %v3111_v23 = vld [vmem:[%s11741_s20 + $0x3d8] sm:$0xff] }
 0x510   : > { %v4104_v56 = vld [vmem:[%s11741_s20 + $0xfb0] sm:$0xff] }
 0x511   : > { %8993 = vmatpush1.bf16.msra.mxu1 %v8992_v14  ;;  %v9012_v14 = vpack.c.bf16 %v3070_v16, %v3068_v7  ;;  %v4086_v7 = vld [vmem:[%s11741_s20 + $0xf20] sm:$0xff]  ;;  %v9286_v16 = vpack.c.bf16 %v4089_v0, %v4087_v63 }
 0x512   : > { %9249 = vmatpush1.bf16.msra.mxu0 %v9248_v35  ;;  %8995 = vmatprep.subr.bf16.mxu1 %v8994_v15  ;;  %v9268_v35 = vpack.c.bf16 %v4068_v10, %v4066_v8  ;;  %v9014_v15 = vpack.c.bf16 %v3075_v44, %v3073_v12  ;;  %v4088_v8 = vld [vmem:[%s11741_s20 + $0xf30] sm:$0xff]  ;;  %v3095_v10 = vld [vmem:[%s11741_s20 + $0x358] sm:$0xff]  ;;  %v4091_v12 = vld [vmem:[%s11741_s20 + $0xf48] sm:$0xff] }
 0x513   : > { %9251 = vmatprep.subr.bf16.mxu0 %v9250_v50  ;;  %v9270_v50 = vpack.c.bf16 %v4073_v20, %v4071_v13  ;;  %v4093_v44 = vld [vmem:[%s11741_s20 + $0xf58] sm:$0xff]  ;;  %v9288_v20 = vpack.c.bf16 %v4088_v8, %v4086_v7  ;;  %v4108_v7 = vld [vmem:[%s11741_s20 + $0xfd0] sm:$0xff] }
 0x514   : > { %3535 = vmatmul.mubr.f32.vlgmr.msra.gmra.mrb[0].mxu1 %v13255_v58  ;;  %v3062_v58 = vld [vmem:[%s11741_s20 + $0x250] sm:$0xff]  ;;  %v3115_v8 = vld [vmem:[%s11741_s20 + $0x3f8] sm:$0xff] }
 0x515   : > { %8997 = vmatpush1.bf16.msra.mxu1 %v8996_v22  ;;  %4201 = vmatmul.mubr.f32.vlgmr.msra.gmra.mrb[0].mxu0 %v13266_v41  ;;  %v4063_v41 = vld [vmem:[%s11741_s20 + $0xe68] sm:$0xff]  ;;  %v9004_v53 = vpack.c.bf16 %v3062_v58, %v3060_v45  ;;  %v9016_v22 = vpack.c.bf16 %v3074_v40, %v3072_v33  ;;  %v4078_v45 = vld [vmem:[%s11741_s20 + $0xee0] sm:$0xff]  ;;  %v9290_v40 = vpack.c.bf16 %v4093_v44, %v4091_v12 }
 0x516   : > { %9253 = vmatpush1.bf16.msra.mxu0 %v9252_v52  ;;  %8999 = vmatprep.subr.bf16.mxu1 %v8998_v24  ;;  %v9262_v60 = vpack.c.bf16 %v4065_v25, %v4063_v41  ;;  %v9272_v52 = vpack.c.bf16 %v4072_v19, %v4070_v18  ;;  %v9018_v24 = vpack.c.bf16 %v3079_v11, %v3077_v21  ;;  %v4090_v33 = vld [vmem:[%s11741_s20 + $0xf40] sm:$0xff]  ;;  %v4092_v18 = vld [vmem:[%s11741_s20 + $0xf50] sm:$0xff]  ;;  %v3099_v19 = vld [vmem:[%s11741_s20 + $0x378] sm:$0xff] }
 0x517   : > { %9255 = vmatprep.subr.bf16.mxu0 %v9254_v29  ;;  %3605 = vmatprep.mubr.f32.mxu1 %v3465_v32  ;;  %v9274_v29 = vpack.c.bf16 %v4077_v43, %v4075_v42  ;;  %v4079_v32 = vld [vmem:[%s11741_s20 + $0xee8] sm:$0xff]  ;;  %v9280_v25 = vpack.c.bf16 %v4080_v6, %v4078_v45  ;;  %v4097_v11 = vld [vmem:[%s11741_s20 + $0xf78] sm:$0xff]  ;;  %v9292_v43 = vpack.c.bf16 %v4092_v18, %v4090_v33  ;;  %v4100_v45 = vld [vmem:[%s11741_s20 + $0xf90] sm:$0xff] }
 0x518   : > { %4271 = vmatprep.mubr.f32.mxu0 %v4131_v36  ;;  %v9276_v36 = vpack.c.bf16 %v4076_v30, %v4074_v28  ;;  %v9278_v58 = vpack.c.bf16 %v4081_v62, %v4079_v32  ;;  %v4095_v21 = vld [vmem:[%s11741_s20 + $0xf68] sm:$0xff]  ;;  %v4096_v28 = vld [vmem:[%s11741_s20 + $0xf70] sm:$0xff]  ;;  %v3103_v30 = vld [vmem:[%s11741_s20 + $0x398] sm:$0xff] }
 0x519   : > { %9001 = vmatpush1.bf16.msra.mxu1 %v9000_v37  ;;  %v9022_v37 = vpack.c.bf16 %v3083_v51, %v3081_v31  ;;  %v9294_v27 = vpack.c.bf16 %v4097_v11, %v4095_v21  ;;  %v4099_v31 = vld [vmem:[%s11741_s20 + $0xf88] sm:$0xff]  ;;  %v4101_v51 = vld [vmem:[%s11741_s20 + $0xf98] sm:$0xff]  ;;  %v9296_v62 = vpack.c.bf16 %v4096_v28, %v4094_v26  ;;  %v4112_v33 = vld [vmem:[%s11741_s20 + $0xff0] sm:$0xff] }
 0x51a   : > { %9257 = vmatpush1.bf16.msra.mxu0 %v9256_v38  ;;  %9003 = vmatprep.subr.bf16.mxu1 %v9002_v39  ;;  %v3080_v38 = vld [vmem:[%s11741_s20 + $0x2e0] sm:$0xff]  ;;  %v3082_v39 = vld [vmem:[%s11741_s20 + $0x2f0] sm:$0xff]  ;;  %v3107_v6 = vld [vmem:[%s11741_s20 + $0x3b8] sm:$0xff] }
 0x51b   : > { %9259 = vmatprep.subr.bf16.mxu0 %v9258_v46  ;;  %v3085_v46 = vld [vmem:[%s11741_s20 + $0x308] sm:$0xff]  ;;  %v9024_v41 = vpack.c.bf16 %v3082_v39, %v3080_v38  ;;  %v4098_v38 = vld [vmem:[%s11741_s20 + $0xf80] sm:$0xff]  ;;  %v9298_v39 = vpack.c.bf16 %v4101_v51, %v4099_v31 }
 0x51c   : > { %v9300_v49 = vpack.c.bf16 %v4100_v45, %v4098_v38 }
 0x51d   : > { %9005 = vmatpush1.bf16.msra.mxu1 %v9004_v53  ;;  %v9026_v53 = vpack.c.bf16 %v3087_v47, %v3085_v46  ;;  %v4103_v46 = vld [vmem:[%s11741_s20 + $0xfa8] sm:$0xff]  ;;  %v4105_v47 = vld [vmem:[%s11741_s20 + $0xfb8] sm:$0xff] }
 0x51e   : > { %9261 = vmatpush1.bf16.msra.mxu0 %v9260_v54  ;;  %9007 = vmatprep.subr.bf16.mxu1 %v9006_v55  ;;  %v3084_v54 = vld [vmem:[%s11741_s20 + $0x300] sm:$0xff]  ;;  %v3086_v55 = vld [vmem:[%s11741_s20 + $0x310] sm:$0xff] }
 0x51f   : > { %9263 = vmatprep.subr.bf16.mxu0 %v9262_v60  ;;  %v3089_v60 = vld [vmem:[%s11741_s20 + $0x328] sm:$0xff]  ;;  %v9028_v1 = vpack.c.bf16 %v3086_v55, %v3084_v54  ;;  %v4102_v54 = vld [vmem:[%s11741_s20 + $0xfa0] sm:$0xff]  ;;  %v9302_v55 = vpack.c.bf16 %v4105_v47, %v4103_v46 }
 0x520   : > { %v9304_v0 = vpack.c.bf16 %v4104_v56, %v4102_v54 }
 0x521   : > { %9009 = vmatpush1.bf16.msra.mxu1 %v9008_v3  ;;  %v9030_v3 = vpack.c.bf16 %v3091_v61, %v3089_v60  ;;  %v4107_v60 = vld [vmem:[%s11741_s20 + $0xfc8] sm:$0xff]  ;;  %v4109_v61 = vld [vmem:[%s11741_s20 + $0xfd8] sm:$0xff] }
 0x522   : > { %9265 = vmatpush1.bf16.msra.mxu0 %v9264_v4  ;;  %9011 = vmatprep.subr.bf16.mxu1 %v9010_v5  ;;  %v3088_v4 = vld [vmem:[%s11741_s20 + $0x320] sm:$0xff]  ;;  %v3090_v5 = vld [vmem:[%s11741_s20 + $0x330] sm:$0xff] }
 0x523   : > { %9267 = vmatprep.subr.bf16.mxu0 %v9266_v9  ;;  %v3093_v9 = vld [vmem:[%s11741_s20 + $0x348] sm:$0xff]  ;;  %v9032_v13 = vpack.c.bf16 %v3090_v5, %v3088_v4  ;;  %v4106_v4 = vld [vmem:[%s11741_s20 + $0xfc0] sm:$0xff]  ;;  %v9306_v5 = vpack.c.bf16 %v4109_v61, %v4107_v60 }
 0x524   : > { %v9308_v44 = vpack.c.bf16 %v4108_v7, %v4106_v4 }
 0x525   : > { %9013 = vmatpush1.bf16.msra.mxu1 %v9012_v14  ;;  %v9034_v14 = vpack.c.bf16 %v3095_v10, %v3093_v9  ;;  %v4111_v9 = vld [vmem:[%s11741_s20 + $0xfe8] sm:$0xff]  ;;  %v4113_v10 = vld [vmem:[%s11741_s20 + $0xff8] sm:$0xff] }
 0x526   : > { %9269 = vmatpush1.bf16.msra.mxu0 %v9268_v35  ;;  %9015 = vmatprep.subr.bf16.mxu1 %v9014_v15  ;;  %v3092_v35 = vld [vmem:[%s11741_s20 + $0x340] sm:$0xff]  ;;  %v3094_v15 = vld [vmem:[%s11741_s20 + $0x350] sm:$0xff] }
 0x527   : > { %9271 = vmatprep.subr.bf16.mxu0 %v9270_v50  ;;  %v3097_v50 = vld [vmem:[%s11741_s20 + $0x368] sm:$0xff]  ;;  %v9036_v42 = vpack.c.bf16 %v3094_v15, %v3092_v35  ;;  %v9310_v35 = vpack.c.bf16 %v4113_v10, %v4111_v9  ;;  %v4110_v15 = vld [vmem:[%s11741_s20 + $0xfe0] sm:$0xff] }
 0x528   : > { %v9312_v18 = vpack.c.bf16 %v4112_v33, %v4110_v15 }
 0x529   : > { %9017 = vmatpush1.bf16.msra.mxu1 %v9016_v22  ;;  %v9038_v22 = vpack.c.bf16 %v3099_v19, %v3097_v50 }
 0x52a   : > { %9273 = vmatpush1.bf16.msra.mxu0 %v9272_v52  ;;  %9019 = vmatprep.subr.bf16.mxu1 %v9018_v24  ;;  %v3096_v52 = vld [vmem:[%s11741_s20 + $0x360] sm:$0xff]  ;;  %v3098_v24 = vld [vmem:[%s11741_s20 + $0x370] sm:$0xff] }
 0x52b   : > { %9275 = vmatprep.subr.bf16.mxu0 %v9274_v29  ;;  %v3101_v29 = vld [vmem:[%s11741_s20 + $0x388] sm:$0xff]  ;;  %v9040_v32 = vpack.c.bf16 %v3098_v24, %v3096_v52 }
 0x52d   : > { %9021 = vmatpush1.bf16.msra.mxu1 %v9020_v34  ;;  %v9042_v34 = vpack.c.bf16 %v3103_v30, %v3101_v29 }
 0x52e   : > { %9277 = vmatpush1.bf16.msra.mxu0 %v9276_v36  ;;  %9023 = vmatprep.subr.bf16.mxu1 %v9022_v37  ;;  %v3100_v36 = vld [vmem:[%s11741_s20 + $0x380] sm:$0xff]  ;;  %v3102_v37 = vld [vmem:[%s11741_s20 + $0x390] sm:$0xff] }
 0x52f   : > { %9279 = vmatprep.subr.bf16.mxu0 %v9278_v58  ;;  %v3105_v58 = vld [vmem:[%s11741_s20 + $0x3a8] sm:$0xff]  ;;  %v9044_v48 = vpack.c.bf16 %v3102_v37, %v3100_v36 }
 0x531   : > { %9025 = vmatpush1.bf16.msra.mxu1 %v9024_v41  ;;  %v9046_v41 = vpack.c.bf16 %v3107_v6, %v3105_v58 }
 0x532   : > { %9281 = vmatpush1.bf16.msra.mxu0 %v9280_v25  ;;  %9027 = vmatprep.subr.bf16.mxu1 %v9026_v53  ;;  %v3104_v25 = vld [vmem:[%s11741_s20 + $0x3a0] sm:$0xff]  ;;  %v3106_v53 = vld [vmem:[%s11741_s20 + $0x3b0] sm:$0xff] }
 0x533   : > { %9283 = vmatprep.subr.bf16.mxu0 %v9282_v57  ;;  %v3109_v57 = vld [vmem:[%s11741_s20 + $0x3c8] sm:$0xff]  ;;  %v9048_v63 = vpack.c.bf16 %v3106_v53, %v3104_v25 }
 0x535   : > { %9029 = vmatpush1.bf16.msra.mxu1 %v9028_v1  ;;  %v9050_v1 = vpack.c.bf16 %v3111_v23, %v3109_v57 }
 0x536   : > { %9285 = vmatpush1.bf16.msra.mxu0 %v9284_v2  ;;  %9031 = vmatprep.subr.bf16.mxu1 %v9030_v3  ;;  %v3108_v2 = vld [vmem:[%s11741_s20 + $0x3c0] sm:$0xff]  ;;  %v3110_v3 = vld [vmem:[%s11741_s20 + $0x3d0] sm:$0xff] }
 0x537   : > { %9287 = vmatprep.subr.bf16.mxu0 %v9286_v16  ;;  %v3113_v16 = vld [vmem:[%s11741_s20 + $0x3e8] sm:$0xff]  ;;  %v9052_v12 = vpack.c.bf16 %v3110_v3, %v3108_v2 }
 0x539   : > { %9033 = vmatpush1.bf16.msra.mxu1 %v9032_v13  ;;  %v9054_v13 = vpack.c.bf16 %v3115_v8, %v3113_v16 }
 0x53a   : > { %9289 = vmatpush1.bf16.msra.mxu0 %v9288_v20  ;;  %9035 = vmatprep.subr.bf16.mxu1 %v9034_v14  ;;  %v3112_v20 = vld [vmem:[%s11741_s20 + $0x3e0] sm:$0xff]  ;;  %v3114_v14 = vld [vmem:[%s11741_s20 + $0x3f0] sm:$0xff]  ;;  %s4294_s20 = scalar_lea.vmem [#allocation3], %s7776_s29 }
 0x53b   : > { %9291 = vmatprep.subr.bf16.mxu0 %v9290_v40  ;;  %v9056_v40 = vpack.c.bf16 %v3114_v14, %v3112_v20 }
 0x53d   : > { %9037 = vmatpush1.bf16.msra.mxu1 %v9036_v42 }
 0x53e   : > { %9293 = vmatpush1.bf16.msra.mxu0 %v9292_v43  ;;  %9039 = vmatprep.subr.bf16.mxu1 %v9038_v22 }
 0x53f   : > { %9295 = vmatprep.subr.bf16.mxu0 %v9294_v27 }
 0x541   : > { %9041 = vmatpush1.bf16.msra.mxu1 %v9040_v32 }
 0x542   : > { %9297 = vmatpush1.bf16.msra.mxu0 %v9296_v62  ;;  %9043 = vmatprep.subr.bf16.mxu1 %v9042_v34 }
 0x543   : > { %9299 = vmatprep.subr.bf16.mxu0 %v9298_v39 }
 0x545   : > { %9045 = vmatpush1.bf16.msra.mxu1 %v9044_v48 }
 0x546   : > { %9301 = vmatpush1.bf16.msra.mxu0 %v9300_v49  ;;  %9047 = vmatprep.subr.bf16.mxu1 %v9046_v41 }
 0x547   : > { %9303 = vmatprep.subr.bf16.mxu0 %v9302_v55 }
 0x549   : > { %9049 = vmatpush1.bf16.msra.mxu1 %v9048_v63 }
 0x54a   : > { %9305 = vmatpush1.bf16.msra.mxu0 %v9304_v0  ;;  %9051 = vmatprep.subr.bf16.mxu1 %v9050_v1 }
 0x54b   : > { %9307 = vmatprep.subr.bf16.mxu0 %v9306_v5 }
 0x54d   : > { %9053 = vmatpush1.bf16.msra.mxu1 %v9052_v12 }
 0x54e   : > { %9309 = vmatpush1.bf16.msra.mxu0 %v9308_v44  ;;  %9055 = vmatprep.subr.bf16.mxu1 %v9054_v13 }
 0x54f   : > { %9311 = vmatprep.subr.bf16.mxu0 %v9310_v35 }
 0x551   : > { %9057 = vmatpush1.bf16.msra.mxu1 %v9056_v40 }
 0x552   : > { %9313 = vmatpush1.bf16.msra.mxu0 %v9312_v18 }
 0x554   : > { %3606 = vmatmul.mubr.f32.vlgmr.msra.gmra.mrb[0].mxu1 %v13366_v59 }
 0x555   : > { %4272 = vmatmul.mubr.f32.vlgmr.msra.gmra.mrb[0].mxu0 %v13371_v17 }
 0x627   : > { %v3607_v50 = vpop.f32.mrb[0].mxu1 }
 0x628   : > { %v4273_v19 = vpop.f32.mrb[0].mxu0  ;;  %v3609_v21 = vpop.f32.mrb[1].mxu1 }
 0x629   : > { %v10622_v11 = vadd.f32 %v4273_v19, %v3607_v50  ;;  %v4275_v42 = vpop.f32.mrb[1].mxu0 }
 0x62a   : > { %v10623_v43 = vadd.f32 %v4275_v42, %v3609_v21 }
 0x62c   : > { %v4283_v22 = vcombine.low %v10622_v11, %v10623_v43 }
 0x62e   : > { %7733 = vst.sshfl [vmem:[%s4294_s20] sm:$0x33 pattern:$0x76325410] %v4283_v22 }
 0x62f PF: > { %p4296_p8 = scmp.ge.s32.totalorder %s11342_s24, 6  ;;  %p4297_p6 = scmp.lt.s32.totalorder %s11342_s24, 10 }
 0x631   : > { %p4298_p12 = pnand %p4297_p6, %p4296_p8 }
 0x632   : > { %v4474_v59 = vld [vmem:[%s11753_s25 + $0x408] sm:$0xff] (!%p4298_p12)  ;;  %v4476_v52 = vld [vmem:[%s11753_s25 + $0x418] sm:$0xff] (!%p4298_p12)  ;;  %v4473_v27 = vld [vmem:[%s11753_s25 + $0x400] sm:$0xff] (!%p4298_p12)  ;;  %s7734_s30 = sadd.s32 (!%p4298_p12), 4294967290, %s11342_s24 }
 0x633   : > { %4301 = sbr.rel (%p4298_p12) target bundleno = 1939 (0x793), region = 100  ;;  %v4478_v17 = vld [vmem:[%s11753_s25 + $0x428] sm:$0xff] (!%p4298_p12)  ;;  %v4480_v26 = vld [vmem:[%s11753_s25 + $0x438] sm:$0xff] (!%p4298_p12)  ;;  %v4477_v28 = vld [vmem:[%s11753_s25 + $0x420] sm:$0xff] (!%p4298_p12) }
 0x634   : > { %v9314_v24 = vpack.c.bf16 (!%p4298_p12), %v4478_v17, %v4474_v59  ;;  %v9378_v29 = vpack.c.bf16 (!%p4298_p12), %v4480_v26, %v4476_v52  ;;  %v9316_v30 = vpack.c.bf16 (!%p4298_p12), %v4477_v28, %v4473_v27  ;;  %v4475_v31 = vld [vmem:[%s11753_s25 + $0x410] sm:$0xff] (!%p4298_p12)  ;;  %v4482_v32 = vld [vmem:[%s11753_s25 + $0x448] sm:$0xff] (!%p4298_p12)  ;;  %v4484_v36 = vld [vmem:[%s11753_s25 + $0x458] sm:$0xff] (!%p4298_p12) }
 0x635   : > { %v4479_v51 = vld [vmem:[%s11753_s25 + $0x430] sm:$0xff] (!%p4298_p12)  ;;  %v4486_v34 = vld [vmem:[%s11753_s25 + $0x468] sm:$0xff] (!%p4298_p12)  ;;  %v4488_v37 = vld [vmem:[%s11753_s25 + $0x478] sm:$0xff] (!%p4298_p12) }
 0x636   : > { %9315 = vmatprep.subr.bf16.mxu0 (!%p4298_p12), %v9314_v24  ;;  %v9380_v62 = vpack.c.bf16 (!%p4298_p12), %v4479_v51, %v4475_v31  ;;  %9379 = vmatprep.subr.bf16.mxu1 (!%p4298_p12), %v9378_v29  ;;  %v9318_v38 = vpack.c.bf16 (!%p4298_p12), %v4486_v34, %v4482_v32  ;;  %v9382_v39 = vpack.c.bf16 (!%p4298_p12), %v4488_v37, %v4484_v36  ;;  %v4481_v45 = vld [vmem:[%s11753_s25 + $0x440] sm:$0xff] (!%p4298_p12)  ;;  %v4483_v6 = vld [vmem:[%s11753_s25 + $0x450] sm:$0xff] (!%p4298_p12)  ;;  %v4490_v48 = vld [vmem:[%s11753_s25 + $0x488] sm:$0xff] (!%p4298_p12) }
 0x637   : > { %9317 = vmatpush1.bf16.msra.mxu0 (!%p4298_p12), %v9316_v30  ;;  %v4485_v58 = vld [vmem:[%s11753_s25 + $0x460] sm:$0xff] (!%p4298_p12)  ;;  %v4487_v47 = vld [vmem:[%s11753_s25 + $0x470] sm:$0xff] (!%p4298_p12)  ;;  %v4494_v49 = vld [vmem:[%s11753_s25 + $0x4a8] sm:$0xff] (!%p4298_p12) }
 0x638   : > { %9381 = vmatpush1.bf16.msra.mxu1 (!%p4298_p12), %v9380_v62  ;;  %v9320_v46 = vpack.c.bf16 (!%p4298_p12), %v4485_v58, %v4481_v45  ;;  %9319 = vmatprep.subr.bf16.mxu0 (!%p4298_p12), %v9318_v38  ;;  %v9384_v41 = vpack.c.bf16 (!%p4298_p12), %v4487_v47, %v4483_v6  ;;  %v9322_v25 = vpack.c.bf16 (!%p4298_p12), %v4494_v49, %v4490_v48  ;;  %v4492_v53 = vld [vmem:[%s11753_s25 + $0x498] sm:$0xff] (!%p4298_p12)  ;;  %v4489_v55 = vld [vmem:[%s11753_s25 + $0x480] sm:$0xff] (!%p4298_p12)  ;;  %v4491_v23 = vld [vmem:[%s11753_s25 + $0x490] sm:$0xff] (!%p4298_p12) }
 0x639   : > { %9383 = vmatprep.subr.bf16.mxu1 (!%p4298_p12), %v9382_v39  ;;  %v4496_v54 = vld [vmem:[%s11753_s25 + $0x4b8] sm:$0xff] (!%p4298_p12)  ;;  %v4493_v57 = vld [vmem:[%s11753_s25 + $0x4a0] sm:$0xff] (!%p4298_p12)  ;;  %v4495_v60 = vld [vmem:[%s11753_s25 + $0x4b0] sm:$0xff] (!%p4298_p12) }
 0x63a   : > { %v9386_v56 = vpack.c.bf16 %v4496_v54, %v4492_v53  ;;  %v9324_v61 = vpack.c.bf16 %v4493_v57, %v4489_v55  ;;  %v4498_v63 = vld [vmem:[%s11753_s25 + $0x4c8] sm:$0xff]  ;;  %v4500_v1 = vld [vmem:[%s11753_s25 + $0x4d8] sm:$0xff]  ;;  %v9388_v2 = vpack.c.bf16 %v4495_v60, %v4491_v23  ;;  %v4497_v5 = vld [vmem:[%s11753_s25 + $0x4c0] sm:$0xff] }
 0x63b   : > { %9321 = vmatpush1.bf16.msra.mxu0 %v9320_v46  ;;  %v4502_v0 = vld [vmem:[%s11753_s25 + $0x4e8] sm:$0xff]  ;;  %v4504_v4 = vld [vmem:[%s11753_s25 + $0x4f8] sm:$0xff]  ;;  %v4501_v7 = vld [vmem:[%s11753_s25 + $0x4e0] sm:$0xff] }
 0x63c   : > { %9385 = vmatpush1.bf16.msra.mxu1 %v9384_v41  ;;  %9323 = vmatprep.subr.bf16.mxu0 %v9322_v25  ;;  %v9326_v3 = vpack.c.bf16 %v4502_v0, %v4498_v63  ;;  %v9390_v16 = vpack.c.bf16 %v4504_v4, %v4500_v1  ;;  %v4499_v8 = vld [vmem:[%s11753_s25 + $0x4d0] sm:$0xff]  ;;  %v4506_v10 = vld [vmem:[%s11753_s25 + $0x508] sm:$0xff]  ;;  %v4508_v44 = vld [vmem:[%s11753_s25 + $0x518] sm:$0xff]  ;;  %v9328_v20 = vpack.c.bf16 %v4501_v7, %v4497_v5 }
 0x63d   : > { %9387 = vmatprep.subr.bf16.mxu1 %v9386_v56  ;;  %v4503_v9 = vld [vmem:[%s11753_s25 + $0x4f0] sm:$0xff]  ;;  %v4510_v12 = vld [vmem:[%s11753_s25 + $0x528] sm:$0xff]  ;;  %v4512_v13 = vld [vmem:[%s11753_s25 + $0x538] sm:$0xff] }
 0x63e   : > { %v9392_v14 = vpack.c.bf16 %v4503_v9, %v4499_v8  ;;  %v9330_v35 = vpack.c.bf16 %v4510_v12, %v4506_v10  ;;  %v4505_v15 = vld [vmem:[%s11753_s25 + $0x500] sm:$0xff]  ;;  %v4507_v40 = vld [vmem:[%s11753_s25 + $0x510] sm:$0xff]  ;;  %v9394_v18 = vpack.c.bf16 %v4512_v13, %v4508_v44  ;;  %v4514_v19 = vld [vmem:[%s11753_s25 + $0x548] sm:$0xff]  ;;  %v4305_v12 = vlaneseq }
 0x63f   : > { %9325 = vmatpush1.bf16.msra.mxu0 %v9324_v61  ;;  %v4509_v33 = vld [vmem:[%s11753_s25 + $0x520] sm:$0xff]  ;;  %v4511_v50 = vld [vmem:[%s11753_s25 + $0x530] sm:$0xff]  ;;  %v4518_v21 = vld [vmem:[%s11753_s25 + $0x568] sm:$0xff] }
 0x640   : > { %9389 = vmatpush1.bf16.msra.mxu1 %v9388_v2  ;;  %9327 = vmatprep.subr.bf16.mxu0 %v9326_v3  ;;  %v4516_v11 = vld [vmem:[%s11753_s25 + $0x558] sm:$0xff]  ;;  %v9332_v43 = vpack.c.bf16 %v4509_v33, %v4505_v15  ;;  %v9396_v22 = vpack.c.bf16 %v4511_v50, %v4507_v40  ;;  %v9334_v59 = vpack.c.bf16 %v4518_v21, %v4514_v19  ;;  %v4513_v17 = vld [vmem:[%s11753_s25 + $0x540] sm:$0xff]  ;;  %v4515_v24 = vld [vmem:[%s11753_s25 + $0x550] sm:$0xff] }
 0x641   : > { %9391 = vmatprep.subr.bf16.mxu1 %v9390_v16  ;;  %v4520_v42 = vld [vmem:[%s11753_s25 + $0x578] sm:$0xff]  ;;  %v4517_v52 = vld [vmem:[%s11753_s25 + $0x560] sm:$0xff]  ;;  %v4519_v27 = vld [vmem:[%s11753_s25 + $0x570] sm:$0xff] }
 0x642   : > { %v9398_v26 = vpack.c.bf16 %v4520_v42, %v4516_v11  ;;  %v4522_v28 = vld [vmem:[%s11753_s25 + $0x588] sm:$0xff]  ;;  %v4524_v30 = vld [vmem:[%s11753_s25 + $0x598] sm:$0xff]  ;;  %v9336_v51 = vpack.c.bf16 %v4517_v52, %v4513_v17  ;;  %v9400_v32 = vpack.c.bf16 %v4519_v27, %v4515_v24  ;;  %v4521_v34 = vld [vmem:[%s11753_s25 + $0x580] sm:$0xff]  ;;  %v13586_v11 = vshrl.u32 %v4305_v12, 7 }
 0x643   : > { %9329 = vmatpush1.bf16.msra.mxu0 %v9328_v20  ;;  %v4526_v29 = vld [vmem:[%s11753_s25 + $0x5a8] sm:$0xff]  ;;  %v4528_v31 = vld [vmem:[%s11753_s25 + $0x5b8] sm:$0xff]  ;;  %v4525_v36 = vld [vmem:[%s11753_s25 + $0x5a0] sm:$0xff]  ;;  %v11224_v42 = vmov 1983009808  }
 0x644   : > { %9393 = vmatpush1.bf16.msra.mxu1 %v9392_v14  ;;  %9331 = vmatprep.subr.bf16.mxu0 %v9330_v35  ;;  %v9338_v62 = vpack.c.bf16 %v4526_v29, %v4522_v28  ;;  %v4523_v37 = vld [vmem:[%s11753_s25 + $0x590] sm:$0xff]  ;;  %v9402_v38 = vpack.c.bf16 %v4528_v31, %v4524_v30  ;;  %v4530_v45 = vld [vmem:[%s11753_s25 + $0x5c8] sm:$0xff]  ;;  %v4532_v6 = vld [vmem:[%s11753_s25 + $0x5d8] sm:$0xff]  ;;  %v9340_v47 = vpack.c.bf16 %v4525_v36, %v4521_v34 }
 0x645   : > { %9395 = vmatprep.subr.bf16.mxu1 %v9394_v18  ;;  %v4527_v39 = vld [vmem:[%s11753_s25 + $0x5b0] sm:$0xff]  ;;  %v4534_v58 = vld [vmem:[%s11753_s25 + $0x5e8] sm:$0xff]  ;;  %v4536_v46 = vld [vmem:[%s11753_s25 + $0x5f8] sm:$0xff] }
 0x646   : > { %v9404_v48 = vpack.c.bf16 %v4527_v39, %v4523_v37  ;;  %v9342_v49 = vpack.c.bf16 %v4534_v58, %v4530_v45  ;;  %v4529_v41 = vld [vmem:[%s11753_s25 + $0x5c0] sm:$0xff]  ;;  %v4531_v53 = vld [vmem:[%s11753_s25 + $0x5d0] sm:$0xff]  ;;  %v9406_v54 = vpack.c.bf16 %v4536_v46, %v4532_v6  ;;  %v4538_v56 = vld [vmem:[%s11753_s25 + $0x608] sm:$0xff] }
 0x647   : > { %9333 = vmatpush1.bf16.msra.mxu0 %v9332_v43  ;;  %v4533_v25 = vld [vmem:[%s11753_s25 + $0x5e0] sm:$0xff]  ;;  %v4535_v55 = vld [vmem:[%s11753_s25 + $0x5f0] sm:$0xff]  ;;  %v4542_v57 = vld [vmem:[%s11753_s25 + $0x628] sm:$0xff]  ;;  %v4315_v43 = vunpack.c.l.s4 %v11224_v42 }
 0x648   : > { %9397 = vmatpush1.bf16.msra.mxu1 %v9396_v22  ;;  %9335 = vmatprep.subr.bf16.mxu0 %v9334_v59  ;;  %v4540_v23 = vld [vmem:[%s11753_s25 + $0x618] sm:$0xff]  ;;  %v9344_v61 = vpack.c.bf16 %v4533_v25, %v4529_v41  ;;  %v9408_v63 = vpack.c.bf16 %v4535_v55, %v4531_v53  ;;  %v9346_v0 = vpack.c.bf16 %v4542_v57, %v4538_v56  ;;  %v4537_v1 = vld [vmem:[%s11753_s25 + $0x600] sm:$0xff]  ;;  %v4539_v3 = vld [vmem:[%s11753_s25 + $0x610] sm:$0xff] }
 0x649   : > { %9399 = vmatprep.subr.bf16.mxu1 %v9398_v26  ;;  %v4544_v60 = vld [vmem:[%s11753_s25 + $0x638] sm:$0xff]  ;;  %v4541_v2 = vld [vmem:[%s11753_s25 + $0x620] sm:$0xff]  ;;  %v4543_v5 = vld [vmem:[%s11753_s25 + $0x630] sm:$0xff]  ;;  %v4316_v34 = vunpack.c.0.s8 %v4315_v43 }
 0x64a   : > { %v9410_v4 = vpack.c.bf16 %v4544_v60, %v4540_v23  ;;  %v4546_v7 = vld [vmem:[%s11753_s25 + $0x648] sm:$0xff]  ;;  %v4548_v8 = vld [vmem:[%s11753_s25 + $0x658] sm:$0xff]  ;;  %v9348_v10 = vpack.c.bf16 %v4541_v2, %v4537_v1  ;;  %v9412_v44 = vpack.c.bf16 %v4543_v5, %v4539_v3  ;;  %v4545_v20 = vld [vmem:[%s11753_s25 + $0x640] sm:$0xff] }
 0x64b   : > { %9337 = vmatpush1.bf16.msra.mxu0 %v9336_v51  ;;  %v4550_v16 = vld [vmem:[%s11753_s25 + $0x668] sm:$0xff]  ;;  %v4552_v9 = vld [vmem:[%s11753_s25 + $0x678] sm:$0xff]  ;;  %v4549_v14 = vld [vmem:[%s11753_s25 + $0x660] sm:$0xff]  ;;  %v13607_v53 = vsub.s32 %v4316_v34, %v13586_v11 }
 0x64c   : > { %9401 = vmatpush1.bf16.msra.mxu1 %v9400_v32  ;;  %9339 = vmatprep.subr.bf16.mxu0 %v9338_v62  ;;  %v9350_v13 = vpack.c.bf16 %v4550_v16, %v4546_v7  ;;  %v4547_v35 = vld [vmem:[%s11753_s25 + $0x650] sm:$0xff]  ;;  %v9414_v15 = vpack.c.bf16 %v4552_v9, %v4548_v8  ;;  %v4554_v40 = vld [vmem:[%s11753_s25 + $0x688] sm:$0xff]  ;;  %v4556_v50 = vld [vmem:[%s11753_s25 + $0x698] sm:$0xff]  ;;  %v9352_v21 = vpack.c.bf16 %v4549_v14, %v4545_v20  ;;  %v4307_v32 = vsub.s32 0, %v13586_v11 }
 0x64d   : > { %9403 = vmatprep.subr.bf16.mxu1 %v9402_v38  ;;  %v4551_v33 = vld [vmem:[%s11753_s25 + $0x670] sm:$0xff]  ;;  %v4558_v18 = vld [vmem:[%s11753_s25 + $0x6a8] sm:$0xff]  ;;  %v4560_v19 = vld [vmem:[%s11753_s25 + $0x6b8] sm:$0xff]  ;;  %v4311_v62 = vsub.s32 1, %v13586_v11 }
 0x64e   : > { %v9416_v22 = vpack.c.bf16 %v4551_v33, %v4547_v35  ;;  %v9354_v59 = vpack.c.bf16 %v4558_v18, %v4554_v40  ;;  %v4553_v17 = vld [vmem:[%s11753_s25 + $0x680] sm:$0xff]  ;;  %v4555_v24 = vld [vmem:[%s11753_s25 + $0x690] sm:$0xff]  ;;  %v9418_v26 = vpack.c.bf16 %v4560_v19, %v4556_v50  ;;  %v4562_v28 = vld [vmem:[%s11753_s25 + $0x6c8] sm:$0xff] }
 0x64f   : > { %9341 = vmatpush1.bf16.msra.mxu0 %v9340_v47  ;;  %v4557_v52 = vld [vmem:[%s11753_s25 + $0x6a0] sm:$0xff]  ;;  %v4559_v27 = vld [vmem:[%s11753_s25 + $0x6b0] sm:$0xff]  ;;  %v4566_v29 = vld [vmem:[%s11753_s25 + $0x6e8] sm:$0xff] }
 0x650   : > { %9405 = vmatpush1.bf16.msra.mxu1 %v9404_v48  ;;  %9343 = vmatprep.subr.bf16.mxu0 %v9342_v49  ;;  %v4564_v30 = vld [vmem:[%s11753_s25 + $0x6d8] sm:$0xff]  ;;  %v9356_v51 = vpack.c.bf16 %v4557_v52, %v4553_v17  ;;  %v9420_v36 = vpack.c.bf16 %v4559_v27, %v4555_v24  ;;  %v9358_v37 = vpack.c.bf16 %v4566_v29, %v4562_v28  ;;  %v4561_v38 = vld [vmem:[%s11753_s25 + $0x6c0] sm:$0xff]  ;;  %v4563_v45 = vld [vmem:[%s11753_s25 + $0x6d0] sm:$0xff] }
 0x651   : > { %9407 = vmatprep.subr.bf16.mxu1 %v9406_v54  ;;  %v4568_v31 = vld [vmem:[%s11753_s25 + $0x6f8] sm:$0xff]  ;;  %v4565_v39 = vld [vmem:[%s11753_s25 + $0x6e0] sm:$0xff]  ;;  %v4567_v6 = vld [vmem:[%s11753_s25 + $0x6f0] sm:$0xff] }
 0x652   : > { %v9422_v58 = vpack.c.bf16 %v4568_v31, %v4564_v30  ;;  %v4570_v46 = vld [vmem:[%s11753_s25 + $0x708] sm:$0xff]  ;;  %v4572_v48 = vld [vmem:[%s11753_s25 + $0x718] sm:$0xff]  ;;  %v9360_v25 = vpack.c.bf16 %v4565_v39, %v4561_v38  ;;  %v9424_v56 = vpack.c.bf16 %v4567_v6, %v4563_v45  ;;  %v4569_v23 = vld [vmem:[%s11753_s25 + $0x700] sm:$0xff] }
 0x653   : > { %9345 = vmatpush1.bf16.msra.mxu0 %v9344_v61  ;;  %v4574_v47 = vld [vmem:[%s11753_s25 + $0x728] sm:$0xff]  ;;  %v4576_v49 = vld [vmem:[%s11753_s25 + $0x738] sm:$0xff]  ;;  %v4573_v60 = vld [vmem:[%s11753_s25 + $0x720] sm:$0xff] }
 0x654   : > { %9409 = vmatpush1.bf16.msra.mxu1 %v9408_v63  ;;  %9347 = vmatprep.subr.bf16.mxu0 %v9346_v0  ;;  %v4453_v41 = vld [vmem:[#allocation10 + $0x2] sm:$0x3]  ;;  %v9362_v57 = vpack.c.bf16 %v4574_v47, %v4570_v46  ;;  %v4571_v61 = vld [vmem:[%s11753_s25 + $0x710] sm:$0xff]  ;;  %v9426_v63 = vpack.c.bf16 %v4576_v49, %v4572_v48  ;;  %v4578_v1 = vld [vmem:[%s11753_s25 + $0x748] sm:$0xff]  ;;  %v9364_v16 = vpack.c.bf16 %v4573_v60, %v4569_v23 }
 0x655   : > { %9411 = vmatprep.subr.bf16.mxu1 %v9410_v4  ;;  %v4458_v54 = vrot.slane %v4453_v41, %v4307_v32  ;;  %v4462_v55 = vrot.slane %v4453_v41, %v4311_v62  ;;  %v4575_v0 = vld [vmem:[%s11753_s25 + $0x730] sm:$0xff]  ;;  %v4582_v2 = vld [vmem:[%s11753_s25 + $0x768] sm:$0xff]  ;;  %v4580_v4 = vld [vmem:[%s11753_s25 + $0x758] sm:$0xff] }
 0x656   : > { %v4584_v5 = vld [vmem:[%s11753_s25 + $0x778] sm:$0xff]  ;;  %v4452_v7 = vld [vmem:[#allocation3 + $0x4] sm:$0xf]  ;;  %v9428_v9 = vpack.c.bf16 %v4575_v0, %v4571_v61  ;;  %v4577_v12 = vld [vmem:[%s11753_s25 + $0x740] sm:$0xff] }
 0x657   : > { %9349 = vmatpush1.bf16.msra.mxu0 %v9348_v10  ;;  %v4463_v3 = vcombine.low %v4458_v54, %v4462_v55  ;;  %v9366_v10 = vpack.c.bf16 %v4582_v2, %v4578_v1  ;;  %v9430_v20 = vpack.c.bf16 %v4584_v5, %v4580_v4  ;;  %v4583_v14 = vld [vmem:[%s11753_s25 + $0x770] sm:$0xff]  ;;  %v4586_v35 = vld [vmem:[%s11753_s25 + $0x788] sm:$0xff]  ;;  %v4588_v40 = vld [vmem:[%s11753_s25 + $0x798] sm:$0xff] }
 0x658   : > { %9413 = vmatpush1.bf16.msra.mxu1 %v9412_v44  ;;  %9351 = vmatprep.subr.bf16.mxu0 %v9350_v13  ;;  %v4581_v44 = vld [vmem:[%s11753_s25 + $0x760] sm:$0xff]  ;;  %v4579_v13 = vld [vmem:[%s11753_s25 + $0x750] sm:$0xff]  ;;  %v4592_v18 = vld [vmem:[%s11753_s25 + $0x7b8] sm:$0xff] }
 0x659   : > { %9415 = vmatprep.subr.bf16.mxu1 %v9414_v15  ;;  %v4470_v8 = vrot.slane %v4463_v3, %v13607_v53  ;;  %v4590_v15 = vld [vmem:[%s11753_s25 + $0x7a8] sm:$0xff]  ;;  %v9368_v50 = vpack.c.bf16 %v4581_v44, %v4577_v12  ;;  %v4585_v43 = vld [vmem:[%s11753_s25 + $0x780] sm:$0xff]  ;;  %v9434_v17 = vpack.c.bf16 %v4592_v18, %v4588_v40  ;;  %v4591_v52 = vld [vmem:[%s11753_s25 + $0x7b0] sm:$0xff] }
 0x65a   : > { %v9370_v42 = vpack.c.bf16 %v4590_v15, %v4586_v35  ;;  %v4594_v24 = vld [vmem:[%s11753_s25 + $0x7c8] sm:$0xff]  ;;  %v4596_v28 = vld [vmem:[%s11753_s25 + $0x7d8] sm:$0xff]  ;;  %v4593_v34 = vld [vmem:[%s11753_s25 + $0x7c0] sm:$0xff] }
 0x65b   : > { %9353 = vmatpush1.bf16.msra.mxu0 %v9352_v21  ;;  %v4472_v33 = vadd.f32 %v4470_v8, %v4452_v7  ;;  %v9432_v21 = vpack.c.bf16 %v4583_v14, %v4579_v13  ;;  %v4600_v29 = vld [vmem:[%s11753_s25 + $0x7f8] sm:$0xff]  ;;  %v4599_v39 = vld [vmem:[%s11753_s25 + $0x7f0] sm:$0xff]  ;;  %v4324_v45 = vld [vmem:[%s11753_s25 + $0x8] sm:$0xff] }
 0x65c   : > { %9417 = vmatpush1.bf16.msra.mxu1 %v9416_v22  ;;  %9355 = vmatprep.subr.bf16.mxu0 %v9354_v59  ;;  %v4589_v22 = vld [vmem:[%s11753_s25 + $0x7a0] sm:$0xff]  ;;  %v4587_v59 = vld [vmem:[%s11753_s25 + $0x790] sm:$0xff]  ;;  %v9438_v38 = vpack.c.bf16 %v4600_v29, %v4596_v28  ;;  %v4326_v6 = vld [vmem:[%s11753_s25 + $0x18] sm:$0xff] }
 0x65d   : > { %9419 = vmatprep.subr.bf16.mxu1 %v9418_v26  ;;  %v13631_v19 = vrot.slane %v4472_v33, %v13607_v53  ;;  %v4598_v26 = vld [vmem:[%s11753_s25 + $0x7e8] sm:$0xff]  ;;  %v9372_v30 = vpack.c.bf16 %v4589_v22, %v4585_v43  ;;  %v9436_v31 = vpack.c.bf16 %v4591_v52, %v4587_v59  ;;  %v4330_v46 = vld [vmem:[%s11753_s25 + $0x38] sm:$0xff]  ;;  %v4323_v41 = vld [vmem:[%s11753_s25] sm:$0xff] }
 0x65e   : > { %v4325_v54 = vld [vmem:[%s11753_s25 + $0x10] sm:$0xff]  ;;  %v9506_v55 = vpack.c.bf16 %v4330_v46, %v4326_v6  ;;  %v4336_v23 = vld [vmem:[%s11753_s25 + $0x68] sm:$0xff]  ;;  %v4334_v60 = vld [vmem:[%s11753_s25 + $0x58] sm:$0xff] }
 0x65f   : > { %9357 = vmatpush1.bf16.msra.mxu0 %v9356_v51  ;;  %v4609_v27 = vcombine.high %v13631_v19, %v13631_v19  ;;  %v9374_v51 = vpack.c.bf16 %v4598_v26, %v4594_v24  ;;  %v4338_v61 = vld [vmem:[%s11753_s25 + $0x78] sm:$0xff]  ;;  %v4331_v2 = vld [vmem:[%s11753_s25 + $0x40] sm:$0xff]  ;;  %v4333_v4 = vld [vmem:[%s11753_s25 + $0x50] sm:$0xff] }
 0x660   : > { %9421 = vmatpush1.bf16.msra.mxu1 %v9420_v36  ;;  %9359 = vmatprep.subr.bf16.mxu0 %v9358_v37  ;;  %v4597_v36 = vld [vmem:[%s11753_s25 + $0x7e0] sm:$0xff]  ;;  %v4595_v37 = vld [vmem:[%s11753_s25 + $0x7d0] sm:$0xff]  ;;  %v9510_v5 = vpack.c.bf16 %v4338_v61, %v4334_v60  ;;  %v4344_v8 = vld [vmem:[%s11753_s25 + $0xa8] sm:$0xff] }
 0x661   : > { %9423 = vmatprep.subr.bf16.mxu1 %v9422_v58  ;;  %4676 = vmatprep.mubr.f32.mxu0 %v4609_v27  ;;  %v4328_v58 = vld [vmem:[%s11753_s25 + $0x28] sm:$0xff]  ;;  %v9376_v47 = vpack.c.bf16 %v4597_v36, %v4593_v34  ;;  %v9440_v48 = vpack.c.bf16 %v4599_v39, %v4595_v37  ;;  %v4335_v3 = vld [vmem:[%s11753_s25 + $0x60] sm:$0xff]  ;;  %v4337_v7 = vld [vmem:[%s11753_s25 + $0x70] sm:$0xff] }
 0x662   : > { %4747 = vmatprep.mubr.f32.mxu1 %v4609_v27  ;;  %v9442_v49 = vpack.c.bf16 %v4328_v58, %v4324_v45  ;;  %v9448_v12 = vpack.c.bf16 %v4335_v3, %v4331_v2  ;;  %v9512_v44 = vpack.c.bf16 %v4337_v7, %v4333_v4  ;;  %v4343_v14 = vld [vmem:[%s11753_s25 + $0xa0] sm:$0xff]  ;;  %v4341_v35 = vld [vmem:[%s11753_s25 + $0x90] sm:$0xff]  ;;  %v4348_v40 = vld [vmem:[%s11753_s25 + $0xc8] sm:$0xff] }
 0x663   : > { %9361 = vmatpush1.bf16.msra.mxu0 %v9360_v25  ;;  %v4327_v25 = vld [vmem:[%s11753_s25 + $0x20] sm:$0xff]  ;;  %v4345_v33 = vld [vmem:[%s11753_s25 + $0xb0] sm:$0xff]  ;;  %v4352_v18 = vld [vmem:[%s11753_s25 + $0xe8] sm:$0xff] }
 0x664   : > { %9425 = vmatpush1.bf16.msra.mxu1 %v9424_v56  ;;  %9363 = vmatprep.subr.bf16.mxu0 %v9362_v57  ;;  %v4329_v56 = vld [vmem:[%s11753_s25 + $0x30] sm:$0xff]  ;;  %v4332_v57 = vld [vmem:[%s11753_s25 + $0x48] sm:$0xff]  ;;  %v9454_v43 = vpack.c.bf16 %v4352_v18, %v4348_v40  ;;  %v4347_v22 = vld [vmem:[%s11753_s25 + $0xc0] sm:$0xff] }
 0x665   : > { %9427 = vmatprep.subr.bf16.mxu1 %v9426_v63  ;;  %v9444_v63 = vpack.c.bf16 %v4327_v25, %v4323_v41  ;;  %v9508_v0 = vpack.c.bf16 %v4329_v56, %v4325_v54  ;;  %v9446_v1 = vpack.c.bf16 %v4336_v23, %v4332_v57  ;;  %v4351_v59 = vld [vmem:[%s11753_s25 + $0xe0] sm:$0xff]  ;;  %v4353_v24 = vld [vmem:[%s11753_s25 + $0xf0] sm:$0xff]  ;;  %v4356_v26 = vld [vmem:[%s11753_s25 + $0x108] sm:$0xff] }
 0x666   : > { %v4360_v27 = vld [vmem:[%s11753_s25 + $0x128] sm:$0xff]  ;;  %v4358_v28 = vld [vmem:[%s11753_s25 + $0x118] sm:$0xff]  ;;  %v4355_v34 = vld [vmem:[%s11753_s25 + $0x100] sm:$0xff] }
 0x667   : > { %9365 = vmatpush1.bf16.msra.mxu0 %v9364_v16  ;;  %v4340_v16 = vld [vmem:[%s11753_s25 + $0x88] sm:$0xff]  ;;  %v4362_v29 = vld [vmem:[%s11753_s25 + $0x138] sm:$0xff]  ;;  %v4359_v36 = vld [vmem:[%s11753_s25 + $0x120] sm:$0xff] }
 0x668   : > { %9429 = vmatpush1.bf16.msra.mxu1 %v9428_v9  ;;  %9367 = vmatprep.subr.bf16.mxu0 %v9366_v10  ;;  %v4342_v9 = vld [vmem:[%s11753_s25 + $0x98] sm:$0xff]  ;;  %v9450_v13 = vpack.c.bf16 %v4344_v8, %v4340_v16  ;;  %v4357_v37 = vld [vmem:[%s11753_s25 + $0x110] sm:$0xff]  ;;  %v4364_v45 = vld [vmem:[%s11753_s25 + $0x148] sm:$0xff] }
 0x669   : > { %9431 = vmatprep.subr.bf16.mxu1 %v9430_v20  ;;  %v4346_v10 = vld [vmem:[%s11753_s25 + $0xb8] sm:$0xff]  ;;  %v4339_v20 = vld [vmem:[%s11753_s25 + $0x80] sm:$0xff]  ;;  %v4361_v39 = vld [vmem:[%s11753_s25 + $0x130] sm:$0xff] }
 0x66a   : > { %v9514_v15 = vpack.c.bf16 %v4346_v10, %v4342_v9  ;;  %v4368_v58 = vld [vmem:[%s11753_s25 + $0x168] sm:$0xff]  ;;  %v4366_v6 = vld [vmem:[%s11753_s25 + $0x158] sm:$0xff]  ;;  %v4363_v41 = vld [vmem:[%s11753_s25 + $0x140] sm:$0xff] }
 0x66b   : > { %9369 = vmatpush1.bf16.msra.mxu0 %v9368_v50  ;;  %v4350_v50 = vld [vmem:[%s11753_s25 + $0xd8] sm:$0xff]  ;;  %v4367_v25 = vld [vmem:[%s11753_s25 + $0x160] sm:$0xff]  ;;  %v4365_v54 = vld [vmem:[%s11753_s25 + $0x150] sm:$0xff] }
 0x66c   : > { %9433 = vmatpush1.bf16.msra.mxu1 %v9432_v21  ;;  %9371 = vmatprep.subr.bf16.mxu0 %v9370_v42  ;;  %v9452_v21 = vpack.c.bf16 %v4343_v14, %v4339_v20  ;;  %v9516_v42 = vpack.c.bf16 %v4345_v33, %v4341_v35  ;;  %v4370_v46 = vld [vmem:[%s11753_s25 + $0x178] sm:$0xff]  ;;  %v4369_v56 = vld [vmem:[%s11753_s25 + $0x170] sm:$0xff]  ;;  %v4372_v57 = vld [vmem:[%s11753_s25 + $0x188] sm:$0xff] }
 0x66d   : > { %9435 = vmatprep.subr.bf16.mxu1 %v9434_v17  ;;  %v4349_v17 = vld [vmem:[%s11753_s25 + $0xd0] sm:$0xff]  ;;  %v4376_v23 = vld [vmem:[%s11753_s25 + $0x1a8] sm:$0xff]  ;;  %v4374_v60 = vld [vmem:[%s11753_s25 + $0x198] sm:$0xff] }
 0x66e   : > { %v4378_v61 = vld [vmem:[%s11753_s25 + $0x1b8] sm:$0xff]  ;;  %v9466_v2 = vpack.c.bf16 %v4376_v23, %v4372_v57  ;;  %v4375_v3 = vld [vmem:[%s11753_s25 + $0x1a0] sm:$0xff]  ;;  %v4373_v4 = vld [vmem:[%s11753_s25 + $0x190] sm:$0xff] }
 0x66f   : > { %9373 = vmatpush1.bf16.msra.mxu0 %v9372_v30  ;;  %v9456_v30 = vpack.c.bf16 %v4351_v59, %v4347_v22  ;;  %v9530_v7 = vpack.c.bf16 %v4378_v61, %v4374_v60  ;;  %v4380_v16 = vld [vmem:[%s11753_s25 + $0x1c8] sm:$0xff]  ;;  %v4303_v9 = vld [vmem:[#allocation10] sm:$0x3]  ;;  %v4379_v14 = vld [vmem:[%s11753_s25 + $0x1c0] sm:$0xff] }
 0x670   : > { %9437 = vmatpush1.bf16.msra.mxu1 %v9436_v31  ;;  %9375 = vmatprep.subr.bf16.mxu0 %v9374_v51  ;;  %v9520_v31 = vpack.c.bf16 %v4353_v24, %v4349_v17  ;;  %v9458_v51 = vpack.c.bf16 %v4360_v27, %v4356_v26  ;;  %v4384_v8 = vld [vmem:[%s11753_s25 + $0x1e8] sm:$0xff]  ;;  %v4382_v10 = vld [vmem:[%s11753_s25 + $0x1d8] sm:$0xff]  ;;  %v4383_v33 = vld [vmem:[%s11753_s25 + $0x1e0] sm:$0xff] }
 0x671   : > { %9439 = vmatprep.subr.bf16.mxu1 %v9438_v38  ;;  %v9522_v38 = vpack.c.bf16 %v4362_v29, %v4358_v28  ;;  %v4381_v40 = vld [vmem:[%s11753_s25 + $0x1d0] sm:$0xff]  ;;  %v9472_v22 = vpack.c.bf16 %v4383_v33, %v4379_v14  ;;  %v4391_v24 = vld [vmem:[%s11753_s25 + $0x220] sm:$0xff]  ;;  %v4422_v14 = vld [vmem:[%s11753_s25 + $0x318] sm:$0xff] }
 0x672   : > { %v4385_v18 = vld [vmem:[%s11753_s25 + $0x1f0] sm:$0xff]  ;;  %v4403_v23 = vld [vmem:[%s11753_s25 + $0x280] sm:$0xff] }
 0x673   : > { %9377 = vmatpush1.bf16.msra.mxu0 %v9376_v47  ;;  %v9460_v47 = vpack.c.bf16 %v4359_v36, %v4355_v34  ;;  %v9536_v59 = vpack.c.bf16 %v4385_v18, %v4381_v40  ;;  %v4389_v26 = vld [vmem:[%s11753_s25 + $0x210] sm:$0xff]  ;;  %v4402_v34 = vld [vmem:[%s11753_s25 + $0x278] sm:$0xff]  ;;  %v4407_v60 = vld [vmem:[%s11753_s25 + $0x2a0] sm:$0xff] }
 0x674   : > { %9441 = vmatpush1.bf16.msra.mxu1 %v9440_v48  ;;  %9443 = vmatprep.subr.bf16.mxu0 %v9442_v49  ;;  %v9524_v48 = vpack.c.bf16 %v4361_v39, %v4357_v37  ;;  %v9462_v49 = vpack.c.bf16 %v4368_v58, %v4364_v45  ;;  %v4393_v29 = vld [vmem:[%s11753_s25 + $0x230] sm:$0xff]  ;;  %v4395_v45 = vld [vmem:[%s11753_s25 + $0x240] sm:$0xff] }
 0x675   : > { %9507 = vmatprep.subr.bf16.mxu1 %v9506_v55  ;;  %v9526_v55 = vpack.c.bf16 %v4370_v46, %v4366_v6  ;;  %v4399_v58 = vld [vmem:[%s11753_s25 + $0x260] sm:$0xff]  ;;  %v4397_v6 = vld [vmem:[%s11753_s25 + $0x250] sm:$0xff] }
 0x676   : > { %4677 = vmatmul.mubr.f32.vlgmr.msra.gmra.mrb[0].mxu0 %v13631_v19  ;;  %v4405_v61 = vld [vmem:[%s11753_s25 + $0x290] sm:$0xff]  ;;  %v4419_v18 = vld [vmem:[%s11753_s25 + $0x300] sm:$0xff] }
 0x677   : > { %4748 = vmatmul.mubr.f32.vlgmr.msra.gmra.mrb[0].mxu1 %v13631_v19  ;;  %9445 = vmatpush1.bf16.msra.mxu0 %v9444_v63  ;;  %v4354_v19 = vld [vmem:[%s11753_s25 + $0xf8] sm:$0xff]  ;;  %v9464_v63 = vpack.c.bf16 %v4367_v25, %v4363_v41  ;;  %v4408_v41 = vld [vmem:[%s11753_s25 + $0x2a8] sm:$0xff] }
 0x678   : > { %9509 = vmatpush1.bf16.msra.mxu1 %v9508_v0  ;;  %9447 = vmatprep.subr.bf16.mxu0 %v9446_v1  ;;  %v9518_v52 = vpack.c.bf16 %v4354_v19, %v4350_v50  ;;  %v4371_v0 = vld [vmem:[%s11753_s25 + $0x180] sm:$0xff]  ;;  %v9528_v1 = vpack.c.bf16 %v4369_v56, %v4365_v54  ;;  %v4406_v25 = vld [vmem:[%s11753_s25 + $0x298] sm:$0xff] }
 0x679   : > { %9511 = vmatprep.subr.bf16.mxu1 %v9510_v5  ;;  %v4377_v5 = vld [vmem:[%s11753_s25 + $0x1b0] sm:$0xff]  ;;  %v9468_v20 = vpack.c.bf16 %v4375_v3, %v4371_v0  ;;  %v4302_v19 = vld [vmem:[#allocation3] sm:$0xf]  ;;  %v4410_v54 = vld [vmem:[%s11753_s25 + $0x2b8] sm:$0xff] }
 0x67a   : > { %v9532_v35 = vpack.c.bf16 %v4377_v5, %v4373_v4  ;;  %v4409_v0 = vld [vmem:[%s11753_s25 + $0x2b0] sm:$0xff]  ;;  %v4414_v3 = vld [vmem:[%s11753_s25 + $0x2d8] sm:$0xff]  ;;  %v9484_v5 = vpack.c.bf16 %v4407_v60, %v4403_v23 }
 0x67b   : > { %9449 = vmatpush1.bf16.msra.mxu0 %v9448_v12  ;;  %v4386_v12 = vld [vmem:[%s11753_s25 + $0x1f8] sm:$0xff]  ;;  %v4445_v60 = vld [vmem:[%s11753_s25 + $0x3d0] sm:$0xff] }
 0x67c   : > { %9513 = vmatpush1.bf16.msra.mxu1 %v9512_v44  ;;  %9451 = vmatprep.subr.bf16.mxu0 %v9450_v13  ;;  %v4308_v44 = vrot.slane %v4303_v9, %v4307_v32  ;;  %v4312_v13 = vrot.slane %v4303_v9, %v4311_v62  ;;  %v9534_v11 = vpack.c.bf16 %v4386_v12, %v4382_v10  ;;  %v4388_v32 = vld [vmem:[%s11753_s25 + $0x208] sm:$0xff]  ;;  %v4418_v4 = vld [vmem:[%s11753_s25 + $0x2f8] sm:$0xff]  ;;  %v4415_v9 = vld [vmem:[%s11753_s25 + $0x2e0] sm:$0xff] }
 0x67d   : > { %9515 = vmatprep.subr.bf16.mxu1 %v9514_v15  ;;  %v9470_v15 = vpack.c.bf16 %v4384_v8, %v4380_v16  ;;  %v4392_v62 = vld [vmem:[%s11753_s25 + $0x228] sm:$0xff]  ;;  %v4411_v8 = vld [vmem:[%s11753_s25 + $0x2c0] sm:$0xff]  ;;  %v4413_v10 = vld [vmem:[%s11753_s25 + $0x2d0] sm:$0xff]  ;;  %v9550_v12 = vpack.c.bf16 %v4418_v4, %v4414_v3 }
 0x67e   : > { %v4313_v50 = vcombine.low %v4308_v44, %v4312_v13  ;;  %v9474_v17 = vpack.c.bf16 %v4392_v62, %v4388_v32  ;;  %v4417_v44 = vld [vmem:[%s11753_s25 + $0x2f0] sm:$0xff]  ;;  %v4420_v13 = vld [vmem:[%s11753_s25 + $0x308] sm:$0xff] }
 0x67f   : > { %9453 = vmatpush1.bf16.msra.mxu0 %v9452_v21  ;;  %v4390_v21 = vld [vmem:[%s11753_s25 + $0x218] sm:$0xff]  ;;  %v9552_v33 = vpack.c.bf16 %v4417_v44, %v4413_v10  ;;  %v4425_v62 = vld [vmem:[%s11753_s25 + $0x330] sm:$0xff] }
 0x680   : > { %9517 = vmatpush1.bf16.msra.mxu1 %v9516_v42  ;;  %9455 = vmatprep.subr.bf16.mxu0 %v9454_v43  ;;  %v4394_v42 = vld [vmem:[%s11753_s25 + $0x238] sm:$0xff]  ;;  %v4320_v43 = vrot.slane %v4313_v50, %v13607_v53  ;;  %v4423_v50 = vld [vmem:[%s11753_s25 + $0x320] sm:$0xff] }
 0x681   : > { %9519 = vmatprep.subr.bf16.mxu1 %v9518_v52  ;;  %v4387_v52 = vld [vmem:[%s11753_s25 + $0x200] sm:$0xff]  ;;  %v9538_v28 = vpack.c.bf16 %v4394_v42, %v4390_v21  ;;  %v4432_v21 = vld [vmem:[%s11753_s25 + $0x368] sm:$0xff]  ;;  %v4430_v42 = vld [vmem:[%s11753_s25 + $0x358] sm:$0xff] }
 0x682   : > { %v4322_v27 = vadd.f32 %v4320_v43, %v4302_v19  ;;  %v9476_v37 = vpack.c.bf16 %v4391_v24, %v4387_v52  ;;  %v4428_v19 = vld [vmem:[%s11753_s25 + $0x348] sm:$0xff]  ;;  %v4434_v43 = vld [vmem:[%s11753_s25 + $0x378] sm:$0xff]  ;;  %v4427_v52 = vld [vmem:[%s11753_s25 + $0x340] sm:$0xff] }
 0x683   : > { %9457 = vmatpush1.bf16.msra.mxu0 %v9456_v30  ;;  %v4396_v30 = vld [vmem:[%s11753_s25 + $0x248] sm:$0xff]  ;;  %v4431_v24 = vld [vmem:[%s11753_s25 + $0x360] sm:$0xff] }
 0x684   : > { %9521 = vmatpush1.bf16.msra.mxu1 %v9520_v31  ;;  %9459 = vmatprep.subr.bf16.mxu0 %v9458_v51  ;;  %v4400_v31 = vld [vmem:[%s11753_s25 + $0x268] sm:$0xff]  ;;  %v4398_v51 = vld [vmem:[%s11753_s25 + $0x258] sm:$0xff]  ;;  %v13731_v36 = vrot.slane %v4322_v27, %v13607_v53  ;;  %v9558_v27 = vpack.c.bf16 %v4434_v43, %v4430_v42 }
 0x685   : > { %9523 = vmatprep.subr.bf16.mxu1 %v9522_v38  ;;  %v9540_v38 = vpack.c.bf16 %v4393_v29, %v4389_v26  ;;  %v9478_v39 = vpack.c.bf16 %v4400_v31, %v4396_v30  ;;  %v4429_v26 = vld [vmem:[%s11753_s25 + $0x350] sm:$0xff]  ;;  %v4436_v29 = vld [vmem:[%s11753_s25 + $0x388] sm:$0xff]  ;;  %v4438_v31 = vld [vmem:[%s11753_s25 + $0x398] sm:$0xff] }
 0x686   : > { %v4762_v46 = vcombine.high %v13731_v36, %v13731_v36  ;;  %v4440_v30 = vld [vmem:[%s11753_s25 + $0x3a8] sm:$0xff] }
 0x687   : > { %9461 = vmatpush1.bf16.msra.mxu0 %v9460_v47  ;;  %v9542_v47 = vpack.c.bf16 %v4402_v34, %v4398_v51  ;;  %v4442_v51 = vld [vmem:[%s11753_s25 + $0x3b8] sm:$0xff]  ;;  %v9496_v34 = vpack.c.bf16 %v4431_v24, %v4427_v52 }
 0x688   : > { %9525 = vmatpush1.bf16.msra.mxu1 %v9524_v48  ;;  %9463 = vmatprep.subr.bf16.mxu0 %v9462_v49  ;;  %v4401_v48 = vld [vmem:[%s11753_s25 + $0x270] sm:$0xff]  ;;  %v4404_v49 = vld [vmem:[%s11753_s25 + $0x288] sm:$0xff] }
 0x689   : > { %9527 = vmatprep.subr.bf16.mxu1 %v9526_v55  ;;  %4829 = vmatprep.mubr.f32.mxu0 %v4762_v46  ;;  %v9480_v55 = vpack.c.bf16 %v4399_v58, %v4395_v45  ;;  %v9544_v56 = vpack.c.bf16 %v4401_v48, %v4397_v6  ;;  %v9482_v57 = vpack.c.bf16 %v4408_v41, %v4404_v49  ;;  %v4439_v45 = vld [vmem:[%s11753_s25 + $0x3a0] sm:$0xff]  ;;  %v4437_v58 = vld [vmem:[%s11753_s25 + $0x390] sm:$0xff]  ;;  %v4448_v48 = vld [vmem:[%s11753_s25 + $0x3e8] sm:$0xff] }
 0x68a   : > { %4900 = vmatprep.mubr.f32.mxu1 %v4762_v46  ;;  %v9562_v6 = vpack.c.bf16 %v4442_v51, %v4438_v31  ;;  %v4441_v46 = vld [vmem:[%s11753_s25 + $0x3b0] sm:$0xff]  ;;  %v4446_v49 = vld [vmem:[%s11753_s25 + $0x3d8] sm:$0xff] }
 0x68b   : > { %9465 = vmatpush1.bf16.msra.mxu0 %v9464_v63  ;;  %v9546_v63 = vpack.c.bf16 %v4410_v54, %v4406_v25  ;;  %v4450_v41 = vld [vmem:[%s11753_s25 + $0x3f8] sm:$0xff]  ;;  %v9564_v54 = vpack.c.bf16 %v4441_v46, %v4437_v58 }
 0x68c   : > { %9529 = vmatpush1.bf16.msra.mxu1 %v9528_v1  ;;  %9467 = vmatprep.subr.bf16.mxu0 %v9466_v2  ;;  %v4412_v1 = vld [vmem:[%s11753_s25 + $0x2c8] sm:$0xff]  ;;  %v9566_v23 = vpack.c.bf16 %v4450_v41, %v4446_v49 }
 0x68d   : > { %9531 = vmatprep.subr.bf16.mxu1 %v9530_v7  ;;  %v4416_v2 = vld [vmem:[%s11753_s25 + $0x2e8] sm:$0xff]  ;;  %v9548_v7 = vpack.c.bf16 %v4409_v0, %v4405_v61  ;;  %v4449_v61 = vld [vmem:[%s11753_s25 + $0x3f0] sm:$0xff] }
 0x68e   : > { %v9486_v16 = vpack.c.bf16 %v4416_v2, %v4412_v1  ;;  %v9568_v0 = vpack.c.bf16 %v4449_v61, %v4445_v60 }
 0x68f   : > { %9469 = vmatpush1.bf16.msra.mxu0 %v9468_v20  ;;  %v4424_v20 = vld [vmem:[%s11753_s25 + $0x328] sm:$0xff] }
 0x690   : > { %9533 = vmatpush1.bf16.msra.mxu1 %v9532_v35  ;;  %9471 = vmatprep.subr.bf16.mxu0 %v9470_v15  ;;  %v4426_v35 = vld [vmem:[%s11753_s25 + $0x338] sm:$0xff]  ;;  %v9488_v15 = vpack.c.bf16 %v4415_v9, %v4411_v8  ;;  %v9490_v40 = vpack.c.bf16 %v4424_v20, %v4420_v13 }
 0x691   : > { %9535 = vmatprep.subr.bf16.mxu1 %v9534_v11  ;;  %v4421_v11 = vld [vmem:[%s11753_s25 + $0x310] sm:$0xff]  ;;  %v9554_v32 = vpack.c.bf16 %v4426_v35, %v4422_v14 }
 0x693   : > { %9473 = vmatpush1.bf16.msra.mxu0 %v9472_v22  ;;  %v9492_v22 = vpack.c.bf16 %v4423_v50, %v4419_v18 }
 0x694   : > { %9537 = vmatpush1.bf16.msra.mxu1 %v9536_v59  ;;  %9475 = vmatprep.subr.bf16.mxu0 %v9474_v17  ;;  %v9556_v59 = vpack.c.bf16 %v4425_v62, %v4421_v11  ;;  %v9494_v17 = vpack.c.bf16 %v4432_v21, %v4428_v19 }
 0x695   : > { %9539 = vmatprep.subr.bf16.mxu1 %v9538_v28  ;;  %v4433_v28 = vld [vmem:[%s11753_s25 + $0x370] sm:$0xff] }
 0x697   : > { %9477 = vmatpush1.bf16.msra.mxu0 %v9476_v37  ;;  %v9560_v37 = vpack.c.bf16 %v4433_v28, %v4429_v26 }
 0x698   : > { %9541 = vmatpush1.bf16.msra.mxu1 %v9540_v38  ;;  %9479 = vmatprep.subr.bf16.mxu0 %v9478_v39  ;;  %v9498_v38 = vpack.c.bf16 %v4440_v30, %v4436_v29  ;;  %v4435_v39 = vld [vmem:[%s11753_s25 + $0x380] sm:$0xff] }
 0x699   : > { %9543 = vmatprep.subr.bf16.mxu1 %v9542_v47  ;;  %v4444_v47 = vld [vmem:[%s11753_s25 + $0x3c8] sm:$0xff]  ;;  %v9500_v25 = vpack.c.bf16 %v4439_v45, %v4435_v39 }
 0x69b   : > { %9481 = vmatpush1.bf16.msra.mxu0 %v9480_v55  ;;  %v9502_v55 = vpack.c.bf16 %v4448_v48, %v4444_v47 }
 0x69c   : > { %9545 = vmatpush1.bf16.msra.mxu1 %v9544_v56  ;;  %9483 = vmatprep.subr.bf16.mxu0 %v9482_v57  ;;  %v4443_v56 = vld [vmem:[%s11753_s25 + $0x3c0] sm:$0xff] }
 0x69d   : > { %9547 = vmatprep.subr.bf16.mxu1 %v9546_v63  ;;  %v4447_v57 = vld [vmem:[%s11753_s25 + $0x3e0] sm:$0xff]  ;;  %s7777_s25 = sshll.u32 %s7734_s30, 3 }
 0x69e   : > { %v9504_v63 = vpack.c.bf16 %v4447_v57, %v4443_v56  ;;  %s4932_s23 = scalar_lea.vmem [#allocation4], %s7777_s25 }
 0x69f   : > { %9485 = vmatpush1.bf16.msra.mxu0 %v9484_v5 }
 0x6a0   : > { %9549 = vmatpush1.bf16.msra.mxu1 %v9548_v7  ;;  %9487 = vmatprep.subr.bf16.mxu0 %v9486_v16 }
 0x6a1   : > { %9551 = vmatprep.subr.bf16.mxu1 %v9550_v12 }
 0x6a3   : > { %9489 = vmatpush1.bf16.msra.mxu0 %v9488_v15 }
 0x6a4   : > { %9553 = vmatpush1.bf16.msra.mxu1 %v9552_v33  ;;  %9491 = vmatprep.subr.bf16.mxu0 %v9490_v40 }
 0x6a5   : > { %9555 = vmatprep.subr.bf16.mxu1 %v9554_v32 }
 0x6a7   : > { %9493 = vmatpush1.bf16.msra.mxu0 %v9492_v22 }
 0x6a8   : > { %9557 = vmatpush1.bf16.msra.mxu1 %v9556_v59  ;;  %9495 = vmatprep.subr.bf16.mxu0 %v9494_v17 }
 0x6a9   : > { %9559 = vmatprep.subr.bf16.mxu1 %v9558_v27 }
 0x6ab   : > { %9497 = vmatpush1.bf16.msra.mxu0 %v9496_v34 }
 0x6ac   : > { %9561 = vmatpush1.bf16.msra.mxu1 %v9560_v37  ;;  %9499 = vmatprep.subr.bf16.mxu0 %v9498_v38 }
 0x6ad   : > { %9563 = vmatprep.subr.bf16.mxu1 %v9562_v6 }
 0x6af   : > { %9501 = vmatpush1.bf16.msra.mxu0 %v9500_v25 }
 0x6b0   : > { %9565 = vmatpush1.bf16.msra.mxu1 %v9564_v54  ;;  %9503 = vmatprep.subr.bf16.mxu0 %v9502_v55 }
 0x6b1   : > { %9567 = vmatprep.subr.bf16.mxu1 %v9566_v23 }
 0x6b3   : > { %9505 = vmatpush1.bf16.msra.mxu0 %v9504_v63 }
 0x6b4   : > { %9569 = vmatpush1.bf16.msra.mxu1 %v9568_v0 }
 0x6b6   : > { %4830 = vmatmul.mubr.f32.vlgmr.msra.gmra.mrb[0].mxu0 %v13731_v36 }
 0x6b7   : > { %4901 = vmatmul.mubr.f32.vlgmr.msra.gmra.mrb[0].mxu1 %v13731_v36 }
 0x789   : > { %v4831_v1 = vpop.f32.mrb[0].mxu0 }
 0x78a   : > { %v4902_v2 = vpop.f32.mrb[0].mxu1  ;;  %v4833_v3 = vpop.f32.mrb[1].mxu0 }
 0x78b   : > { %v4912_v4 = vcombine.low %v4831_v1, %v4833_v3  ;;  %v4904_v5 = vpop.f32.mrb[1].mxu1 }
 0x78c   : > { %v4913_v7 = vcombine.low %v4902_v2, %v4904_v5 }
 0x78d   : > { %v4920_v16 = vrot.slane %v4912_v4, %v13607_v53 }
 0x78e   : > { %v4927_v8 = vrot.slane %v4913_v7, %v13607_v53 }
 0x790   : > { %v4928_v9 = vcombine.low %v4920_v16, %v4927_v8 }
 0x792   : > { %4933 = vst [vmem:[%s4932_s23] sm:$0xff] %v4928_v9 }
 0x793 PF: > { %4937 = sbr.rel (%p4297_p6) target bundleno = 2678 (0xa76), region = 104  ;;  %v5274_v36 = vld [vmem:[%s11765_s13 + $0x808] sm:$0xff] (!%p4297_p6)  ;;  %v5276_v10 = vld [vmem:[%s11765_s13 + $0x818] sm:$0xff] (!%p4297_p6)  ;;  %v5273_v13 = vld [vmem:[%s11765_s13 + $0x800] sm:$0xff] (!%p4297_p6) }
 0x794   : > { %v5278_v53 = vld [vmem:[%s11765_s13 + $0x828] sm:$0xff] (!%p4297_p6)  ;;  %v5280_v44 = vld [vmem:[%s11765_s13 + $0x838] sm:$0xff] (!%p4297_p6)  ;;  %v5277_v20 = vld [vmem:[%s11765_s13 + $0x820] sm:$0xff] (!%p4297_p6) }
 0x795   : > { %v9570_v12 = vpack.c.bf16 (!%p4297_p6), %v5278_v53, %v5274_v36  ;;  %v9698_v14 = vpack.c.bf16 (!%p4297_p6), %v5280_v44, %v5276_v10  ;;  %v9572_v35 = vpack.c.bf16 (!%p4297_p6), %v5277_v20, %v5273_v13  ;;  %v5275_v15 = vld [vmem:[%s11765_s13 + $0x810] sm:$0xff] (!%p4297_p6)  ;;  %v5282_v40 = vld [vmem:[%s11765_s13 + $0x848] sm:$0xff] (!%p4297_p6)  ;;  %v5284_v11 = vld [vmem:[%s11765_s13 + $0x858] sm:$0xff] (!%p4297_p6) }
 0x796   : > { %v5279_v33 = vld [vmem:[%s11765_s13 + $0x830] sm:$0xff] (!%p4297_p6)  ;;  %v5286_v50 = vld [vmem:[%s11765_s13 + $0x868] sm:$0xff] (!%p4297_p6)  ;;  %v5288_v32 = vld [vmem:[%s11765_s13 + $0x878] sm:$0xff] (!%p4297_p6) }
 0x797   : > { %9571 = vmatprep.subr.bf16.mxu0 (!%p4297_p6), %v9570_v12  ;;  %v9700_v18 = vpack.c.bf16 (!%p4297_p6), %v5279_v33, %v5275_v15  ;;  %9699 = vmatprep.subr.bf16.mxu1 (!%p4297_p6), %v9698_v14  ;;  %v9574_v62 = vpack.c.bf16 (!%p4297_p6), %v5286_v50, %v5282_v40  ;;  %v9702_v19 = vpack.c.bf16 (!%p4297_p6), %v5288_v32, %v5284_v11  ;;  %v5281_v21 = vld [vmem:[%s11765_s13 + $0x840] sm:$0xff] (!%p4297_p6)  ;;  %v5283_v43 = vld [vmem:[%s11765_s13 + $0x850] sm:$0xff] (!%p4297_p6)  ;;  %v5290_v17 = vld [vmem:[%s11765_s13 + $0x888] sm:$0xff] (!%p4297_p6) }
 0x798   : > { %9573 = vmatpush1.bf16.msra.mxu0 (!%p4297_p6), %v9572_v35  ;;  %v5285_v42 = vld [vmem:[%s11765_s13 + $0x860] sm:$0xff] (!%p4297_p6)  ;;  %v5287_v59 = vld [vmem:[%s11765_s13 + $0x870] sm:$0xff] (!%p4297_p6)  ;;  %v5294_v52 = vld [vmem:[%s11765_s13 + $0x8a8] sm:$0xff] (!%p4297_p6) }
 0x799   : > { %9701 = vmatpush1.bf16.msra.mxu1 (!%p4297_p6), %v9700_v18  ;;  %v9576_v22 = vpack.c.bf16 (!%p4297_p6), %v5285_v42, %v5281_v21  ;;  %9575 = vmatprep.subr.bf16.mxu0 (!%p4297_p6), %v9574_v62  ;;  %v9704_v24 = vpack.c.bf16 (!%p4297_p6), %v5287_v59, %v5283_v43  ;;  %v9578_v26 = vpack.c.bf16 (!%p4297_p6), %v5294_v52, %v5290_v17  ;;  %v5292_v27 = vld [vmem:[%s11765_s13 + $0x898] sm:$0xff] (!%p4297_p6)  ;;  %v5289_v29 = vld [vmem:[%s11765_s13 + $0x880] sm:$0xff] (!%p4297_p6)  ;;  %v5291_v51 = vld [vmem:[%s11765_s13 + $0x890] sm:$0xff] (!%p4297_p6) }
 0x79a   : > { %9703 = vmatprep.subr.bf16.mxu1 %v9702_v19  ;;  %v5296_v28 = vld [vmem:[%s11765_s13 + $0x8b8] sm:$0xff]  ;;  %v5293_v31 = vld [vmem:[%s11765_s13 + $0x8a0] sm:$0xff]  ;;  %v5295_v34 = vld [vmem:[%s11765_s13 + $0x8b0] sm:$0xff] }
 0x79b   : > { %v9706_v30 = vpack.c.bf16 %v5296_v28, %v5292_v27  ;;  %v9580_v37 = vpack.c.bf16 %v5293_v31, %v5289_v29  ;;  %v5298_v38 = vld [vmem:[%s11765_s13 + $0x8c8] sm:$0xff]  ;;  %v5300_v45 = vld [vmem:[%s11765_s13 + $0x8d8] sm:$0xff]  ;;  %v9708_v58 = vpack.c.bf16 %v5295_v34, %v5291_v51  ;;  %v5297_v47 = vld [vmem:[%s11765_s13 + $0x8c0] sm:$0xff] }
 0x79c   : > { %9577 = vmatpush1.bf16.msra.mxu0 %v9576_v22  ;;  %v5302_v39 = vld [vmem:[%s11765_s13 + $0x8e8] sm:$0xff]  ;;  %v5304_v46 = vld [vmem:[%s11765_s13 + $0x8f8] sm:$0xff]  ;;  %v5301_v48 = vld [vmem:[%s11765_s13 + $0x8e0] sm:$0xff] }
 0x79d   : > { %9705 = vmatpush1.bf16.msra.mxu1 %v9704_v24  ;;  %9579 = vmatprep.subr.bf16.mxu0 %v9578_v26  ;;  %v9582_v6 = vpack.c.bf16 %v5302_v39, %v5298_v38  ;;  %v9710_v49 = vpack.c.bf16 %v5304_v46, %v5300_v45  ;;  %v5299_v41 = vld [vmem:[%s11765_s13 + $0x8d0] sm:$0xff]  ;;  %v5306_v54 = vld [vmem:[%s11765_s13 + $0x908] sm:$0xff]  ;;  %v5308_v56 = vld [vmem:[%s11765_s13 + $0x918] sm:$0xff]  ;;  %v9584_v23 = vpack.c.bf16 %v5301_v48, %v5297_v47 }
 0x79e   : > { %9707 = vmatprep.subr.bf16.mxu1 %v9706_v30  ;;  %v5303_v25 = vld [vmem:[%s11765_s13 + $0x8f0] sm:$0xff]  ;;  %v5310_v55 = vld [vmem:[%s11765_s13 + $0x928] sm:$0xff]  ;;  %v5312_v57 = vld [vmem:[%s11765_s13 + $0x938] sm:$0xff] }
 0x79f   : > { %v9712_v60 = vpack.c.bf16 %v5303_v25, %v5299_v41  ;;  %v9586_v61 = vpack.c.bf16 %v5310_v55, %v5306_v54  ;;  %v5305_v63 = vld [vmem:[%s11765_s13 + $0x900] sm:$0xff]  ;;  %v5307_v1 = vld [vmem:[%s11765_s13 + $0x910] sm:$0xff]  ;;  %v9714_v2 = vpack.c.bf16 %v5312_v57, %v5308_v56  ;;  %v5314_v4 = vld [vmem:[%s11765_s13 + $0x948] sm:$0xff]  ;;  %v4941_v54 = vlaneseq }
 0x7a0   : > { %9581 = vmatpush1.bf16.msra.mxu0 %v9580_v37  ;;  %v5309_v0 = vld [vmem:[%s11765_s13 + $0x920] sm:$0xff]  ;;  %v5311_v3 = vld [vmem:[%s11765_s13 + $0x930] sm:$0xff]  ;;  %v5318_v5 = vld [vmem:[%s11765_s13 + $0x968] sm:$0xff] }
 0x7a1   : > { %9709 = vmatpush1.bf16.msra.mxu1 %v9708_v58  ;;  %9583 = vmatprep.subr.bf16.mxu0 %v9582_v6  ;;  %v5316_v7 = vld [vmem:[%s11765_s13 + $0x958] sm:$0xff]  ;;  %v9588_v8 = vpack.c.bf16 %v5309_v0, %v5305_v63  ;;  %v9716_v9 = vpack.c.bf16 %v5311_v3, %v5307_v1  ;;  %v9590_v36 = vpack.c.bf16 %v5318_v5, %v5314_v4  ;;  %v5313_v53 = vld [vmem:[%s11765_s13 + $0x940] sm:$0xff]  ;;  %v5315_v12 = vld [vmem:[%s11765_s13 + $0x950] sm:$0xff]  ;;  %v4942_v5 = vshrl.u32 %v4941_v54, 7 }
 0x7a2   : > { %9711 = vmatprep.subr.bf16.mxu1 %v9710_v49  ;;  %v5320_v16 = vld [vmem:[%s11765_s13 + $0x978] sm:$0xff]  ;;  %v5317_v10 = vld [vmem:[%s11765_s13 + $0x960] sm:$0xff]  ;;  %v5319_v13 = vld [vmem:[%s11765_s13 + $0x970] sm:$0xff] }
 0x7a3   : > { %v9718_v44 = vpack.c.bf16 %v5320_v16, %v5316_v7  ;;  %v5322_v20 = vld [vmem:[%s11765_s13 + $0x988] sm:$0xff]  ;;  %v5324_v35 = vld [vmem:[%s11765_s13 + $0x998] sm:$0xff]  ;;  %v9592_v33 = vpack.c.bf16 %v5317_v10, %v5313_v53  ;;  %v9720_v40 = vpack.c.bf16 %v5319_v13, %v5315_v12  ;;  %v5321_v50 = vld [vmem:[%s11765_s13 + $0x980] sm:$0xff]  ;;  %v11225_v7 = vmov 1983009808  }
 0x7a4   : > { %9585 = vmatpush1.bf16.msra.mxu0 %v9584_v23  ;;  %v5326_v14 = vld [vmem:[%s11765_s13 + $0x9a8] sm:$0xff]  ;;  %v5328_v15 = vld [vmem:[%s11765_s13 + $0x9b8] sm:$0xff]  ;;  %v5325_v11 = vld [vmem:[%s11765_s13 + $0x9a0] sm:$0xff]  ;;  %v4960_v16 = vunpack.c.l.s4 %v11225_v7 }
 0x7a5   : > { %9713 = vmatpush1.bf16.msra.mxu1 %v9712_v60  ;;  %9587 = vmatprep.subr.bf16.mxu0 %v9586_v61  ;;  %v9594_v18 = vpack.c.bf16 %v5326_v14, %v5322_v20  ;;  %v5323_v32 = vld [vmem:[%s11765_s13 + $0x990] sm:$0xff]  ;;  %v9722_v62 = vpack.c.bf16 %v5328_v15, %v5324_v35  ;;  %v5330_v21 = vld [vmem:[%s11765_s13 + $0x9c8] sm:$0xff]  ;;  %v5332_v43 = vld [vmem:[%s11765_s13 + $0x9d8] sm:$0xff]  ;;  %v9596_v59 = vpack.c.bf16 %v5325_v11, %v5321_v50 }
 0x7a6   : > { %9715 = vmatprep.subr.bf16.mxu1 %v9714_v2  ;;  %v5327_v19 = vld [vmem:[%s11765_s13 + $0x9b0] sm:$0xff]  ;;  %v5334_v42 = vld [vmem:[%s11765_s13 + $0x9e8] sm:$0xff]  ;;  %v5336_v22 = vld [vmem:[%s11765_s13 + $0x9f8] sm:$0xff] }
 0x7a7   : > { %v9724_v17 = vpack.c.bf16 %v5327_v19, %v5323_v32  ;;  %v9598_v52 = vpack.c.bf16 %v5334_v42, %v5330_v21  ;;  %v5329_v24 = vld [vmem:[%s11765_s13 + $0x9c0] sm:$0xff]  ;;  %v5331_v27 = vld [vmem:[%s11765_s13 + $0x9d0] sm:$0xff]  ;;  %v9726_v28 = vpack.c.bf16 %v5336_v22, %v5332_v43  ;;  %v5338_v30 = vld [vmem:[%s11765_s13 + $0xa08] sm:$0xff]  ;;  %v13890_v32 = vsub.s32 1, %v4942_v5 }
 0x7a8   : > { %9589 = vmatpush1.bf16.msra.mxu0 %v9588_v8  ;;  %v5333_v26 = vld [vmem:[%s11765_s13 + $0x9e0] sm:$0xff]  ;;  %v5335_v29 = vld [vmem:[%s11765_s13 + $0x9f0] sm:$0xff]  ;;  %v5342_v31 = vld [vmem:[%s11765_s13 + $0xa28] sm:$0xff]  ;;  %v13894_v19 = vsub.s32 3, %v4942_v5 }
 0x7a9   : > { %9717 = vmatpush1.bf16.msra.mxu1 %v9716_v9  ;;  %9591 = vmatprep.subr.bf16.mxu0 %v9590_v36  ;;  %v5340_v51 = vld [vmem:[%s11765_s13 + $0xa18] sm:$0xff]  ;;  %v9600_v37 = vpack.c.bf16 %v5333_v26, %v5329_v24  ;;  %v9728_v38 = vpack.c.bf16 %v5335_v29, %v5331_v27  ;;  %v9602_v39 = vpack.c.bf16 %v5342_v31, %v5338_v30  ;;  %v5337_v45 = vld [vmem:[%s11765_s13 + $0xa00] sm:$0xff]  ;;  %v5339_v6 = vld [vmem:[%s11765_s13 + $0xa10] sm:$0xff] }
 0x7aa   : > { %9719 = vmatprep.subr.bf16.mxu1 %v9718_v44  ;;  %v5344_v34 = vld [vmem:[%s11765_s13 + $0xa38] sm:$0xff]  ;;  %v5341_v58 = vld [vmem:[%s11765_s13 + $0xa20] sm:$0xff]  ;;  %v5343_v47 = vld [vmem:[%s11765_s13 + $0xa30] sm:$0xff] }
 0x7ab   : > { %v9730_v46 = vpack.c.bf16 %v5344_v34, %v5340_v51  ;;  %v5346_v48 = vld [vmem:[%s11765_s13 + $0xa48] sm:$0xff]  ;;  %v5348_v41 = vld [vmem:[%s11765_s13 + $0xa58] sm:$0xff]  ;;  %v9604_v55 = vpack.c.bf16 %v5341_v58, %v5337_v45  ;;  %v9732_v56 = vpack.c.bf16 %v5343_v47, %v5339_v6  ;;  %v5345_v23 = vld [vmem:[%s11765_s13 + $0xa40] sm:$0xff] }
 0x7ac   : > { %9593 = vmatpush1.bf16.msra.mxu0 %v9592_v33  ;;  %v5350_v49 = vld [vmem:[%s11765_s13 + $0xa68] sm:$0xff]  ;;  %v5352_v25 = vld [vmem:[%s11765_s13 + $0xa78] sm:$0xff]  ;;  %v5349_v60 = vld [vmem:[%s11765_s13 + $0xa60] sm:$0xff]  ;;  %v13886_v33 = vsub.s32 0, %v4942_v5 }
 0x7ad   : > { %9721 = vmatpush1.bf16.msra.mxu1 %v9720_v40  ;;  %9595 = vmatprep.subr.bf16.mxu0 %v9594_v18  ;;  %v9606_v57 = vpack.c.bf16 %v5350_v49, %v5346_v48  ;;  %v5347_v61 = vld [vmem:[%s11765_s13 + $0xa50] sm:$0xff]  ;;  %v9734_v63 = vpack.c.bf16 %v5352_v25, %v5348_v41  ;;  %v5354_v1 = vld [vmem:[%s11765_s13 + $0xa88] sm:$0xff]  ;;  %v5356_v3 = vld [vmem:[%s11765_s13 + $0xa98] sm:$0xff]  ;;  %v9608_v8 = vpack.c.bf16 %v5349_v60, %v5345_v23  ;;  %v4961_v40 = vunpack.c.0.s8 %v4960_v16 }
 0x7ae   : > { %9723 = vmatprep.subr.bf16.mxu1 %v9722_v62  ;;  %v5351_v0 = vld [vmem:[%s11765_s13 + $0xa70] sm:$0xff]  ;;  %v5358_v2 = vld [vmem:[%s11765_s13 + $0xaa8] sm:$0xff]  ;;  %v5360_v4 = vld [vmem:[%s11765_s13 + $0xab8] sm:$0xff]  ;;  %v13892_v62 = vsub.s32 2, %v4942_v5 }
 0x7af   : > { %v9736_v9 = vpack.c.bf16 %v5351_v0, %v5347_v61  ;;  %v9610_v36 = vpack.c.bf16 %v5358_v2, %v5354_v1  ;;  %v5353_v53 = vld [vmem:[%s11765_s13 + $0xa80] sm:$0xff]  ;;  %v5355_v12 = vld [vmem:[%s11765_s13 + $0xa90] sm:$0xff]  ;;  %v9738_v44 = vpack.c.bf16 %v5360_v4, %v5356_v3  ;;  %v5362_v20 = vld [vmem:[%s11765_s13 + $0xac8] sm:$0xff] }
 0x7b0   : > { %9597 = vmatpush1.bf16.msra.mxu0 %v9596_v59  ;;  %v5357_v10 = vld [vmem:[%s11765_s13 + $0xaa0] sm:$0xff]  ;;  %v5359_v13 = vld [vmem:[%s11765_s13 + $0xab0] sm:$0xff]  ;;  %v5366_v14 = vld [vmem:[%s11765_s13 + $0xae8] sm:$0xff] }
 0x7b1   : > { %9725 = vmatpush1.bf16.msra.mxu1 %v9724_v17  ;;  %9599 = vmatprep.subr.bf16.mxu0 %v9598_v52  ;;  %v5364_v35 = vld [vmem:[%s11765_s13 + $0xad8] sm:$0xff]  ;;  %v9612_v18 = vpack.c.bf16 %v5357_v10, %v5353_v53  ;;  %v5361_v50 = vld [vmem:[%s11765_s13 + $0xac0] sm:$0xff]  ;;  %v9740_v21 = vpack.c.bf16 %v5359_v13, %v5355_v12  ;;  %v9614_v42 = vpack.c.bf16 %v5366_v14, %v5362_v20  ;;  %v5363_v43 = vld [vmem:[%s11765_s13 + $0xad0] sm:$0xff] }
 0x7b2   : > { %9727 = vmatprep.subr.bf16.mxu1 %v9726_v28  ;;  %v5368_v15 = vld [vmem:[%s11765_s13 + $0xaf8] sm:$0xff]  ;;  %v5365_v11 = vld [vmem:[%s11765_s13 + $0xae0] sm:$0xff]  ;;  %v5367_v59 = vld [vmem:[%s11765_s13 + $0xaf0] sm:$0xff]  ;;  %v13902_v28 = vsub.s32 %v4961_v40, %v4942_v5 }
 0x7b3   : > { %v9742_v22 = vpack.c.bf16 %v5368_v15, %v5364_v35  ;;  %v5370_v17 = vld [vmem:[%s11765_s13 + $0xb08] sm:$0xff]  ;;  %v9616_v24 = vpack.c.bf16 %v5365_v11, %v5361_v50  ;;  %v5372_v26 = vld [vmem:[%s11765_s13 + $0xb18] sm:$0xff]  ;;  %v5235_v29 = vld [vmem:[#allocation13 + $0x4] sm:$0xf] }
 0x7b4   : > { %9601 = vmatpush1.bf16.msra.mxu0 %v9600_v37  ;;  %v5374_v52 = vld [vmem:[%s11765_s13 + $0xb28] sm:$0xff]  ;;  %v5376_v27 = vld [vmem:[%s11765_s13 + $0xb38] sm:$0xff]  ;;  %v5240_v30 = vrot.slane %v5235_v29, %v13886_v33  ;;  %v5244_v31 = vrot.slane %v5235_v29, %v13890_v32  ;;  %v5248_v51 = vrot.slane %v5235_v29, %v13892_v62  ;;  %v5252_v34 = vrot.slane %v5235_v29, %v13894_v19  ;;  %v5373_v45 = vld [vmem:[%s11765_s13 + $0xb20] sm:$0xff] }
 0x7b5   : > { %9729 = vmatpush1.bf16.msra.mxu1 %v9728_v38  ;;  %9603 = vmatprep.subr.bf16.mxu0 %v9602_v39  ;;  %v9744_v37 = vpack.c.bf16 %v5367_v59, %v5363_v43  ;;  %v9618_v38 = vpack.c.bf16 %v5374_v52, %v5370_v17  ;;  %v5369_v39 = vld [vmem:[%s11765_s13 + $0xb00] sm:$0xff]  ;;  %v5371_v58 = vld [vmem:[%s11765_s13 + $0xb10] sm:$0xff]  ;;  %v9746_v6 = vpack.c.bf16 %v5376_v27, %v5372_v26  ;;  %v5378_v47 = vld [vmem:[%s11765_s13 + $0xb48] sm:$0xff] }
 0x7b6   : > { %9731 = vmatprep.subr.bf16.mxu1 %v9730_v46  ;;  %v5375_v46 = vld [vmem:[%s11765_s13 + $0xb30] sm:$0xff]  ;;  %v5382_v48 = vld [vmem:[%s11765_s13 + $0xb68] sm:$0xff]  ;;  %v5253_v49 = vcombine.low %v5240_v30, %v5244_v31  ;;  %v5254_v41 = vcombine.low %v5248_v51, %v5252_v34  ;;  %v5380_v25 = vld [vmem:[%s11765_s13 + $0xb58] sm:$0xff] }
 0x7b7   : > { %v5384_v54 = vld [vmem:[%s11765_s13 + $0xb78] sm:$0xff]  ;;  %v9748_v60 = vpack.c.bf16 %v5375_v46, %v5371_v58  ;;  %v9622_v61 = vpack.c.bf16 %v5382_v48, %v5378_v47  ;;  %v5379_v0 = vld [vmem:[%s11765_s13 + $0xb50] sm:$0xff]  ;;  %v5234_v1 = vld [vmem:[#allocation4 + $0x8] sm:$0xff] }
 0x7b8   : > { %9605 = vmatpush1.bf16.msra.mxu0 %v9604_v55  ;;  %v9620_v55 = vpack.c.bf16 %v5373_v45, %v5369_v39  ;;  %v5268_v23 = vrot.slane %v5254_v41, %v13902_v28  ;;  %v9750_v2 = vpack.c.bf16 %v5384_v54, %v5380_v25  ;;  %v5383_v3 = vld [vmem:[%s11765_s13 + $0xb70] sm:$0xff]  ;;  %v5386_v4 = vld [vmem:[%s11765_s13 + $0xb88] sm:$0xff]  ;;  %v5388_v16 = vld [vmem:[%s11765_s13 + $0xb98] sm:$0xff] }
 0x7b9   : > { %9733 = vmatpush1.bf16.msra.mxu1 %v9732_v56  ;;  %9607 = vmatprep.subr.bf16.mxu0 %v9606_v57  ;;  %v5377_v56 = vld [vmem:[%s11765_s13 + $0xb40] sm:$0xff]  ;;  %v5261_v57 = vrot.slane %v5253_v49, %v13902_v28  ;;  %v5390_v5 = vld [vmem:[%s11765_s13 + $0xba8] sm:$0xff]  ;;  %v9752_v53 = vpack.c.bf16 %v5383_v3, %v5379_v0  ;;  %v5387_v13 = vld [vmem:[%s11765_s13 + $0xb90] sm:$0xff] }
 0x7ba   : > { %9735 = vmatprep.subr.bf16.mxu1 %v9734_v63  ;;  %v5381_v63 = vld [vmem:[%s11765_s13 + $0xb60] sm:$0xff]  ;;  %v9626_v10 = vpack.c.bf16 %v5390_v5, %v5386_v4  ;;  %v5391_v14 = vld [vmem:[%s11765_s13 + $0xbb0] sm:$0xff]  ;;  %v5394_v35 = vld [vmem:[%s11765_s13 + $0xbc8] sm:$0xff] }
 0x7bb   : > { %v5269_v7 = vcombine.low %v5261_v57, %v5268_v23  ;;  %v5385_v12 = vld [vmem:[%s11765_s13 + $0xb80] sm:$0xff]  ;;  %v5398_v15 = vld [vmem:[%s11765_s13 + $0xbe8] sm:$0xff]  ;;  %v5400_v50 = vld [vmem:[%s11765_s13 + $0xbf8] sm:$0xff] }
 0x7bc   : > { %9609 = vmatpush1.bf16.msra.mxu0 %v9608_v8  ;;  %v5392_v8 = vld [vmem:[%s11765_s13 + $0xbb8] sm:$0xff]  ;;  %v9630_v43 = vpack.c.bf16 %v5398_v15, %v5394_v35  ;;  %v5397_v59 = vld [vmem:[%s11765_s13 + $0xbe0] sm:$0xff]  ;;  %v5395_v17 = vld [vmem:[%s11765_s13 + $0xbd0] sm:$0xff] }
 0x7bd   : > { %9737 = vmatpush1.bf16.msra.mxu1 %v9736_v9  ;;  %9611 = vmatprep.subr.bf16.mxu0 %v9610_v36  ;;  %v9624_v9 = vpack.c.bf16 %v5381_v63, %v5377_v56  ;;  %v5271_v36 = vadd.f32 %v5269_v7, %v5234_v1  ;;  %v9754_v20 = vpack.c.bf16 %v5392_v8, %v5388_v16  ;;  %v5402_v29 = vld [vmem:[%s11765_s13 + $0xc08] sm:$0xff]  ;;  %v5404_v31 = vld [vmem:[%s11765_s13 + $0xc18] sm:$0xff]  ;;  %v5401_v39 = vld [vmem:[%s11765_s13 + $0xc00] sm:$0xff] }
 0x7be   : > { %9739 = vmatprep.subr.bf16.mxu1 %v9738_v44  ;;  %v5389_v44 = vld [vmem:[%s11765_s13 + $0xba0] sm:$0xff]  ;;  %v5406_v30 = vld [vmem:[%s11765_s13 + $0xc28] sm:$0xff]  ;;  %v5408_v51 = vld [vmem:[%s11765_s13 + $0xc38] sm:$0xff] }
 0x7bf   : > { %v5272_v40 = vmax.f32 %v5271_v36, 0.0  ;;  %v9628_v11 = vpack.c.bf16 %v5389_v44, %v5385_v12  ;;  %v5405_v45 = vld [vmem:[%s11765_s13 + $0xc20] sm:$0xff]  ;;  %v5403_v58 = vld [vmem:[%s11765_s13 + $0xc10] sm:$0xff]  ;;  %v5410_v47 = vld [vmem:[%s11765_s13 + $0xc48] sm:$0xff] }
 0x7c0   : > { %9613 = vmatpush1.bf16.msra.mxu0 %v9612_v18  ;;  %v5396_v18 = vld [vmem:[%s11765_s13 + $0xbd8] sm:$0xff]  ;;  %v5407_v46 = vld [vmem:[%s11765_s13 + $0xc30] sm:$0xff]  ;;  %v5414_v48 = vld [vmem:[%s11765_s13 + $0xc68] sm:$0xff]  ;;  %v9636_v54 = vpack.c.bf16 %v5405_v45, %v5401_v39 }
 0x7c1   : > { %9741 = vmatpush1.bf16.msra.mxu1 %v9740_v21  ;;  %9615 = vmatprep.subr.bf16.mxu0 %v9614_v42  ;;  %v5537_v21 = vrot.slane %v5272_v40, %v13902_v28  ;;  %v9756_v42 = vpack.c.bf16 %v5391_v14, %v5387_v13  ;;  %v9758_v52 = vpack.c.bf16 %v5400_v50, %v5396_v18  ;;  %v5412_v41 = vld [vmem:[%s11765_s13 + $0xc58] sm:$0xff]  ;;  %v5409_v57 = vld [vmem:[%s11765_s13 + $0xc40] sm:$0xff]  ;;  %v5415_v63 = vld [vmem:[%s11765_s13 + $0xc70] sm:$0xff] }
 0x7c2   : > { %9743 = vmatprep.subr.bf16.mxu1 %v9742_v22  ;;  %v5393_v22 = vld [vmem:[%s11765_s13 + $0xbc0] sm:$0xff]  ;;  %v5530_v26 = vcombine.high %v5272_v40, %v5272_v40  ;;  %v5416_v25 = vld [vmem:[%s11765_s13 + $0xc78] sm:$0xff]  ;;  %v9638_v56 = vpack.c.bf16 %v5414_v48, %v5410_v47  ;;  %v5418_v0 = vld [vmem:[%s11765_s13 + $0xc88] sm:$0xff] }
 0x7c3   : > { %v5545_v27 = vcombine.high %v5537_v21, %v5537_v21  ;;  %v9632_v34 = vpack.c.bf16 %v5397_v59, %v5393_v22  ;;  %v5413_v23 = vld [vmem:[%s11765_s13 + $0xc60] sm:$0xff]  ;;  %v5422_v1 = vld [vmem:[%s11765_s13 + $0xca8] sm:$0xff]  ;;  %v5420_v3 = vld [vmem:[%s11765_s13 + $0xc98] sm:$0xff] }
 0x7c4   : > { %9617 = vmatpush1.bf16.msra.mxu0 %v9616_v24  ;;  %v5399_v24 = vld [vmem:[%s11765_s13 + $0xbf0] sm:$0xff]  ;;  %v13950_v49 = vrot.slane %v5530_v26, %v13902_v28  ;;  %v5424_v4 = vld [vmem:[%s11765_s13 + $0xcb8] sm:$0xff]  ;;  %v9640_v5 = vpack.c.bf16 %v5413_v23, %v5409_v57  ;;  %v9642_v16 = vpack.c.bf16 %v5422_v1, %v5418_v0  ;;  %v5417_v8 = vld [vmem:[%s11765_s13 + $0xc80] sm:$0xff] }
 0x7c5   : > { %9745 = vmatpush1.bf16.msra.mxu1 %v9744_v37  ;;  %9619 = vmatprep.subr.bf16.mxu0 %v9618_v38  ;;  %v9760_v37 = vpack.c.bf16 %v5399_v24, %v5395_v17  ;;  %v9634_v38 = vpack.c.bf16 %v5406_v30, %v5402_v29  ;;  %v5419_v36 = vld [vmem:[%s11765_s13 + $0xc90] sm:$0xff]  ;;  %v5426_v12 = vld [vmem:[%s11765_s13 + $0xcc8] sm:$0xff]  ;;  %v5428_v13 = vld [vmem:[%s11765_s13 + $0xcd8] sm:$0xff] }
 0x7c6   : > { %9747 = vmatprep.subr.bf16.mxu1 %v9746_v6  ;;  %5615 = vmatprep.mubr.f32.mxu0 %v5545_v27  ;;  %v9762_v6 = vpack.c.bf16 %v5408_v51, %v5404_v31  ;;  %v5430_v44 = vld [vmem:[%s11765_s13 + $0xce8] sm:$0xff]  ;;  %v5425_v40 = vld [vmem:[%s11765_s13 + $0xcc0] sm:$0xff]  ;;  %v5427_v50 = vld [vmem:[%s11765_s13 + $0xcd0] sm:$0xff] }
 0x7c7   : > { %5757 = vmatprep.mubr.f32.mxu1 %v5545_v27  ;;  %v9646_v15 = vpack.c.bf16 %v5430_v44, %v5426_v12  ;;  %v5429_v18 = vld [vmem:[%s11765_s13 + $0xce0] sm:$0xff]  ;;  %v5436_v22 = vld [vmem:[%s11765_s13 + $0xd18] sm:$0xff]  ;;  %v5435_v29 = vld [vmem:[%s11765_s13 + $0xd10] sm:$0xff] }
 0x7c8   : > { %9621 = vmatpush1.bf16.msra.mxu0 %v9620_v55  ;;  %v9764_v55 = vpack.c.bf16 %v5407_v46, %v5403_v58  ;;  %v5440_v59 = vld [vmem:[%s11765_s13 + $0xd38] sm:$0xff]  ;;  %v9648_v17 = vpack.c.bf16 %v5429_v18, %v5425_v40  ;;  %v5433_v26 = vld [vmem:[%s11765_s13 + $0xd00] sm:$0xff]  ;;  %v5439_v31 = vld [vmem:[%s11765_s13 + $0xd30] sm:$0xff] }
 0x7c9   : > { %9749 = vmatpush1.bf16.msra.mxu1 %v9748_v60  ;;  %9623 = vmatprep.subr.bf16.mxu0 %v9622_v61  ;;  %v5411_v60 = vld [vmem:[%s11765_s13 + $0xc50] sm:$0xff]  ;;  %v9766_v61 = vpack.c.bf16 %v5416_v25, %v5412_v41  ;;  %v5437_v27 = vld [vmem:[%s11765_s13 + $0xd20] sm:$0xff]  ;;  %v9778_v30 = vpack.c.bf16 %v5440_v59, %v5436_v22  ;;  %v5442_v51 = vld [vmem:[%s11765_s13 + $0xd48] sm:$0xff]  ;;  %v9780_v45 = vpack.c.bf16 %v5439_v31, %v5435_v29 }
 0x7ca   : > { %9751 = vmatprep.subr.bf16.mxu1 %v9750_v2  ;;  %v5546_v2 = vcombine.high %v13950_v49, %v13950_v49  ;;  %v9768_v7 = vpack.c.bf16 %v5415_v63, %v5411_v60  ;;  %v9652_v39 = vpack.c.bf16 %v5437_v27, %v5433_v26  ;;  %v5445_v46 = vld [vmem:[%s11765_s13 + $0xd60] sm:$0xff]  ;;  %v5443_v47 = vld [vmem:[%s11765_s13 + $0xd50] sm:$0xff]  ;;  %v5450_v25 = vld [vmem:[%s11765_s13 + $0xd88] sm:$0xff] }
 0x7cb   : > { %v5447_v41 = vld [vmem:[%s11765_s13 + $0xd70] sm:$0xff]  ;;  %v5453_v63 = vld [vmem:[%s11765_s13 + $0xda0] sm:$0xff]  ;;  %v5474_v22 = vld [vmem:[%s11765_s13 + $0xe48] sm:$0xff] }
 0x7cc   : > { %9625 = vmatpush1.bf16.msra.mxu0 %v9624_v9  ;;  %v5421_v9 = vld [vmem:[%s11765_s13 + $0xca0] sm:$0xff]  ;;  %v9784_v23 = vpack.c.bf16 %v5447_v41, %v5443_v47  ;;  %v5451_v0 = vld [vmem:[%s11765_s13 + $0xd90] sm:$0xff]  ;;  %v5478_v59 = vld [vmem:[%s11765_s13 + $0xe68] sm:$0xff] }
 0x7cd   : > { %9753 = vmatpush1.bf16.msra.mxu1 %v9752_v53  ;;  %9627 = vmatprep.subr.bf16.mxu0 %v9626_v10  ;;  %v9770_v53 = vpack.c.bf16 %v5424_v4, %v5420_v3  ;;  %v5423_v10 = vld [vmem:[%s11765_s13 + $0xcb0] sm:$0xff]  ;;  %v9644_v14 = vpack.c.bf16 %v5421_v9, %v5417_v8  ;;  %v5458_v3 = vld [vmem:[%s11765_s13 + $0xdc8] sm:$0xff]  ;;  %v9670_v27 = vpack.c.bf16 %v5478_v59, %v5474_v22  ;;  %v5473_v29 = vld [vmem:[%s11765_s13 + $0xe40] sm:$0xff] }
 0x7ce   : > { %9755 = vmatprep.subr.bf16.mxu1 %v9754_v20  ;;  %v5432_v20 = vld [vmem:[%s11765_s13 + $0xcf8] sm:$0xff]  ;;  %v9772_v35 = vpack.c.bf16 %v5423_v10, %v5419_v36  ;;  %v5462_v4 = vld [vmem:[%s11765_s13 + $0xde8] sm:$0xff]  ;;  %v5457_v36 = vld [vmem:[%s11765_s13 + $0xdc0] sm:$0xff] }
 0x7cf   : > { %v9662_v9 = vpack.c.bf16 %v5462_v4, %v5458_v3  ;;  %v5459_v10 = vld [vmem:[%s11765_s13 + $0xdd0] sm:$0xff]  ;;  %v5481_v47 = vld [vmem:[%s11765_s13 + $0xe80] sm:$0xff] }
 0x7d0   : > { %9629 = vmatpush1.bf16.msra.mxu0 %v9628_v11  ;;  %v9774_v11 = vpack.c.bf16 %v5432_v20, %v5428_v13  ;;  %v5463_v44 = vld [vmem:[%s11765_s13 + $0xdf0] sm:$0xff]  ;;  %v5466_v13 = vld [vmem:[%s11765_s13 + $0xe08] sm:$0xff] }
 0x7d1   : > { %9757 = vmatpush1.bf16.msra.mxu1 %v9756_v42  ;;  %9631 = vmatprep.subr.bf16.mxu0 %v9630_v43  ;;  %v5434_v42 = vld [vmem:[%s11765_s13 + $0xd08] sm:$0xff]  ;;  %v9792_v40 = vpack.c.bf16 %v5463_v44, %v5459_v10  ;;  %v5475_v31 = vld [vmem:[%s11765_s13 + $0xe50] sm:$0xff]  ;;  %v5497_v10 = vld [vmem:[%s11765_s13 + $0xf00] sm:$0xff] }
 0x7d2   : > { %9759 = vmatprep.subr.bf16.mxu1 %v9758_v52  ;;  %v5438_v43 = vld [vmem:[%s11765_s13 + $0xd28] sm:$0xff]  ;;  %v5483_v41 = vld [vmem:[%s11765_s13 + $0xe90] sm:$0xff] }
 0x7d3   : > { %v9650_v24 = vpack.c.bf16 %v5438_v43, %v5434_v42  ;;  %v5470_v20 = vld [vmem:[%s11765_s13 + $0xe28] sm:$0xff]  ;;  %v5471_v43 = vld [vmem:[%s11765_s13 + $0xe30] sm:$0xff] }
 0x7d4   : > { %9633 = vmatpush1.bf16.msra.mxu0 %v9632_v34  ;;  %v5446_v34 = vld [vmem:[%s11765_s13 + $0xd68] sm:$0xff]  ;;  %v9666_v18 = vpack.c.bf16 %v5470_v20, %v5466_v13  ;;  %v5495_v4 = vld [vmem:[%s11765_s13 + $0xef0] sm:$0xff] }
 0x7d5   : > { %9761 = vmatpush1.bf16.msra.mxu1 %v9760_v37  ;;  %9635 = vmatprep.subr.bf16.mxu0 %v9634_v38  ;;  %v5444_v37 = vld [vmem:[%s11765_s13 + $0xd58] sm:$0xff]  ;;  %v9654_v58 = vpack.c.bf16 %v5446_v34, %v5442_v51  ;;  %v5479_v34 = vld [vmem:[%s11765_s13 + $0xe70] sm:$0xff] }
 0x7d6   : > { %9763 = vmatprep.subr.bf16.mxu1 %v9762_v6  ;;  %v5448_v38 = vld [vmem:[%s11765_s13 + $0xd78] sm:$0xff]  ;;  %v5441_v6 = vld [vmem:[%s11765_s13 + $0xd40] sm:$0xff]  ;;  %v5499_v44 = vld [vmem:[%s11765_s13 + $0xf10] sm:$0xff] }
 0x7d7   : > { %5616 = vmatmul.mubr.f32.vlgmr.msra.gmra.mrb[0].mxu0 %v5537_v21  ;;  %v9782_v48 = vpack.c.bf16 %v5448_v38, %v5444_v37  ;;  %v9656_v57 = vpack.c.bf16 %v5445_v46, %v5441_v6  ;;  %v5482_v37 = vld [vmem:[%s11765_s13 + $0xe88] sm:$0xff]  ;;  %v9800_v6 = vpack.c.bf16 %v5479_v34, %v5475_v31  ;;  %v5503_v20 = vld [vmem:[%s11765_s13 + $0xf30] sm:$0xff]  ;;  %v5513_v31 = vld [vmem:[%s11765_s13 + $0xf80] sm:$0xff] }
 0x7d8   : > { %9637 = vmatpush1.bf16.msra.mxu0 %v9636_v54  ;;  %5758 = vmatmul.mubr.f32.vlgmr.msra.gmra.mrb[0].mxu1 %v5537_v21  ;;  %v5431_v21 = vld [vmem:[%s11765_s13 + $0xcf0] sm:$0xff]  ;;  %v5454_v54 = vld [vmem:[%s11765_s13 + $0xda8] sm:$0xff] }
 0x7d9   : > { %9765 = vmatpush1.bf16.msra.mxu1 %v9764_v55  ;;  %9639 = vmatprep.subr.bf16.mxu0 %v9638_v56  ;;  %v9776_v52 = vpack.c.bf16 %v5431_v21, %v5427_v50  ;;  %v5452_v55 = vld [vmem:[%s11765_s13 + $0xd98] sm:$0xff]  ;;  %v9658_v60 = vpack.c.bf16 %v5454_v54, %v5450_v25  ;;  %v5465_v50 = vld [vmem:[%s11765_s13 + $0xe00] sm:$0xff]  ;;  %v5467_v21 = vld [vmem:[%s11765_s13 + $0xe10] sm:$0xff] }
 0x7da   : > { %9767 = vmatprep.subr.bf16.mxu1 %v9766_v61  ;;  %5686 = vmatprep.mubr.f32.mxu0 %v5546_v2  ;;  %v5456_v56 = vld [vmem:[%s11765_s13 + $0xdb8] sm:$0xff]  ;;  %v5449_v61 = vld [vmem:[%s11765_s13 + $0xd80] sm:$0xff]  ;;  %v9796_v26 = vpack.c.bf16 %v5471_v43, %v5467_v21  ;;  %v5486_v38 = vld [vmem:[%s11765_s13 + $0xea8] sm:$0xff] }
 0x7db   : > { %5828 = vmatprep.mubr.f32.mxu1 %v5546_v2  ;;  %v9786_v1 = vpack.c.bf16 %v5456_v56, %v5452_v55  ;;  %v5455_v2 = vld [vmem:[%s11765_s13 + $0xdb0] sm:$0xff]  ;;  %v9674_v46 = vpack.c.bf16 %v5486_v38, %v5482_v37  ;;  %v5490_v55 = vld [vmem:[%s11765_s13 + $0xec8] sm:$0xff]  ;;  %v5505_v21 = vld [vmem:[%s11765_s13 + $0xf40] sm:$0xff] }
 0x7dc   : > { %9641 = vmatpush1.bf16.msra.mxu0 %v9640_v5  ;;  %v5460_v5 = vld [vmem:[%s11765_s13 + $0xdd8] sm:$0xff]  ;;  %v9788_v8 = vpack.c.bf16 %v5455_v2, %v5451_v0  ;;  %v5487_v54 = vld [vmem:[%s11765_s13 + $0xeb0] sm:$0xff]  ;;  %v5494_v56 = vld [vmem:[%s11765_s13 + $0xee8] sm:$0xff] }
 0x7dd   : > { %9769 = vmatpush1.bf16.msra.mxu1 %v9768_v7  ;;  %9643 = vmatprep.subr.bf16.mxu0 %v9642_v16  ;;  %v5464_v7 = vld [vmem:[%s11765_s13 + $0xdf8] sm:$0xff]  ;;  %v9660_v16 = vpack.c.bf16 %v5453_v63, %v5449_v61  ;;  %v9804_v61 = vpack.c.bf16 %v5487_v54, %v5483_v41  ;;  %v9678_v63 = vpack.c.bf16 %v5494_v56, %v5490_v55  ;;  %v5489_v0 = vld [vmem:[%s11765_s13 + $0xec0] sm:$0xff]  ;;  %v5491_v2 = vld [vmem:[%s11765_s13 + $0xed0] sm:$0xff] }
 0x7de   : > { %9771 = vmatprep.subr.bf16.mxu1 %v9770_v53  ;;  %v5461_v53 = vld [vmem:[%s11765_s13 + $0xde0] sm:$0xff]  ;;  %v9790_v12 = vpack.c.bf16 %v5464_v7, %v5460_v5  ;;  %v5498_v5 = vld [vmem:[%s11765_s13 + $0xf08] sm:$0xff]  ;;  %v5507_v43 = vld [vmem:[%s11765_s13 + $0xf50] sm:$0xff] }
 0x7df   : > { %v5502_v7 = vld [vmem:[%s11765_s13 + $0xf28] sm:$0xff]  ;;  %v5511_v59 = vld [vmem:[%s11765_s13 + $0xf70] sm:$0xff]  ;;  %v5521_v41 = vld [vmem:[%s11765_s13 + $0xfc0] sm:$0xff] }
 0x7e0   : > { %9645 = vmatpush1.bf16.msra.mxu0 %v9644_v14  ;;  %v5468_v14 = vld [vmem:[%s11765_s13 + $0xe18] sm:$0xff]  ;;  %v5515_v34 = vld [vmem:[%s11765_s13 + $0xf90] sm:$0xff] }
 0x7e1   : > { %9773 = vmatpush1.bf16.msra.mxu1 %v9772_v35  ;;  %9647 = vmatprep.subr.bf16.mxu0 %v9646_v15  ;;  %v5472_v35 = vld [vmem:[%s11765_s13 + $0xe38] sm:$0xff]  ;;  %v9664_v15 = vpack.c.bf16 %v5461_v53, %v5457_v36  ;;  %v9808_v36 = vpack.c.bf16 %v5495_v4, %v5491_v2  ;;  %v9682_v53 = vpack.c.bf16 %v5502_v7, %v5498_v5  ;;  %v5519_v38 = vld [vmem:[%s11765_s13 + $0xfb0] sm:$0xff]  ;;  %v4986_v7 = vld [vmem:[%s11765_s13 + $0x48] sm:$0xff] }
 0x7e2   : > { %9775 = vmatprep.subr.bf16.mxu1 %v9774_v11  ;;  %v5469_v11 = vld [vmem:[%s11765_s13 + $0xe20] sm:$0xff]  ;;  %v9794_v42 = vpack.c.bf16 %v5472_v35, %v5468_v14  ;;  %v5506_v14 = vld [vmem:[%s11765_s13 + $0xf48] sm:$0xff]  ;;  %v5523_v54 = vld [vmem:[%s11765_s13 + $0xfd0] sm:$0xff] }
 0x7e3   : > { %v5510_v35 = vld [vmem:[%s11765_s13 + $0xf68] sm:$0xff]  ;;  %v5527_v56 = vld [vmem:[%s11765_s13 + $0xff0] sm:$0xff] }
 0x7e4   : > { %9649 = vmatpush1.bf16.msra.mxu0 %v9648_v17  ;;  %v5476_v17 = vld [vmem:[%s11765_s13 + $0xe58] sm:$0xff]  ;;  %v9824_v2 = vpack.c.bf16 %v5527_v56, %v5523_v54  ;;  %v4979_v4 = vld [vmem:[%s11765_s13 + $0x10] sm:$0xff] }
 0x7e5   : > { %9777 = vmatpush1.bf16.msra.mxu1 %v9776_v52  ;;  %9651 = vmatprep.subr.bf16.mxu0 %v9650_v24  ;;  %v5480_v52 = vld [vmem:[%s11765_s13 + $0xe78] sm:$0xff]  ;;  %v9668_v24 = vpack.c.bf16 %v5469_v11, %v5465_v50  ;;  %v9812_v50 = vpack.c.bf16 %v5503_v20, %v5499_v44  ;;  %v9686_v11 = vpack.c.bf16 %v5510_v35, %v5506_v14  ;;  %v4983_v5 = vld [vmem:[%s11765_s13 + $0x30] sm:$0xff]  ;;  %v4989_v20 = vld [vmem:[%s11765_s13 + $0x60] sm:$0xff] }
 0x7e6   : > { %9779 = vmatprep.subr.bf16.mxu1 %v9778_v30  ;;  %v5477_v30 = vld [vmem:[%s11765_s13 + $0xe60] sm:$0xff]  ;;  %v9798_v51 = vpack.c.bf16 %v5480_v52, %v5476_v17  ;;  %v5514_v17 = vld [vmem:[%s11765_s13 + $0xf88] sm:$0xff]  ;;  %v4987_v14 = vld [vmem:[%s11765_s13 + $0x50] sm:$0xff] }
 0x7e7   : > { %v5518_v52 = vld [vmem:[%s11765_s13 + $0xfa8] sm:$0xff]  ;;  %v4939_v35 = vld [vmem:[#allocation13] sm:$0xf] }
 0x7e8   : > { %9653 = vmatpush1.bf16.msra.mxu0 %v9652_v39  ;;  %v5484_v39 = vld [vmem:[%s11765_s13 + $0xe98] sm:$0xff]  ;;  %v5003_v54 = vld [vmem:[%s11765_s13 + $0xd0] sm:$0xff] }
 0x7e9   : > { %9781 = vmatpush1.bf16.msra.mxu1 %v9780_v45  ;;  %9655 = vmatprep.subr.bf16.mxu0 %v9654_v58  ;;  %v5488_v45 = vld [vmem:[%s11765_s13 + $0xeb8] sm:$0xff]  ;;  %v9672_v58 = vpack.c.bf16 %v5477_v30, %v5473_v29  ;;  %v9816_v29 = vpack.c.bf16 %v5511_v59, %v5507_v43  ;;  %v9690_v30 = vpack.c.bf16 %v5518_v52, %v5514_v17  ;;  %v5007_v56 = vld [vmem:[%s11765_s13 + $0xf0] sm:$0xff] }
 0x7ea   : > { %9783 = vmatprep.subr.bf16.mxu1 %v9782_v48  ;;  %v5485_v48 = vld [vmem:[%s11765_s13 + $0xea0] sm:$0xff]  ;;  %v9802_v25 = vpack.c.bf16 %v5488_v45, %v5484_v39  ;;  %v5522_v39 = vld [vmem:[%s11765_s13 + $0xfc8] sm:$0xff]  ;;  %v4996_v43 = vld [vmem:[%s11765_s13 + $0x98] sm:$0xff] }
 0x7eb   : > { %v5526_v45 = vld [vmem:[%s11765_s13 + $0xfe8] sm:$0xff] }
 0x7ec   : > { %9657 = vmatpush1.bf16.msra.mxu0 %v9656_v57  ;;  %v5492_v57 = vld [vmem:[%s11765_s13 + $0xed8] sm:$0xff] }
 0x7ed   : > { %9785 = vmatpush1.bf16.msra.mxu1 %v9784_v23  ;;  %9659 = vmatprep.subr.bf16.mxu0 %v9658_v60  ;;  %v5496_v23 = vld [vmem:[%s11765_s13 + $0xef8] sm:$0xff]  ;;  %v9676_v60 = vpack.c.bf16 %v5485_v48, %v5481_v47  ;;  %v9820_v47 = vpack.c.bf16 %v5519_v38, %v5515_v34  ;;  %v9694_v48 = vpack.c.bf16 %v5526_v45, %v5522_v39  ;;  %v5006_v34 = vld [vmem:[%s11765_s13 + $0xe8] sm:$0xff] }
 0x7ee   : > { %9787 = vmatprep.subr.bf16.mxu1 %v9786_v1  ;;  %v5493_v1 = vld [vmem:[%s11765_s13 + $0xee0] sm:$0xff]  ;;  %v9806_v3 = vpack.c.bf16 %v5496_v23, %v5492_v57  ;;  %v4978_v57 = vld [vmem:[%s11765_s13 + $0x8] sm:$0xff]  ;;  %v5004_v39 = vld [vmem:[%s11765_s13 + $0xd8] sm:$0xff] }
 0x7ef   : > { %v4982_v23 = vld [vmem:[%s11765_s13 + $0x28] sm:$0xff]  ;;  %v5008_v45 = vld [vmem:[%s11765_s13 + $0xf8] sm:$0xff] }
 0x7f0   : > { %9661 = vmatpush1.bf16.msra.mxu0 %v9660_v16  ;;  %v5500_v16 = vld [vmem:[%s11765_s13 + $0xf18] sm:$0xff] }
 0x7f1   : > { %9789 = vmatpush1.bf16.msra.mxu1 %v9788_v8  ;;  %9663 = vmatprep.subr.bf16.mxu0 %v9662_v9  ;;  %v5504_v8 = vld [vmem:[%s11765_s13 + $0xf38] sm:$0xff]  ;;  %v9680_v9 = vpack.c.bf16 %v5493_v1, %v5489_v0  ;;  %v4977_v0 = vld [vmem:[%s11765_s13] sm:$0xff] }
 0x7f2   : > { %9791 = vmatprep.subr.bf16.mxu1 %v9790_v12  ;;  %v5501_v12 = vld [vmem:[%s11765_s13 + $0xf20] sm:$0xff]  ;;  %v9810_v13 = vpack.c.bf16 %v5504_v8, %v5500_v16  ;;  %v4990_v8 = vld [vmem:[%s11765_s13 + $0x68] sm:$0xff] }
 0x7f3   : > { %v4981_v1 = vld [vmem:[%s11765_s13 + $0x20] sm:$0xff]  ;;  %v9830_v44 = vpack.c.bf16 %v4990_v8, %v4986_v7  ;;  %v5011_v7 = vld [vmem:[%s11765_s13 + $0x110] sm:$0xff] }
 0x7f4   : > { %9665 = vmatpush1.bf16.msra.mxu0 %v9664_v15  ;;  %v5508_v15 = vld [vmem:[%s11765_s13 + $0xf58] sm:$0xff]  ;;  %v5015_v8 = vld [vmem:[%s11765_s13 + $0x130] sm:$0xff] }
 0x7f5   : > { %9793 = vmatpush1.bf16.msra.mxu1 %v9792_v40  ;;  %9667 = vmatprep.subr.bf16.mxu0 %v9666_v18  ;;  %v5512_v40 = vld [vmem:[%s11765_s13 + $0xf78] sm:$0xff]  ;;  %v9684_v18 = vpack.c.bf16 %v5501_v12, %v5497_v10  ;;  %v4985_v10 = vld [vmem:[%s11765_s13 + $0x40] sm:$0xff]  ;;  %v9956_v12 = vpack.c.bf16 %v4983_v5, %v4979_v4 }
 0x7f6   : > { %9795 = vmatprep.subr.bf16.mxu1 %v9794_v42  ;;  %v5509_v42 = vld [vmem:[%s11765_s13 + $0xf60] sm:$0xff]  ;;  %v9814_v22 = vpack.c.bf16 %v5512_v40, %v5508_v15  ;;  %v4991_v15 = vld [vmem:[%s11765_s13 + $0x70] sm:$0xff]  ;;  %v4994_v40 = vld [vmem:[%s11765_s13 + $0x88] sm:$0xff]  ;;  %v9832_v59 = vpack.c.bf16 %v4989_v20, %v4985_v10  ;;  %v9972_v20 = vpack.c.bf16 %v5015_v8, %v5011_v7 }
 0x7f7   : > { %v5009_v4 = vld [vmem:[%s11765_s13 + $0x100] sm:$0xff]  ;;  %v5020_v10 = vld [vmem:[%s11765_s13 + $0x158] sm:$0xff] }
 0x7f8   : > { %9669 = vmatpush1.bf16.msra.mxu0 %v9668_v24  ;;  %v5516_v24 = vld [vmem:[%s11765_s13 + $0xf98] sm:$0xff]  ;;  %v5013_v5 = vld [vmem:[%s11765_s13 + $0x120] sm:$0xff] }
 0x7f9   : > { %9797 = vmatpush1.bf16.msra.mxu1 %v9796_v26  ;;  %9671 = vmatprep.subr.bf16.mxu0 %v9670_v27  ;;  %v5520_v26 = vld [vmem:[%s11765_s13 + $0xfb8] sm:$0xff]  ;;  %v9688_v27 = vpack.c.bf16 %v5509_v42, %v5505_v21  ;;  %v4952_v21 = vrot.slane %v4939_v35, %v13892_v62  ;;  %v4956_v42 = vrot.slane %v4939_v35, %v13894_v19  ;;  %v5049_v8 = vld [vmem:[%s11765_s13 + $0x240] sm:$0xff] }
 0x7fa   : > { %9799 = vmatprep.subr.bf16.mxu1 %v9798_v51  ;;  %v5517_v51 = vld [vmem:[%s11765_s13 + $0xfa0] sm:$0xff]  ;;  %v9818_v37 = vpack.c.bf16 %v5520_v26, %v5516_v24  ;;  %v9960_v24 = vpack.c.bf16 %v4991_v15, %v4987_v14 }
 0x7fb   : > { %v4958_v52 = vcombine.low %v4952_v21, %v4956_v42  ;;  %v5021_v15 = vld [vmem:[%s11765_s13 + $0x160] sm:$0xff]  ;;  %v5030_v21 = vld [vmem:[%s11765_s13 + $0x1a8] sm:$0xff]  ;;  %v5028_v42 = vld [vmem:[%s11765_s13 + $0x198] sm:$0xff] }
 0x7fc   : > { %9673 = vmatpush1.bf16.msra.mxu0 %v9672_v58  ;;  %v5524_v58 = vld [vmem:[%s11765_s13 + $0xfd8] sm:$0xff] }
 0x7fd   : > { %9801 = vmatpush1.bf16.msra.mxu1 %v9800_v6  ;;  %9675 = vmatprep.subr.bf16.mxu0 %v9674_v46  ;;  %v5528_v6 = vld [vmem:[%s11765_s13 + $0xff8] sm:$0xff]  ;;  %v9692_v46 = vpack.c.bf16 %v5517_v51, %v5513_v31  ;;  %v4999_v51 = vld [vmem:[%s11765_s13 + $0xb0] sm:$0xff]  ;;  %v4972_v38 = vrot.slane %v4958_v52, %v13902_v28  ;;  %v5025_v52 = vld [vmem:[%s11765_s13 + $0x180] sm:$0xff] }
 0x7fe   : > { %9803 = vmatprep.subr.bf16.mxu1 %v9802_v25  ;;  %v5525_v25 = vld [vmem:[%s11765_s13 + $0xfe0] sm:$0xff]  ;;  %v9822_v55 = vpack.c.bf16 %v5528_v6, %v5524_v58 }
 0x7ff   : > { %v4938_v58 = vld [vmem:[#allocation4] sm:$0xff] }
 0x800   : > { %9677 = vmatpush1.bf16.msra.mxu0 %v9676_v60  ;;  %v4980_v60 = vld [vmem:[%s11765_s13 + $0x18] sm:$0xff] }
 0x801   : > { %9805 = vmatpush1.bf16.msra.mxu1 %v9804_v61  ;;  %9679 = vmatprep.subr.bf16.mxu0 %v9678_v63  ;;  %v4984_v61 = vld [vmem:[%s11765_s13 + $0x38] sm:$0xff]  ;;  %v9696_v63 = vpack.c.bf16 %v5525_v25, %v5521_v41  ;;  %v5001_v41 = vld [vmem:[%s11765_s13 + $0xc0] sm:$0xff] }
 0x802   : > { %9807 = vmatprep.subr.bf16.mxu1 %v9806_v3  ;;  %v9826_v3 = vpack.c.bf16 %v4982_v23, %v4978_v57  ;;  %v9954_v16 = vpack.c.bf16 %v4984_v61, %v4980_v60  ;;  %v5005_v25 = vld [vmem:[%s11765_s13 + $0xe0] sm:$0xff]  ;;  %v5010_v57 = vld [vmem:[%s11765_s13 + $0x108] sm:$0xff]  ;;  %v5012_v61 = vld [vmem:[%s11765_s13 + $0x118] sm:$0xff] }
 0x803   : > { %v5014_v23 = vld [vmem:[%s11765_s13 + $0x128] sm:$0xff] }
 0x804   : > { %9681 = vmatpush1.bf16.msra.mxu0 %v9680_v9  ;;  %v4988_v9 = vld [vmem:[%s11765_s13 + $0x58] sm:$0xff] }
 0x805   : > { %9809 = vmatpush1.bf16.msra.mxu1 %v9808_v36  ;;  %9683 = vmatprep.subr.bf16.mxu0 %v9682_v53  ;;  %v4992_v36 = vld [vmem:[%s11765_s13 + $0x78] sm:$0xff]  ;;  %v9828_v53 = vpack.c.bf16 %v4981_v1, %v4977_v0  ;;  %v9840_v0 = vpack.c.bf16 %v5005_v25, %v5001_v41 }
 0x806   : > { %9811 = vmatprep.subr.bf16.mxu1 %v9810_v13  ;;  %v9958_v13 = vpack.c.bf16 %v4992_v36, %v4988_v9  ;;  %v5018_v9 = vld [vmem:[%s11765_s13 + $0x148] sm:$0xff]  ;;  %v5044_v41 = vld [vmem:[%s11765_s13 + $0x218] sm:$0xff] }
 0x807   : > { %v5022_v36 = vld [vmem:[%s11765_s13 + $0x168] sm:$0xff]  ;;  %v5048_v25 = vld [vmem:[%s11765_s13 + $0x238] sm:$0xff] }
 0x808   : > { %9685 = vmatpush1.bf16.msra.mxu0 %v9684_v18  ;;  %v4998_v18 = vld [vmem:[%s11765_s13 + $0xa8] sm:$0xff]  ;;  %v9846_v14 = vpack.c.bf16 %v5022_v36, %v5018_v9  ;;  %v5053_v9 = vld [vmem:[%s11765_s13 + $0x260] sm:$0xff]  ;;  %v5051_v36 = vld [vmem:[%s11765_s13 + $0x250] sm:$0xff] }
 0x809   : > { %9813 = vmatpush1.bf16.msra.mxu1 %v9812_v50  ;;  %9687 = vmatprep.subr.bf16.mxu0 %v9686_v11  ;;  %v4944_v50 = vrot.slane %v4939_v35, %v13886_v33  ;;  %v4948_v11 = vrot.slane %v4939_v35, %v13890_v32  ;;  %v9834_v26 = vpack.c.bf16 %v4998_v18, %v4994_v40  ;;  %v5017_v35 = vld [vmem:[%s11765_s13 + $0x140] sm:$0xff]  ;;  %v5019_v40 = vld [vmem:[%s11765_s13 + $0x150] sm:$0xff] }
 0x80a   : > { %9815 = vmatprep.subr.bf16.mxu1 %v9814_v22  ;;  %v5000_v22 = vld [vmem:[%s11765_s13 + $0xb8] sm:$0xff] }
 0x80b   : > { %v4957_v17 = vcombine.low %v4944_v50, %v4948_v11  ;;  %v9962_v31 = vpack.c.bf16 %v5000_v22, %v4996_v43  ;;  %v5023_v50 = vld [vmem:[%s11765_s13 + $0x170] sm:$0xff]  ;;  %v5026_v11 = vld [vmem:[%s11765_s13 + $0x188] sm:$0xff]  ;;  %v5032_v43 = vld [vmem:[%s11765_s13 + $0x1b8] sm:$0xff]  ;;  %v9848_v22 = vpack.c.bf16 %v5021_v15, %v5017_v35  ;;  %v9864_v35 = vpack.c.bf16 %v5053_v9, %v5049_v8 }
 0x80c   : > { %9689 = vmatpush1.bf16.msra.mxu0 %v9688_v27  ;;  %v4993_v27 = vld [vmem:[%s11765_s13 + $0x80] sm:$0xff] }
 0x80d   : > { %9817 = vmatpush1.bf16.msra.mxu1 %v9816_v29  ;;  %9691 = vmatprep.subr.bf16.mxu0 %v9690_v30  ;;  %v4997_v29 = vld [vmem:[%s11765_s13 + $0xa0] sm:$0xff]  ;;  %v4995_v30 = vld [vmem:[%s11765_s13 + $0x90] sm:$0xff] }
 0x80e   : > { %9819 = vmatprep.subr.bf16.mxu1 %v9818_v37  ;;  %v4965_v37 = vrot.slane %v4957_v17, %v13902_v28  ;;  %v9836_v6 = vpack.c.bf16 %v4997_v29, %v4993_v27  ;;  %v9850_v17 = vpack.c.bf16 %v5030_v21, %v5026_v11  ;;  %v9978_v27 = vpack.c.bf16 %v5032_v43, %v5028_v42  ;;  %v5031_v29 = vld [vmem:[%s11765_s13 + $0x1b0] sm:$0xff]  ;;  %v5066_v43 = vld [vmem:[%s11765_s13 + $0x2c8] sm:$0xff] }
 0x80f   : > { %v5059_v11 = vld [vmem:[%s11765_s13 + $0x290] sm:$0xff] }
 0x810   : > { %9693 = vmatpush1.bf16.msra.mxu0 %v9692_v46  ;;  %v4973_v46 = vcombine.low %v4965_v37, %v4972_v38  ;;  %v5063_v42 = vld [vmem:[%s11765_s13 + $0x2b0] sm:$0xff] }
 0x811   : > { %9821 = vmatpush1.bf16.msra.mxu1 %v9820_v47  ;;  %9695 = vmatprep.subr.bf16.mxu0 %v9694_v48  ;;  %v9964_v47 = vpack.c.bf16 %v4999_v51, %v4995_v30  ;;  %v5034_v30 = vld [vmem:[%s11765_s13 + $0x1c8] sm:$0xff]  ;;  %v5036_v51 = vld [vmem:[%s11765_s13 + $0x1d8] sm:$0xff] }
 0x812   : > { %9823 = vmatprep.subr.bf16.mxu1 %v9822_v55  ;;  %v9966_v55 = vpack.c.bf16 %v5008_v45, %v5004_v39  ;;  %v4975_v60 = vadd.f32 %v4973_v46, %v4938_v58  ;;  %v5033_v39 = vld [vmem:[%s11765_s13 + $0x1c0] sm:$0xff]  ;;  %v5035_v58 = vld [vmem:[%s11765_s13 + $0x1d0] sm:$0xff] }
 0x813   : > { %v5037_v45 = vld [vmem:[%s11765_s13 + $0x1e0] sm:$0xff]  ;;  %v5039_v46 = vld [vmem:[%s11765_s13 + $0x1f0] sm:$0xff] }
 0x814   : > { %9697 = vmatpush1.bf16.msra.mxu0 %v9696_v63  ;;  %v5016_v63 = vld [vmem:[%s11765_s13 + $0x138] sm:$0xff]  ;;  %v14116_v1 = vmax.f32 %v4975_v60, 0.0  ;;  %v5043_v60 = vld [vmem:[%s11765_s13 + $0x210] sm:$0xff] }
 0x815   : > { %9825 = vmatpush1.bf16.msra.mxu1 %v9824_v2  ;;  %9827 = vmatprep.subr.bf16.mxu0 %v9826_v3  ;;  %v9968_v2 = vpack.c.bf16 %v5007_v56, %v5003_v54  ;;  %v9842_v3 = vpack.c.bf16 %v5014_v23, %v5010_v57  ;;  %v9856_v54 = vpack.c.bf16 %v5037_v45, %v5033_v39  ;;  %v5041_v57 = vld [vmem:[%s11765_s13 + $0x200] sm:$0xff] }
 0x816   : > { %9955 = vmatprep.subr.bf16.mxu1 %v9954_v16  ;;  %v9970_v16 = vpack.c.bf16 %v5016_v63, %v5012_v61  ;;  %v5045_v23 = vld [vmem:[%s11765_s13 + $0x220] sm:$0xff]  ;;  %v9986_v61 = vpack.c.bf16 %v5048_v25, %v5044_v41  ;;  %v5047_v63 = vld [vmem:[%s11765_s13 + $0x230] sm:$0xff]  ;;  %v5082_v25 = vld [vmem:[%s11765_s13 + $0x348] sm:$0xff] }
 0x817   : > { %5687 = vmatmul.mubr.f32.vlgmr.msra.gmra.mrb[0].mxu0 %v13950_v49  ;;  %v9988_v7 = vpack.c.bf16 %v5047_v63, %v5043_v60  ;;  %v5079_v41 = vld [vmem:[%s11765_s13 + $0x330] sm:$0xff]  ;;  %v5085_v63 = vld [vmem:[%s11765_s13 + $0x360] sm:$0xff] }
 0x818   : > { %5829 = vmatmul.mubr.f32.vlgmr.msra.gmra.mrb[0].mxu1 %v13950_v49  ;;  %9829 = vmatpush1.bf16.msra.mxu0 %v9828_v53  ;;  %v5002_v49 = vld [vmem:[%s11765_s13 + $0xc8] sm:$0xff]  ;;  %v14126_v53 = vrot.slane %v14116_v1, %v13902_v28 }
 0x819   : > { %9957 = vmatpush1.bf16.msra.mxu1 %v9956_v12  ;;  %9831 = vmatprep.subr.bf16.mxu0 %v9830_v44  ;;  %v9838_v48 = vpack.c.bf16 %v5006_v34, %v5002_v49  ;;  %v5024_v12 = vld [vmem:[%s11765_s13 + $0x178] sm:$0xff]  ;;  %v9844_v44 = vpack.c.bf16 %v5013_v5, %v5009_v4  ;;  %v9860_v5 = vpack.c.bf16 %v5045_v23, %v5041_v57 }
 0x81a   : > { %9959 = vmatprep.subr.bf16.mxu1 %v9958_v13  ;;  %v5851_v13 = vcombine.high %v14126_v53, %v14126_v53  ;;  %v9974_v18 = vpack.c.bf16 %v5024_v12, %v5020_v10  ;;  %v5040_v49 = vld [vmem:[%s11765_s13 + $0x1f8] sm:$0xff]  ;;  %v5055_v12 = vld [vmem:[%s11765_s13 + $0x270] sm:$0xff] }
 0x81b   : > { %v5056_v4 = vld [vmem:[%s11765_s13 + $0x278] sm:$0xff]  ;;  %v9992_v15 = vpack.c.bf16 %v5055_v12, %v5051_v36  ;;  %v5093_v12 = vld [vmem:[%s11765_s13 + $0x3a0] sm:$0xff] }
 0x81c   : > { %9833 = vmatpush1.bf16.msra.mxu0 %v9832_v59  ;;  %5921 = vmatprep.mubr.f32.mxu0 %v5851_v13  ;;  %v9976_v59 = vpack.c.bf16 %v5023_v50, %v5019_v40  ;;  %v5061_v50 = vld [vmem:[%s11765_s13 + $0x2a0] sm:$0xff] }
 0x81d   : > { %9961 = vmatpush1.bf16.msra.mxu1 %v9960_v24  ;;  %9835 = vmatprep.subr.bf16.mxu0 %v9834_v26  ;;  %v5029_v24 = vld [vmem:[%s11765_s13 + $0x1a0] sm:$0xff]  ;;  %v5027_v26 = vld [vmem:[%s11765_s13 + $0x190] sm:$0xff] }
 0x81e   : > { %9963 = vmatprep.subr.bf16.mxu1 %v9962_v31  ;;  %6063 = vmatprep.mubr.f32.mxu1 %v5851_v13  ;;  %v5038_v31 = vld [vmem:[%s11765_s13 + $0x1e8] sm:$0xff]  ;;  %v9852_v34 = vpack.c.bf16 %v5029_v24, %v5025_v52  ;;  %v9980_v37 = vpack.c.bf16 %v5031_v29, %v5027_v26  ;;  %v9996_v24 = vpack.c.bf16 %v5063_v42, %v5059_v11  ;;  %v5069_v29 = vld [vmem:[%s11765_s13 + $0x2e0] sm:$0xff] }
 0x81f   : > { %v9854_v38 = vpack.c.bf16 %v5038_v31, %v5034_v30  ;;  %v5062_v13 = vld [vmem:[%s11765_s13 + $0x2a8] sm:$0xff]  ;;  %v5067_v30 = vld [vmem:[%s11765_s13 + $0x2d0] sm:$0xff]  ;;  %v5101_v42 = vld [vmem:[%s11765_s13 + $0x3e0] sm:$0xff] }
 0x820   : > { %9837 = vmatpush1.bf16.msra.mxu0 %v9836_v6  ;;  %v9982_v6 = vpack.c.bf16 %v5040_v49, %v5036_v51  ;;  %v5071_v51 = vld [vmem:[%s11765_s13 + $0x2f0] sm:$0xff]  ;;  %v5074_v49 = vld [vmem:[%s11765_s13 + $0x308] sm:$0xff] }
 0x821   : > { %9965 = vmatpush1.bf16.msra.mxu1 %v9964_v47  ;;  %9839 = vmatprep.subr.bf16.mxu0 %v9838_v48  ;;  %v5042_v47 = vld [vmem:[%s11765_s13 + $0x208] sm:$0xff]  ;;  %v10000_v45 = vpack.c.bf16 %v5071_v51, %v5067_v30  ;;  %v5105_v51 = vld [vmem:[%s11765_s13 + $0x400] sm:$0xff] }
 0x822   : > { %9967 = vmatprep.subr.bf16.mxu1 %v9966_v55  ;;  %v5046_v48 = vld [vmem:[%s11765_s13 + $0x228] sm:$0xff]  ;;  %v9984_v55 = vpack.c.bf16 %v5039_v46, %v5035_v58  ;;  %v5077_v46 = vld [vmem:[%s11765_s13 + $0x320] sm:$0xff] }
 0x823   : > { %v9858_v56 = vpack.c.bf16 %v5046_v48, %v5042_v47  ;;  %v5075_v47 = vld [vmem:[%s11765_s13 + $0x310] sm:$0xff] }
 0x824   : > { %9841 = vmatpush1.bf16.msra.mxu0 %v9840_v0  ;;  %v5050_v0 = vld [vmem:[%s11765_s13 + $0x248] sm:$0xff]  ;;  %v10004_v23 = vpack.c.bf16 %v5079_v41, %v5075_v47  ;;  %v5113_v41 = vld [vmem:[%s11765_s13 + $0x440] sm:$0xff] }
 0x825   : > { %9969 = vmatpush1.bf16.msra.mxu1 %v9968_v2  ;;  %9843 = vmatprep.subr.bf16.mxu0 %v9842_v3  ;;  %v5054_v2 = vld [vmem:[%s11765_s13 + $0x268] sm:$0xff]  ;;  %v5052_v3 = vld [vmem:[%s11765_s13 + $0x258] sm:$0xff] }
 0x826   : > { %9971 = vmatprep.subr.bf16.mxu1 %v9970_v16  ;;  %v9862_v16 = vpack.c.bf16 %v5054_v2, %v5050_v0  ;;  %v9990_v10 = vpack.c.bf16 %v5056_v4, %v5052_v3  ;;  %v5083_v0 = vld [vmem:[%s11765_s13 + $0x350] sm:$0xff]  ;;  %v5090_v4 = vld [vmem:[%s11765_s13 + $0x388] sm:$0xff] }
 0x827   : > { %v5087_v3 = vld [vmem:[%s11765_s13 + $0x370] sm:$0xff] }
 0x828   : > { %9845 = vmatpush1.bf16.msra.mxu0 %v9844_v44  ;;  %v5058_v44 = vld [vmem:[%s11765_s13 + $0x288] sm:$0xff]  ;;  %v10008_v9 = vpack.c.bf16 %v5087_v3, %v5083_v0 }
 0x829   : > { %9973 = vmatpush1.bf16.msra.mxu1 %v9972_v20  ;;  %9847 = vmatprep.subr.bf16.mxu0 %v9846_v14  ;;  %v5060_v20 = vld [vmem:[%s11765_s13 + $0x298] sm:$0xff]  ;;  %v9866_v40 = vpack.c.bf16 %v5062_v13, %v5058_v44  ;;  %v5091_v44 = vld [vmem:[%s11765_s13 + $0x390] sm:$0xff] }
 0x82a   : > { %9975 = vmatprep.subr.bf16.mxu1 %v9974_v18  ;;  %v5064_v14 = vld [vmem:[%s11765_s13 + $0x2b8] sm:$0xff]  ;;  %v5057_v18 = vld [vmem:[%s11765_s13 + $0x280] sm:$0xff] }
 0x82b   : > { %v9994_v21 = vpack.c.bf16 %v5064_v14, %v5060_v20  ;;  %v9868_v52 = vpack.c.bf16 %v5061_v50, %v5057_v18  ;;  %v5095_v20 = vld [vmem:[%s11765_s13 + $0x3b0] sm:$0xff]  ;;  %v5098_v14 = vld [vmem:[%s11765_s13 + $0x3c8] sm:$0xff] }
 0x82c   : > { %9849 = vmatpush1.bf16.msra.mxu0 %v9848_v22  ;;  %v5070_v22 = vld [vmem:[%s11765_s13 + $0x2e8] sm:$0xff]  ;;  %v10012_v50 = vpack.c.bf16 %v5095_v20, %v5091_v44  ;;  %v5129_v20 = vld [vmem:[%s11765_s13 + $0x4c0] sm:$0xff] }
 0x82d   : > { %9977 = vmatpush1.bf16.msra.mxu1 %v9976_v59  ;;  %9851 = vmatprep.subr.bf16.mxu0 %v9850_v17  ;;  %v5068_v59 = vld [vmem:[%s11765_s13 + $0x2d8] sm:$0xff]  ;;  %v9870_v26 = vpack.c.bf16 %v5070_v22, %v5066_v43  ;;  %v5099_v43 = vld [vmem:[%s11765_s13 + $0x3d0] sm:$0xff] }
 0x82e   : > { %9979 = vmatprep.subr.bf16.mxu1 %v9978_v27  ;;  %v5072_v17 = vld [vmem:[%s11765_s13 + $0x2f8] sm:$0xff]  ;;  %v5065_v27 = vld [vmem:[%s11765_s13 + $0x2c0] sm:$0xff] }
 0x82f   : > { %v9998_v31 = vpack.c.bf16 %v5072_v17, %v5068_v59  ;;  %v9872_v39 = vpack.c.bf16 %v5069_v29, %v5065_v27  ;;  %v5103_v59 = vld [vmem:[%s11765_s13 + $0x3f0] sm:$0xff]  ;;  %v5106_v17 = vld [vmem:[%s11765_s13 + $0x408] sm:$0xff]  ;;  %v5112_v27 = vld [vmem:[%s11765_s13 + $0x438] sm:$0xff] }
 0x830   : > { %9853 = vmatpush1.bf16.msra.mxu0 %v9852_v34  ;;  %v5078_v34 = vld [vmem:[%s11765_s13 + $0x328] sm:$0xff]  ;;  %v10016_v30 = vpack.c.bf16 %v5103_v59, %v5099_v43  ;;  %v5137_v59 = vld [vmem:[%s11765_s13 + $0x500] sm:$0xff] }
 0x831   : > { %9981 = vmatpush1.bf16.msra.mxu1 %v9980_v37  ;;  %9855 = vmatprep.subr.bf16.mxu0 %v9854_v38  ;;  %v5076_v37 = vld [vmem:[%s11765_s13 + $0x318] sm:$0xff]  ;;  %v9874_v58 = vpack.c.bf16 %v5078_v34, %v5074_v49  ;;  %v5109_v49 = vld [vmem:[%s11765_s13 + $0x420] sm:$0xff]  ;;  %v5107_v34 = vld [vmem:[%s11765_s13 + $0x410] sm:$0xff] }
 0x832   : > { %9983 = vmatprep.subr.bf16.mxu1 %v9982_v6  ;;  %v5080_v38 = vld [vmem:[%s11765_s13 + $0x338] sm:$0xff]  ;;  %v5073_v6 = vld [vmem:[%s11765_s13 + $0x300] sm:$0xff] }
 0x833   : > { %v10002_v48 = vpack.c.bf16 %v5080_v38, %v5076_v37  ;;  %v9876_v57 = vpack.c.bf16 %v5077_v46, %v5073_v6  ;;  %v5114_v38 = vld [vmem:[%s11765_s13 + $0x448] sm:$0xff]  ;;  %v5120_v6 = vld [vmem:[%s11765_s13 + $0x478] sm:$0xff]  ;;  %v9892_v46 = vpack.c.bf16 %v5109_v49, %v5105_v51 }
 0x834   : > { %9857 = vmatpush1.bf16.msra.mxu0 %v9856_v54  ;;  %v5086_v54 = vld [vmem:[%s11765_s13 + $0x368] sm:$0xff] }
 0x835   : > { %9985 = vmatpush1.bf16.msra.mxu1 %v9984_v55  ;;  %9859 = vmatprep.subr.bf16.mxu0 %v9858_v56  ;;  %v5084_v55 = vld [vmem:[%s11765_s13 + $0x358] sm:$0xff]  ;;  %v9878_v60 = vpack.c.bf16 %v5086_v54, %v5082_v25  ;;  %v5117_v25 = vld [vmem:[%s11765_s13 + $0x460] sm:$0xff]  ;;  %v5115_v54 = vld [vmem:[%s11765_s13 + $0x450] sm:$0xff] }
 0x836   : > { %9987 = vmatprep.subr.bf16.mxu1 %v9986_v61  ;;  %v5088_v56 = vld [vmem:[%s11765_s13 + $0x378] sm:$0xff]  ;;  %v5081_v61 = vld [vmem:[%s11765_s13 + $0x340] sm:$0xff]  ;;  %v9896_v0 = vpack.c.bf16 %v5117_v25, %v5113_v41 }
 0x837   : > { %v10006_v2 = vpack.c.bf16 %v5088_v56, %v5084_v55  ;;  %v9880_v8 = vpack.c.bf16 %v5085_v63, %v5081_v61  ;;  %v5119_v56 = vld [vmem:[%s11765_s13 + $0x470] sm:$0xff]  ;;  %v5124_v61 = vld [vmem:[%s11765_s13 + $0x498] sm:$0xff] }
 0x838   : > { %9861 = vmatpush1.bf16.msra.mxu0 %v9860_v5  ;;  %v5094_v5 = vld [vmem:[%s11765_s13 + $0x3a8] sm:$0xff]  ;;  %v5128_v63 = vld [vmem:[%s11765_s13 + $0x4b8] sm:$0xff] }
 0x839   : > { %9989 = vmatpush1.bf16.msra.mxu1 %v9988_v7  ;;  %9863 = vmatprep.subr.bf16.mxu0 %v9862_v16  ;;  %v5092_v7 = vld [vmem:[%s11765_s13 + $0x398] sm:$0xff]  ;;  %v9882_v36 = vpack.c.bf16 %v5094_v5, %v5090_v4  ;;  %v5121_v4 = vld [vmem:[%s11765_s13 + $0x480] sm:$0xff] }
 0x83a   : > { %9991 = vmatprep.subr.bf16.mxu1 %v9990_v10  ;;  %v5096_v16 = vld [vmem:[%s11765_s13 + $0x3b8] sm:$0xff]  ;;  %v5089_v10 = vld [vmem:[%s11765_s13 + $0x380] sm:$0xff] }
 0x83b   : > { %v10010_v13 = vpack.c.bf16 %v5096_v16, %v5092_v7  ;;  %v9884_v18 = vpack.c.bf16 %v5093_v12, %v5089_v10  ;;  %v5125_v5 = vld [vmem:[%s11765_s13 + $0x4a0] sm:$0xff]  ;;  %v5123_v7 = vld [vmem:[%s11765_s13 + $0x490] sm:$0xff]  ;;  %v10026_v16 = vpack.c.bf16 %v5128_v63, %v5124_v61  ;;  %v5136_v10 = vld [vmem:[%s11765_s13 + $0x4f8] sm:$0xff] }
 0x83c   : > { %9865 = vmatpush1.bf16.msra.mxu0 %v9864_v35  ;;  %v5102_v35 = vld [vmem:[%s11765_s13 + $0x3e8] sm:$0xff]  ;;  %v9900_v12 = vpack.c.bf16 %v5125_v5, %v5121_v4 }
 0x83d   : > { %9993 = vmatpush1.bf16.msra.mxu1 %v9992_v15  ;;  %9867 = vmatprep.subr.bf16.mxu0 %v9866_v40  ;;  %v5100_v15 = vld [vmem:[%s11765_s13 + $0x3d8] sm:$0xff]  ;;  %v9886_v11 = vpack.c.bf16 %v5102_v35, %v5098_v14  ;;  %v5133_v14 = vld [vmem:[%s11765_s13 + $0x4e0] sm:$0xff]  ;;  %v5131_v35 = vld [vmem:[%s11765_s13 + $0x4d0] sm:$0xff] }
 0x83e   : > { %9995 = vmatprep.subr.bf16.mxu1 %v9994_v21  ;;  %v5104_v40 = vld [vmem:[%s11765_s13 + $0x3f8] sm:$0xff]  ;;  %v5097_v21 = vld [vmem:[%s11765_s13 + $0x3c0] sm:$0xff]  ;;  %v5162_v61 = vld [vmem:[%s11765_s13 + $0x5c8] sm:$0xff] }
 0x83f   : > { %v10014_v22 = vpack.c.bf16 %v5104_v40, %v5100_v15  ;;  %v9888_v29 = vpack.c.bf16 %v5101_v42, %v5097_v21  ;;  %v5135_v40 = vld [vmem:[%s11765_s13 + $0x4f0] sm:$0xff]  ;;  %v5144_v21 = vld [vmem:[%s11765_s13 + $0x538] sm:$0xff]  ;;  %v9904_v42 = vpack.c.bf16 %v5133_v14, %v5129_v20  ;;  %v5166_v63 = vld [vmem:[%s11765_s13 + $0x5e8] sm:$0xff] }
 0x840   : > { %9869 = vmatpush1.bf16.msra.mxu0 %v9868_v52  ;;  %v5110_v52 = vld [vmem:[%s11765_s13 + $0x428] sm:$0xff]  ;;  %v10032_v43 = vpack.c.bf16 %v5135_v40, %v5131_v35  ;;  %v9918_v5 = vpack.c.bf16 %v5166_v63, %v5162_v61  ;;  %v5169_v35 = vld [vmem:[%s11765_s13 + $0x600] sm:$0xff]  ;;  %v5171_v40 = vld [vmem:[%s11765_s13 + $0x610] sm:$0xff] }
 0x841   : > { %9997 = vmatpush1.bf16.msra.mxu1 %v9996_v24  ;;  %9871 = vmatprep.subr.bf16.mxu0 %v9870_v26  ;;  %v5836_v24 = vcombine.high %v14116_v1, %v14116_v1  ;;  %v5108_v26 = vld [vmem:[%s11765_s13 + $0x418] sm:$0xff]  ;;  %v5111_v1 = vld [vmem:[%s11765_s13 + $0x430] sm:$0xff] }
 0x842   : > { %9999 = vmatprep.subr.bf16.mxu1 %v9998_v31  ;;  %v9890_v31 = vpack.c.bf16 %v5110_v52, %v5106_v17  ;;  %v10018_v37 = vpack.c.bf16 %v5112_v27, %v5108_v26  ;;  %v10020_v47 = vpack.c.bf16 %v5111_v1, %v5107_v34  ;;  %v5141_v17 = vld [vmem:[%s11765_s13 + $0x520] sm:$0xff]  ;;  %v5139_v52 = vld [vmem:[%s11765_s13 + $0x510] sm:$0xff]  ;;  %v5146_v27 = vld [vmem:[%s11765_s13 + $0x548] sm:$0xff] }
 0x843   : > { %v5143_v26 = vld [vmem:[%s11765_s13 + $0x530] sm:$0xff]  ;;  %v9908_v51 = vpack.c.bf16 %v5141_v17, %v5137_v59  ;;  %v5149_v1 = vld [vmem:[%s11765_s13 + $0x560] sm:$0xff] }
 0x844   : > { %9873 = vmatpush1.bf16.msra.mxu0 %v9872_v39  ;;  %v5118_v39 = vld [vmem:[%s11765_s13 + $0x468] sm:$0xff]  ;;  %v10036_v49 = vpack.c.bf16 %v5143_v26, %v5139_v52  ;;  %v5177_v59 = vld [vmem:[%s11765_s13 + $0x640] sm:$0xff]  ;;  %v5179_v26 = vld [vmem:[%s11765_s13 + $0x650] sm:$0xff] }
 0x845   : > { %10001 = vmatpush1.bf16.msra.mxu1 %v10000_v45  ;;  %9875 = vmatprep.subr.bf16.mxu0 %v9874_v58  ;;  %v14229_v45 = vrot.slane %v5836_v24, %v13902_v28  ;;  %v5116_v58 = vld [vmem:[%s11765_s13 + $0x458] sm:$0xff]  ;;  %v5181_v17 = vld [vmem:[%s11765_s13 + $0x660] sm:$0xff] }
 0x846   : > { %10003 = vmatprep.subr.bf16.mxu1 %v10002_v48  ;;  %v9894_v48 = vpack.c.bf16 %v5118_v39, %v5114_v38  ;;  %v10022_v55 = vpack.c.bf16 %v5120_v6, %v5116_v58  ;;  %v5147_v38 = vld [vmem:[%s11765_s13 + $0x550] sm:$0xff]  ;;  %v5154_v6 = vld [vmem:[%s11765_s13 + $0x588] sm:$0xff] }
 0x847   : > { %v5151_v58 = vld [vmem:[%s11765_s13 + $0x570] sm:$0xff] }
 0x848   : > { %9877 = vmatpush1.bf16.msra.mxu0 %v9876_v57  ;;  %v5122_v57 = vld [vmem:[%s11765_s13 + $0x488] sm:$0xff]  ;;  %v10040_v25 = vpack.c.bf16 %v5151_v58, %v5147_v38  ;;  %v5185_v58 = vld [vmem:[%s11765_s13 + $0x680] sm:$0xff] }
 0x849   : > { %10005 = vmatpush1.bf16.msra.mxu1 %v10004_v23  ;;  %9879 = vmatprep.subr.bf16.mxu0 %v9878_v60  ;;  %v5126_v23 = vld [vmem:[%s11765_s13 + $0x4a8] sm:$0xff]  ;;  %v5852_v60 = vcombine.high %v14229_v45, %v14229_v45 }
 0x84a   : > { %10007 = vmatprep.subr.bf16.mxu1 %v10006_v2  ;;  %v10024_v2 = vpack.c.bf16 %v5119_v56, %v5115_v54  ;;  %v9898_v3 = vpack.c.bf16 %v5126_v23, %v5122_v57  ;;  %v5157_v56 = vld [vmem:[%s11765_s13 + $0x5a0] sm:$0xff]  ;;  %v5155_v57 = vld [vmem:[%s11765_s13 + $0x590] sm:$0xff] }
 0x84c   : > { %9881 = vmatpush1.bf16.msra.mxu0 %v9880_v8  ;;  %v5127_v8 = vld [vmem:[%s11765_s13 + $0x4b0] sm:$0xff] }
 0x84d   : > { %10009 = vmatpush1.bf16.msra.mxu1 %v10008_v9  ;;  %9883 = vmatprep.subr.bf16.mxu0 %v9882_v36  ;;  %v5130_v9 = vld [vmem:[%s11765_s13 + $0x4c8] sm:$0xff]  ;;  %v10028_v44 = vpack.c.bf16 %v5127_v8, %v5123_v7  ;;  %v5161_v7 = vld [vmem:[%s11765_s13 + $0x5c0] sm:$0xff]  ;;  %v5163_v8 = vld [vmem:[%s11765_s13 + $0x5d0] sm:$0xff] }
 0x84e   : > { %10011 = vmatprep.subr.bf16.mxu1 %v10010_v13  ;;  %v5134_v36 = vld [vmem:[%s11765_s13 + $0x4e8] sm:$0xff] }
 0x84f   : > { %v9902_v13 = vpack.c.bf16 %v5134_v36, %v5130_v9  ;;  %v5167_v36 = vld [vmem:[%s11765_s13 + $0x5f0] sm:$0xff] }
 0x850   : > { %9885 = vmatpush1.bf16.msra.mxu0 %v9884_v18  ;;  %v5138_v18 = vld [vmem:[%s11765_s13 + $0x508] sm:$0xff]  ;;  %v10048_v20 = vpack.c.bf16 %v5167_v36, %v5163_v8  ;;  %v5204_v36 = vld [vmem:[%s11765_s13 + $0x718] sm:$0xff] }
 0x851   : > { %10013 = vmatpush1.bf16.msra.mxu1 %v10012_v50  ;;  %9887 = vmatprep.subr.bf16.mxu0 %v9886_v11  ;;  %v5142_v50 = vld [vmem:[%s11765_s13 + $0x528] sm:$0xff]  ;;  %v5140_v11 = vld [vmem:[%s11765_s13 + $0x518] sm:$0xff] }
 0x852   : > { %10015 = vmatprep.subr.bf16.mxu1 %v10014_v22  ;;  %v9906_v22 = vpack.c.bf16 %v5142_v50, %v5138_v18  ;;  %v10034_v24 = vpack.c.bf16 %v5144_v21, %v5140_v11  ;;  %v5175_v50 = vld [vmem:[%s11765_s13 + $0x630] sm:$0xff]  ;;  %v5178_v11 = vld [vmem:[%s11765_s13 + $0x648] sm:$0xff] }
 0x853   : > { %v5182_v21 = vld [vmem:[%s11765_s13 + $0x668] sm:$0xff]  ;;  %v10052_v52 = vpack.c.bf16 %v5175_v50, %v5171_v40 }
 0x854   : > { %9889 = vmatpush1.bf16.msra.mxu0 %v9888_v29  ;;  %v5150_v29 = vld [vmem:[%s11765_s13 + $0x568] sm:$0xff] }
 0x855   : > { %10017 = vmatpush1.bf16.msra.mxu1 %v10016_v30  ;;  %9891 = vmatprep.subr.bf16.mxu0 %v9890_v31  ;;  %v5148_v30 = vld [vmem:[%s11765_s13 + $0x558] sm:$0xff]  ;;  %v9910_v34 = vpack.c.bf16 %v5150_v29, %v5146_v27  ;;  %v5183_v27 = vld [vmem:[%s11765_s13 + $0x670] sm:$0xff]  ;;  %v5186_v29 = vld [vmem:[%s11765_s13 + $0x688] sm:$0xff] }
 0x856   : > { %10019 = vmatprep.subr.bf16.mxu1 %v10018_v37  ;;  %v5152_v31 = vld [vmem:[%s11765_s13 + $0x578] sm:$0xff]  ;;  %v5145_v37 = vld [vmem:[%s11765_s13 + $0x540] sm:$0xff]  ;;  %v5210_v40 = vld [vmem:[%s11765_s13 + $0x748] sm:$0xff] }
 0x857   : > { %5922 = vmatmul.mubr.f32.vlgmr.msra.gmra.mrb[0].mxu0 %v14126_v53  ;;  %v10038_v39 = vpack.c.bf16 %v5152_v31, %v5148_v30  ;;  %v9912_v41 = vpack.c.bf16 %v5149_v1, %v5145_v37  ;;  %v5190_v31 = vld [vmem:[%s11765_s13 + $0x6a8] sm:$0xff]  ;;  %v9928_v37 = vpack.c.bf16 %v5181_v17, %v5177_v59  ;;  %v10056_v1 = vpack.c.bf16 %v5183_v27, %v5179_v26  ;;  %v5209_v17 = vld [vmem:[%s11765_s13 + $0x740] sm:$0xff]  ;;  %v5215_v27 = vld [vmem:[%s11765_s13 + $0x770] sm:$0xff] }
 0x858   : > { %9893 = vmatpush1.bf16.msra.mxu0 %v9892_v46  ;;  %6064 = vmatmul.mubr.f32.vlgmr.msra.gmra.mrb[0].mxu1 %v14126_v53  ;;  %v5132_v53 = vld [vmem:[%s11765_s13 + $0x4d8] sm:$0xff]  ;;  %v5158_v46 = vld [vmem:[%s11765_s13 + $0x5a8] sm:$0xff]  ;;  %v9930_v38 = vpack.c.bf16 %v5190_v31, %v5186_v29 }
 0x859   : > { %10021 = vmatpush1.bf16.msra.mxu1 %v10020_v47  ;;  %9895 = vmatprep.subr.bf16.mxu0 %v9894_v48  ;;  %v10030_v15 = vpack.c.bf16 %v5136_v10, %v5132_v53  ;;  %v5156_v47 = vld [vmem:[%s11765_s13 + $0x598] sm:$0xff]  ;;  %v9914_v54 = vpack.c.bf16 %v5158_v46, %v5154_v6  ;;  %v5170_v53 = vld [vmem:[%s11765_s13 + $0x608] sm:$0xff]  ;;  %v5189_v6 = vld [vmem:[%s11765_s13 + $0x6a0] sm:$0xff] }
 0x85a   : > { %10023 = vmatprep.subr.bf16.mxu1 %v10022_v55  ;;  %5992 = vmatprep.mubr.f32.mxu0 %v5852_v60  ;;  %v5160_v48 = vld [vmem:[%s11765_s13 + $0x5b8] sm:$0xff]  ;;  %v5153_v55 = vld [vmem:[%s11765_s13 + $0x580] sm:$0xff]  ;;  %v5174_v10 = vld [vmem:[%s11765_s13 + $0x628] sm:$0xff] }
 0x85b   : > { %6134 = vmatprep.mubr.f32.mxu1 %v5852_v60  ;;  %v10042_v23 = vpack.c.bf16 %v5160_v48, %v5156_v47  ;;  %v5159_v60 = vld [vmem:[%s11765_s13 + $0x5b0] sm:$0xff]  ;;  %v9922_v14 = vpack.c.bf16 %v5174_v10, %v5170_v53  ;;  %v5194_v48 = vld [vmem:[%s11765_s13 + $0x6c8] sm:$0xff]  ;;  %v5208_v53 = vld [vmem:[%s11765_s13 + $0x738] sm:$0xff] }
 0x85c   : > { %9897 = vmatpush1.bf16.msra.mxu0 %v9896_v0  ;;  %v5164_v0 = vld [vmem:[%s11765_s13 + $0x5d8] sm:$0xff]  ;;  %v10044_v4 = vpack.c.bf16 %v5159_v60, %v5155_v57  ;;  %v5187_v46 = vld [vmem:[%s11765_s13 + $0x690] sm:$0xff]  ;;  %v9932_v60 = vpack.c.bf16 %v5189_v6, %v5185_v58  ;;  %v5218_v29 = vld [vmem:[%s11765_s13 + $0x788] sm:$0xff] }
 0x85d   : > { %10025 = vmatpush1.bf16.msra.mxu1 %v10024_v2  ;;  %9899 = vmatprep.subr.bf16.mxu0 %v9898_v3  ;;  %v5168_v2 = vld [vmem:[%s11765_s13 + $0x5f8] sm:$0xff]  ;;  %v9916_v3 = vpack.c.bf16 %v5157_v56, %v5153_v55  ;;  %v5191_v47 = vld [vmem:[%s11765_s13 + $0x6b0] sm:$0xff]  ;;  %v5221_v58 = vld [vmem:[%s11765_s13 + $0x7a0] sm:$0xff] }
 0x85e   : > { %10027 = vmatprep.subr.bf16.mxu1 %v10026_v16  ;;  %v5165_v16 = vld [vmem:[%s11765_s13 + $0x5e0] sm:$0xff]  ;;  %v10046_v9 = vpack.c.bf16 %v5168_v2, %v5164_v0  ;;  %v5196_v57 = vld [vmem:[%s11765_s13 + $0x6d8] sm:$0xff]  ;;  %v10060_v61 = vpack.c.bf16 %v5191_v47, %v5187_v46  ;;  %v5219_v6 = vld [vmem:[%s11765_s13 + $0x790] sm:$0xff] }
 0x85f   : > { %v5193_v0 = vld [vmem:[%s11765_s13 + $0x6c0] sm:$0xff]  ;;  %v5223_v47 = vld [vmem:[%s11765_s13 + $0x7b0] sm:$0xff] }
 0x860   : > { %9901 = vmatpush1.bf16.msra.mxu0 %v9900_v12  ;;  %v5172_v12 = vld [vmem:[%s11765_s13 + $0x618] sm:$0xff]  ;;  %v5197_v2 = vld [vmem:[%s11765_s13 + $0x6e0] sm:$0xff] }
 0x861   : > { %10029 = vmatpush1.bf16.msra.mxu1 %v10028_v44  ;;  %9903 = vmatprep.subr.bf16.mxu0 %v9902_v13  ;;  %v5176_v44 = vld [vmem:[%s11765_s13 + $0x638] sm:$0xff]  ;;  %v9920_v13 = vpack.c.bf16 %v5165_v16, %v5161_v7  ;;  %v5202_v7 = vld [vmem:[%s11765_s13 + $0x708] sm:$0xff]  ;;  %v9936_v10 = vpack.c.bf16 %v5197_v2, %v5193_v0  ;;  %v5231_v2 = vld [vmem:[%s11765_s13 + $0x7f0] sm:$0xff] }
 0x862   : > { %10031 = vmatprep.subr.bf16.mxu1 %v10030_v15  ;;  %v5173_v15 = vld [vmem:[%s11765_s13 + $0x620] sm:$0xff]  ;;  %v10050_v18 = vpack.c.bf16 %v5176_v44, %v5172_v12  ;;  %v5206_v16 = vld [vmem:[%s11765_s13 + $0x728] sm:$0xff] }
 0x863   : > { %v9938_v44 = vpack.c.bf16 %v5206_v16, %v5202_v7  ;;  %v6184_v7 = vld [vmem:[%s11765_s13 + $0x1018] sm:$0xff] }
 0x864   : > { %9905 = vmatpush1.bf16.msra.mxu0 %v9904_v42  ;;  %v5180_v42 = vld [vmem:[%s11765_s13 + $0x658] sm:$0xff] }
 0x865   : > { %10033 = vmatpush1.bf16.msra.mxu1 %v10032_v43  ;;  %9907 = vmatprep.subr.bf16.mxu0 %v9906_v22  ;;  %v5184_v43 = vld [vmem:[%s11765_s13 + $0x678] sm:$0xff]  ;;  %v9924_v22 = vpack.c.bf16 %v5173_v15, %v5169_v35  ;;  %v10066_v35 = vpack.c.bf16 %v5208_v53, %v5204_v36  ;;  %v5207_v15 = vld [vmem:[%s11765_s13 + $0x730] sm:$0xff]  ;;  %v6181_v53 = vld [vmem:[%s11765_s13 + $0x1000] sm:$0xff] }
 0x866   : > { %10035 = vmatprep.subr.bf16.mxu1 %v10034_v24  ;;  %v9926_v24 = vpack.c.bf16 %v5182_v21, %v5178_v11  ;;  %v10054_v30 = vpack.c.bf16 %v5184_v43, %v5180_v42  ;;  %v5212_v21 = vld [vmem:[%s11765_s13 + $0x758] sm:$0xff] }
 0x867   : > { %v5216_v42 = vld [vmem:[%s11765_s13 + $0x778] sm:$0xff] }
 0x868   : > { %9909 = vmatpush1.bf16.msra.mxu0 %v9908_v51  ;;  %v5188_v51 = vld [vmem:[%s11765_s13 + $0x698] sm:$0xff]  ;;  %v10070_v26 = vpack.c.bf16 %v5216_v42, %v5212_v21  ;;  %v6189_v21 = vld [vmem:[%s11765_s13 + $0x1040] sm:$0xff] }
 0x869   : > { %10037 = vmatpush1.bf16.msra.mxu1 %v10036_v49  ;;  %9911 = vmatprep.subr.bf16.mxu0 %v9910_v34  ;;  %v5192_v49 = vld [vmem:[%s11765_s13 + $0x6b8] sm:$0xff]  ;;  %v6193_v42 = vld [vmem:[%s11765_s13 + $0x1060] sm:$0xff] }
 0x86a   : > { %10039 = vmatprep.subr.bf16.mxu1 %v10038_v39  ;;  %v6143_v34 = vld [vmem:[#allocation13 + $0x8] sm:$0xf]  ;;  %v10058_v39 = vpack.c.bf16 %v5192_v49, %v5188_v51 }
 0x86b   : > { %v6156_v55 = vrot.slane %v6143_v34, %v13892_v62  ;;  %v6160_v56 = vrot.slane %v6143_v34, %v13894_v19  ;;  %v5220_v51 = vld [vmem:[%s11765_s13 + $0x798] sm:$0xff] }
 0x86c   : > { %9913 = vmatpush1.bf16.msra.mxu0 %v9912_v41  ;;  %v5198_v41 = vld [vmem:[%s11765_s13 + $0x6e8] sm:$0xff]  ;;  %v5224_v49 = vld [vmem:[%s11765_s13 + $0x7b8] sm:$0xff] }
 0x86d   : > { %10041 = vmatpush1.bf16.msra.mxu1 %v10040_v25  ;;  %9915 = vmatprep.subr.bf16.mxu0 %v9914_v54  ;;  %v6148_v25 = vrot.slane %v6143_v34, %v13886_v33  ;;  %v6152_v54 = vrot.slane %v6143_v34, %v13890_v32  ;;  %v9934_v63 = vpack.c.bf16 %v5198_v41, %v5194_v48  ;;  %v6142_v34 = vld [vmem:[#allocation4 + $0x10] sm:$0xff]  ;;  %v6188_v16 = vld [vmem:[%s11765_s13 + $0x1038] sm:$0xff] }
 0x86e   : > { %10043 = vmatprep.subr.bf16.mxu1 %v10042_v23  ;;  %v5200_v23 = vld [vmem:[%s11765_s13 + $0x6f8] sm:$0xff]  ;;  %v10074_v46 = vpack.c.bf16 %v5224_v49, %v5220_v51  ;;  %v5226_v48 = vld [vmem:[%s11765_s13 + $0x7c8] sm:$0xff]  ;;  %v6197_v51 = vld [vmem:[%s11765_s13 + $0x1080] sm:$0xff] }
 0x86f   : > { %v6161_v8 = vcombine.low %v6148_v25, %v6152_v54  ;;  %v5230_v41 = vld [vmem:[%s11765_s13 + $0x7e8] sm:$0xff]  ;;  %v5228_v54 = vld [vmem:[%s11765_s13 + $0x7d8] sm:$0xff]  ;;  %v6201_v49 = vld [vmem:[%s11765_s13 + $0x10a0] sm:$0xff] }
 0x870   : > { %9917 = vmatpush1.bf16.msra.mxu0 %v9916_v3  ;;  %v5195_v3 = vld [vmem:[%s11765_s13 + $0x6d0] sm:$0xff] }
 0x871   : > { %10045 = vmatpush1.bf16.msra.mxu1 %v10044_v4  ;;  %9919 = vmatprep.subr.bf16.mxu0 %v9918_v5  ;;  %v10062_v4 = vpack.c.bf16 %v5200_v23, %v5196_v57  ;;  %v5199_v5 = vld [vmem:[%s11765_s13 + $0x6f0] sm:$0xff]  ;;  %v6169_v50 = vrot.slane %v6161_v8, %v13902_v28  ;;  %v10076_v57 = vpack.c.bf16 %v5223_v47, %v5219_v6 }
 0x872   : > { %10047 = vmatprep.subr.bf16.mxu1 %v10046_v9  ;;  %v6162_v9 = vcombine.low %v6156_v55, %v6160_v56  ;;  %v10064_v12 = vpack.c.bf16 %v5199_v5, %v5195_v3  ;;  %v5232_v55 = vld [vmem:[%s11765_s13 + $0x7f8] sm:$0xff]  ;;  %v9950_v23 = vpack.c.bf16 %v5230_v41, %v5226_v48  ;;  %v6182_v3 = vld [vmem:[%s11765_s13 + $0x1008] sm:$0xff]  ;;  %v10092_v6 = vpack.c.bf16 %v6201_v49, %v6197_v51  ;;  %v6205_v48 = vld [vmem:[%s11765_s13 + $0x10c0] sm:$0xff] }
 0x873   : > { %v10078_v0 = vpack.c.bf16 %v5232_v55, %v5228_v54  ;;  %v6209_v41 = vld [vmem:[%s11765_s13 + $0x10e0] sm:$0xff]  ;;  %v6211_v55 = vld [vmem:[%s11765_s13 + $0x10f0] sm:$0xff] }
 0x874   : > { %9921 = vmatpush1.bf16.msra.mxu0 %v9920_v13  ;;  %v5201_v13 = vld [vmem:[%s11765_s13 + $0x700] sm:$0xff]  ;;  %v6176_v11 = vrot.slane %v6162_v9, %v13902_v28 }
 0x875   : > { %10049 = vmatpush1.bf16.msra.mxu1 %v10048_v20  ;;  %9923 = vmatprep.subr.bf16.mxu0 %v9922_v14  ;;  %v5205_v20 = vld [vmem:[%s11765_s13 + $0x720] sm:$0xff]  ;;  %v5203_v14 = vld [vmem:[%s11765_s13 + $0x710] sm:$0xff] }
 0x876   : > { %10051 = vmatprep.subr.bf16.mxu1 %v10050_v18  ;;  %v5214_v18 = vld [vmem:[%s11765_s13 + $0x768] sm:$0xff]  ;;  %v9940_v43 = vpack.c.bf16 %v5205_v20, %v5201_v13  ;;  %v6177_v31 = vcombine.low %v6169_v50, %v6176_v11  ;;  %v6187_v13 = vld [vmem:[%s11765_s13 + $0x1030] sm:$0xff] }
 0x877   : > { %v9942_v59 = vpack.c.bf16 %v5214_v18, %v5210_v40  ;;  %v6190_v20 = vld [vmem:[%s11765_s13 + $0x1048] sm:$0xff]  ;;  %v6196_v40 = vld [vmem:[%s11765_s13 + $0x1078] sm:$0xff] }
 0x878   : > { %9925 = vmatpush1.bf16.msra.mxu0 %v9924_v22  ;;  %v10068_v22 = vpack.c.bf16 %v5207_v15, %v5203_v14  ;;  %v6179_v25 = vadd.f32 %v6177_v31, %v6142_v34  ;;  %v6194_v14 = vld [vmem:[%s11765_s13 + $0x1068] sm:$0xff]  ;;  %v6192_v15 = vld [vmem:[%s11765_s13 + $0x1058] sm:$0xff]  ;;  %v6199_v34 = vld [vmem:[%s11765_s13 + $0x1090] sm:$0xff] }
 0x879   : > { %10053 = vmatpush1.bf16.msra.mxu1 %v10052_v52  ;;  %9927 = vmatprep.subr.bf16.mxu0 %v9926_v24  ;;  %v5213_v52 = vld [vmem:[%s11765_s13 + $0x760] sm:$0xff]  ;;  %v5211_v24 = vld [vmem:[%s11765_s13 + $0x750] sm:$0xff]  ;;  %v10086_v11 = vpack.c.bf16 %v6194_v14, %v6190_v20 }
 0x87a   : > { %10055 = vmatprep.subr.bf16.mxu1 %v10054_v30  ;;  %v5222_v30 = vld [vmem:[%s11765_s13 + $0x7a8] sm:$0xff]  ;;  %v14361_v5 = vmax.f32 %v6179_v25, 0.0  ;;  %v6207_v25 = vld [vmem:[%s11765_s13 + $0x10d0] sm:$0xff]  ;;  %v6225_v20 = vld [vmem:[%s11765_s13 + $0x1160] sm:$0xff] }
 0x87b   : > { %v6223_v14 = vld [vmem:[%s11765_s13 + $0x1150] sm:$0xff] }
 0x87c   : > { %9929 = vmatpush1.bf16.msra.mxu0 %v9928_v37  ;;  %v9944_v37 = vpack.c.bf16 %v5213_v52, %v5209_v17  ;;  %v6198_v17 = vld [vmem:[%s11765_s13 + $0x1088] sm:$0xff] }
 0x87d   : > { %10057 = vmatpush1.bf16.msra.mxu1 %v10056_v1  ;;  %9931 = vmatprep.subr.bf16.mxu0 %v9930_v38  ;;  %v10072_v1 = vpack.c.bf16 %v5215_v27, %v5211_v24  ;;  %v9946_v38 = vpack.c.bf16 %v5222_v30, %v5218_v29  ;;  %v6202_v52 = vld [vmem:[%s11765_s13 + $0x10a8] sm:$0xff]  ;;  %v6204_v27 = vld [vmem:[%s11765_s13 + $0x10b8] sm:$0xff]  ;;  %v10088_v29 = vpack.c.bf16 %v6193_v42, %v6189_v21 }
 0x87e   : > { %10059 = vmatprep.subr.bf16.mxu1 %v10058_v39  ;;  %v5217_v39 = vld [vmem:[%s11765_s13 + $0x780] sm:$0xff]  ;;  %v10090_v31 = vpack.c.bf16 %v6202_v52, %v6198_v17  ;;  %v6236_v21 = vld [vmem:[%s11765_s13 + $0x11b8] sm:$0xff]  ;;  %v6231_v52 = vld [vmem:[%s11765_s13 + $0x1190] sm:$0xff] }
 0x87f   : > { %v9948_v56 = vpack.c.bf16 %v5221_v58, %v5217_v39  ;;  %v6210_v39 = vld [vmem:[%s11765_s13 + $0x10e8] sm:$0xff]  ;;  %v6212_v58 = vld [vmem:[%s11765_s13 + $0x10f8] sm:$0xff]  ;;  %v6233_v17 = vld [vmem:[%s11765_s13 + $0x11a0] sm:$0xff] }
 0x880   : > { %9933 = vmatpush1.bf16.msra.mxu0 %v9932_v60  ;;  %v5225_v60 = vld [vmem:[%s11765_s13 + $0x7c0] sm:$0xff] }
 0x881   : > { %10061 = vmatpush1.bf16.msra.mxu1 %v10060_v61  ;;  %9935 = vmatprep.subr.bf16.mxu0 %v9934_v63  ;;  %v5229_v61 = vld [vmem:[%s11765_s13 + $0x7e0] sm:$0xff]  ;;  %v5227_v63 = vld [vmem:[%s11765_s13 + $0x7d0] sm:$0xff] }
 0x882   : > { %10063 = vmatprep.subr.bf16.mxu1 %v10062_v4  ;;  %v6186_v4 = vld [vmem:[%s11765_s13 + $0x1028] sm:$0xff]  ;;  %v9952_v8 = vpack.c.bf16 %v5229_v61, %v5225_v60  ;;  %v10080_v9 = vpack.c.bf16 %v5231_v2, %v5227_v63  ;;  %v6220_v60 = vld [vmem:[%s11765_s13 + $0x1138] sm:$0xff]  ;;  %v10096_v61 = vpack.c.bf16 %v6209_v41, %v6205_v48  ;;  %v10224_v63 = vpack.c.bf16 %v6211_v55, %v6207_v25  ;;  %v6213_v2 = vld [vmem:[%s11765_s13 + $0x1100] sm:$0xff] }
 0x883   : > { %v10082_v36 = vpack.c.bf16 %v6186_v4, %v6182_v3  ;;  %v6217_v3 = vld [vmem:[%s11765_s13 + $0x1120] sm:$0xff]  ;;  %v6215_v4 = vld [vmem:[%s11765_s13 + $0x1110] sm:$0xff] }
 0x884   : > { %9937 = vmatpush1.bf16.msra.mxu0 %v9936_v10  ;;  %v6185_v10 = vld [vmem:[%s11765_s13 + $0x1020] sm:$0xff] }
 0x885   : > { %10065 = vmatpush1.bf16.msra.mxu1 %v10064_v12  ;;  %9939 = vmatprep.subr.bf16.mxu0 %v9938_v44  ;;  %v6183_v12 = vld [vmem:[%s11765_s13 + $0x1010] sm:$0xff]  ;;  %v10210_v44 = vpack.c.bf16 %v6188_v16, %v6184_v7  ;;  %v10084_v18 = vpack.c.bf16 %v6185_v10, %v6181_v53  ;;  %v6228_v53 = vld [vmem:[%s11765_s13 + $0x1178] sm:$0xff]  ;;  %v10100_v10 = vpack.c.bf16 %v6217_v3, %v6213_v2  ;;  %v6249_v55 = vld [vmem:[%s11765_s13 + $0x1220] sm:$0xff] }
 0x886   : > { %10067 = vmatprep.subr.bf16.mxu1 %v10066_v35  ;;  %v14373_v35 = vrot.slane %v14361_v5, %v13902_v28  ;;  %v10212_v50 = vpack.c.bf16 %v6187_v13, %v6183_v12  ;;  %v6219_v16 = vld [vmem:[%s11765_s13 + $0x1130] sm:$0xff]  ;;  %v6221_v13 = vld [vmem:[%s11765_s13 + $0x1140] sm:$0xff] }
 0x887   : > { %v10228_v12 = vpack.c.bf16 %v6219_v16, %v6215_v4  ;;  %v10104_v42 = vpack.c.bf16 %v6225_v20, %v6221_v13  ;;  %v6257_v16 = vld [vmem:[%s11765_s13 + $0x1260] sm:$0xff] }
 0x888   : > { %9941 = vmatpush1.bf16.msra.mxu0 %v9940_v43  ;;  %v6191_v43 = vld [vmem:[%s11765_s13 + $0x1050] sm:$0xff]  ;;  %v6453_v24 = vcombine.high %v14373_v35, %v14373_v35 }
 0x889   : > { %10069 = vmatpush1.bf16.msra.mxu1 %v10068_v22  ;;  %9943 = vmatprep.subr.bf16.mxu0 %v9942_v59  ;;  %v10214_v22 = vpack.c.bf16 %v6196_v40, %v6192_v15  ;;  %v6195_v59 = vld [vmem:[%s11765_s13 + $0x1070] sm:$0xff] }
 0x88a   : > { %10071 = vmatprep.subr.bf16.mxu1 %v10070_v26  ;;  %v6200_v26 = vld [vmem:[%s11765_s13 + $0x1098] sm:$0xff]  ;;  %v10216_v30 = vpack.c.bf16 %v6195_v59, %v6191_v43  ;;  %v6227_v40 = vld [vmem:[%s11765_s13 + $0x1170] sm:$0xff]  ;;  %v6229_v59 = vld [vmem:[%s11765_s13 + $0x1180] sm:$0xff] }
 0x88b   : > { %v10232_v43 = vpack.c.bf16 %v6227_v40, %v6223_v14  ;;  %v10108_v51 = vpack.c.bf16 %v6233_v17, %v6229_v59  ;;  %v6265_v40 = vld [vmem:[%s11765_s13 + $0x12a0] sm:$0xff] }
 0x88c   : > { %9945 = vmatpush1.bf16.msra.mxu0 %v9944_v37  ;;  %v10218_v37 = vpack.c.bf16 %v6204_v27, %v6200_v26  ;;  %v6235_v26 = vld [vmem:[%s11765_s13 + $0x11b0] sm:$0xff]  ;;  %v6238_v27 = vld [vmem:[%s11765_s13 + $0x11c8] sm:$0xff] }
 0x88d   : > { %10073 = vmatpush1.bf16.msra.mxu1 %v10072_v1  ;;  %9947 = vmatprep.subr.bf16.mxu0 %v9946_v38  ;;  %v6203_v1 = vld [vmem:[%s11765_s13 + $0x10b0] sm:$0xff]  ;;  %v6206_v38 = vld [vmem:[%s11765_s13 + $0x10c8] sm:$0xff]  ;;  %v10236_v49 = vpack.c.bf16 %v6235_v26, %v6231_v52  ;;  %v6273_v26 = vld [vmem:[%s11765_s13 + $0x12e0] sm:$0xff] }
 0x88e   : > { %10075 = vmatprep.subr.bf16.mxu1 %v10074_v46  ;;  %v10220_v46 = vpack.c.bf16 %v6203_v1, %v6199_v34  ;;  %v10094_v47 = vpack.c.bf16 %v6210_v39, %v6206_v38  ;;  %v6241_v1 = vld [vmem:[%s11765_s13 + $0x11e0] sm:$0xff]  ;;  %v6239_v38 = vld [vmem:[%s11765_s13 + $0x11d0] sm:$0xff] }
 0x890   : > { %9949 = vmatpush1.bf16.msra.mxu0 %v9948_v56  ;;  %v6214_v56 = vld [vmem:[%s11765_s13 + $0x1108] sm:$0xff] }
 0x891   : > { %10077 = vmatpush1.bf16.msra.mxu1 %v10076_v57  ;;  %9951 = vmatprep.subr.bf16.mxu0 %v9950_v23  ;;  %v6218_v57 = vld [vmem:[%s11765_s13 + $0x1128] sm:$0xff]  ;;  %v6216_v23 = vld [vmem:[%s11765_s13 + $0x1118] sm:$0xff] }
 0x892   : > { %10079 = vmatprep.subr.bf16.mxu1 %v10078_v0  ;;  %v10098_v0 = vpack.c.bf16 %v6218_v57, %v6214_v56  ;;  %v10226_v7 = vpack.c.bf16 %v6220_v60, %v6216_v23  ;;  %v6247_v56 = vld [vmem:[%s11765_s13 + $0x1210] sm:$0xff]  ;;  %v6254_v60 = vld [vmem:[%s11765_s13 + $0x1248] sm:$0xff] }
 0x893   : > { %v6251_v23 = vld [vmem:[%s11765_s13 + $0x1230] sm:$0xff] }
 0x894   : > { %9953 = vmatpush1.bf16.msra.mxu0 %v9952_v8  ;;  %v6222_v8 = vld [vmem:[%s11765_s13 + $0x1148] sm:$0xff]  ;;  %v10244_v3 = vpack.c.bf16 %v6251_v23, %v6247_v56  ;;  %v6289_v23 = vld [vmem:[%s11765_s13 + $0x1360] sm:$0xff] }
 0x895   : > { %10081 = vmatpush1.bf16.msra.mxu1 %v10080_v9  ;;  %10083 = vmatprep.subr.bf16.mxu0 %v10082_v36  ;;  %v6226_v9 = vld [vmem:[%s11765_s13 + $0x1168] sm:$0xff]  ;;  %v6224_v36 = vld [vmem:[%s11765_s13 + $0x1158] sm:$0xff] }
 0x896   : > { %10211 = vmatprep.subr.bf16.mxu1 %v10210_v44  ;;  %v10102_v44 = vpack.c.bf16 %v6226_v9, %v6222_v8  ;;  %v10230_v15 = vpack.c.bf16 %v6228_v53, %v6224_v36  ;;  %v6255_v8 = vld [vmem:[%s11765_s13 + $0x1250] sm:$0xff]  ;;  %v6262_v53 = vld [vmem:[%s11765_s13 + $0x1288] sm:$0xff] }
 0x897   : > { %5993 = vmatmul.mubr.f32.vlgmr.msra.gmra.mrb[0].mxu0 %v14229_v45  ;;  %v6259_v36 = vld [vmem:[%s11765_s13 + $0x1270] sm:$0xff] }
 0x898   : > { %6135 = vmatmul.mubr.f32.vlgmr.msra.gmra.mrb[0].mxu1 %v14229_v45  ;;  %10085 = vmatpush1.bf16.msra.mxu0 %v10084_v18  ;;  %v6208_v45 = vld [vmem:[%s11765_s13 + $0x10d8] sm:$0xff]  ;;  %v6230_v18 = vld [vmem:[%s11765_s13 + $0x1188] sm:$0xff]  ;;  %v10248_v20 = vpack.c.bf16 %v6259_v36, %v6255_v8  ;;  %v6297_v36 = vld [vmem:[%s11765_s13 + $0x13a0] sm:$0xff] }
 0x899   : > { %10213 = vmatpush1.bf16.msra.mxu1 %v10212_v50  ;;  %10087 = vmatprep.subr.bf16.mxu0 %v10086_v11  ;;  %v10222_v54 = vpack.c.bf16 %v6212_v58, %v6208_v45  ;;  %v6234_v50 = vld [vmem:[%s11765_s13 + $0x11a8] sm:$0xff]  ;;  %v6232_v11 = vld [vmem:[%s11765_s13 + $0x1198] sm:$0xff]  ;;  %v6243_v45 = vld [vmem:[%s11765_s13 + $0x11f0] sm:$0xff] }
 0x89a   : > { %10215 = vmatprep.subr.bf16.mxu1 %v10214_v22  ;;  %6523 = vmatprep.mubr.f32.mxu0 %v6453_v24  ;;  %v10106_v22 = vpack.c.bf16 %v6234_v50, %v6230_v18  ;;  %v6246_v58 = vld [vmem:[%s11765_s13 + $0x1208] sm:$0xff]  ;;  %v10240_v41 = vpack.c.bf16 %v6243_v45, %v6239_v38  ;;  %v6263_v18 = vld [vmem:[%s11765_s13 + $0x1290] sm:$0xff]  ;;  %v6281_v45 = vld [vmem:[%s11765_s13 + $0x1320] sm:$0xff] }
 0x89b   : > { %6665 = vmatprep.mubr.f32.mxu1 %v6453_v24  ;;  %v10234_v24 = vpack.c.bf16 %v6236_v21, %v6232_v11  ;;  %v6267_v11 = vld [vmem:[%s11765_s13 + $0x12b0] sm:$0xff]  ;;  %v6270_v21 = vld [vmem:[%s11765_s13 + $0x12c8] sm:$0xff] }
 0x89c   : > { %10089 = vmatpush1.bf16.msra.mxu0 %v10088_v29  ;;  %v6242_v29 = vld [vmem:[%s11765_s13 + $0x11e8] sm:$0xff]  ;;  %v10252_v17 = vpack.c.bf16 %v6267_v11, %v6263_v18  ;;  %v6305_v11 = vld [vmem:[%s11765_s13 + $0x13e0] sm:$0xff] }
 0x89d   : > { %10217 = vmatpush1.bf16.msra.mxu1 %v10216_v30  ;;  %10091 = vmatprep.subr.bf16.mxu0 %v10090_v31  ;;  %v6240_v30 = vld [vmem:[%s11765_s13 + $0x11d8] sm:$0xff]  ;;  %v10110_v34 = vpack.c.bf16 %v6242_v29, %v6238_v27  ;;  %v6271_v27 = vld [vmem:[%s11765_s13 + $0x12d0] sm:$0xff] }
 0x89e   : > { %10219 = vmatprep.subr.bf16.mxu1 %v10218_v37  ;;  %v6244_v31 = vld [vmem:[%s11765_s13 + $0x11f8] sm:$0xff]  ;;  %v6237_v37 = vld [vmem:[%s11765_s13 + $0x11c0] sm:$0xff] }
 0x89f   : > { %v10238_v39 = vpack.c.bf16 %v6244_v31, %v6240_v30  ;;  %v10112_v48 = vpack.c.bf16 %v6241_v1, %v6237_v37  ;;  %v6275_v30 = vld [vmem:[%s11765_s13 + $0x12f0] sm:$0xff]  ;;  %v6278_v31 = vld [vmem:[%s11765_s13 + $0x1308] sm:$0xff] }
 0x8a0   : > { %10093 = vmatpush1.bf16.msra.mxu0 %v10092_v6  ;;  %v6250_v6 = vld [vmem:[%s11765_s13 + $0x1228] sm:$0xff]  ;;  %v10256_v1 = vpack.c.bf16 %v6275_v30, %v6271_v27  ;;  %v6309_v30 = vld [vmem:[%s11765_s13 + $0x1400] sm:$0xff] }
 0x8a1   : > { %10221 = vmatpush1.bf16.msra.mxu1 %v10220_v46  ;;  %10095 = vmatprep.subr.bf16.mxu0 %v10094_v47  ;;  %v6248_v46 = vld [vmem:[%s11765_s13 + $0x1218] sm:$0xff]  ;;  %v10114_v25 = vpack.c.bf16 %v6250_v6, %v6246_v58  ;;  %v6279_v58 = vld [vmem:[%s11765_s13 + $0x1310] sm:$0xff] }
 0x8a2   : > { %10223 = vmatprep.subr.bf16.mxu1 %v10222_v54  ;;  %v6252_v47 = vld [vmem:[%s11765_s13 + $0x1238] sm:$0xff]  ;;  %v6245_v54 = vld [vmem:[%s11765_s13 + $0x1200] sm:$0xff] }
 0x8a3   : > { %v10242_v57 = vpack.c.bf16 %v6252_v47, %v6248_v46  ;;  %v10116_v2 = vpack.c.bf16 %v6249_v55, %v6245_v54  ;;  %v6283_v46 = vld [vmem:[%s11765_s13 + $0x1330] sm:$0xff]  ;;  %v6286_v47 = vld [vmem:[%s11765_s13 + $0x1348] sm:$0xff] }
 0x8a4   : > { %10097 = vmatpush1.bf16.msra.mxu0 %v10096_v61  ;;  %v6258_v61 = vld [vmem:[%s11765_s13 + $0x1268] sm:$0xff]  ;;  %v10260_v55 = vpack.c.bf16 %v6283_v46, %v6279_v58  ;;  %v6317_v46 = vld [vmem:[%s11765_s13 + $0x1440] sm:$0xff] }
 0x8a5   : > { %10225 = vmatpush1.bf16.msra.mxu1 %v10224_v63  ;;  %10099 = vmatprep.subr.bf16.mxu0 %v10098_v0  ;;  %v6256_v63 = vld [vmem:[%s11765_s13 + $0x1258] sm:$0xff]  ;;  %v10118_v4 = vpack.c.bf16 %v6258_v61, %v6254_v60  ;;  %v6287_v60 = vld [vmem:[%s11765_s13 + $0x1350] sm:$0xff] }
 0x8a6   : > { %10227 = vmatprep.subr.bf16.mxu1 %v10226_v7  ;;  %v6260_v0 = vld [vmem:[%s11765_s13 + $0x1278] sm:$0xff]  ;;  %v6253_v7 = vld [vmem:[%s11765_s13 + $0x1240] sm:$0xff] }
 0x8a7   : > { %v10246_v9 = vpack.c.bf16 %v6260_v0, %v6256_v63  ;;  %v10120_v13 = vpack.c.bf16 %v6257_v16, %v6253_v7  ;;  %v6291_v63 = vld [vmem:[%s11765_s13 + $0x1370] sm:$0xff]  ;;  %v6294_v0 = vld [vmem:[%s11765_s13 + $0x1388] sm:$0xff] }
 0x8a8   : > { %10101 = vmatpush1.bf16.msra.mxu0 %v10100_v10  ;;  %v6266_v10 = vld [vmem:[%s11765_s13 + $0x12a8] sm:$0xff]  ;;  %v10264_v16 = vpack.c.bf16 %v6291_v63, %v6287_v60 }
 0x8a9   : > { %10229 = vmatpush1.bf16.msra.mxu1 %v10228_v12  ;;  %10103 = vmatprep.subr.bf16.mxu0 %v10102_v44  ;;  %v6264_v12 = vld [vmem:[%s11765_s13 + $0x1298] sm:$0xff]  ;;  %v10122_v14 = vpack.c.bf16 %v6266_v10, %v6262_v53  ;;  %v6295_v53 = vld [vmem:[%s11765_s13 + $0x1390] sm:$0xff] }
 0x8aa   : > { %10231 = vmatprep.subr.bf16.mxu1 %v10230_v15  ;;  %v6268_v44 = vld [vmem:[%s11765_s13 + $0x12b8] sm:$0xff]  ;;  %v6261_v15 = vld [vmem:[%s11765_s13 + $0x1280] sm:$0xff] }
 0x8ab   : > { %v10250_v50 = vpack.c.bf16 %v6268_v44, %v6264_v12  ;;  %v10124_v59 = vpack.c.bf16 %v6265_v40, %v6261_v15  ;;  %v6299_v12 = vld [vmem:[%s11765_s13 + $0x13b0] sm:$0xff]  ;;  %v6302_v44 = vld [vmem:[%s11765_s13 + $0x13c8] sm:$0xff] }
 0x8ac   : > { %10105 = vmatpush1.bf16.msra.mxu0 %v10104_v42  ;;  %v6274_v42 = vld [vmem:[%s11765_s13 + $0x12e8] sm:$0xff]  ;;  %v10268_v40 = vpack.c.bf16 %v6299_v12, %v6295_v53  ;;  %v6333_v12 = vld [vmem:[%s11765_s13 + $0x14c0] sm:$0xff] }
 0x8ad   : > { %10233 = vmatpush1.bf16.msra.mxu1 %v10232_v43  ;;  %10107 = vmatprep.subr.bf16.mxu0 %v10106_v22  ;;  %v6272_v43 = vld [vmem:[%s11765_s13 + $0x12d8] sm:$0xff]  ;;  %v10126_v52 = vpack.c.bf16 %v6274_v42, %v6270_v21  ;;  %v6303_v21 = vld [vmem:[%s11765_s13 + $0x13d0] sm:$0xff] }
 0x8ae   : > { %10235 = vmatprep.subr.bf16.mxu1 %v10234_v24  ;;  %v6276_v22 = vld [vmem:[%s11765_s13 + $0x12f8] sm:$0xff]  ;;  %v6269_v24 = vld [vmem:[%s11765_s13 + $0x12c0] sm:$0xff] }
 0x8af   : > { %v10254_v29 = vpack.c.bf16 %v6276_v22, %v6272_v43  ;;  %v10128_v37 = vpack.c.bf16 %v6273_v26, %v6269_v24  ;;  %v6307_v43 = vld [vmem:[%s11765_s13 + $0x13f0] sm:$0xff]  ;;  %v6310_v22 = vld [vmem:[%s11765_s13 + $0x1408] sm:$0xff]  ;;  %v6316_v24 = vld [vmem:[%s11765_s13 + $0x1438] sm:$0xff] }
 0x8b0   : > { %10109 = vmatpush1.bf16.msra.mxu0 %v10108_v51  ;;  %v6282_v51 = vld [vmem:[%s11765_s13 + $0x1328] sm:$0xff]  ;;  %v10272_v27 = vpack.c.bf16 %v6307_v43, %v6303_v21  ;;  %v6341_v43 = vld [vmem:[%s11765_s13 + $0x1500] sm:$0xff] }
 0x8b1   : > { %10237 = vmatpush1.bf16.msra.mxu1 %v10236_v49  ;;  %10111 = vmatprep.subr.bf16.mxu0 %v10110_v34  ;;  %v6280_v49 = vld [vmem:[%s11765_s13 + $0x1318] sm:$0xff]  ;;  %v10130_v38 = vpack.c.bf16 %v6282_v51, %v6278_v31  ;;  %v6313_v31 = vld [vmem:[%s11765_s13 + $0x1420] sm:$0xff]  ;;  %v6311_v51 = vld [vmem:[%s11765_s13 + $0x1410] sm:$0xff] }
 0x8b2   : > { %10239 = vmatprep.subr.bf16.mxu1 %v10238_v39  ;;  %v6284_v34 = vld [vmem:[%s11765_s13 + $0x1338] sm:$0xff]  ;;  %v6277_v39 = vld [vmem:[%s11765_s13 + $0x1300] sm:$0xff] }
 0x8b3   : > { %v10258_v6 = vpack.c.bf16 %v6284_v34, %v6280_v49  ;;  %v10132_v54 = vpack.c.bf16 %v6281_v45, %v6277_v39  ;;  %v6318_v34 = vld [vmem:[%s11765_s13 + $0x1448] sm:$0xff]  ;;  %v6324_v39 = vld [vmem:[%s11765_s13 + $0x1478] sm:$0xff]  ;;  %v10148_v45 = vpack.c.bf16 %v6313_v31, %v6309_v30 }
 0x8b4   : > { %10113 = vmatpush1.bf16.msra.mxu0 %v10112_v48  ;;  %v6290_v48 = vld [vmem:[%s11765_s13 + $0x1368] sm:$0xff] }
 0x8b5   : > { %10241 = vmatpush1.bf16.msra.mxu1 %v10240_v41  ;;  %10115 = vmatprep.subr.bf16.mxu0 %v10114_v25  ;;  %v6288_v41 = vld [vmem:[%s11765_s13 + $0x1358] sm:$0xff]  ;;  %v10134_v56 = vpack.c.bf16 %v6290_v48, %v6286_v47  ;;  %v6321_v47 = vld [vmem:[%s11765_s13 + $0x1460] sm:$0xff]  ;;  %v6319_v48 = vld [vmem:[%s11765_s13 + $0x1450] sm:$0xff] }
 0x8b6   : > { %10243 = vmatprep.subr.bf16.mxu1 %v10242_v57  ;;  %v6292_v25 = vld [vmem:[%s11765_s13 + $0x1378] sm:$0xff]  ;;  %v6285_v57 = vld [vmem:[%s11765_s13 + $0x1340] sm:$0xff]  ;;  %v10152_v60 = vpack.c.bf16 %v6321_v47, %v6317_v46 }
 0x8b7   : > { %v10262_v61 = vpack.c.bf16 %v6292_v25, %v6288_v41  ;;  %v10136_v7 = vpack.c.bf16 %v6289_v23, %v6285_v57  ;;  %v6323_v25 = vld [vmem:[%s11765_s13 + $0x1470] sm:$0xff]  ;;  %v6328_v57 = vld [vmem:[%s11765_s13 + $0x1498] sm:$0xff] }
 0x8b8   : > { %10117 = vmatpush1.bf16.msra.mxu0 %v10116_v2  ;;  %v6298_v2 = vld [vmem:[%s11765_s13 + $0x13a8] sm:$0xff]  ;;  %v6332_v23 = vld [vmem:[%s11765_s13 + $0x14b8] sm:$0xff] }
 0x8b9   : > { %10245 = vmatpush1.bf16.msra.mxu1 %v10244_v3  ;;  %10119 = vmatprep.subr.bf16.mxu0 %v10118_v4  ;;  %v6296_v3 = vld [vmem:[%s11765_s13 + $0x1398] sm:$0xff]  ;;  %v10138_v8 = vpack.c.bf16 %v6298_v2, %v6294_v0  ;;  %v6325_v0 = vld [vmem:[%s11765_s13 + $0x1480] sm:$0xff] }
 0x8ba   : > { %10247 = vmatprep.subr.bf16.mxu1 %v10246_v9  ;;  %v6300_v4 = vld [vmem:[%s11765_s13 + $0x13b8] sm:$0xff]  ;;  %v6293_v9 = vld [vmem:[%s11765_s13 + $0x1380] sm:$0xff] }
 0x8bb   : > { %v10266_v10 = vpack.c.bf16 %v6300_v4, %v6296_v3  ;;  %v10140_v15 = vpack.c.bf16 %v6297_v36, %v6293_v9  ;;  %v6329_v2 = vld [vmem:[%s11765_s13 + $0x14a0] sm:$0xff]  ;;  %v6327_v3 = vld [vmem:[%s11765_s13 + $0x1490] sm:$0xff]  ;;  %v10282_v4 = vpack.c.bf16 %v6332_v23, %v6328_v57  ;;  %v6340_v9 = vld [vmem:[%s11765_s13 + $0x14f8] sm:$0xff] }
 0x8bc   : > { %10121 = vmatpush1.bf16.msra.mxu0 %v10120_v13  ;;  %v6306_v13 = vld [vmem:[%s11765_s13 + $0x13e8] sm:$0xff]  ;;  %v10156_v36 = vpack.c.bf16 %v6329_v2, %v6325_v0 }
 0x8bd   : > { %10249 = vmatpush1.bf16.msra.mxu1 %v10248_v20  ;;  %10123 = vmatprep.subr.bf16.mxu0 %v10122_v14  ;;  %v6304_v20 = vld [vmem:[%s11765_s13 + $0x13d8] sm:$0xff]  ;;  %v10142_v18 = vpack.c.bf16 %v6306_v13, %v6302_v44  ;;  %v6337_v44 = vld [vmem:[%s11765_s13 + $0x14e0] sm:$0xff]  ;;  %v6335_v13 = vld [vmem:[%s11765_s13 + $0x14d0] sm:$0xff] }
 0x8be   : > { %10251 = vmatprep.subr.bf16.mxu1 %v10250_v50  ;;  %v6308_v14 = vld [vmem:[%s11765_s13 + $0x13f8] sm:$0xff]  ;;  %v6301_v50 = vld [vmem:[%s11765_s13 + $0x13c0] sm:$0xff]  ;;  %v6366_v57 = vld [vmem:[%s11765_s13 + $0x15c8] sm:$0xff] }
 0x8bf   : > { %v10270_v42 = vpack.c.bf16 %v6308_v14, %v6304_v20  ;;  %v10144_v26 = vpack.c.bf16 %v6305_v11, %v6301_v50  ;;  %v6339_v14 = vld [vmem:[%s11765_s13 + $0x14f0] sm:$0xff]  ;;  %v6348_v50 = vld [vmem:[%s11765_s13 + $0x1538] sm:$0xff]  ;;  %v10160_v11 = vpack.c.bf16 %v6337_v44, %v6333_v12  ;;  %v6370_v23 = vld [vmem:[%s11765_s13 + $0x15e8] sm:$0xff] }
 0x8c0   : > { %10125 = vmatpush1.bf16.msra.mxu0 %v10124_v59  ;;  %v6314_v59 = vld [vmem:[%s11765_s13 + $0x1428] sm:$0xff]  ;;  %v10288_v21 = vpack.c.bf16 %v6339_v14, %v6335_v13  ;;  %v10174_v2 = vpack.c.bf16 %v6370_v23, %v6366_v57  ;;  %v6373_v13 = vld [vmem:[%s11765_s13 + $0x1600] sm:$0xff]  ;;  %v6375_v14 = vld [vmem:[%s11765_s13 + $0x1610] sm:$0xff] }
 0x8c1   : > { %10253 = vmatpush1.bf16.msra.mxu1 %v10252_v17  ;;  %10127 = vmatprep.subr.bf16.mxu0 %v10126_v52  ;;  %v6438_v17 = vcombine.high %v14361_v5, %v14361_v5  ;;  %v6312_v52 = vld [vmem:[%s11765_s13 + $0x1418] sm:$0xff]  ;;  %v6315_v5 = vld [vmem:[%s11765_s13 + $0x1430] sm:$0xff] }
 0x8c2   : > { %10255 = vmatprep.subr.bf16.mxu1 %v10254_v29  ;;  %v10146_v29 = vpack.c.bf16 %v6314_v59, %v6310_v22  ;;  %v10274_v49 = vpack.c.bf16 %v6316_v24, %v6312_v52  ;;  %v10276_v58 = vpack.c.bf16 %v6315_v5, %v6311_v51  ;;  %v6345_v22 = vld [vmem:[%s11765_s13 + $0x1520] sm:$0xff]  ;;  %v6343_v59 = vld [vmem:[%s11765_s13 + $0x1510] sm:$0xff]  ;;  %v6350_v24 = vld [vmem:[%s11765_s13 + $0x1548] sm:$0xff] }
 0x8c3   : > { %v6347_v52 = vld [vmem:[%s11765_s13 + $0x1530] sm:$0xff]  ;;  %v10164_v30 = vpack.c.bf16 %v6345_v22, %v6341_v43  ;;  %v6353_v5 = vld [vmem:[%s11765_s13 + $0x1560] sm:$0xff] }
 0x8c4   : > { %10129 = vmatpush1.bf16.msra.mxu0 %v10128_v37  ;;  %v6322_v37 = vld [vmem:[%s11765_s13 + $0x1468] sm:$0xff]  ;;  %v10292_v31 = vpack.c.bf16 %v6347_v52, %v6343_v59  ;;  %v6381_v43 = vld [vmem:[%s11765_s13 + $0x1640] sm:$0xff]  ;;  %v6383_v52 = vld [vmem:[%s11765_s13 + $0x1650] sm:$0xff] }
 0x8c5   : > { %10257 = vmatpush1.bf16.msra.mxu1 %v10256_v1  ;;  %10131 = vmatprep.subr.bf16.mxu0 %v10130_v38  ;;  %v14510_v1 = vrot.slane %v6438_v17, %v13902_v28  ;;  %v6320_v38 = vld [vmem:[%s11765_s13 + $0x1458] sm:$0xff]  ;;  %v6385_v22 = vld [vmem:[%s11765_s13 + $0x1660] sm:$0xff] }
 0x8c6   : > { %10259 = vmatprep.subr.bf16.mxu1 %v10258_v6  ;;  %v10150_v6 = vpack.c.bf16 %v6322_v37, %v6318_v34  ;;  %v10278_v41 = vpack.c.bf16 %v6324_v39, %v6320_v38  ;;  %v6351_v34 = vld [vmem:[%s11765_s13 + $0x1550] sm:$0xff]  ;;  %v6358_v39 = vld [vmem:[%s11765_s13 + $0x1588] sm:$0xff] }
 0x8c7   : > { %v6355_v38 = vld [vmem:[%s11765_s13 + $0x1570] sm:$0xff] }
 0x8c8   : > { %10133 = vmatpush1.bf16.msra.mxu0 %v10132_v54  ;;  %v6326_v54 = vld [vmem:[%s11765_s13 + $0x1488] sm:$0xff]  ;;  %v10296_v47 = vpack.c.bf16 %v6355_v38, %v6351_v34  ;;  %v6389_v38 = vld [vmem:[%s11765_s13 + $0x1680] sm:$0xff] }
 0x8c9   : > { %10261 = vmatpush1.bf16.msra.mxu1 %v10260_v55  ;;  %10135 = vmatprep.subr.bf16.mxu0 %v10134_v56  ;;  %v6330_v55 = vld [vmem:[%s11765_s13 + $0x14a8] sm:$0xff]  ;;  %v6454_v56 = vcombine.high %v14510_v1, %v14510_v1 }
 0x8ca   : > { %10263 = vmatprep.subr.bf16.mxu1 %v10262_v61  ;;  %v10280_v61 = vpack.c.bf16 %v6323_v25, %v6319_v48  ;;  %v10154_v63 = vpack.c.bf16 %v6330_v55, %v6326_v54  ;;  %v6361_v25 = vld [vmem:[%s11765_s13 + $0x15a0] sm:$0xff]  ;;  %v6359_v54 = vld [vmem:[%s11765_s13 + $0x1590] sm:$0xff] }
 0x8cc   : > { %10137 = vmatpush1.bf16.msra.mxu0 %v10136_v7  ;;  %v6331_v7 = vld [vmem:[%s11765_s13 + $0x14b0] sm:$0xff] }
 0x8cd   : > { %10265 = vmatpush1.bf16.msra.mxu1 %v10264_v16  ;;  %10139 = vmatprep.subr.bf16.mxu0 %v10138_v8  ;;  %v6334_v16 = vld [vmem:[%s11765_s13 + $0x14c8] sm:$0xff]  ;;  %v10284_v53 = vpack.c.bf16 %v6331_v7, %v6327_v3  ;;  %v6365_v3 = vld [vmem:[%s11765_s13 + $0x15c0] sm:$0xff]  ;;  %v6367_v7 = vld [vmem:[%s11765_s13 + $0x15d0] sm:$0xff] }
 0x8ce   : > { %10267 = vmatprep.subr.bf16.mxu1 %v10266_v10  ;;  %v6338_v8 = vld [vmem:[%s11765_s13 + $0x14e8] sm:$0xff] }
 0x8cf   : > { %v10158_v10 = vpack.c.bf16 %v6338_v8, %v6334_v16  ;;  %v6371_v8 = vld [vmem:[%s11765_s13 + $0x15f0] sm:$0xff] }
 0x8d0   : > { %10141 = vmatpush1.bf16.msra.mxu0 %v10140_v15  ;;  %v6342_v15 = vld [vmem:[%s11765_s13 + $0x1508] sm:$0xff]  ;;  %v10304_v12 = vpack.c.bf16 %v6371_v8, %v6367_v7  ;;  %v6408_v8 = vld [vmem:[%s11765_s13 + $0x1718] sm:$0xff] }
 0x8d1   : > { %10269 = vmatpush1.bf16.msra.mxu1 %v10268_v40  ;;  %10143 = vmatprep.subr.bf16.mxu0 %v10142_v18  ;;  %v6346_v40 = vld [vmem:[%s11765_s13 + $0x1528] sm:$0xff]  ;;  %v6344_v18 = vld [vmem:[%s11765_s13 + $0x1518] sm:$0xff] }
 0x8d2   : > { %10271 = vmatprep.subr.bf16.mxu1 %v10270_v42  ;;  %v10162_v42 = vpack.c.bf16 %v6346_v40, %v6342_v15  ;;  %v10290_v17 = vpack.c.bf16 %v6348_v50, %v6344_v18  ;;  %v6379_v40 = vld [vmem:[%s11765_s13 + $0x1630] sm:$0xff]  ;;  %v6382_v18 = vld [vmem:[%s11765_s13 + $0x1648] sm:$0xff] }
 0x8d3   : > { %v6386_v50 = vld [vmem:[%s11765_s13 + $0x1668] sm:$0xff]  ;;  %v10308_v59 = vpack.c.bf16 %v6379_v40, %v6375_v14 }
 0x8d4   : > { %10145 = vmatpush1.bf16.msra.mxu0 %v10144_v26  ;;  %v6354_v26 = vld [vmem:[%s11765_s13 + $0x1568] sm:$0xff] }
 0x8d5   : > { %10273 = vmatpush1.bf16.msra.mxu1 %v10272_v27  ;;  %10147 = vmatprep.subr.bf16.mxu0 %v10146_v29  ;;  %v6352_v27 = vld [vmem:[%s11765_s13 + $0x1558] sm:$0xff]  ;;  %v10166_v51 = vpack.c.bf16 %v6354_v26, %v6350_v24  ;;  %v6387_v24 = vld [vmem:[%s11765_s13 + $0x1670] sm:$0xff]  ;;  %v6390_v26 = vld [vmem:[%s11765_s13 + $0x1688] sm:$0xff] }
 0x8d6   : > { %10275 = vmatprep.subr.bf16.mxu1 %v10274_v49  ;;  %v6356_v29 = vld [vmem:[%s11765_s13 + $0x1578] sm:$0xff]  ;;  %v6349_v49 = vld [vmem:[%s11765_s13 + $0x1540] sm:$0xff]  ;;  %v6414_v14 = vld [vmem:[%s11765_s13 + $0x1748] sm:$0xff] }
 0x8d7   : > { %6524 = vmatmul.mubr.f32.vlgmr.msra.gmra.mrb[0].mxu0 %v14373_v35  ;;  %v10294_v37 = vpack.c.bf16 %v6356_v29, %v6352_v27  ;;  %v10168_v46 = vpack.c.bf16 %v6353_v5, %v6349_v49  ;;  %v6394_v29 = vld [vmem:[%s11765_s13 + $0x16a8] sm:$0xff]  ;;  %v10184_v49 = vpack.c.bf16 %v6385_v22, %v6381_v43  ;;  %v10312_v5 = vpack.c.bf16 %v6387_v24, %v6383_v52  ;;  %v6413_v22 = vld [vmem:[%s11765_s13 + $0x1740] sm:$0xff]  ;;  %v6419_v24 = vld [vmem:[%s11765_s13 + $0x1770] sm:$0xff] }
 0x8d8   : > { %10149 = vmatpush1.bf16.msra.mxu0 %v10148_v45  ;;  %6666 = vmatmul.mubr.f32.vlgmr.msra.gmra.mrb[0].mxu1 %v14373_v35  ;;  %v6336_v35 = vld [vmem:[%s11765_s13 + $0x14d8] sm:$0xff]  ;;  %v6362_v45 = vld [vmem:[%s11765_s13 + $0x15a8] sm:$0xff]  ;;  %v10186_v34 = vpack.c.bf16 %v6394_v29, %v6390_v26 }
 0x8d9   : > { %10277 = vmatpush1.bf16.msra.mxu1 %v10276_v58  ;;  %10151 = vmatprep.subr.bf16.mxu0 %v10150_v6  ;;  %v10286_v20 = vpack.c.bf16 %v6340_v9, %v6336_v35  ;;  %v6360_v58 = vld [vmem:[%s11765_s13 + $0x1598] sm:$0xff]  ;;  %v10170_v48 = vpack.c.bf16 %v6362_v45, %v6358_v39  ;;  %v6374_v35 = vld [vmem:[%s11765_s13 + $0x1608] sm:$0xff]  ;;  %v6393_v39 = vld [vmem:[%s11765_s13 + $0x16a0] sm:$0xff] }
 0x8da   : > { %10279 = vmatprep.subr.bf16.mxu1 %v10278_v41  ;;  %6594 = vmatprep.mubr.f32.mxu0 %v6454_v56  ;;  %v6364_v6 = vld [vmem:[%s11765_s13 + $0x15b8] sm:$0xff]  ;;  %v6357_v41 = vld [vmem:[%s11765_s13 + $0x1580] sm:$0xff]  ;;  %v6378_v9 = vld [vmem:[%s11765_s13 + $0x1628] sm:$0xff] }
 0x8db   : > { %6736 = vmatprep.mubr.f32.mxu1 %v6454_v56  ;;  %v10298_v55 = vpack.c.bf16 %v6364_v6, %v6360_v58  ;;  %v6363_v56 = vld [vmem:[%s11765_s13 + $0x15b0] sm:$0xff]  ;;  %v10178_v44 = vpack.c.bf16 %v6378_v9, %v6374_v35  ;;  %v6398_v6 = vld [vmem:[%s11765_s13 + $0x16c8] sm:$0xff]  ;;  %v6412_v35 = vld [vmem:[%s11765_s13 + $0x1738] sm:$0xff] }
 0x8dc   : > { %10153 = vmatpush1.bf16.msra.mxu0 %v10152_v60  ;;  %v6368_v60 = vld [vmem:[%s11765_s13 + $0x15d8] sm:$0xff]  ;;  %v10300_v0 = vpack.c.bf16 %v6363_v56, %v6359_v54  ;;  %v6391_v45 = vld [vmem:[%s11765_s13 + $0x1690] sm:$0xff]  ;;  %v10188_v56 = vpack.c.bf16 %v6393_v39, %v6389_v38  ;;  %v6422_v26 = vld [vmem:[%s11765_s13 + $0x1788] sm:$0xff] }
 0x8dd   : > { %10281 = vmatpush1.bf16.msra.mxu1 %v10280_v61  ;;  %10155 = vmatprep.subr.bf16.mxu0 %v10154_v63  ;;  %v6372_v61 = vld [vmem:[%s11765_s13 + $0x15f8] sm:$0xff]  ;;  %v10172_v63 = vpack.c.bf16 %v6361_v25, %v6357_v41  ;;  %v6395_v58 = vld [vmem:[%s11765_s13 + $0x16b0] sm:$0xff]  ;;  %v6425_v38 = vld [vmem:[%s11765_s13 + $0x17a0] sm:$0xff] }
 0x8de   : > { %10283 = vmatprep.subr.bf16.mxu1 %v10282_v4  ;;  %v6369_v4 = vld [vmem:[%s11765_s13 + $0x15e0] sm:$0xff]  ;;  %v10302_v16 = vpack.c.bf16 %v6372_v61, %v6368_v60  ;;  %v6400_v54 = vld [vmem:[%s11765_s13 + $0x16d8] sm:$0xff]  ;;  %v10316_v57 = vpack.c.bf16 %v6395_v58, %v6391_v45  ;;  %v6423_v39 = vld [vmem:[%s11765_s13 + $0x1790] sm:$0xff] }
 0x8df   : > { %v6397_v60 = vld [vmem:[%s11765_s13 + $0x16c0] sm:$0xff]  ;;  %v6427_v58 = vld [vmem:[%s11765_s13 + $0x17b0] sm:$0xff] }
 0x8e0   : > { %10157 = vmatpush1.bf16.msra.mxu0 %v10156_v36  ;;  %v6376_v36 = vld [vmem:[%s11765_s13 + $0x1618] sm:$0xff]  ;;  %v6401_v61 = vld [vmem:[%s11765_s13 + $0x16e0] sm:$0xff] }
 0x8e1   : > { %10285 = vmatpush1.bf16.msra.mxu1 %v10284_v53  ;;  %10159 = vmatprep.subr.bf16.mxu0 %v10158_v10  ;;  %v6380_v53 = vld [vmem:[%s11765_s13 + $0x1638] sm:$0xff]  ;;  %v10176_v10 = vpack.c.bf16 %v6369_v4, %v6365_v3  ;;  %v6406_v3 = vld [vmem:[%s11765_s13 + $0x1708] sm:$0xff]  ;;  %v10192_v9 = vpack.c.bf16 %v6401_v61, %v6397_v60  ;;  %v6435_v61 = vld [vmem:[%s11765_s13 + $0x17f0] sm:$0xff] }
 0x8e2   : > { %10287 = vmatprep.subr.bf16.mxu1 %v10286_v20  ;;  %v6377_v20 = vld [vmem:[%s11765_s13 + $0x1620] sm:$0xff]  ;;  %v10306_v15 = vpack.c.bf16 %v6380_v53, %v6376_v36  ;;  %v6410_v4 = vld [vmem:[%s11765_s13 + $0x1728] sm:$0xff] }
 0x8e3   : > { %v10194_v53 = vpack.c.bf16 %v6410_v4, %v6406_v3  ;;  %v6790_v3 = vld [vmem:[%s11765_s13 + $0x1818] sm:$0xff] }
 0x8e4   : > { %10161 = vmatpush1.bf16.msra.mxu0 %v10160_v11  ;;  %v6384_v11 = vld [vmem:[%s11765_s13 + $0x1658] sm:$0xff] }
 0x8e5   : > { %10289 = vmatpush1.bf16.msra.mxu1 %v10288_v21  ;;  %10163 = vmatprep.subr.bf16.mxu0 %v10162_v42  ;;  %v6388_v21 = vld [vmem:[%s11765_s13 + $0x1678] sm:$0xff]  ;;  %v10180_v42 = vpack.c.bf16 %v6377_v20, %v6373_v13  ;;  %v10322_v13 = vpack.c.bf16 %v6412_v35, %v6408_v8  ;;  %v6411_v20 = vld [vmem:[%s11765_s13 + $0x1730] sm:$0xff]  ;;  %v6787_v35 = vld [vmem:[%s11765_s13 + $0x1800] sm:$0xff] }
 0x8e6   : > { %10291 = vmatprep.subr.bf16.mxu1 %v10290_v17  ;;  %v10182_v17 = vpack.c.bf16 %v6386_v50, %v6382_v18  ;;  %v10310_v27 = vpack.c.bf16 %v6388_v21, %v6384_v11  ;;  %v6416_v50 = vld [vmem:[%s11765_s13 + $0x1758] sm:$0xff] }
 0x8e7   : > { %v6420_v11 = vld [vmem:[%s11765_s13 + $0x1778] sm:$0xff] }
 0x8e8   : > { %10165 = vmatpush1.bf16.msra.mxu0 %v10164_v30  ;;  %v6392_v30 = vld [vmem:[%s11765_s13 + $0x1698] sm:$0xff]  ;;  %v10326_v52 = vpack.c.bf16 %v6420_v11, %v6416_v50  ;;  %v6795_v50 = vld [vmem:[%s11765_s13 + $0x1840] sm:$0xff] }
 0x8e9   : > { %10293 = vmatpush1.bf16.msra.mxu1 %v10292_v31  ;;  %10167 = vmatprep.subr.bf16.mxu0 %v10166_v51  ;;  %v6396_v31 = vld [vmem:[%s11765_s13 + $0x16b8] sm:$0xff]  ;;  %v6799_v11 = vld [vmem:[%s11765_s13 + $0x1860] sm:$0xff] }
 0x8ea   : > { %10295 = vmatprep.subr.bf16.mxu1 %v10294_v37  ;;  %v6749_v51 = vld [vmem:[#allocation13 + $0xc] sm:$0xf]  ;;  %v10314_v37 = vpack.c.bf16 %v6396_v31, %v6392_v30 }
 0x8eb   : > { %v6762_v41 = vrot.slane %v6749_v51, %v13892_v62  ;;  %v6766_v25 = vrot.slane %v6749_v51, %v13894_v19  ;;  %v6424_v30 = vld [vmem:[%s11765_s13 + $0x1798] sm:$0xff] }
 0x8ec   : > { %10169 = vmatpush1.bf16.msra.mxu0 %v10168_v46  ;;  %v6402_v46 = vld [vmem:[%s11765_s13 + $0x16e8] sm:$0xff]  ;;  %v6428_v31 = vld [vmem:[%s11765_s13 + $0x17b8] sm:$0xff] }
 0x8ed   : > { %10297 = vmatpush1.bf16.msra.mxu1 %v10296_v47  ;;  %10171 = vmatprep.subr.bf16.mxu0 %v10170_v48  ;;  %v6754_v47 = vrot.slane %v6749_v51, %v13886_v33  ;;  %v6758_v48 = vrot.slane %v6749_v51, %v13890_v32  ;;  %v10190_v23 = vpack.c.bf16 %v6402_v46, %v6398_v6  ;;  %v6748_v51 = vld [vmem:[#allocation4 + $0x18] sm:$0xff]  ;;  %v6430_v6 = vld [vmem:[%s11765_s13 + $0x17c8] sm:$0xff] }
 0x8ee   : > { %10299 = vmatprep.subr.bf16.mxu1 %v10298_v55  ;;  %v6404_v55 = vld [vmem:[%s11765_s13 + $0x16f8] sm:$0xff]  ;;  %v10330_v45 = vpack.c.bf16 %v6428_v31, %v6424_v30  ;;  %v6434_v46 = vld [vmem:[%s11765_s13 + $0x17e8] sm:$0xff]  ;;  %v6803_v30 = vld [vmem:[%s11765_s13 + $0x1880] sm:$0xff] }
 0x8ef   : > { %v6767_v7 = vcombine.low %v6754_v47, %v6758_v48  ;;  %v6432_v48 = vld [vmem:[%s11765_s13 + $0x17d8] sm:$0xff]  ;;  %v6807_v31 = vld [vmem:[%s11765_s13 + $0x18a0] sm:$0xff] }
 0x8f0   : > { %10173 = vmatpush1.bf16.msra.mxu0 %v10172_v63  ;;  %v6399_v63 = vld [vmem:[%s11765_s13 + $0x16d0] sm:$0xff]  ;;  %v6794_v4 = vld [vmem:[%s11765_s13 + $0x1838] sm:$0xff] }
 0x8f1   : > { %10301 = vmatpush1.bf16.msra.mxu1 %v10300_v0  ;;  %10175 = vmatprep.subr.bf16.mxu0 %v10174_v2  ;;  %v10318_v0 = vpack.c.bf16 %v6404_v55, %v6400_v54  ;;  %v6403_v2 = vld [vmem:[%s11765_s13 + $0x16f0] sm:$0xff]  ;;  %v6775_v40 = vrot.slane %v6767_v7, %v13902_v28  ;;  %v10332_v54 = vpack.c.bf16 %v6427_v58, %v6423_v39 }
 0x8f2   : > { %10303 = vmatprep.subr.bf16.mxu1 %v10302_v16  ;;  %v6768_v16 = vcombine.low %v6762_v41, %v6766_v25  ;;  %v10320_v36 = vpack.c.bf16 %v6403_v2, %v6399_v63  ;;  %v6436_v41 = vld [vmem:[%s11765_s13 + $0x17f8] sm:$0xff]  ;;  %v10206_v55 = vpack.c.bf16 %v6434_v46, %v6430_v6  ;;  %v6788_v63 = vld [vmem:[%s11765_s13 + $0x1808] sm:$0xff]  ;;  %v10348_v39 = vpack.c.bf16 %v6807_v31, %v6803_v30  ;;  %v6811_v6 = vld [vmem:[%s11765_s13 + $0x18c0] sm:$0xff] }
 0x8f3   : > { %v10334_v60 = vpack.c.bf16 %v6436_v41, %v6432_v48  ;;  %v6815_v46 = vld [vmem:[%s11765_s13 + $0x18e0] sm:$0xff]  ;;  %v6817_v41 = vld [vmem:[%s11765_s13 + $0x18f0] sm:$0xff] }
 0x8f4   : > { %10177 = vmatpush1.bf16.msra.mxu0 %v10176_v10  ;;  %v6405_v10 = vld [vmem:[%s11765_s13 + $0x1700] sm:$0xff]  ;;  %v6782_v18 = vrot.slane %v6768_v16, %v13902_v28 }
 0x8f5   : > { %10305 = vmatpush1.bf16.msra.mxu1 %v10304_v12  ;;  %10179 = vmatprep.subr.bf16.mxu0 %v10178_v44  ;;  %v6409_v12 = vld [vmem:[%s11765_s13 + $0x1720] sm:$0xff]  ;;  %v6407_v44 = vld [vmem:[%s11765_s13 + $0x1710] sm:$0xff] }
 0x8f6   : > { %10307 = vmatprep.subr.bf16.mxu1 %v10306_v15  ;;  %v6418_v15 = vld [vmem:[%s11765_s13 + $0x1768] sm:$0xff]  ;;  %v10196_v21 = vpack.c.bf16 %v6409_v12, %v6405_v10  ;;  %v6783_v29 = vcombine.low %v6775_v40, %v6782_v18  ;;  %v6793_v10 = vld [vmem:[%s11765_s13 + $0x1830] sm:$0xff] }
 0x8f7   : > { %v10198_v43 = vpack.c.bf16 %v6418_v15, %v6414_v14  ;;  %v6796_v12 = vld [vmem:[%s11765_s13 + $0x1848] sm:$0xff]  ;;  %v6802_v14 = vld [vmem:[%s11765_s13 + $0x1878] sm:$0xff] }
 0x8f8   : > { %10181 = vmatpush1.bf16.msra.mxu0 %v10180_v42  ;;  %v10324_v42 = vpack.c.bf16 %v6411_v20, %v6407_v44  ;;  %v6785_v47 = vadd.f32 %v6783_v29, %v6748_v51  ;;  %v6800_v44 = vld [vmem:[%s11765_s13 + $0x1868] sm:$0xff]  ;;  %v6798_v20 = vld [vmem:[%s11765_s13 + $0x1858] sm:$0xff]  ;;  %v6805_v51 = vld [vmem:[%s11765_s13 + $0x1890] sm:$0xff] }
 0x8f9   : > { %10309 = vmatpush1.bf16.msra.mxu1 %v10308_v59  ;;  %10183 = vmatprep.subr.bf16.mxu0 %v10182_v17  ;;  %v6417_v59 = vld [vmem:[%s11765_s13 + $0x1760] sm:$0xff]  ;;  %v6415_v17 = vld [vmem:[%s11765_s13 + $0x1750] sm:$0xff]  ;;  %v10342_v18 = vpack.c.bf16 %v6800_v44, %v6796_v12 }
 0x8fa   : > { %10311 = vmatprep.subr.bf16.mxu1 %v10310_v27  ;;  %v6426_v27 = vld [vmem:[%s11765_s13 + $0x17a8] sm:$0xff]  ;;  %v14642_v2 = vmax.f32 %v6785_v47, 0.0  ;;  %v6813_v47 = vld [vmem:[%s11765_s13 + $0x18d0] sm:$0xff]  ;;  %v6831_v12 = vld [vmem:[%s11765_s13 + $0x1960] sm:$0xff] }
 0x8fb   : > { %v6829_v44 = vld [vmem:[%s11765_s13 + $0x1950] sm:$0xff] }
 0x8fc   : > { %10185 = vmatpush1.bf16.msra.mxu0 %v10184_v49  ;;  %v10200_v49 = vpack.c.bf16 %v6417_v59, %v6413_v22  ;;  %v6804_v22 = vld [vmem:[%s11765_s13 + $0x1888] sm:$0xff] }
 0x8fd   : > { %10313 = vmatpush1.bf16.msra.mxu1 %v10312_v5  ;;  %10187 = vmatprep.subr.bf16.mxu0 %v10186_v34  ;;  %v10328_v5 = vpack.c.bf16 %v6419_v24, %v6415_v17  ;;  %v10202_v34 = vpack.c.bf16 %v6426_v27, %v6422_v26  ;;  %v6808_v59 = vld [vmem:[%s11765_s13 + $0x18a8] sm:$0xff]  ;;  %v6810_v24 = vld [vmem:[%s11765_s13 + $0x18b8] sm:$0xff]  ;;  %v10344_v26 = vpack.c.bf16 %v6799_v11, %v6795_v50 }
 0x8fe   : > { %10315 = vmatprep.subr.bf16.mxu1 %v10314_v37  ;;  %v6421_v37 = vld [vmem:[%s11765_s13 + $0x1780] sm:$0xff]  ;;  %v10346_v29 = vpack.c.bf16 %v6808_v59, %v6804_v22  ;;  %v6842_v50 = vld [vmem:[%s11765_s13 + $0x19b8] sm:$0xff]  ;;  %v6837_v59 = vld [vmem:[%s11765_s13 + $0x1990] sm:$0xff] }
 0x8ff   : > { %v10204_v25 = vpack.c.bf16 %v6425_v38, %v6421_v37  ;;  %v6816_v37 = vld [vmem:[%s11765_s13 + $0x18e8] sm:$0xff]  ;;  %v6818_v38 = vld [vmem:[%s11765_s13 + $0x18f8] sm:$0xff]  ;;  %v6839_v22 = vld [vmem:[%s11765_s13 + $0x19a0] sm:$0xff] }
 0x900   : > { %10189 = vmatpush1.bf16.msra.mxu0 %v10188_v56  ;;  %v6429_v56 = vld [vmem:[%s11765_s13 + $0x17c0] sm:$0xff] }
 0x901   : > { %10317 = vmatpush1.bf16.msra.mxu1 %v10316_v57  ;;  %10191 = vmatprep.subr.bf16.mxu0 %v10190_v23  ;;  %v6433_v57 = vld [vmem:[%s11765_s13 + $0x17e0] sm:$0xff]  ;;  %v6431_v23 = vld [vmem:[%s11765_s13 + $0x17d0] sm:$0xff] }
 0x902   : > { %10319 = vmatprep.subr.bf16.mxu1 %v10318_v0  ;;  %v6792_v0 = vld [vmem:[%s11765_s13 + $0x1828] sm:$0xff]  ;;  %v10208_v7 = vpack.c.bf16 %v6433_v57, %v6429_v56  ;;  %v10336_v16 = vpack.c.bf16 %v6435_v61, %v6431_v23  ;;  %v6826_v56 = vld [vmem:[%s11765_s13 + $0x1938] sm:$0xff]  ;;  %v10352_v57 = vpack.c.bf16 %v6815_v46, %v6811_v6  ;;  %v10480_v23 = vpack.c.bf16 %v6817_v41, %v6813_v47  ;;  %v6819_v61 = vld [vmem:[%s11765_s13 + $0x1900] sm:$0xff] }
 0x903   : > { %v10338_v8 = vpack.c.bf16 %v6792_v0, %v6788_v63  ;;  %v6823_v63 = vld [vmem:[%s11765_s13 + $0x1920] sm:$0xff]  ;;  %v6821_v0 = vld [vmem:[%s11765_s13 + $0x1910] sm:$0xff] }
 0x904   : > { %10193 = vmatpush1.bf16.msra.mxu0 %v10192_v9  ;;  %v6791_v9 = vld [vmem:[%s11765_s13 + $0x1820] sm:$0xff] }
 0x905   : > { %10321 = vmatpush1.bf16.msra.mxu1 %v10320_v36  ;;  %10195 = vmatprep.subr.bf16.mxu0 %v10194_v53  ;;  %v6789_v36 = vld [vmem:[%s11765_s13 + $0x1810] sm:$0xff]  ;;  %v10466_v53 = vpack.c.bf16 %v6794_v4, %v6790_v3  ;;  %v10340_v15 = vpack.c.bf16 %v6791_v9, %v6787_v35  ;;  %v6834_v35 = vld [vmem:[%s11765_s13 + $0x1978] sm:$0xff]  ;;  %v10356_v9 = vpack.c.bf16 %v6823_v63, %v6819_v61  ;;  %v6855_v41 = vld [vmem:[%s11765_s13 + $0x1a20] sm:$0xff] }
 0x906   : > { %10323 = vmatprep.subr.bf16.mxu1 %v10322_v13  ;;  %v14654_v13 = vrot.slane %v14642_v2, %v13902_v28  ;;  %v10468_v40 = vpack.c.bf16 %v6793_v10, %v6789_v36  ;;  %v6825_v4 = vld [vmem:[%s11765_s13 + $0x1930] sm:$0xff]  ;;  %v6827_v10 = vld [vmem:[%s11765_s13 + $0x1940] sm:$0xff] }
 0x907   : > { %v10484_v36 = vpack.c.bf16 %v6825_v4, %v6821_v0  ;;  %v10360_v11 = vpack.c.bf16 %v6831_v12, %v6827_v10  ;;  %v6863_v4 = vld [vmem:[%s11765_s13 + $0x1a60] sm:$0xff] }
 0x908   : > { %10197 = vmatpush1.bf16.msra.mxu0 %v10196_v21  ;;  %v6797_v21 = vld [vmem:[%s11765_s13 + $0x1850] sm:$0xff]  ;;  %v7059_v17 = vcombine.high %v14654_v13, %v14654_v13 }
 0x909   : > { %10325 = vmatpush1.bf16.msra.mxu1 %v10324_v42  ;;  %10199 = vmatprep.subr.bf16.mxu0 %v10198_v43  ;;  %v10470_v42 = vpack.c.bf16 %v6802_v14, %v6798_v20  ;;  %v6801_v43 = vld [vmem:[%s11765_s13 + $0x1870] sm:$0xff] }
 0x90a   : > { %10327 = vmatprep.subr.bf16.mxu1 %v10326_v52  ;;  %v6806_v52 = vld [vmem:[%s11765_s13 + $0x1898] sm:$0xff]  ;;  %v10472_v27 = vpack.c.bf16 %v6801_v43, %v6797_v21  ;;  %v6833_v14 = vld [vmem:[%s11765_s13 + $0x1970] sm:$0xff]  ;;  %v6835_v43 = vld [vmem:[%s11765_s13 + $0x1980] sm:$0xff] }
 0x90b   : > { %v10488_v21 = vpack.c.bf16 %v6833_v14, %v6829_v44  ;;  %v10364_v30 = vpack.c.bf16 %v6839_v22, %v6835_v43  ;;  %v6871_v14 = vld [vmem:[%s11765_s13 + $0x1aa0] sm:$0xff] }
 0x90c   : > { %10201 = vmatpush1.bf16.msra.mxu0 %v10200_v49  ;;  %v10474_v49 = vpack.c.bf16 %v6810_v24, %v6806_v52  ;;  %v6841_v52 = vld [vmem:[%s11765_s13 + $0x19b0] sm:$0xff]  ;;  %v6844_v24 = vld [vmem:[%s11765_s13 + $0x19c8] sm:$0xff] }
 0x90d   : > { %10329 = vmatpush1.bf16.msra.mxu1 %v10328_v5  ;;  %10203 = vmatprep.subr.bf16.mxu0 %v10202_v34  ;;  %v6809_v5 = vld [vmem:[%s11765_s13 + $0x18b0] sm:$0xff]  ;;  %v6812_v34 = vld [vmem:[%s11765_s13 + $0x18c8] sm:$0xff]  ;;  %v10492_v31 = vpack.c.bf16 %v6841_v52, %v6837_v59  ;;  %v6879_v52 = vld [vmem:[%s11765_s13 + $0x1ae0] sm:$0xff] }
 0x90e   : > { %10331 = vmatprep.subr.bf16.mxu1 %v10330_v45  ;;  %v10476_v45 = vpack.c.bf16 %v6809_v5, %v6805_v51  ;;  %v10350_v58 = vpack.c.bf16 %v6816_v37, %v6812_v34  ;;  %v6847_v5 = vld [vmem:[%s11765_s13 + $0x19e0] sm:$0xff]  ;;  %v6845_v34 = vld [vmem:[%s11765_s13 + $0x19d0] sm:$0xff] }
 0x910   : > { %10205 = vmatpush1.bf16.msra.mxu0 %v10204_v25  ;;  %v6820_v25 = vld [vmem:[%s11765_s13 + $0x1908] sm:$0xff] }
 0x911   : > { %10333 = vmatpush1.bf16.msra.mxu1 %v10332_v54  ;;  %10207 = vmatprep.subr.bf16.mxu0 %v10206_v55  ;;  %v6824_v54 = vld [vmem:[%s11765_s13 + $0x1928] sm:$0xff]  ;;  %v6822_v55 = vld [vmem:[%s11765_s13 + $0x1918] sm:$0xff] }
 0x912   : > { %10335 = vmatprep.subr.bf16.mxu1 %v10334_v60  ;;  %v10354_v60 = vpack.c.bf16 %v6824_v54, %v6820_v25  ;;  %v10482_v3 = vpack.c.bf16 %v6826_v56, %v6822_v55  ;;  %v6853_v25 = vld [vmem:[%s11765_s13 + $0x1a10] sm:$0xff]  ;;  %v6860_v56 = vld [vmem:[%s11765_s13 + $0x1a48] sm:$0xff] }
 0x913   : > { %v6857_v55 = vld [vmem:[%s11765_s13 + $0x1a30] sm:$0xff] }
 0x914   : > { %10209 = vmatpush1.bf16.msra.mxu0 %v10208_v7  ;;  %v6828_v7 = vld [vmem:[%s11765_s13 + $0x1948] sm:$0xff]  ;;  %v10500_v63 = vpack.c.bf16 %v6857_v55, %v6853_v25  ;;  %v6895_v55 = vld [vmem:[%s11765_s13 + $0x1b60] sm:$0xff] }
 0x915   : > { %10337 = vmatpush1.bf16.msra.mxu1 %v10336_v16  ;;  %10339 = vmatprep.subr.bf16.mxu0 %v10338_v8  ;;  %v6832_v16 = vld [vmem:[%s11765_s13 + $0x1968] sm:$0xff]  ;;  %v6830_v8 = vld [vmem:[%s11765_s13 + $0x1958] sm:$0xff] }
 0x916   : > { %10467 = vmatprep.subr.bf16.mxu1 %v10466_v53  ;;  %v10358_v53 = vpack.c.bf16 %v6832_v16, %v6828_v7  ;;  %v10486_v20 = vpack.c.bf16 %v6834_v35, %v6830_v8  ;;  %v6861_v7 = vld [vmem:[%s11765_s13 + $0x1a50] sm:$0xff]  ;;  %v6868_v35 = vld [vmem:[%s11765_s13 + $0x1a88] sm:$0xff] }
 0x917   : > { %6595 = vmatmul.mubr.f32.vlgmr.msra.gmra.mrb[0].mxu0 %v14510_v1  ;;  %v6865_v8 = vld [vmem:[%s11765_s13 + $0x1a70] sm:$0xff] }
 0x918   : > { %6737 = vmatmul.mubr.f32.vlgmr.msra.gmra.mrb[0].mxu1 %v14510_v1  ;;  %10341 = vmatpush1.bf16.msra.mxu0 %v10340_v15  ;;  %v6814_v1 = vld [vmem:[%s11765_s13 + $0x18d8] sm:$0xff]  ;;  %v6836_v15 = vld [vmem:[%s11765_s13 + $0x1988] sm:$0xff]  ;;  %v10504_v12 = vpack.c.bf16 %v6865_v8, %v6861_v7  ;;  %v6903_v8 = vld [vmem:[%s11765_s13 + $0x1ba0] sm:$0xff] }
 0x919   : > { %10469 = vmatpush1.bf16.msra.mxu1 %v10468_v40  ;;  %10343 = vmatprep.subr.bf16.mxu0 %v10342_v18  ;;  %v10478_v48 = vpack.c.bf16 %v6818_v38, %v6814_v1  ;;  %v6840_v40 = vld [vmem:[%s11765_s13 + $0x19a8] sm:$0xff]  ;;  %v6838_v18 = vld [vmem:[%s11765_s13 + $0x1998] sm:$0xff]  ;;  %v6849_v1 = vld [vmem:[%s11765_s13 + $0x19f0] sm:$0xff] }
 0x91a   : > { %10471 = vmatprep.subr.bf16.mxu1 %v10470_v42  ;;  %7129 = vmatprep.mubr.f32.mxu0 %v7059_v17  ;;  %v10362_v42 = vpack.c.bf16 %v6840_v40, %v6836_v15  ;;  %v6852_v38 = vld [vmem:[%s11765_s13 + $0x1a08] sm:$0xff]  ;;  %v10496_v46 = vpack.c.bf16 %v6849_v1, %v6845_v34  ;;  %v6869_v15 = vld [vmem:[%s11765_s13 + $0x1a90] sm:$0xff]  ;;  %v6887_v1 = vld [vmem:[%s11765_s13 + $0x1b20] sm:$0xff] }
 0x91b   : > { %7271 = vmatprep.mubr.f32.mxu1 %v7059_v17  ;;  %v10490_v17 = vpack.c.bf16 %v6842_v50, %v6838_v18  ;;  %v6873_v18 = vld [vmem:[%s11765_s13 + $0x1ab0] sm:$0xff]  ;;  %v6876_v50 = vld [vmem:[%s11765_s13 + $0x1ac8] sm:$0xff] }
 0x91c   : > { %10345 = vmatpush1.bf16.msra.mxu0 %v10344_v26  ;;  %v6848_v26 = vld [vmem:[%s11765_s13 + $0x19e8] sm:$0xff]  ;;  %v10508_v22 = vpack.c.bf16 %v6873_v18, %v6869_v15  ;;  %v6911_v18 = vld [vmem:[%s11765_s13 + $0x1be0] sm:$0xff] }
 0x91d   : > { %10473 = vmatpush1.bf16.msra.mxu1 %v10472_v27  ;;  %10347 = vmatprep.subr.bf16.mxu0 %v10346_v29  ;;  %v6846_v27 = vld [vmem:[%s11765_s13 + $0x19d8] sm:$0xff]  ;;  %v10366_v51 = vpack.c.bf16 %v6848_v26, %v6844_v24  ;;  %v6877_v24 = vld [vmem:[%s11765_s13 + $0x1ad0] sm:$0xff] }
 0x91e   : > { %10475 = vmatprep.subr.bf16.mxu1 %v10474_v49  ;;  %v6850_v29 = vld [vmem:[%s11765_s13 + $0x19f8] sm:$0xff]  ;;  %v6843_v49 = vld [vmem:[%s11765_s13 + $0x19c0] sm:$0xff] }
 0x91f   : > { %v10494_v37 = vpack.c.bf16 %v6850_v29, %v6846_v27  ;;  %v10368_v6 = vpack.c.bf16 %v6847_v5, %v6843_v49  ;;  %v6881_v27 = vld [vmem:[%s11765_s13 + $0x1af0] sm:$0xff]  ;;  %v6884_v29 = vld [vmem:[%s11765_s13 + $0x1b08] sm:$0xff] }
 0x920   : > { %10349 = vmatpush1.bf16.msra.mxu0 %v10348_v39  ;;  %v6856_v39 = vld [vmem:[%s11765_s13 + $0x1a28] sm:$0xff]  ;;  %v10512_v5 = vpack.c.bf16 %v6881_v27, %v6877_v24  ;;  %v6915_v27 = vld [vmem:[%s11765_s13 + $0x1c00] sm:$0xff] }
 0x921   : > { %10477 = vmatpush1.bf16.msra.mxu1 %v10476_v45  ;;  %10351 = vmatprep.subr.bf16.mxu0 %v10350_v58  ;;  %v6854_v45 = vld [vmem:[%s11765_s13 + $0x1a18] sm:$0xff]  ;;  %v10370_v47 = vpack.c.bf16 %v6856_v39, %v6852_v38  ;;  %v6885_v38 = vld [vmem:[%s11765_s13 + $0x1b10] sm:$0xff] }
 0x922   : > { %10479 = vmatprep.subr.bf16.mxu1 %v10478_v48  ;;  %v6858_v58 = vld [vmem:[%s11765_s13 + $0x1a38] sm:$0xff]  ;;  %v6851_v48 = vld [vmem:[%s11765_s13 + $0x1a00] sm:$0xff] }
 0x923   : > { %v10498_v54 = vpack.c.bf16 %v6858_v58, %v6854_v45  ;;  %v10372_v61 = vpack.c.bf16 %v6855_v41, %v6851_v48  ;;  %v6889_v45 = vld [vmem:[%s11765_s13 + $0x1b30] sm:$0xff]  ;;  %v6892_v58 = vld [vmem:[%s11765_s13 + $0x1b48] sm:$0xff] }
 0x924   : > { %10353 = vmatpush1.bf16.msra.mxu0 %v10352_v57  ;;  %v6864_v57 = vld [vmem:[%s11765_s13 + $0x1a68] sm:$0xff]  ;;  %v10516_v41 = vpack.c.bf16 %v6889_v45, %v6885_v38  ;;  %v6923_v45 = vld [vmem:[%s11765_s13 + $0x1c40] sm:$0xff] }
 0x925   : > { %10481 = vmatpush1.bf16.msra.mxu1 %v10480_v23  ;;  %10355 = vmatprep.subr.bf16.mxu0 %v10354_v60  ;;  %v6862_v23 = vld [vmem:[%s11765_s13 + $0x1a58] sm:$0xff]  ;;  %v10374_v0 = vpack.c.bf16 %v6864_v57, %v6860_v56  ;;  %v6893_v56 = vld [vmem:[%s11765_s13 + $0x1b50] sm:$0xff] }
 0x926   : > { %10483 = vmatprep.subr.bf16.mxu1 %v10482_v3  ;;  %v6866_v60 = vld [vmem:[%s11765_s13 + $0x1a78] sm:$0xff]  ;;  %v6859_v3 = vld [vmem:[%s11765_s13 + $0x1a40] sm:$0xff] }
 0x927   : > { %v10502_v16 = vpack.c.bf16 %v6866_v60, %v6862_v23  ;;  %v10376_v10 = vpack.c.bf16 %v6863_v4, %v6859_v3  ;;  %v6897_v23 = vld [vmem:[%s11765_s13 + $0x1b70] sm:$0xff]  ;;  %v6900_v60 = vld [vmem:[%s11765_s13 + $0x1b88] sm:$0xff] }
 0x928   : > { %10357 = vmatpush1.bf16.msra.mxu0 %v10356_v9  ;;  %v6872_v9 = vld [vmem:[%s11765_s13 + $0x1aa8] sm:$0xff]  ;;  %v10520_v4 = vpack.c.bf16 %v6897_v23, %v6893_v56 }
 0x929   : > { %10485 = vmatpush1.bf16.msra.mxu1 %v10484_v36  ;;  %10359 = vmatprep.subr.bf16.mxu0 %v10358_v53  ;;  %v6870_v36 = vld [vmem:[%s11765_s13 + $0x1a98] sm:$0xff]  ;;  %v10378_v44 = vpack.c.bf16 %v6872_v9, %v6868_v35  ;;  %v6901_v35 = vld [vmem:[%s11765_s13 + $0x1b90] sm:$0xff] }
 0x92a   : > { %10487 = vmatprep.subr.bf16.mxu1 %v10486_v20  ;;  %v6874_v53 = vld [vmem:[%s11765_s13 + $0x1ab8] sm:$0xff]  ;;  %v6867_v20 = vld [vmem:[%s11765_s13 + $0x1a80] sm:$0xff] }
 0x92b   : > { %v10506_v40 = vpack.c.bf16 %v6874_v53, %v6870_v36  ;;  %v10380_v43 = vpack.c.bf16 %v6871_v14, %v6867_v20  ;;  %v6905_v36 = vld [vmem:[%s11765_s13 + $0x1bb0] sm:$0xff]  ;;  %v6908_v53 = vld [vmem:[%s11765_s13 + $0x1bc8] sm:$0xff] }
 0x92c   : > { %10361 = vmatpush1.bf16.msra.mxu0 %v10360_v11  ;;  %v6880_v11 = vld [vmem:[%s11765_s13 + $0x1ae8] sm:$0xff]  ;;  %v10524_v14 = vpack.c.bf16 %v6905_v36, %v6901_v35  ;;  %v6939_v36 = vld [vmem:[%s11765_s13 + $0x1cc0] sm:$0xff] }
 0x92d   : > { %10489 = vmatpush1.bf16.msra.mxu1 %v10488_v21  ;;  %10363 = vmatprep.subr.bf16.mxu0 %v10362_v42  ;;  %v6878_v21 = vld [vmem:[%s11765_s13 + $0x1ad8] sm:$0xff]  ;;  %v10382_v59 = vpack.c.bf16 %v6880_v11, %v6876_v50  ;;  %v6909_v50 = vld [vmem:[%s11765_s13 + $0x1bd0] sm:$0xff] }
 0x92e   : > { %10491 = vmatprep.subr.bf16.mxu1 %v10490_v17  ;;  %v6882_v42 = vld [vmem:[%s11765_s13 + $0x1af8] sm:$0xff]  ;;  %v6875_v17 = vld [vmem:[%s11765_s13 + $0x1ac0] sm:$0xff] }
 0x92f   : > { %v10510_v26 = vpack.c.bf16 %v6882_v42, %v6878_v21  ;;  %v10384_v49 = vpack.c.bf16 %v6879_v52, %v6875_v17  ;;  %v6913_v21 = vld [vmem:[%s11765_s13 + $0x1bf0] sm:$0xff]  ;;  %v6916_v42 = vld [vmem:[%s11765_s13 + $0x1c08] sm:$0xff]  ;;  %v6922_v17 = vld [vmem:[%s11765_s13 + $0x1c38] sm:$0xff] }
 0x930   : > { %10365 = vmatpush1.bf16.msra.mxu0 %v10364_v30  ;;  %v6888_v30 = vld [vmem:[%s11765_s13 + $0x1b28] sm:$0xff]  ;;  %v10528_v24 = vpack.c.bf16 %v6913_v21, %v6909_v50  ;;  %v6947_v21 = vld [vmem:[%s11765_s13 + $0x1d00] sm:$0xff] }
 0x931   : > { %10493 = vmatpush1.bf16.msra.mxu1 %v10492_v31  ;;  %10367 = vmatprep.subr.bf16.mxu0 %v10366_v51  ;;  %v6886_v31 = vld [vmem:[%s11765_s13 + $0x1b18] sm:$0xff]  ;;  %v10386_v34 = vpack.c.bf16 %v6888_v30, %v6884_v29  ;;  %v6919_v29 = vld [vmem:[%s11765_s13 + $0x1c20] sm:$0xff]  ;;  %v6917_v30 = vld [vmem:[%s11765_s13 + $0x1c10] sm:$0xff] }
 0x932   : > { %10495 = vmatprep.subr.bf16.mxu1 %v10494_v37  ;;  %v6890_v51 = vld [vmem:[%s11765_s13 + $0x1b38] sm:$0xff]  ;;  %v6883_v37 = vld [vmem:[%s11765_s13 + $0x1b00] sm:$0xff] }
 0x933   : > { %v10514_v39 = vpack.c.bf16 %v6890_v51, %v6886_v31  ;;  %v10388_v48 = vpack.c.bf16 %v6887_v1, %v6883_v37  ;;  %v6924_v51 = vld [vmem:[%s11765_s13 + $0x1c48] sm:$0xff]  ;;  %v6930_v37 = vld [vmem:[%s11765_s13 + $0x1c78] sm:$0xff]  ;;  %v10404_v1 = vpack.c.bf16 %v6919_v29, %v6915_v27 }
 0x934   : > { %10369 = vmatpush1.bf16.msra.mxu0 %v10368_v6  ;;  %v6896_v6 = vld [vmem:[%s11765_s13 + $0x1b68] sm:$0xff] }
 0x935   : > { %10497 = vmatpush1.bf16.msra.mxu1 %v10496_v46  ;;  %10371 = vmatprep.subr.bf16.mxu0 %v10370_v47  ;;  %v6894_v46 = vld [vmem:[%s11765_s13 + $0x1b58] sm:$0xff]  ;;  %v10390_v25 = vpack.c.bf16 %v6896_v6, %v6892_v58  ;;  %v6927_v58 = vld [vmem:[%s11765_s13 + $0x1c60] sm:$0xff]  ;;  %v6925_v6 = vld [vmem:[%s11765_s13 + $0x1c50] sm:$0xff] }
 0x936   : > { %10499 = vmatprep.subr.bf16.mxu1 %v10498_v54  ;;  %v6898_v47 = vld [vmem:[%s11765_s13 + $0x1b78] sm:$0xff]  ;;  %v6891_v54 = vld [vmem:[%s11765_s13 + $0x1b40] sm:$0xff]  ;;  %v10408_v56 = vpack.c.bf16 %v6927_v58, %v6923_v45 }
 0x937   : > { %v10518_v57 = vpack.c.bf16 %v6898_v47, %v6894_v46  ;;  %v10392_v3 = vpack.c.bf16 %v6895_v55, %v6891_v54  ;;  %v6929_v47 = vld [vmem:[%s11765_s13 + $0x1c70] sm:$0xff]  ;;  %v6934_v54 = vld [vmem:[%s11765_s13 + $0x1c98] sm:$0xff] }
 0x938   : > { %10373 = vmatpush1.bf16.msra.mxu0 %v10372_v61  ;;  %v6904_v61 = vld [vmem:[%s11765_s13 + $0x1ba8] sm:$0xff]  ;;  %v6938_v55 = vld [vmem:[%s11765_s13 + $0x1cb8] sm:$0xff] }
 0x939   : > { %10501 = vmatpush1.bf16.msra.mxu1 %v10500_v63  ;;  %10375 = vmatprep.subr.bf16.mxu0 %v10374_v0  ;;  %v6902_v63 = vld [vmem:[%s11765_s13 + $0x1b98] sm:$0xff]  ;;  %v10394_v7 = vpack.c.bf16 %v6904_v61, %v6900_v60  ;;  %v6931_v60 = vld [vmem:[%s11765_s13 + $0x1c80] sm:$0xff] }
 0x93a   : > { %10503 = vmatprep.subr.bf16.mxu1 %v10502_v16  ;;  %v6906_v0 = vld [vmem:[%s11765_s13 + $0x1bb8] sm:$0xff]  ;;  %v6899_v16 = vld [vmem:[%s11765_s13 + $0x1b80] sm:$0xff] }
 0x93b   : > { %v10522_v9 = vpack.c.bf16 %v6906_v0, %v6902_v63  ;;  %v10396_v20 = vpack.c.bf16 %v6903_v8, %v6899_v16  ;;  %v6935_v61 = vld [vmem:[%s11765_s13 + $0x1ca0] sm:$0xff]  ;;  %v6933_v63 = vld [vmem:[%s11765_s13 + $0x1c90] sm:$0xff]  ;;  %v10538_v0 = vpack.c.bf16 %v6938_v55, %v6934_v54  ;;  %v6946_v16 = vld [vmem:[%s11765_s13 + $0x1cf8] sm:$0xff] }
 0x93c   : > { %10377 = vmatpush1.bf16.msra.mxu0 %v10376_v10  ;;  %v6912_v10 = vld [vmem:[%s11765_s13 + $0x1be8] sm:$0xff]  ;;  %v10412_v8 = vpack.c.bf16 %v6935_v61, %v6931_v60 }
 0x93d   : > { %10505 = vmatpush1.bf16.msra.mxu1 %v10504_v12  ;;  %10379 = vmatprep.subr.bf16.mxu0 %v10378_v44  ;;  %v6910_v12 = vld [vmem:[%s11765_s13 + $0x1bd8] sm:$0xff]  ;;  %v10398_v15 = vpack.c.bf16 %v6912_v10, %v6908_v53  ;;  %v6943_v53 = vld [vmem:[%s11765_s13 + $0x1ce0] sm:$0xff]  ;;  %v6941_v10 = vld [vmem:[%s11765_s13 + $0x1cd0] sm:$0xff] }
 0x93e   : > { %10507 = vmatprep.subr.bf16.mxu1 %v10506_v40  ;;  %v6914_v44 = vld [vmem:[%s11765_s13 + $0x1bf8] sm:$0xff]  ;;  %v6907_v40 = vld [vmem:[%s11765_s13 + $0x1bc0] sm:$0xff]  ;;  %v6972_v54 = vld [vmem:[%s11765_s13 + $0x1dc8] sm:$0xff] }
 0x93f   : > { %v10526_v11 = vpack.c.bf16 %v6914_v44, %v6910_v12  ;;  %v10400_v52 = vpack.c.bf16 %v6911_v18, %v6907_v40  ;;  %v6945_v44 = vld [vmem:[%s11765_s13 + $0x1cf0] sm:$0xff]  ;;  %v6954_v40 = vld [vmem:[%s11765_s13 + $0x1d38] sm:$0xff]  ;;  %v10416_v18 = vpack.c.bf16 %v6943_v53, %v6939_v36  ;;  %v6976_v55 = vld [vmem:[%s11765_s13 + $0x1de8] sm:$0xff] }
 0x940   : > { %10381 = vmatpush1.bf16.msra.mxu0 %v10380_v43  ;;  %v6920_v43 = vld [vmem:[%s11765_s13 + $0x1c28] sm:$0xff]  ;;  %v10544_v50 = vpack.c.bf16 %v6945_v44, %v6941_v10  ;;  %v10430_v61 = vpack.c.bf16 %v6976_v55, %v6972_v54  ;;  %v6979_v10 = vld [vmem:[%s11765_s13 + $0x1e00] sm:$0xff]  ;;  %v6981_v44 = vld [vmem:[%s11765_s13 + $0x1e10] sm:$0xff] }
 0x941   : > { %10509 = vmatpush1.bf16.msra.mxu1 %v10508_v22  ;;  %10383 = vmatprep.subr.bf16.mxu0 %v10382_v59  ;;  %v7044_v22 = vcombine.high %v14642_v2, %v14642_v2  ;;  %v6918_v59 = vld [vmem:[%s11765_s13 + $0x1c18] sm:$0xff]  ;;  %v6921_v2 = vld [vmem:[%s11765_s13 + $0x1c30] sm:$0xff] }
 0x942   : > { %10511 = vmatprep.subr.bf16.mxu1 %v10510_v26  ;;  %v10402_v26 = vpack.c.bf16 %v6920_v43, %v6916_v42  ;;  %v10530_v31 = vpack.c.bf16 %v6922_v17, %v6918_v59  ;;  %v10532_v38 = vpack.c.bf16 %v6921_v2, %v6917_v30  ;;  %v6951_v42 = vld [vmem:[%s11765_s13 + $0x1d20] sm:$0xff]  ;;  %v6949_v43 = vld [vmem:[%s11765_s13 + $0x1d10] sm:$0xff]  ;;  %v6956_v17 = vld [vmem:[%s11765_s13 + $0x1d48] sm:$0xff] }
 0x943   : > { %v6953_v59 = vld [vmem:[%s11765_s13 + $0x1d30] sm:$0xff]  ;;  %v10420_v27 = vpack.c.bf16 %v6951_v42, %v6947_v21  ;;  %v6959_v2 = vld [vmem:[%s11765_s13 + $0x1d60] sm:$0xff] }
 0x944   : > { %10385 = vmatpush1.bf16.msra.mxu0 %v10384_v49  ;;  %v6928_v49 = vld [vmem:[%s11765_s13 + $0x1c68] sm:$0xff]  ;;  %v10548_v29 = vpack.c.bf16 %v6953_v59, %v6949_v43  ;;  %v6987_v43 = vld [vmem:[%s11765_s13 + $0x1e40] sm:$0xff]  ;;  %v6989_v59 = vld [vmem:[%s11765_s13 + $0x1e50] sm:$0xff] }
 0x945   : > { %10513 = vmatpush1.bf16.msra.mxu1 %v10512_v5  ;;  %10387 = vmatprep.subr.bf16.mxu0 %v10386_v34  ;;  %v14791_v5 = vrot.slane %v7044_v22, %v13902_v28  ;;  %v6926_v34 = vld [vmem:[%s11765_s13 + $0x1c58] sm:$0xff]  ;;  %v7009_v55 = vld [vmem:[%s11765_s13 + $0x1ef0] sm:$0xff] }
 0x946   : > { %10515 = vmatprep.subr.bf16.mxu1 %v10514_v39  ;;  %v10406_v39 = vpack.c.bf16 %v6928_v49, %v6924_v51  ;;  %v10534_v46 = vpack.c.bf16 %v6930_v37, %v6926_v34  ;;  %v6957_v51 = vld [vmem:[%s11765_s13 + $0x1d50] sm:$0xff]  ;;  %v6964_v37 = vld [vmem:[%s11765_s13 + $0x1d88] sm:$0xff] }
 0x947   : > { %v6961_v34 = vld [vmem:[%s11765_s13 + $0x1d70] sm:$0xff] }
 0x948   : > { %10389 = vmatpush1.bf16.msra.mxu0 %v10388_v48  ;;  %v6932_v48 = vld [vmem:[%s11765_s13 + $0x1c88] sm:$0xff]  ;;  %v10552_v58 = vpack.c.bf16 %v6961_v34, %v6957_v51  ;;  %v6995_v51 = vld [vmem:[%s11765_s13 + $0x1e80] sm:$0xff]  ;;  %v6997_v34 = vld [vmem:[%s11765_s13 + $0x1e90] sm:$0xff] }
 0x949   : > { %10517 = vmatpush1.bf16.msra.mxu1 %v10516_v41  ;;  %10391 = vmatprep.subr.bf16.mxu0 %v10390_v25  ;;  %v6936_v41 = vld [vmem:[%s11765_s13 + $0x1ca8] sm:$0xff]  ;;  %v7060_v25 = vcombine.high %v14791_v5, %v14791_v5 }
 0x94a   : > { %10519 = vmatprep.subr.bf16.mxu1 %v10518_v57  ;;  %v10536_v57 = vpack.c.bf16 %v6929_v47, %v6925_v6  ;;  %v10410_v23 = vpack.c.bf16 %v6936_v41, %v6932_v48  ;;  %v6967_v47 = vld [vmem:[%s11765_s13 + $0x1da0] sm:$0xff]  ;;  %v6965_v48 = vld [vmem:[%s11765_s13 + $0x1d90] sm:$0xff] }
 0x94c   : > { %10393 = vmatpush1.bf16.msra.mxu0 %v10392_v3  ;;  %v6937_v3 = vld [vmem:[%s11765_s13 + $0x1cb0] sm:$0xff] }
 0x94d   : > { %10521 = vmatpush1.bf16.msra.mxu1 %v10520_v4  ;;  %10395 = vmatprep.subr.bf16.mxu0 %v10394_v7  ;;  %v6940_v4 = vld [vmem:[%s11765_s13 + $0x1cc8] sm:$0xff]  ;;  %v10540_v35 = vpack.c.bf16 %v6937_v3, %v6933_v63  ;;  %v6971_v63 = vld [vmem:[%s11765_s13 + $0x1dc0] sm:$0xff]  ;;  %v6973_v3 = vld [vmem:[%s11765_s13 + $0x1dd0] sm:$0xff] }
 0x94e   : > { %10523 = vmatprep.subr.bf16.mxu1 %v10522_v9  ;;  %v6944_v7 = vld [vmem:[%s11765_s13 + $0x1ce8] sm:$0xff] }
 0x94f   : > { %v10414_v9 = vpack.c.bf16 %v6944_v7, %v6940_v4  ;;  %v6977_v7 = vld [vmem:[%s11765_s13 + $0x1df0] sm:$0xff] }
 0x950   : > { %10397 = vmatpush1.bf16.msra.mxu0 %v10396_v20  ;;  %v6948_v20 = vld [vmem:[%s11765_s13 + $0x1d08] sm:$0xff]  ;;  %v10560_v36 = vpack.c.bf16 %v6977_v7, %v6973_v3  ;;  %v7011_v3 = vld [vmem:[%s11765_s13 + $0x1f00] sm:$0xff]  ;;  %v7013_v7 = vld [vmem:[%s11765_s13 + $0x1f10] sm:$0xff] }
 0x951   : > { %10525 = vmatpush1.bf16.msra.mxu1 %v10524_v14  ;;  %10399 = vmatprep.subr.bf16.mxu0 %v10398_v15  ;;  %v6952_v14 = vld [vmem:[%s11765_s13 + $0x1d28] sm:$0xff]  ;;  %v6950_v15 = vld [vmem:[%s11765_s13 + $0x1d18] sm:$0xff] }
 0x952   : > { %10527 = vmatprep.subr.bf16.mxu1 %v10526_v11  ;;  %v10418_v11 = vpack.c.bf16 %v6952_v14, %v6948_v20  ;;  %v10546_v22 = vpack.c.bf16 %v6954_v40, %v6950_v15  ;;  %v6985_v14 = vld [vmem:[%s11765_s13 + $0x1e30] sm:$0xff]  ;;  %v6988_v15 = vld [vmem:[%s11765_s13 + $0x1e48] sm:$0xff] }
 0x953   : > { %v6992_v40 = vld [vmem:[%s11765_s13 + $0x1e68] sm:$0xff]  ;;  %v10564_v21 = vpack.c.bf16 %v6985_v14, %v6981_v44  ;;  %v7019_v44 = vld [vmem:[%s11765_s13 + $0x1f40] sm:$0xff]  ;;  %v7021_v14 = vld [vmem:[%s11765_s13 + $0x1f50] sm:$0xff] }
 0x954   : > { %10401 = vmatpush1.bf16.msra.mxu0 %v10400_v52  ;;  %v6960_v52 = vld [vmem:[%s11765_s13 + $0x1d68] sm:$0xff]  ;;  %v10438_v42 = vpack.c.bf16 %v6992_v40, %v6988_v15  ;;  %v7025_v40 = vld [vmem:[%s11765_s13 + $0x1f70] sm:$0xff] }
 0x955   : > { %10529 = vmatpush1.bf16.msra.mxu1 %v10528_v24  ;;  %10403 = vmatprep.subr.bf16.mxu0 %v10402_v26  ;;  %v6958_v24 = vld [vmem:[%s11765_s13 + $0x1d58] sm:$0xff]  ;;  %v10422_v30 = vpack.c.bf16 %v6960_v52, %v6956_v17  ;;  %v6993_v52 = vld [vmem:[%s11765_s13 + $0x1e70] sm:$0xff] }
 0x956   : > { %10531 = vmatprep.subr.bf16.mxu1 %v10530_v31  ;;  %v6962_v26 = vld [vmem:[%s11765_s13 + $0x1d78] sm:$0xff]  ;;  %v6955_v31 = vld [vmem:[%s11765_s13 + $0x1d40] sm:$0xff] }
 0x957   : > { %7130 = vmatmul.mubr.f32.vlgmr.msra.gmra.mrb[0].mxu0 %v14654_v13  ;;  %v10550_v49 = vpack.c.bf16 %v6962_v26, %v6958_v24  ;;  %v10424_v45 = vpack.c.bf16 %v6959_v2, %v6955_v31  ;;  %v6996_v24 = vld [vmem:[%s11765_s13 + $0x1e88] sm:$0xff]  ;;  %v10568_v31 = vpack.c.bf16 %v6993_v52, %v6989_v59  ;;  %v7027_v59 = vld [vmem:[%s11765_s13 + $0x1f80] sm:$0xff]  ;;  %v7029_v52 = vld [vmem:[%s11765_s13 + $0x1f90] sm:$0xff] }
 0x958   : > { %10405 = vmatpush1.bf16.msra.mxu0 %v10404_v1  ;;  %7272 = vmatmul.mubr.f32.vlgmr.msra.gmra.mrb[0].mxu1 %v14654_v13  ;;  %v6942_v13 = vld [vmem:[%s11765_s13 + $0x1cd8] sm:$0xff]  ;;  %v6968_v1 = vld [vmem:[%s11765_s13 + $0x1da8] sm:$0xff] }
 0x959   : > { %10533 = vmatpush1.bf16.msra.mxu1 %v10532_v38  ;;  %10407 = vmatprep.subr.bf16.mxu0 %v10406_v39  ;;  %v10542_v12 = vpack.c.bf16 %v6946_v16, %v6942_v13  ;;  %v6966_v38 = vld [vmem:[%s11765_s13 + $0x1d98] sm:$0xff]  ;;  %v10426_v6 = vpack.c.bf16 %v6968_v1, %v6964_v37  ;;  %v6980_v13 = vld [vmem:[%s11765_s13 + $0x1e08] sm:$0xff]  ;;  %v7001_v1 = vld [vmem:[%s11765_s13 + $0x1eb0] sm:$0xff] }
 0x95a   : > { %10535 = vmatprep.subr.bf16.mxu1 %v10534_v46  ;;  %7200 = vmatprep.mubr.f32.mxu0 %v7060_v25  ;;  %v6970_v39 = vld [vmem:[%s11765_s13 + $0x1db8] sm:$0xff]  ;;  %v6963_v46 = vld [vmem:[%s11765_s13 + $0x1d80] sm:$0xff]  ;;  %v6984_v16 = vld [vmem:[%s11765_s13 + $0x1e28] sm:$0xff] }
 0x95b   : > { %7342 = vmatprep.mubr.f32.mxu1 %v7060_v25  ;;  %v10554_v41 = vpack.c.bf16 %v6970_v39, %v6966_v38  ;;  %v6969_v25 = vld [vmem:[%s11765_s13 + $0x1db0] sm:$0xff]  ;;  %v10434_v53 = vpack.c.bf16 %v6984_v16, %v6980_v13  ;;  %v7000_v26 = vld [vmem:[%s11765_s13 + $0x1ea8] sm:$0xff] }
 0x95c   : > { %10409 = vmatpush1.bf16.msra.mxu0 %v10408_v56  ;;  %v6974_v56 = vld [vmem:[%s11765_s13 + $0x1dd8] sm:$0xff]  ;;  %v10556_v60 = vpack.c.bf16 %v6969_v25, %v6965_v48  ;;  %v10442_v2 = vpack.c.bf16 %v7000_v26, %v6996_v24  ;;  %v7004_v38 = vld [vmem:[%s11765_s13 + $0x1ec8] sm:$0xff]  ;;  %v7003_v48 = vld [vmem:[%s11765_s13 + $0x1ec0] sm:$0xff] }
 0x95d   : > { %10537 = vmatpush1.bf16.msra.mxu1 %v10536_v57  ;;  %10411 = vmatprep.subr.bf16.mxu0 %v10410_v23  ;;  %v6978_v57 = vld [vmem:[%s11765_s13 + $0x1df8] sm:$0xff]  ;;  %v10428_v23 = vpack.c.bf16 %v6967_v47, %v6963_v46  ;;  %v7008_v39 = vld [vmem:[%s11765_s13 + $0x1ee8] sm:$0xff]  ;;  %v10572_v46 = vpack.c.bf16 %v7001_v1, %v6997_v34  ;;  %v7005_v25 = vld [vmem:[%s11765_s13 + $0x1ed0] sm:$0xff] }
 0x95e   : > { %10539 = vmatprep.subr.bf16.mxu1 %v10538_v0  ;;  %v6975_v0 = vld [vmem:[%s11765_s13 + $0x1de0] sm:$0xff]  ;;  %v10558_v4 = vpack.c.bf16 %v6978_v57, %v6974_v56  ;;  %v10446_v47 = vpack.c.bf16 %v7008_v39, %v7004_v38  ;;  %v7012_v56 = vld [vmem:[%s11765_s13 + $0x1f08] sm:$0xff]  ;;  %v7017_v16 = vld [vmem:[%s11765_s13 + $0x1f30] sm:$0xff] }
 0x95f   : > { %v7016_v57 = vld [vmem:[%s11765_s13 + $0x1f28] sm:$0xff]  ;;  %v7033_v26 = vld [vmem:[%s11765_s13 + $0x1fb0] sm:$0xff]  ;;  %v7035_v34 = vld [vmem:[%s11765_s13 + $0x1fc0] sm:$0xff] }
 0x960   : > { %10413 = vmatpush1.bf16.msra.mxu0 %v10412_v8  ;;  %v6982_v8 = vld [vmem:[%s11765_s13 + $0x1e18] sm:$0xff]  ;;  %v7037_v38 = vld [vmem:[%s11765_s13 + $0x1fd0] sm:$0xff] }
 0x961   : > { %10541 = vmatpush1.bf16.msra.mxu1 %v10540_v35  ;;  %10415 = vmatprep.subr.bf16.mxu0 %v10414_v9  ;;  %v6986_v35 = vld [vmem:[%s11765_s13 + $0x1e38] sm:$0xff]  ;;  %v10432_v9 = vpack.c.bf16 %v6975_v0, %v6971_v63  ;;  %v10576_v63 = vpack.c.bf16 %v7009_v55, %v7005_v25  ;;  %v10450_v0 = vpack.c.bf16 %v7016_v57, %v7012_v56  ;;  %v7041_v39 = vld [vmem:[%s11765_s13 + $0x1ff0] sm:$0xff] }
 0x962   : > { %10543 = vmatprep.subr.bf16.mxu1 %v10542_v12  ;;  %v6983_v12 = vld [vmem:[%s11765_s13 + $0x1e20] sm:$0xff]  ;;  %v10562_v20 = vpack.c.bf16 %v6986_v35, %v6982_v8  ;;  %v7020_v8 = vld [vmem:[%s11765_s13 + $0x1f48] sm:$0xff] }
 0x963   : > { %v7024_v35 = vld [vmem:[%s11765_s13 + $0x1f68] sm:$0xff] }
 0x964   : > { %10417 = vmatpush1.bf16.msra.mxu0 %v10416_v18  ;;  %v6990_v18 = vld [vmem:[%s11765_s13 + $0x1e58] sm:$0xff] }
 0x965   : > { %10545 = vmatpush1.bf16.msra.mxu1 %v10544_v50  ;;  %10419 = vmatprep.subr.bf16.mxu0 %v10418_v11  ;;  %v6994_v50 = vld [vmem:[%s11765_s13 + $0x1e78] sm:$0xff]  ;;  %v10436_v11 = vpack.c.bf16 %v6983_v12, %v6979_v10  ;;  %v10580_v10 = vpack.c.bf16 %v7017_v16, %v7013_v7  ;;  %v10454_v12 = vpack.c.bf16 %v7024_v35, %v7020_v8 }
 0x966   : > { %10547 = vmatprep.subr.bf16.mxu1 %v10546_v22  ;;  %v6991_v22 = vld [vmem:[%s11765_s13 + $0x1e60] sm:$0xff]  ;;  %v10566_v17 = vpack.c.bf16 %v6994_v50, %v6990_v18  ;;  %v7028_v18 = vld [vmem:[%s11765_s13 + $0x1f88] sm:$0xff] }
 0x967   : > { %v7032_v50 = vld [vmem:[%s11765_s13 + $0x1fa8] sm:$0xff] }
 0x968   : > { %10421 = vmatpush1.bf16.msra.mxu0 %v10420_v27  ;;  %v6998_v27 = vld [vmem:[%s11765_s13 + $0x1e98] sm:$0xff] }
 0x969   : > { %10549 = vmatpush1.bf16.msra.mxu1 %v10548_v29  ;;  %10423 = vmatprep.subr.bf16.mxu0 %v10422_v30  ;;  %v7002_v29 = vld [vmem:[%s11765_s13 + $0x1eb8] sm:$0xff]  ;;  %v10440_v30 = vpack.c.bf16 %v6991_v22, %v6987_v43  ;;  %v10584_v43 = vpack.c.bf16 %v7025_v40, %v7021_v14  ;;  %v10458_v22 = vpack.c.bf16 %v7032_v50, %v7028_v18 }
 0x96a   : > { %10551 = vmatprep.subr.bf16.mxu1 %v10550_v49  ;;  %v6999_v49 = vld [vmem:[%s11765_s13 + $0x1ea0] sm:$0xff]  ;;  %v10570_v37 = vpack.c.bf16 %v7002_v29, %v6998_v27  ;;  %v7036_v27 = vld [vmem:[%s11765_s13 + $0x1fc8] sm:$0xff] }
 0x96b   : > { %v7040_v29 = vld [vmem:[%s11765_s13 + $0x1fe8] sm:$0xff] }
 0x96c   : > { %10425 = vmatpush1.bf16.msra.mxu0 %v10424_v45  ;;  %v7006_v45 = vld [vmem:[%s11765_s13 + $0x1ed8] sm:$0xff] }
 0x96d   : > { %10553 = vmatpush1.bf16.msra.mxu1 %v10552_v58  ;;  %10427 = vmatprep.subr.bf16.mxu0 %v10426_v6  ;;  %v7010_v58 = vld [vmem:[%s11765_s13 + $0x1ef8] sm:$0xff]  ;;  %v10444_v6 = vpack.c.bf16 %v6999_v49, %v6995_v51  ;;  %v10588_v51 = vpack.c.bf16 %v7033_v26, %v7029_v52  ;;  %v10462_v49 = vpack.c.bf16 %v7040_v29, %v7036_v27 }
 0x96e   : > { %10555 = vmatprep.subr.bf16.mxu1 %v10554_v41  ;;  %v7007_v41 = vld [vmem:[%s11765_s13 + $0x1ee0] sm:$0xff]  ;;  %v10574_v54 = vpack.c.bf16 %v7010_v58, %v7006_v45  ;;  %v10592_v58 = vpack.c.bf16 %v7041_v39, %v7037_v38 }
 0x970   : > { %10429 = vmatpush1.bf16.msra.mxu0 %v10428_v23  ;;  %v7014_v23 = vld [vmem:[%s11765_s13 + $0x1f18] sm:$0xff] }
 0x971   : > { %10557 = vmatpush1.bf16.msra.mxu1 %v10556_v60  ;;  %10431 = vmatprep.subr.bf16.mxu0 %v10430_v61  ;;  %v7018_v60 = vld [vmem:[%s11765_s13 + $0x1f38] sm:$0xff]  ;;  %v10448_v61 = vpack.c.bf16 %v7007_v41, %v7003_v48 }
 0x972   : > { %10559 = vmatprep.subr.bf16.mxu1 %v10558_v4  ;;  %v7015_v4 = vld [vmem:[%s11765_s13 + $0x1f20] sm:$0xff]  ;;  %v10578_v13 = vpack.c.bf16 %v7018_v60, %v7014_v23 }
 0x974   : > { %10433 = vmatpush1.bf16.msra.mxu0 %v10432_v9  ;;  %v7022_v9 = vld [vmem:[%s11765_s13 + $0x1f58] sm:$0xff] }
 0x975   : > { %10561 = vmatpush1.bf16.msra.mxu1 %v10560_v36  ;;  %10435 = vmatprep.subr.bf16.mxu0 %v10434_v53  ;;  %v7026_v36 = vld [vmem:[%s11765_s13 + $0x1f78] sm:$0xff]  ;;  %v10452_v53 = vpack.c.bf16 %v7015_v4, %v7011_v3 }
 0x976   : > { %10563 = vmatprep.subr.bf16.mxu1 %v10562_v20  ;;  %v7023_v20 = vld [vmem:[%s11765_s13 + $0x1f60] sm:$0xff]  ;;  %v10582_v15 = vpack.c.bf16 %v7026_v36, %v7022_v9 }
 0x978   : > { %10437 = vmatpush1.bf16.msra.mxu0 %v10436_v11  ;;  %v7030_v11 = vld [vmem:[%s11765_s13 + $0x1f98] sm:$0xff] }
 0x979   : > { %10565 = vmatpush1.bf16.msra.mxu1 %v10564_v21  ;;  %10439 = vmatprep.subr.bf16.mxu0 %v10438_v42  ;;  %v7034_v21 = vld [vmem:[%s11765_s13 + $0x1fb8] sm:$0xff]  ;;  %v10456_v42 = vpack.c.bf16 %v7023_v20, %v7019_v44 }
 0x97a   : > { %10567 = vmatprep.subr.bf16.mxu1 %v10566_v17  ;;  %v7031_v17 = vld [vmem:[%s11765_s13 + $0x1fa0] sm:$0xff]  ;;  %v10586_v24 = vpack.c.bf16 %v7034_v21, %v7030_v11 }
 0x97c   : > { %10441 = vmatpush1.bf16.msra.mxu0 %v10440_v30  ;;  %v7038_v30 = vld [vmem:[%s11765_s13 + $0x1fd8] sm:$0xff] }
 0x97d   : > { %10569 = vmatpush1.bf16.msra.mxu1 %v10568_v31  ;;  %10443 = vmatprep.subr.bf16.mxu0 %v10442_v2  ;;  %v7042_v31 = vld [vmem:[%s11765_s13 + $0x1ff8] sm:$0xff]  ;;  %v10460_v2 = vpack.c.bf16 %v7031_v17, %v7027_v59 }
 0x97e   : > { %10571 = vmatprep.subr.bf16.mxu1 %v10570_v37  ;;  %v7039_v37 = vld [vmem:[%s11765_s13 + $0x1fe0] sm:$0xff]  ;;  %v10590_v1 = vpack.c.bf16 %v7042_v31, %v7038_v30 }
 0x97f   : > { %v10464_v45 = vpack.c.bf16 %v7039_v37, %v7035_v34 }
 0x980   : > { %10445 = vmatpush1.bf16.msra.mxu0 %v10444_v6  ;;  %v7353_v6 = vld [vmem:[%s558_s0] sm:$0xf] }
 0x981   : > { %10573 = vmatpush1.bf16.msra.mxu1 %v10572_v46  ;;  %10447 = vmatprep.subr.bf16.mxu0 %v10446_v47  ;;  %v7358_v46 = vrot.slane %v7353_v6, %v13886_v33  ;;  %v7366_v47 = vrot.slane %v7353_v6, %v13892_v62  ;;  %v7362_v48 = vrot.slane %v7353_v6, %v13890_v32 }
 0x982   : > { %10575 = vmatprep.subr.bf16.mxu1 %v10574_v54  ;;  %v7370_v41 = vrot.slane %v7353_v6, %v13894_v19 }
 0x984   : > { %10449 = vmatpush1.bf16.msra.mxu0 %v10448_v61 }
 0x985   : > { %10577 = vmatpush1.bf16.msra.mxu1 %v10576_v63  ;;  %10451 = vmatprep.subr.bf16.mxu0 %v10450_v0 }
 0x986   : > { %10579 = vmatprep.subr.bf16.mxu1 %v10578_v13 }
 0x988   : > { %10453 = vmatpush1.bf16.msra.mxu0 %v10452_v53 }
 0x989   : > { %10581 = vmatpush1.bf16.msra.mxu1 %v10580_v10  ;;  %10455 = vmatprep.subr.bf16.mxu0 %v10454_v12 }
 0x98a   : > { %10583 = vmatprep.subr.bf16.mxu1 %v10582_v15 }
 0x98c   : > { %10457 = vmatpush1.bf16.msra.mxu0 %v10456_v42 }
 0x98d   : > { %10585 = vmatpush1.bf16.msra.mxu1 %v10584_v43  ;;  %10459 = vmatprep.subr.bf16.mxu0 %v10458_v22 }
 0x98e   : > { %10587 = vmatprep.subr.bf16.mxu1 %v10586_v24 }
 0x990   : > { %10461 = vmatpush1.bf16.msra.mxu0 %v10460_v2 }
 0x991   : > { %10589 = vmatpush1.bf16.msra.mxu1 %v10588_v51  ;;  %10463 = vmatprep.subr.bf16.mxu0 %v10462_v49 }
 0x992   : > { %10591 = vmatprep.subr.bf16.mxu1 %v10590_v1 }
 0x994   : > { %10465 = vmatpush1.bf16.msra.mxu0 %v10464_v45 }
 0x995   : > { %10593 = vmatpush1.bf16.msra.mxu1 %v10592_v58 }
 0x997   : > { %7201 = vmatmul.mubr.f32.vlgmr.msra.gmra.mrb[0].mxu0 %v14791_v5 }
 0x998   : > { %7343 = vmatmul.mubr.f32.vlgmr.msra.gmra.mrb[0].mxu1 %v14791_v5 }
 0xa6a   : > { %v7202_v25 = vpop.f32.mrb[0].mxu0 }
 0xa6b   : > { %v7375_v54 = vadd.f32 %v7358_v46, %v7202_v25  ;;  %v7344_v55 = vpop.f32.mrb[0].mxu1  ;;  %v7204_v56 = vpop.f32.mrb[1].mxu0 }
 0xa6c   : > { %v7377_v57 = vadd.f32 %v7366_v47, %v7344_v55  ;;  %v7376_v23 = vadd.f32 %v7362_v48, %v7204_v56  ;;  %v7346_v60 = vpop.f32.mrb[1].mxu1 }
 0xa6d   : > { %v7378_v61 = vadd.f32 %v7370_v41, %v7346_v60 }
 0xa6e   : > { %v7383_v5 = vcombine.low %v7375_v54, %v7376_v23 }
 0xa6f   : > { %v7384_v63 = vcombine.low %v7377_v57, %v7378_v61 }
 0xa70   : > { %v7391_v0 = vrot.slane %v7383_v5, %v13902_v28 }
 0xa71   : > { %v7398_v33 = vrot.slane %v7384_v63, %v13902_v28 }
 0xa73   : > { %v7399_v62 = vcombine.low %v7391_v0, %v7398_v33 }
 0xa75   : > { %7401 = vst [vmem:[%s11777_s21] sm:$0xff] %v7399_v62 }
 0xa76 PF: > { %s15086_s30 = sld [smem:[#allocation24_spill]]  ;;  %s15087_s24 = sld [smem:[#allocation32_spill]] }
 0xa77   : > { %s15088_s13 = sld [smem:[#allocation26_spill]]  ;;  %s15089_s9 = smov %s11585_s12 }
 0xa78   : > { %s15090_s0 = sld [smem:[#allocation27_spill]]  ;;  %s15091_s20 = sld [smem:[#allocation30_spill]] }
 0xa79   : > { %p26_p13 = scmp.ge.s32.totalorder %s11409_s8, 16   ;;  %s15092_s10 = smov %s11167_s11 }
 0xa7a   : > { %s15100_s18 = smov %s11199_s19  ;;  %s15102_s21 = smov %s11409_s8 }
 0xa7b   :  { %28 = sbr.rel (!%p26_p13) target bundleno = 24 (0x18), region = 182 }
 0xa7c   : > { %s15093_s11 = smov %s15087_s24 }
 0xa7d   : > { %s15094_s12 = smov %s15088_s13  ;;  %s15095_s13 = smov %s11179_s14 }
 0xa7e   : > { %s15096_s14 = smov %s11644_s15  ;;  %s15097_s15 = smov %s11187_s16 }
 0xa7f   : > { %s15098_s16 = smov %s11191_s17  ;;  %s15099_s17 = smov %s15089_s9 }
 0xa80   : > { %s15101_s19 = smov %s15090_s0 }
 0xa82   :  { %7439 = vsyncpa [#allocation6], 1 }
 0xa83   :  { %7441 = vsyncpa [#allocation6 + $0x1], 1 }
 0xa84   :  { %7442 = vsyncpa [#allocation8], 1 }
 0xa85   :  { %7443 = vsyncpa [#allocation12], 1 }
 0xa86   :  { %7445 = vsyncpa [#allocation12 + $0x1], 1 }
 0xa87   :  { %7446 = vsyncpa [#allocation15], 1 }
 0xa88   :  { %7448 = vsyncpa [#allocation15 + $0x1], 1 }

</bundles_post_ra>
